<compile_context>
chip_gen: v5e
topology: v5e:2x2
jax: 0.10.0
libtpu: 0.0.40
codegen_flags: <defaults>
</compile_context>

<pallas_src>
import math
import numpy as np

import jax
import jax.numpy as jnp
from jax import lax
from jax.experimental import pallas as pl
from jax.experimental.pallas import tpu as pltpu


_BN_EPS = 1e-5
_VMEM_LIMIT = 48 * 1024 * 1024    # scoped VMEM cap (v7x has only 64 MiB physical)
_VMEM_BUDGET = 20 * 1024 * 1024   # target per-step working set for block sizing


# ---------------------------------------------------------------------------
# Pallas kernels
# ---------------------------------------------------------------------------

def _conv_stats_kernel(xm_ref, xh_ref, w_ref, b_ref,
                       mm_ref, sum_ref, ssq_ref, xs_ref):
    """ContractBlock pass 1 (one tile of `bh` pool-output rows of one image).

    xm_ref : (1, 4, bh, Wo+1, Cin) bf16  -- 4 parity planes, main row block
    xh_ref : (1, 4, 1,  Wo+1, Cin) bf16  -- +1-row halo (first row of next block)
    w_ref  : (3, 3, Cin, Cout)     bf16  -- HWIO 3x3 weights (resident)
    b_ref  : (1, Cout)             f32
    mm_ref : (2, bm, Cout)         bf16  -- per-window max / min conv planes
    sum_ref/ssq_ref : (1, 8, Cout) f32   -- per-tile partial BN statistics
    xs_ref : (4, bh+1, Wo+1, Cin)  bf16  -- VMEM staging scratch
    """
    bh = xm_ref.shape[2]
    wo1 = xm_ref.shape[3]
    wo = wo1 - 1
    cin = xm_ref.shape[4]
    cout = w_ref.shape[3]
    bm = bh * wo

    # Stage main block + halo row contiguously so every tap is a static slice.
    xs_ref[:, 0:bh] = xm_ref[0]
    xs_ref[:, bh:bh + 1] = xh_ref[0]

    w = w_ref[...]            # (3, 3, Cin, Cout), loaded once
    b = b_ref[...]            # (1, Cout)

    # 16 distinct input slabs, indexed by (pr+kh, pc+kw) in {0..3}^2.
    slabs = {}
    for rs in range(4):
        rpar, rq = rs & 1, rs >> 1
        for cs in range(4):
            cpar, cq = cs & 1, cs >> 1
            plane = rpar * 2 + cpar
            sl = xs_ref[plane, rq:rq + bh, cq:cq + wo, :]     # (bh, Wo, Cin)
            slabs[(rs, cs)] = sl.reshape(bm, cin)             # free when Wo%8==0

    ymax = None
    ymin = None
    s = jnp.zeros((1, cout), jnp.float32)
    q = jnp.zeros((1, cout), jnp.float32)
    for pr in range(2):                       # static unroll: 4 pool positions
        for pc in range(2):
            acc = jnp.zeros((bm, cout), jnp.float32)
            for kh in range(3):
                for kw in range(3):
                    acc += jnp.dot(slabs[(pr + kh, pc + kw)], w[kh, kw],
                                   preferred_element_type=jnp.float32)
            y = acc + b
            s = s + jnp.sum(y, axis=0, keepdims=True)
            q = q + jnp.sum(y * y, axis=0, keepdims=True)
            ymax = y if ymax is None else jnp.maximum(ymax, y)
            ymin = y if ymin is None else jnp.minimum(ymin, y)

    mm_ref[0] = ymax.astype(mm_ref.dtype)
    mm_ref[1] = ymin.astype(mm_ref.dtype)
    sum_ref[0] = jnp.broadcast_to(s, (8, cout))
    ssq_ref[0] = jnp.broadcast_to(q, (8, cout))


def _bn_lrelu_kernel(mm_ref, scale_ref, shift_ref, o_ref):
    """Pass 2: select max/min plane by sign(scale), folded BN affine, LeakyReLU."""
    scale = scale_ref[...]
    shift = shift_ref[...]
    y = jnp.where(scale >= 0.0,
                  mm_ref[0].astype(jnp.float32),
                  mm_ref[1].astype(jnp.float32))
    z = y * scale + shift
    z = jnp.where(z > 0, z, 0.2 * z)
    o_ref[...] = z.astype(o_ref.dtype)


def _bn_lrelu_outconv_kernel(mm_ref, scale_ref, shift_ref, wo_ref, bo_ref, o_ref):
    """Last block's pass 2 with the 1x1 out_conv (128-lane padded) fused in."""
    scale = scale_ref[...]
    shift = shift_ref[...]
    y = jnp.where(scale >= 0.0,
                  mm_ref[0].astype(jnp.float32),
                  mm_ref[1].astype(jnp.float32))
    z = y * scale + shift
    z = jnp.where(z > 0, z, 0.2 * z)
    a = z.astype(jnp.bfloat16)
    o_ref[...] = (jnp.dot(a, wo_ref[...], preferred_element_type=jnp.float32)
                  + bo_ref[...])


# ---------------------------------------------------------------------------
# Helpers: compiler params, block sizing, input de-interleave
# ---------------------------------------------------------------------------

def _params(semantics):
    return pltpu.CompilerParams(dimension_semantics=semantics,
                                vmem_limit_bytes=_VMEM_LIMIT)


def _rows_from_budget(per_row, fixed, floor_rows):
    avail = _VMEM_BUDGET - fixed
    if avail <= per_row:
        return floor_rows
    return max(int(avail // per_row), floor_rows)


def _pick_bh(hh, wo, max_rows):
    """Largest pool-row block bh | hh with (bh*wo) a multiple of 16 (then 8)."""
    cap = max(max_rows, wo)
    for mult in (16, 8):
        for bh in range(hh, 0, -1):
            bm = bh * wo
            if hh % bh == 0 and bm % mult == 0 and bm <= cap:
                return bh
    raise ValueError(f"cannot tile pool rows: Hh={hh} Wo={wo}")


def _pick_bm2(m, max_rows):
    """Largest divisor of m <= cap that is a multiple of 16 (then 8); else m."""
    cap = max(min(max_rows, m), 1)
    for mult in (16, 8):
        for bm in range(cap, 0, -1):
            if m % bm == 0 and bm % mult == 0:
                return bm
    return m           # block == full dim is always a legal BlockSpec


def _deinterleave_pool(x):
    """(N, H, W, C) -> (N, 4, Hh+1, Wo+1, C): zero-pad by 1, split into the four
    (row-parity, col-parity) planes so 3x3 taps become {0,1} offsets per plane
    and 2x2 max-pooling becomes an elementwise max over planes."""
    n, h, w, c = x.shape
    hh, wo = h // 2, w // 2
    xp = jnp.pad(x, ((0, 0), (1, 1), (1, 1), (0, 0)))            # (N, H+2, W+2, C)
    xr = xp.reshape(n, hh + 1, 2, 2 * (wo + 1), c)
    xc = xr.reshape(n, hh + 1, 2, wo + 1, 2, c)
    xd = jnp.transpose(xc, (0, 2, 4, 1, 3, 5))                    # (N, rp, cp, R, C, c)
    return xd.reshape(n, 4, hh + 1, wo + 1, c)


# ---------------------------------------------------------------------------
# ContractBlock forward (+ optional fused out_conv)
# ---------------------------------------------------------------------------

def contract_block(x, w, b, gamma, beta, *, block_rows, out_w=None, out_b=None):
    """x: (N, H, W, Cin) bf16 -> (N, H/2, W/2, Cout) bf16, or (N, H/2, W/2, 1)
    f32 logits when out_w/out_b are given (last block, fused out_conv)."""
    n, h, wdt, cin = x.shape
    assert h % 2 == 0 and wdt % 2 == 0
    cout = w.shape[-1]
    hh, wo = h // 2, wdt // 2
    m = n * hh * wo

    xd = _deinterleave_pool(x)                                    # (N,4,Hh+1,Wo+1,Cin)

    # --- pass 1 block sizing (per-layer, VMEM-budgeted) ---
    w1 = (wo + 1) / wo
    per_row1 = (4 * w1 * cin * 2 * 2        # de-interleaved input, double buffered
                + 4 * w1 * cin * 2          # staging scratch
                + 16 * cin * 2              # tap slabs
                + 2 * cout * 2 * 2          # max/min planes out, double buffered
                + 4 * cout * 4              # four f32 conv accumulators
                + 2 * cout * 4)             # ymax/ymin temporaries
    fixed1 = 2 * 9 * cin * cout * 2 + 4 * 8 * cout * 4 + 4 * cout * 4
    cap1 = min(block_rows, _rows_from_budget(per_row1, fixed1, wo))
    bh = _pick_bh(hh, wo, cap1)
    bm = bh * wo
    t_tiles = hh // bh

    mm, psum, pssq = pl.pallas_call(
        _conv_stats_kernel,
        out_shape=(jax.ShapeDtypeStruct((2, m, cout), jnp.bfloat16),
                   jax.ShapeDtypeStruct((n * t_tiles, 8, cout), jnp.float32),
                   jax.ShapeDtypeStruct((n * t_tiles, 8, cout), jnp.float32)),
        grid=(n, t_tiles),
        in_specs=[
            pl.BlockSpec((1, 4, bh, wo + 1, cin), lambda i, t: (i, 0, t, 0, 0)),
            pl.BlockSpec((1, 4, 1, wo + 1, cin),
                         lambda i, t: (i, 0, t * bh + bh, 0, 0)),
            pl.BlockSpec((3, 3, cin, cout), lambda i, t: (0, 0, 0, 0)),
            pl.BlockSpec((1, cout), lambda i, t: (0, 0)),
        ],
        out_specs=(
            pl.BlockSpec((2, bm, cout), lambda i, t: (0, i * t_tiles + t, 0)),
            pl.BlockSpec((1, 8, cout), lambda i, t: (i * t_tiles + t, 0, 0)),
            pl.BlockSpec((1, 8, cout), lambda i, t: (i * t_tiles + t, 0, 0)),
        ),
        scratch_shapes=[pltpu.VMEM((4, bh + 1, wo + 1, cin), jnp.bfloat16)],
        compiler_params=_params(("parallel", "parallel")),
    )(xd, xd, w, b)

    # --- fold BN batch statistics + gamma/beta into one scale/shift (tiny JAX) ---
    count = float(4 * m)                                          # pre-pool positions
    ssum = jnp.sum(psum[:, 0, :], axis=0, keepdims=True)
    ssq = jnp.sum(pssq[:, 0, :], axis=0, keepdims=True)
    mean = ssum / count
    var = jnp.maximum(ssq / count - mean * mean, 0.0)
    inv = lax.rsqrt(var + _BN_EPS)
    scale = gamma * inv                                           # (1, Cout)
    shift = beta - mean * scale                                   # (1, Cout)

    # --- pass 2 block sizing (decoupled, pure memory streaming) ---
    nout = cout if out_w is None else out_w.shape[1]
    per_row2 = (2 * cout * 2 * 2
                + 3 * cout * 4
                + nout * (2 if out_w is None else 4) * 2)
    fixed2 = 0 if out_w is None else 2 * (out_w.size * 2 + nout * 4)
    cap2 = min(4 * block_rows, _rows_from_budget(per_row2, fixed2, 8))
    bm2 = _pick_bm2(m, cap2)

    if out_w is None:
        out = pl.pallas_call(
            _bn_lrelu_kernel,
            out_shape=jax.ShapeDtypeStruct((m, cout), jnp.bfloat16),
            grid=(m // bm2,),
            in_specs=[pl.BlockSpec((2, bm2, cout), lambda i: (0, i, 0)),
                      pl.BlockSpec((1, cout), lambda i: (0, 0)),
                      pl.BlockSpec((1, cout), lambda i: (0, 0))],
            out_specs=pl.BlockSpec((bm2, cout), lambda i: (i, 0)),
            compiler_params=_params(("parallel",)),
        )(mm, scale, shift)
        return out.reshape(n, hh, wo, cout)

    out = pl.pallas_call(
        _bn_lrelu_outconv_kernel,
        out_shape=jax.ShapeDtypeStruct((m, nout), jnp.float32),
        grid=(m // bm2,),
        in_specs=[pl.BlockSpec((2, bm2, cout), lambda i: (0, i, 0)),
                  pl.BlockSpec((1, cout), lambda i: (0, 0)),
                  pl.BlockSpec((1, cout), lambda i: (0, 0)),
                  pl.BlockSpec((cout, nout), lambda i: (0, 0)),
                  pl.BlockSpec((1, nout), lambda i: (0, 0))],
        out_specs=pl.BlockSpec((bm2, nout), lambda i: (i, 0)),
        compiler_params=_params(("parallel",)),
    )(mm, scale, shift, out_w, out_b)
    return out[:, :1].reshape(n, hh, wo, 1)


# ---------------------------------------------------------------------------
# Parameter init (matching PyTorch _init_weights semantics)
# ---------------------------------------------------------------------------

def _kaiming_normal(key, cout, cin, kh, kw, a=0.2):
    # kaiming_normal_(a=0.2, mode='fan_out', nonlinearity='leaky_relu')
    fan_out = cout * kh * kw
    gain = math.sqrt(2.0 / (1.0 + a * a))
    std = gain / math.sqrt(fan_out)
    return std * jax.random.normal(key, (cout, cin, kh, kw), jnp.float32)


class Discriminator:
    """PatchGAN discriminator (JAX/Pallas forward, training-mode BatchNorm)."""

    def __init__(self, in_ch, hidden_ch=32, depth=4, key=None, block_rows=1024):
        if key is None:
            key = jax.random.PRNGKey(0)
        keys = jax.random.split(key, depth + 2)
        self.depth = depth
        self.block_rows = block_rows

        # in_conv 1x1 (in_ch -> hidden_ch), folded into the first 3x3 conv below.
        w_in = _kaiming_normal(keys[0], hidden_ch, in_ch, 1, 1)
        in_w = jnp.transpose(w_in.reshape(hidden_ch, in_ch), (1, 0))    # (in_ch, hid)
        in_b = jnp.zeros((1, hidden_ch), jnp.float32)
        in_w_aug = jnp.concatenate([in_w, in_b], axis=0)                # (in_ch+1, hid)

        self.blocks = []
        ch = hidden_ch
        for d in range(depth):
            wc = _kaiming_normal(keys[1 + d], 2 * ch, ch, 3, 3)         # (Cout,Cin,3,3)
            w_hwio = jnp.transpose(wc, (2, 3, 1, 0))                    # (3,3,Cin,Cout)
            if d == 0:
                # Exact fold: x_aug -> 1x1 -> 3x3 == x_aug -> 3x3 with composed weight.
                w_hwio = jnp.einsum("ac,hwco->hwao", in_w_aug, w_hwio)
            bconv = jnp.zeros((1, 2 * ch), jnp.float32)
            gamma = jnp.ones((1, 2 * ch), jnp.float32)
            beta = jnp.zeros((1, 2 * ch), jnp.float32)
            self.blocks.append((w_hwio.astype(jnp.bfloat16), bconv, gamma, beta))
            ch *= 2

        # out_conv 1x1 (ch -> 1): pad the single output channel to 128 lanes so
        # the fused matmul stores are unmasked; the wrapper slices channel 0.
        w_out = _kaiming_normal(keys[-1], 1, ch, 1, 1).reshape(1, ch).T
        self.out_w = jnp.pad(w_out, ((0, 0), (0, 127))).astype(jnp.bfloat16)
        self.out_b = jnp.zeros((1, 128), jnp.float32)

    def __call__(self, x, y):
        """x, y: NCHW f32.  Returns NCHW (N, 1, H/2^depth, W/2^depth) f32."""
        h = jnp.concatenate([x, y], axis=1)                  # NCHW
        h = jnp.transpose(h, (0, 2, 3, 1))                   # NHWC
        ones = jnp.ones(h.shape[:-1] + (1,), h.dtype)
        h = jnp.concatenate([h, ones], axis=-1).astype(jnp.bfloat16)

        for d, (w, b, gamma, beta) in enumerate(self.blocks):
            last = d == self.depth - 1
            h = contract_block(
                h, w, b, gamma, beta, block_rows=self.block_rows,
                out_w=self.out_w if last else None,
                out_b=self.out_b if last else None)
        return jnp.transpose(h, (0, 3, 1, 2))                # back to NCHW


# ---------------------------------------------------------------------------
# Pure-JAX reference (precision-matched: bf16 matmul inputs, f32 accumulation,
# bf16 rounding of the conv output before the BN affine, exactly like the kernel)
# ---------------------------------------------------------------------------

def _reference(disc, x, y):
    h = jnp.concatenate([x, y], axis=1)
    h = jnp.transpose(h, (0, 2, 3, 1))
    ones = jnp.ones(h.shape[:-1] + (1,), h.dtype)
    h = jnp.concatenate([h, ones], axis=-1).astype(jnp.bfloat16)
    for (w, b, gamma, beta) in disc.blocks:
        z = lax.conv_general_dilated(
            h, w, (1, 1), "SAME",
            dimension_numbers=("NHWC", "HWIO", "NHWC"),
            preferred_element_type=jnp.float32) + b
        mean = jnp.mean(z, axis=(0, 1, 2), keepdims=True)
        var = jnp.maximum(jnp.mean(z * z, axis=(0, 1, 2), keepdims=True)
                          - mean * mean, 0.0)
        inv = lax.rsqrt(var + _BN_EPS)
        scale = gamma.reshape(1, 1, 1, -1) * inv
        shift = beta.reshape(1, 1, 1, -1) - mean * scale
        zr = z.astype(jnp.bfloat16).astype(jnp.float32)
        zn = zr * scale + shift
        zn = jnp.where(zn > 0, zn, 0.2 * zn)
        zn = lax.reduce_window(zn, -jnp.inf, lax.max,
                               (1, 2, 2, 1), (1, 2, 2, 1), "VALID")
        h = zn.astype(jnp.bfloat16)
    nb, ho, wo, c = h.shape
    o = jnp.dot(h.reshape(-1, c), disc.out_w,
                preferred_element_type=jnp.float32) + disc.out_b
    o = o[:, :1].reshape(nb, ho, wo, 1)
    return jnp.transpose(o, (0, 3, 1, 2))


# ---------------------------------------------------------------------------

if __name__ == "__main__":
    key = jax.random.PRNGKey(0)
    kx, ky, kp = jax.random.split(key, 3)

    N, H, W = 2, 32, 32
    x = jax.random.normal(kx, (N, 3, H, W), jnp.float32)   # e.g. satellite image
    y = jax.random.normal(ky, (N, 1, H, W), jnp.float32)   # e.g. route map

    # block_rows=32 keeps every grid multi-step at this toy resolution so the
    # halo spec, per-tile stats and decoupled pass-2 tiling are all exercised.
    disc = Discriminator(in_ch=4, hidden_ch=8, depth=2, key=kp, block_rows=32)

    fwd = jax.jit(lambda a, b: disc(a, b))
    out = jax.block_until_ready(fwd(x, y))
    assert out.shape == (N, 1, H // 4, W // 4), out.shape

    ref = jax.block_until_ready(_reference(disc, x, y))
    np.testing.assert_allclose(np.asarray(out, np.float32),
                               np.asarray(ref, np.float32),
                               rtol=5e-2, atol=5e-2)
    print("KERNEL_OK")
</pallas_src>

<mosaic_0001>
module attributes {stable_mosaic.version = 11 : i64} {
  func.func @_conv_stats_kernel(%arg0: i32, %arg1: i32, %arg2: memref<1x4x2x17x5xbf16, #tpu.memory_space<vmem>>, %arg3: memref<1x4x1x17x5xbf16, #tpu.memory_space<vmem>>, %arg4: memref<3x3x5x16xbf16, #tpu.memory_space<vmem>>, %arg5: memref<1x16xf32, #tpu.memory_space<vmem>>, %arg6: memref<2x32x16xbf16, #tpu.memory_space<vmem>>, %arg7: memref<1x8x16xf32, #tpu.memory_space<vmem>>, %arg8: memref<1x8x16xf32, #tpu.memory_space<vmem>>, %arg9: memref<4x3x17x5xbf16, #tpu.memory_space<vmem>>) attributes {dimension_semantics = [#tpu.dimension_semantics<parallel>, #tpu.dimension_semantics<parallel>], iteration_bounds = array<i64: 2, 8>, scalar_prefetch = 0 : i64, scratch_operands = 1 : i64, tpu.core_type = #tpu.core_type<tc>, window_params = [{transform_indices = @transform_0, window_bounds = array<i64: 1, 4, 2, 17, 5>}, {transform_indices = @transform_1, window_bounds = array<i64: 1, 4, 1, 17, 5>}, {pipeline_mode = #tpu.pipeline_mode<synchronous>, transform_indices = @transform_2, window_bounds = array<i64: 3, 3, 5, 16>}, {pipeline_mode = #tpu.pipeline_mode<synchronous>, transform_indices = @transform_3, window_bounds = array<i64: 1, 16>}, {transform_indices = @transform_4, window_bounds = array<i64: 2, 32, 16>}, {transform_indices = @transform_5, window_bounds = array<i64: 1, 8, 16>}, {transform_indices = @transform_6, window_bounds = array<i64: 1, 8, 16>}]} {
    %c0 = arith.constant 0 : index
    %c0_0 = arith.constant 0 : index
    %c0_1 = arith.constant 0 : index
    %c0_2 = arith.constant 0 : index
    %c0_3 = arith.constant 0 : index
    %0 = vector.load %arg2[%c0, %c0_0, %c0_1, %c0_2, %c0_3] : memref<1x4x2x17x5xbf16, #tpu.memory_space<vmem>>, vector<1x4x2x17x5xbf16>
    %1 = vector.shape_cast %0 : vector<1x4x2x17x5xbf16> to vector<4x2x17x5xbf16>
    %c0_4 = arith.constant 0 : index
    %c0_5 = arith.constant 0 : index
    %c0_6 = arith.constant 0 : index
    %c0_7 = arith.constant 0 : index
    %2 = vector.load %arg9[%c0_4, %c0_5, %c0_6, %c0_7] : memref<4x3x17x5xbf16, #tpu.memory_space<vmem>>, vector<4x2x17x5xbf16>
    tpu.vector_store %arg9[%c0_4, %c0_5, %c0_6, %c0_7], %1 {strides = array<i32>} : memref<4x3x17x5xbf16, #tpu.memory_space<vmem>>, vector<4x2x17x5xbf16>,
    %c0_8 = arith.constant 0 : index
    %c0_9 = arith.constant 0 : index
    %c0_10 = arith.constant 0 : index
    %c0_11 = arith.constant 0 : index
    %c0_12 = arith.constant 0 : index
    %3 = vector.load %arg3[%c0_8, %c0_9, %c0_10, %c0_11, %c0_12] : memref<1x4x1x17x5xbf16, #tpu.memory_space<vmem>>, vector<1x4x1x17x5xbf16>
    %4 = vector.shape_cast %3 : vector<1x4x1x17x5xbf16> to vector<4x1x17x5xbf16>
    %c0_13 = arith.constant 0 : index
    %c2 = arith.constant 2 : index
    %c0_14 = arith.constant 0 : index
    %c0_15 = arith.constant 0 : index
    %5 = vector.load %arg9[%c0_13, %c2, %c0_14, %c0_15] : memref<4x3x17x5xbf16, #tpu.memory_space<vmem>>, vector<4x1x17x5xbf16>
    tpu.vector_store %arg9[%c0_13, %c2, %c0_14, %c0_15], %4 {strides = array<i32>} : memref<4x3x17x5xbf16, #tpu.memory_space<vmem>>, vector<4x1x17x5xbf16>,
    %c0_16 = arith.constant 0 : index
    %c0_17 = arith.constant 0 : index
    %c0_18 = arith.constant 0 : index
    %c0_19 = arith.constant 0 : index
    %6 = vector.load %arg4[%c0_16, %c0_17, %c0_18, %c0_19] : memref<3x3x5x16xbf16, #tpu.memory_space<vmem>>, vector<3x3x5x16xbf16>
    %c0_20 = arith.constant 0 : index
    %c0_21 = arith.constant 0 : index
    %7 = vector.load %arg5[%c0_20, %c0_21] : memref<1x16xf32, #tpu.memory_space<vmem>>, vector<1x16xf32>
    %c0_22 = arith.constant 0 : index
    %c0_23 = arith.constant 0 : index
    %c0_24 = arith.constant 0 : index
    %c0_25 = arith.constant 0 : index
    %8 = vector.load %arg9[%c0_22, %c0_23, %c0_24, %c0_25] : memref<4x3x17x5xbf16, #tpu.memory_space<vmem>>, vector<1x2x16x5xbf16>
    %9 = vector.shape_cast %8 : vector<1x2x16x5xbf16> to vector<2x16x5xbf16>
    %10 = vector.shape_cast %9 : vector<2x16x5xbf16> to vector<32x5xbf16>
    %c1 = arith.constant 1 : index
    %c0_26 = arith.constant 0 : index
    %c0_27 = arith.constant 0 : index
    %c0_28 = arith.constant 0 : index
    %11 = vector.load %arg9[%c1, %c0_26, %c0_27, %c0_28] : memref<4x3x17x5xbf16, #tpu.memory_space<vmem>>, vector<1x2x16x5xbf16>
    %12 = vector.shape_cast %11 : vector<1x2x16x5xbf16> to vector<2x16x5xbf16>
    %13 = vector.shape_cast %12 : vector<2x16x5xbf16> to vector<32x5xbf16>
    %c0_29 = arith.constant 0 : index
    %c0_30 = arith.constant 0 : index
    %c1_31 = arith.constant 1 : index
    %c0_32 = arith.constant 0 : index
    %14 = vector.load %arg9[%c0_29, %c0_30, %c1_31, %c0_32] : memref<4x3x17x5xbf16, #tpu.memory_space<vmem>>, vector<1x2x16x5xbf16>
    %15 = vector.shape_cast %14 : vector<1x2x16x5xbf16> to vector<2x16x5xbf16>
    %16 = vector.shape_cast %15 : vector<2x16x5xbf16> to vector<32x5xbf16>
    %c1_33 = arith.constant 1 : index
    %c0_34 = arith.constant 0 : index
    %c1_35 = arith.constant 1 : index
    %c0_36 = arith.constant 0 : index
    %17 = vector.load %arg9[%c1_33, %c0_34, %c1_35, %c0_36] : memref<4x3x17x5xbf16, #tpu.memory_space<vmem>>, vector<1x2x16x5xbf16>
    %18 = vector.shape_cast %17 : vector<1x2x16x5xbf16> to vector<2x16x5xbf16>
    %19 = vector.shape_cast %18 : vector<2x16x5xbf16> to vector<32x5xbf16>
    %c2_37 = arith.constant 2 : index
    %c0_38 = arith.constant 0 : index
    %c0_39 = arith.constant 0 : index
    %c0_40 = arith.constant 0 : index
    %20 = vector.load %arg9[%c2_37, %c0_38, %c0_39, %c0_40] : memref<4x3x17x5xbf16, #tpu.memory_space<vmem>>, vector<1x2x16x5xbf16>
    %21 = vector.shape_cast %20 : vector<1x2x16x5xbf16> to vector<2x16x5xbf16>
    %22 = vector.shape_cast %21 : vector<2x16x5xbf16> to vector<32x5xbf16>
    %c3 = arith.constant 3 : index
    %c0_41 = arith.constant 0 : index
    %c0_42 = arith.constant 0 : index
    %c0_43 = arith.constant 0 : index
    %23 = vector.load %arg9[%c3, %c0_41, %c0_42, %c0_43] : memref<4x3x17x5xbf16, #tpu.memory_space<vmem>>, vector<1x2x16x5xbf16>
    %24 = vector.shape_cast %23 : vector<1x2x16x5xbf16> to vector<2x16x5xbf16>
    %25 = vector.shape_cast %24 : vector<2x16x5xbf16> to vector<32x5xbf16>
    %c2_44 = arith.constant 2 : index
    %c0_45 = arith.constant 0 : index
    %c1_46 = arith.constant 1 : index
    %c0_47 = arith.constant 0 : index
    %26 = vector.load %arg9[%c2_44, %c0_45, %c1_46, %c0_47] : memref<4x3x17x5xbf16, #tpu.memory_space<vmem>>, vector<1x2x16x5xbf16>
    %27 = vector.shape_cast %26 : vector<1x2x16x5xbf16> to vector<2x16x5xbf16>
    %28 = vector.shape_cast %27 : vector<2x16x5xbf16> to vector<32x5xbf16>
    %c3_48 = arith.constant 3 : index
    %c0_49 = arith.constant 0 : index
    %c1_50 = arith.constant 1 : index
    %c0_51 = arith.constant 0 : index
    %29 = vector.load %arg9[%c3_48, %c0_49, %c1_50, %c0_51] : memref<4x3x17x5xbf16, #tpu.memory_space<vmem>>, vector<1x2x16x5xbf16>
    %30 = vector.shape_cast %29 : vector<1x2x16x5xbf16> to vector<2x16x5xbf16>
    %31 = vector.shape_cast %30 : vector<2x16x5xbf16> to vector<32x5xbf16>
    %c0_52 = arith.constant 0 : index
    %c1_53 = arith.constant 1 : index
    %c0_54 = arith.constant 0 : index
    %c0_55 = arith.constant 0 : index
    %32 = vector.load %arg9[%c0_52, %c1_53, %c0_54, %c0_55] : memref<4x3x17x5xbf16, #tpu.memory_space<vmem>>, vector<1x2x16x5xbf16>
    %33 = vector.shape_cast %32 : vector<1x2x16x5xbf16> to vector<2x16x5xbf16>
    %34 = vector.shape_cast %33 : vector<2x16x5xbf16> to vector<32x5xbf16>
    %c1_56 = arith.constant 1 : index
    %c1_57 = arith.constant 1 : index
    %c0_58 = arith.constant 0 : index
    %c0_59 = arith.constant 0 : index
    %35 = vector.load %arg9[%c1_56, %c1_57, %c0_58, %c0_59] : memref<4x3x17x5xbf16, #tpu.memory_space<vmem>>, vector<1x2x16x5xbf16>
    %36 = vector.shape_cast %35 : vector<1x2x16x5xbf16> to vector<2x16x5xbf16>
    %37 = vector.shape_cast %36 : vector<2x16x5xbf16> to vector<32x5xbf16>
    %c0_60 = arith.constant 0 : index
    %c1_61 = arith.constant 1 : index
    %c1_62 = arith.constant 1 : index
    %c0_63 = arith.constant 0 : index
    %38 = vector.load %arg9[%c0_60, %c1_61, %c1_62, %c0_63] : memref<4x3x17x5xbf16, #tpu.memory_space<vmem>>, vector<1x2x16x5xbf16>
    %39 = vector.shape_cast %38 : vector<1x2x16x5xbf16> to vector<2x16x5xbf16>
    %40 = vector.shape_cast %39 : vector<2x16x5xbf16> to vector<32x5xbf16>
    %c1_64 = arith.constant 1 : index
    %c1_65 = arith.constant 1 : index
    %c1_66 = arith.constant 1 : index
    %c0_67 = arith.constant 0 : index
    %41 = vector.load %arg9[%c1_64, %c1_65, %c1_66, %c0_67] : memref<4x3x17x5xbf16, #tpu.memory_space<vmem>>, vector<1x2x16x5xbf16>
    %42 = vector.shape_cast %41 : vector<1x2x16x5xbf16> to vector<2x16x5xbf16>
    %43 = vector.shape_cast %42 : vector<2x16x5xbf16> to vector<32x5xbf16>
    %c2_68 = arith.constant 2 : index
    %c1_69 = arith.constant 1 : index
    %c0_70 = arith.constant 0 : index
    %c0_71 = arith.constant 0 : index
    %44 = vector.load %arg9[%c2_68, %c1_69, %c0_70, %c0_71] : memref<4x3x17x5xbf16, #tpu.memory_space<vmem>>, vector<1x2x16x5xbf16>
    %45 = vector.shape_cast %44 : vector<1x2x16x5xbf16> to vector<2x16x5xbf16>
    %46 = vector.shape_cast %45 : vector<2x16x5xbf16> to vector<32x5xbf16>
    %c3_72 = arith.constant 3 : index
    %c1_73 = arith.constant 1 : index
    %c0_74 = arith.constant 0 : index
    %c0_75 = arith.constant 0 : index
    %47 = vector.load %arg9[%c3_72, %c1_73, %c0_74, %c0_75] : memref<4x3x17x5xbf16, #tpu.memory_space<vmem>>, vector<1x2x16x5xbf16>
    %48 = vector.shape_cast %47 : vector<1x2x16x5xbf16> to vector<2x16x5xbf16>
    %49 = vector.shape_cast %48 : vector<2x16x5xbf16> to vector<32x5xbf16>
    %c2_76 = arith.constant 2 : index
    %c1_77 = arith.constant 1 : index
    %c1_78 = arith.constant 1 : index
    %c0_79 = arith.constant 0 : index
    %50 = vector.load %arg9[%c2_76, %c1_77, %c1_78, %c0_79] : memref<4x3x17x5xbf16, #tpu.memory_space<vmem>>, vector<1x2x16x5xbf16>
    %51 = vector.shape_cast %50 : vector<1x2x16x5xbf16> to vector<2x16x5xbf16>
    %52 = vector.shape_cast %51 : vector<2x16x5xbf16> to vector<32x5xbf16>
    %c3_80 = arith.constant 3 : index
    %c1_81 = arith.constant 1 : index
    %c1_82 = arith.constant 1 : index
    %c0_83 = arith.constant 0 : index
    %53 = vector.load %arg9[%c3_80, %c1_81, %c1_82, %c0_83] : memref<4x3x17x5xbf16, #tpu.memory_space<vmem>>, vector<1x2x16x5xbf16>
    %54 = vector.shape_cast %53 : vector<1x2x16x5xbf16> to vector<2x16x5xbf16>
    %55 = vector.shape_cast %54 : vector<2x16x5xbf16> to vector<32x5xbf16>
    %cst = arith.constant 0.000000e+00 : f32
    %56 = vector.broadcast %cst : f32 to vector<1x16xf32>
    %cst_84 = arith.constant 0.000000e+00 : f32
    %57 = vector.broadcast %cst_84 : f32 to vector<1x16xf32>
    %cst_85 = arith.constant 0.000000e+00 : f32
    %58 = vector.broadcast %cst_85 : f32 to vector<32x16xf32>
    %59 = vector.extract_strided_slice %6 {offsets = [0, 0, 0, 0], sizes = [1, 1, 5, 16], strides = [1, 1, 1, 1]} : vector<3x3x5x16xbf16> to vector<1x1x5x16xbf16>
    %60 = vector.shape_cast %59 : vector<1x1x5x16xbf16> to vector<5x16xbf16>
    %cst_86 = arith.constant dense<0.000000e+00> : vector<32x16xf32>
    %61 = tpu.matmul %10, %60, %cst_86 {dimension_numbers = #tpu.dot_dimension_numbers<[1], [0], [0], [1], [0, 0, 1, 1], [], []>} : vector<32x5xbf16>, vector<5x16xbf16>, vector<32x16xf32> -> vector<32x16xf32>
    %62 = arith.addf %58, %61 : vector<32x16xf32>
    %63 = vector.extract_strided_slice %6 {offsets = [0, 1, 0, 0], sizes = [1, 1, 5, 16], strides = [1, 1, 1, 1]} : vector<3x3x5x16xbf16> to vector<1x1x5x16xbf16>
    %64 = vector.shape_cast %63 : vector<1x1x5x16xbf16> to vector<5x16xbf16>
    %cst_87 = arith.constant dense<0.000000e+00> : vector<32x16xf32>
    %65 = tpu.matmul %13, %64, %cst_87 {dimension_numbers = #tpu.dot_dimension_numbers<[1], [0], [0], [1], [0, 0, 1, 1], [], []>} : vector<32x5xbf16>, vector<5x16xbf16>, vector<32x16xf32> -> vector<32x16xf32>
    %66 = arith.addf %62, %65 : vector<32x16xf32>
    %67 = vector.extract_strided_slice %6 {offsets = [0, 2, 0, 0], sizes = [1, 1, 5, 16], strides = [1, 1, 1, 1]} : vector<3x3x5x16xbf16> to vector<1x1x5x16xbf16>
    %68 = vector.shape_cast %67 : vector<1x1x5x16xbf16> to vector<5x16xbf16>
    %cst_88 = arith.constant dense<0.000000e+00> : vector<32x16xf32>
    %69 = tpu.matmul %16, %68, %cst_88 {dimension_numbers = #tpu.dot_dimension_numbers<[1], [0], [0], [1], [0, 0, 1, 1], [], []>} : vector<32x5xbf16>, vector<5x16xbf16>, vector<32x16xf32> -> vector<32x16xf32>
    %70 = arith.addf %66, %69 : vector<32x16xf32>
    %71 = vector.extract_strided_slice %6 {offsets = [1, 0, 0, 0], sizes = [1, 1, 5, 16], strides = [1, 1, 1, 1]} : vector<3x3x5x16xbf16> to vector<1x1x5x16xbf16>
    %72 = vector.shape_cast %71 : vector<1x1x5x16xbf16> to vector<5x16xbf16>
    %cst_89 = arith.constant dense<0.000000e+00> : vector<32x16xf32>
    %73 = tpu.matmul %22, %72, %cst_89 {dimension_numbers = #tpu.dot_dimension_numbers<[1], [0], [0], [1], [0, 0, 1, 1], [], []>} : vector<32x5xbf16>, vector<5x16xbf16>, vector<32x16xf32> -> vector<32x16xf32>
    %74 = arith.addf %70, %73 : vector<32x16xf32>
    %75 = vector.extract_strided_slice %6 {offsets = [1, 1, 0, 0], sizes = [1, 1, 5, 16], strides = [1, 1, 1, 1]} : vector<3x3x5x16xbf16> to vector<1x1x5x16xbf16>
    %76 = vector.shape_cast %75 : vector<1x1x5x16xbf16> to vector<5x16xbf16>
    %cst_90 = arith.constant dense<0.000000e+00> : vector<32x16xf32>
    %77 = tpu.matmul %25, %76, %cst_90 {dimension_numbers = #tpu.dot_dimension_numbers<[1], [0], [0], [1], [0, 0, 1, 1], [], []>} : vector<32x5xbf16>, vector<5x16xbf16>, vector<32x16xf32> -> vector<32x16xf32>
    %78 = arith.addf %74, %77 : vector<32x16xf32>
    %79 = vector.extract_strided_slice %6 {offsets = [1, 2, 0, 0], sizes = [1, 1, 5, 16], strides = [1, 1, 1, 1]} : vector<3x3x5x16xbf16> to vector<1x1x5x16xbf16>
    %80 = vector.shape_cast %79 : vector<1x1x5x16xbf16> to vector<5x16xbf16>
    %cst_91 = arith.constant dense<0.000000e+00> : vector<32x16xf32>
    %81 = tpu.matmul %28, %80, %cst_91 {dimension_numbers = #tpu.dot_dimension_numbers<[1], [0], [0], [1], [0, 0, 1, 1], [], []>} : vector<32x5xbf16>, vector<5x16xbf16>, vector<32x16xf32> -> vector<32x16xf32>
    %82 = arith.addf %78, %81 : vector<32x16xf32>
    %83 = vector.extract_strided_slice %6 {offsets = [2, 0, 0, 0], sizes = [1, 1, 5, 16], strides = [1, 1, 1, 1]} : vector<3x3x5x16xbf16> to vector<1x1x5x16xbf16>
    %84 = vector.shape_cast %83 : vector<1x1x5x16xbf16> to vector<5x16xbf16>
    %cst_92 = arith.constant dense<0.000000e+00> : vector<32x16xf32>
    %85 = tpu.matmul %34, %84, %cst_92 {dimension_numbers = #tpu.dot_dimension_numbers<[1], [0], [0], [1], [0, 0, 1, 1], [], []>} : vector<32x5xbf16>, vector<5x16xbf16>, vector<32x16xf32> -> vector<32x16xf32>
    %86 = arith.addf %82, %85 : vector<32x16xf32>
    %87 = vector.extract_strided_slice %6 {offsets = [2, 1, 0, 0], sizes = [1, 1, 5, 16], strides = [1, 1, 1, 1]} : vector<3x3x5x16xbf16> to vector<1x1x5x16xbf16>
    %88 = vector.shape_cast %87 : vector<1x1x5x16xbf16> to vector<5x16xbf16>
    %cst_93 = arith.constant dense<0.000000e+00> : vector<32x16xf32>
    %89 = tpu.matmul %37, %88, %cst_93 {dimension_numbers = #tpu.dot_dimension_numbers<[1], [0], [0], [1], [0, 0, 1, 1], [], []>} : vector<32x5xbf16>, vector<5x16xbf16>, vector<32x16xf32> -> vector<32x16xf32>
    %90 = arith.addf %86, %89 : vector<32x16xf32>
    %91 = vector.extract_strided_slice %6 {offsets = [2, 2, 0, 0], sizes = [1, 1, 5, 16], strides = [1, 1, 1, 1]} : vector<3x3x5x16xbf16> to vector<1x1x5x16xbf16>
    %92 = vector.shape_cast %91 : vector<1x1x5x16xbf16> to vector<5x16xbf16>
    %cst_94 = arith.constant dense<0.000000e+00> : vector<32x16xf32>
    %93 = tpu.matmul %40, %92, %cst_94 {dimension_numbers = #tpu.dot_dimension_numbers<[1], [0], [0], [1], [0, 0, 1, 1], [], []>} : vector<32x5xbf16>, vector<5x16xbf16>, vector<32x16xf32> -> vector<32x16xf32>
    %94 = arith.addf %90, %93 : vector<32x16xf32>
    %95 = vector.broadcast %7 : vector<1x16xf32> to vector<32x16xf32>
    %96 = arith.addf %94, %95 : vector<32x16xf32>
    %cst_95 = arith.constant dense<0.000000e+00> : vector<16xf32>
    %97 = vector.multi_reduction <add>, %96, %cst_95 [0] : vector<32x16xf32> to vector<16xf32>
    %98 = vector.shape_cast %97 : vector<16xf32> to vector<1x16xf32>
    %99 = arith.addf %56, %98 : vector<1x16xf32>
    %100 = arith.mulf %96, %96 : vector<32x16xf32>
    %cst_96 = arith.constant dense<0.000000e+00> : vector<16xf32>
    %101 = vector.multi_reduction <add>, %100, %cst_96 [0] : vector<32x16xf32> to vector<16xf32>
    %102 = vector.shape_cast %101 : vector<16xf32> to vector<1x16xf32>
    %103 = arith.addf %57, %102 : vector<1x16xf32>
    %cst_97 = arith.constant 0.000000e+00 : f32
    %104 = vector.broadcast %cst_97 : f32 to vector<32x16xf32>
    %105 = vector.extract_strided_slice %6 {offsets = [0, 0, 0, 0], sizes = [1, 1, 5, 16], strides = [1, 1, 1, 1]} : vector<3x3x5x16xbf16> to vector<1x1x5x16xbf16>
    %106 = vector.shape_cast %105 : vector<1x1x5x16xbf16> to vector<5x16xbf16>
    %cst_98 = arith.constant dense<0.000000e+00> : vector<32x16xf32>
    %107 = tpu.matmul %13, %106, %cst_98 {dimension_numbers = #tpu.dot_dimension_numbers<[1], [0], [0], [1], [0, 0, 1, 1], [], []>} : vector<32x5xbf16>, vector<5x16xbf16>, vector<32x16xf32> -> vector<32x16xf32>
    %108 = arith.addf %104, %107 : vector<32x16xf32>
    %109 = vector.extract_strided_slice %6 {offsets = [0, 1, 0, 0], sizes = [1, 1, 5, 16], strides = [1, 1, 1, 1]} : vector<3x3x5x16xbf16> to vector<1x1x5x16xbf16>
    %110 = vector.shape_cast %109 : vector<1x1x5x16xbf16> to vector<5x16xbf16>
    %cst_99 = arith.constant dense<0.000000e+00> : vector<32x16xf32>
    %111 = tpu.matmul %16, %110, %cst_99 {dimension_numbers = #tpu.dot_dimension_numbers<[1], [0], [0], [1], [0, 0, 1, 1], [], []>} : vector<32x5xbf16>, vector<5x16xbf16>, vector<32x16xf32> -> vector<32x16xf32>
    %112 = arith.addf %108, %111 : vector<32x16xf32>
    %113 = vector.extract_strided_slice %6 {offsets = [0, 2, 0, 0], sizes = [1, 1, 5, 16], strides = [1, 1, 1, 1]} : vector<3x3x5x16xbf16> to vector<1x1x5x16xbf16>
    %114 = vector.shape_cast %113 : vector<1x1x5x16xbf16> to vector<5x16xbf16>
    %cst_100 = arith.constant dense<0.000000e+00> : vector<32x16xf32>
    %115 = tpu.matmul %19, %114, %cst_100 {dimension_numbers = #tpu.dot_dimension_numbers<[1], [0], [0], [1], [0, 0, 1, 1], [], []>} : vector<32x5xbf16>, vector<5x16xbf16>, vector<32x16xf32> -> vector<32x16xf32>
    %116 = arith.addf %112, %115 : vector<32x16xf32>
    %117 = vector.extract_strided_slice %6 {offsets = [1, 0, 0, 0], sizes = [1, 1, 5, 16], strides = [1, 1, 1, 1]} : vector<3x3x5x16xbf16> to vector<1x1x5x16xbf16>
    %118 = vector.shape_cast %117 : vector<1x1x5x16xbf16> to vector<5x16xbf16>
    %cst_101 = arith.constant dense<0.000000e+00> : vector<32x16xf32>
    %119 = tpu.matmul %25, %118, %cst_101 {dimension_numbers = #tpu.dot_dimension_numbers<[1], [0], [0], [1], [0, 0, 1, 1], [], []>} : vector<32x5xbf16>, vector<5x16xbf16>, vector<32x16xf32> -> vector<32x16xf32>
    %120 = arith.addf %116, %119 : vector<32x16xf32>
    %121 = vector.extract_strided_slice %6 {offsets = [1, 1, 0, 0], sizes = [1, 1, 5, 16], strides = [1, 1, 1, 1]} : vector<3x3x5x16xbf16> to vector<1x1x5x16xbf16>
    %122 = vector.shape_cast %121 : vector<1x1x5x16xbf16> to vector<5x16xbf16>
    %cst_102 = arith.constant dense<0.000000e+00> : vector<32x16xf32>
    %123 = tpu.matmul %28, %122, %cst_102 {dimension_numbers = #tpu.dot_dimension_numbers<[1], [0], [0], [1], [0, 0, 1, 1], [], []>} : vector<32x5xbf16>, vector<5x16xbf16>, vector<32x16xf32> -> vector<32x16xf32>
    %124 = arith.addf %120, %123 : vector<32x16xf32>
    %125 = vector.extract_strided_slice %6 {offsets = [1, 2, 0, 0], sizes = [1, 1, 5, 16], strides = [1, 1, 1, 1]} : vector<3x3x5x16xbf16> to vector<1x1x5x16xbf16>
    %126 = vector.shape_cast %125 : vector<1x1x5x16xbf16> to vector<5x16xbf16>
    %cst_103 = arith.constant dense<0.000000e+00> : vector<32x16xf32>
    %127 = tpu.matmul %31, %126, %cst_103 {dimension_numbers = #tpu.dot_dimension_numbers<[1], [0], [0], [1], [0, 0, 1, 1], [], []>} : vector<32x5xbf16>, vector<5x16xbf16>, vector<32x16xf32> -> vector<32x16xf32>
    %128 = arith.addf %124, %127 : vector<32x16xf32>
    %129 = vector.extract_strided_slice %6 {offsets = [2, 0, 0, 0], sizes = [1, 1, 5, 16], strides = [1, 1, 1, 1]} : vector<3x3x5x16xbf16> to vector<1x1x5x16xbf16>
    %130 = vector.shape_cast %129 : vector<1x1x5x16xbf16> to vector<5x16xbf16>
    %cst_104 = arith.constant dense<0.000000e+00> : vector<32x16xf32>
    %131 = tpu.matmul %37, %130, %cst_104 {dimension_numbers = #tpu.dot_dimension_numbers<[1], [0], [0], [1], [0, 0, 1, 1], [], []>} : vector<32x5xbf16>, vector<5x16xbf16>, vector<32x16xf32> -> vector<32x16xf32>
    %132 = arith.addf %128, %131 : vector<32x16xf32>
    %133 = vector.extract_strided_slice %6 {offsets = [2, 1, 0, 0], sizes = [1, 1, 5, 16], strides = [1, 1, 1, 1]} : vector<3x3x5x16xbf16> to vector<1x1x5x16xbf16>
    %134 = vector.shape_cast %133 : vector<1x1x5x16xbf16> to vector<5x16xbf16>
    %cst_105 = arith.constant dense<0.000000e+00> : vector<32x16xf32>
    %135 = tpu.matmul %40, %134, %cst_105 {dimension_numbers = #tpu.dot_dimension_numbers<[1], [0], [0], [1], [0, 0, 1, 1], [], []>} : vector<32x5xbf16>, vector<5x16xbf16>, vector<32x16xf32> -> vector<32x16xf32>
    %136 = arith.addf %132, %135 : vector<32x16xf32>
    %137 = vector.extract_strided_slice %6 {offsets = [2, 2, 0, 0], sizes = [1, 1, 5, 16], strides = [1, 1, 1, 1]} : vector<3x3x5x16xbf16> to vector<1x1x5x16xbf16>
    %138 = vector.shape_cast %137 : vector<1x1x5x16xbf16> to vector<5x16xbf16>
    %cst_106 = arith.constant dense<0.000000e+00> : vector<32x16xf32>
    %139 = tpu.matmul %43, %138, %cst_106 {dimension_numbers = #tpu.dot_dimension_numbers<[1], [0], [0], [1], [0, 0, 1, 1], [], []>} : vector<32x5xbf16>, vector<5x16xbf16>, vector<32x16xf32> -> vector<32x16xf32>
    %140 = arith.addf %136, %139 : vector<32x16xf32>
    %141 = vector.broadcast %7 : vector<1x16xf32> to vector<32x16xf32>
    %142 = arith.addf %140, %141 : vector<32x16xf32>
    %cst_107 = arith.constant dense<0.000000e+00> : vector<16xf32>
    %143 = vector.multi_reduction <add>, %142, %cst_107 [0] : vector<32x16xf32> to vector<16xf32>
    %144 = vector.shape_cast %143 : vector<16xf32> to vector<1x16xf32>
    %145 = arith.addf %99, %144 : vector<1x16xf32>
    %146 = arith.mulf %142, %142 : vector<32x16xf32>
    %cst_108 = arith.constant dense<0.000000e+00> : vector<16xf32>
    %147 = vector.multi_reduction <add>, %146, %cst_108 [0] : vector<32x16xf32> to vector<16xf32>
    %148 = vector.shape_cast %147 : vector<16xf32> to vector<1x16xf32>
    %149 = arith.addf %103, %148 : vector<1x16xf32>
    %150 = arith.maximumf %96, %142 : vector<32x16xf32>
    %151 = arith.minimumf %96, %142 : vector<32x16xf32>
    %cst_109 = arith.constant 0.000000e+00 : f32
    %152 = vector.broadcast %cst_109 : f32 to vector<32x16xf32>
    %153 = vector.extract_strided_slice %6 {offsets = [0, 0, 0, 0], sizes = [1, 1, 5, 16], strides = [1, 1, 1, 1]} : vector<3x3x5x16xbf16> to vector<1x1x5x16xbf16>
    %154 = vector.shape_cast %153 : vector<1x1x5x16xbf16> to vector<5x16xbf16>
    %cst_110 = arith.constant dense<0.000000e+00> : vector<32x16xf32>
    %155 = tpu.matmul %22, %154, %cst_110 {dimension_numbers = #tpu.dot_dimension_numbers<[1], [0], [0], [1], [0, 0, 1, 1], [], []>} : vector<32x5xbf16>, vector<5x16xbf16>, vector<32x16xf32> -> vector<32x16xf32>
    %156 = arith.addf %152, %155 : vector<32x16xf32>
    %157 = vector.extract_strided_slice %6 {offsets = [0, 1, 0, 0], sizes = [1, 1, 5, 16], strides = [1, 1, 1, 1]} : vector<3x3x5x16xbf16> to vector<1x1x5x16xbf16>
    %158 = vector.shape_cast %157 : vector<1x1x5x16xbf16> to vector<5x16xbf16>
    %cst_111 = arith.constant dense<0.000000e+00> : vector<32x16xf32>
    %159 = tpu.matmul %25, %158, %cst_111 {dimension_numbers = #tpu.dot_dimension_numbers<[1], [0], [0], [1], [0, 0, 1, 1], [], []>} : vector<32x5xbf16>, vector<5x16xbf16>, vector<32x16xf32> -> vector<32x16xf32>
    %160 = arith.addf %156, %159 : vector<32x16xf32>
    %161 = vector.extract_strided_slice %6 {offsets = [0, 2, 0, 0], sizes = [1, 1, 5, 16], strides = [1, 1, 1, 1]} : vector<3x3x5x16xbf16> to vector<1x1x5x16xbf16>
    %162 = vector.shape_cast %161 : vector<1x1x5x16xbf16> to vector<5x16xbf16>
    %cst_112 = arith.constant dense<0.000000e+00> : vector<32x16xf32>
    %163 = tpu.matmul %28, %162, %cst_112 {dimension_numbers = #tpu.dot_dimension_numbers<[1], [0], [0], [1], [0, 0, 1, 1], [], []>} : vector<32x5xbf16>, vector<5x16xbf16>, vector<32x16xf32> -> vector<32x16xf32>
    %164 = arith.addf %160, %163 : vector<32x16xf32>
    %165 = vector.extract_strided_slice %6 {offsets = [1, 0, 0, 0], sizes = [1, 1, 5, 16], strides = [1, 1, 1, 1]} : vector<3x3x5x16xbf16> to vector<1x1x5x16xbf16>
    %166 = vector.shape_cast %165 : vector<1x1x5x16xbf16> to vector<5x16xbf16>
    %cst_113 = arith.constant dense<0.000000e+00> : vector<32x16xf32>
    %167 = tpu.matmul %34, %166, %cst_113 {dimension_numbers = #tpu.dot_dimension_numbers<[1], [0], [0], [1], [0, 0, 1, 1], [], []>} : vector<32x5xbf16>, vector<5x16xbf16>, vector<32x16xf32> -> vector<32x16xf32>
    %168 = arith.addf %164, %167 : vector<32x16xf32>
    %169 = vector.extract_strided_slice %6 {offsets = [1, 1, 0, 0], sizes = [1, 1, 5, 16], strides = [1, 1, 1, 1]} : vector<3x3x5x16xbf16> to vector<1x1x5x16xbf16>
    %170 = vector.shape_cast %169 : vector<1x1x5x16xbf16> to vector<5x16xbf16>
    %cst_114 = arith.constant dense<0.000000e+00> : vector<32x16xf32>
    %171 = tpu.matmul %37, %170, %cst_114 {dimension_numbers = #tpu.dot_dimension_numbers<[1], [0], [0], [1], [0, 0, 1, 1], [], []>} : vector<32x5xbf16>, vector<5x16xbf16>, vector<32x16xf32> -> vector<32x16xf32>
    %172 = arith.addf %168, %171 : vector<32x16xf32>
    %173 = vector.extract_strided_slice %6 {offsets = [1, 2, 0, 0], sizes = [1, 1, 5, 16], strides = [1, 1, 1, 1]} : vector<3x3x5x16xbf16> to vector<1x1x5x16xbf16>
    %174 = vector.shape_cast %173 : vector<1x1x5x16xbf16> to vector<5x16xbf16>
    %cst_115 = arith.constant dense<0.000000e+00> : vector<32x16xf32>
    %175 = tpu.matmul %40, %174, %cst_115 {dimension_numbers = #tpu.dot_dimension_numbers<[1], [0], [0], [1], [0, 0, 1, 1], [], []>} : vector<32x5xbf16>, vector<5x16xbf16>, vector<32x16xf32> -> vector<32x16xf32>
    %176 = arith.addf %172, %175 : vector<32x16xf32>
    %177 = vector.extract_strided_slice %6 {offsets = [2, 0, 0, 0], sizes = [1, 1, 5, 16], strides = [1, 1, 1, 1]} : vector<3x3x5x16xbf16> to vector<1x1x5x16xbf16>
    %178 = vector.shape_cast %177 : vector<1x1x5x16xbf16> to vector<5x16xbf16>
    %cst_116 = arith.constant dense<0.000000e+00> : vector<32x16xf32>
    %179 = tpu.matmul %46, %178, %cst_116 {dimension_numbers = #tpu.dot_dimension_numbers<[1], [0], [0], [1], [0, 0, 1, 1], [], []>} : vector<32x5xbf16>, vector<5x16xbf16>, vector<32x16xf32> -> vector<32x16xf32>
    %180 = arith.addf %176, %179 : vector<32x16xf32>
    %181 = vector.extract_strided_slice %6 {offsets = [2, 1, 0, 0], sizes = [1, 1, 5, 16], strides = [1, 1, 1, 1]} : vector<3x3x5x16xbf16> to vector<1x1x5x16xbf16>
    %182 = vector.shape_cast %181 : vector<1x1x5x16xbf16> to vector<5x16xbf16>
    %cst_117 = arith.constant dense<0.000000e+00> : vector<32x16xf32>
    %183 = tpu.matmul %49, %182, %cst_117 {dimension_numbers = #tpu.dot_dimension_numbers<[1], [0], [0], [1], [0, 0, 1, 1], [], []>} : vector<32x5xbf16>, vector<5x16xbf16>, vector<32x16xf32> -> vector<32x16xf32>
    %184 = arith.addf %180, %183 : vector<32x16xf32>
    %185 = vector.extract_strided_slice %6 {offsets = [2, 2, 0, 0], sizes = [1, 1, 5, 16], strides = [1, 1, 1, 1]} : vector<3x3x5x16xbf16> to vector<1x1x5x16xbf16>
    %186 = vector.shape_cast %185 : vector<1x1x5x16xbf16> to vector<5x16xbf16>
    %cst_118 = arith.constant dense<0.000000e+00> : vector<32x16xf32>
    %187 = tpu.matmul %52, %186, %cst_118 {dimension_numbers = #tpu.dot_dimension_numbers<[1], [0], [0], [1], [0, 0, 1, 1], [], []>} : vector<32x5xbf16>, vector<5x16xbf16>, vector<32x16xf32> -> vector<32x16xf32>
    %188 = arith.addf %184, %187 : vector<32x16xf32>
    %189 = vector.broadcast %7 : vector<1x16xf32> to vector<32x16xf32>
    %190 = arith.addf %188, %189 : vector<32x16xf32>
    %cst_119 = arith.constant dense<0.000000e+00> : vector<16xf32>
    %191 = vector.multi_reduction <add>, %190, %cst_119 [0] : vector<32x16xf32> to vector<16xf32>
    %192 = vector.shape_cast %191 : vector<16xf32> to vector<1x16xf32>
    %193 = arith.addf %145, %192 : vector<1x16xf32>
    %194 = arith.mulf %190, %190 : vector<32x16xf32>
    %cst_120 = arith.constant dense<0.000000e+00> : vector<16xf32>
    %195 = vector.multi_reduction <add>, %194, %cst_120 [0] : vector<32x16xf32> to vector<16xf32>
    %196 = vector.shape_cast %195 : vector<16xf32> to vector<1x16xf32>
    %197 = arith.addf %149, %196 : vector<1x16xf32>
    %198 = arith.maximumf %150, %190 : vector<32x16xf32>
    %199 = arith.minimumf %151, %190 : vector<32x16xf32>
    %cst_121 = arith.constant 0.000000e+00 : f32
    %200 = vector.broadcast %cst_121 : f32 to vector<32x16xf32>
    %201 = vector.extract_strided_slice %6 {offsets = [0, 0, 0, 0], sizes = [1, 1, 5, 16], strides = [1, 1, 1, 1]} : vector<3x3x5x16xbf16> to vector<1x1x5x16xbf16>
    %202 = vector.shape_cast %201 : vector<1x1x5x16xbf16> to vector<5x16xbf16>
    %cst_122 = arith.constant dense<0.000000e+00> : vector<32x16xf32>
    %203 = tpu.matmul %25, %202, %cst_122 {dimension_numbers = #tpu.dot_dimension_numbers<[1], [0], [0], [1], [0, 0, 1, 1], [], []>} : vector<32x5xbf16>, vector<5x16xbf16>, vector<32x16xf32> -> vector<32x16xf32>
    %204 = arith.addf %200, %203 : vector<32x16xf32>
    %205 = vector.extract_strided_slice %6 {offsets = [0, 1, 0, 0], sizes = [1, 1, 5, 16], strides = [1, 1, 1, 1]} : vector<3x3x5x16xbf16> to vector<1x1x5x16xbf16>
    %206 = vector.shape_cast %205 : vector<1x1x5x16xbf16> to vector<5x16xbf16>
    %cst_123 = arith.constant dense<0.000000e+00> : vector<32x16xf32>
    %207 = tpu.matmul %28, %206, %cst_123 {dimension_numbers = #tpu.dot_dimension_numbers<[1], [0], [0], [1], [0, 0, 1, 1], [], []>} : vector<32x5xbf16>, vector<5x16xbf16>, vector<32x16xf32> -> vector<32x16xf32>
    %208 = arith.addf %204, %207 : vector<32x16xf32>
    %209 = vector.extract_strided_slice %6 {offsets = [0, 2, 0, 0], sizes = [1, 1, 5, 16], strides = [1, 1, 1, 1]} : vector<3x3x5x16xbf16> to vector<1x1x5x16xbf16>
    %210 = vector.shape_cast %209 : vector<1x1x5x16xbf16> to vector<5x16xbf16>
    %cst_124 = arith.constant dense<0.000000e+00> : vector<32x16xf32>
    %211 = tpu.matmul %31, %210, %cst_124 {dimension_numbers = #tpu.dot_dimension_numbers<[1], [0], [0], [1], [0, 0, 1, 1], [], []>} : vector<32x5xbf16>, vector<5x16xbf16>, vector<32x16xf32> -> vector<32x16xf32>
    %212 = arith.addf %208, %211 : vector<32x16xf32>
    %213 = vector.extract_strided_slice %6 {offsets = [1, 0, 0, 0], sizes = [1, 1, 5, 16], strides = [1, 1, 1, 1]} : vector<3x3x5x16xbf16> to vector<1x1x5x16xbf16>
    %214 = vector.shape_cast %213 : vector<1x1x5x16xbf16> to vector<5x16xbf16>
    %cst_125 = arith.constant dense<0.000000e+00> : vector<32x16xf32>
    %215 = tpu.matmul %37, %214, %cst_125 {dimension_numbers = #tpu.dot_dimension_numbers<[1], [0], [0], [1], [0, 0, 1, 1], [], []>} : vector<32x5xbf16>, vector<5x16xbf16>, vector<32x16xf32> -> vector<32x16xf32>
    %216 = arith.addf %212, %215 : vector<32x16xf32>
    %217 = vector.extract_strided_slice %6 {offsets = [1, 1, 0, 0], sizes = [1, 1, 5, 16], strides = [1, 1, 1, 1]} : vector<3x3x5x16xbf16> to vector<1x1x5x16xbf16>
    %218 = vector.shape_cast %217 : vector<1x1x5x16xbf16> to vector<5x16xbf16>
    %cst_126 = arith.constant dense<0.000000e+00> : vector<32x16xf32>
    %219 = tpu.matmul %40, %218, %cst_126 {dimension_numbers = #tpu.dot_dimension_numbers<[1], [0], [0], [1], [0, 0, 1, 1], [], []>} : vector<32x5xbf16>, vector<5x16xbf16>, vector<32x16xf32> -> vector<32x16xf32>
    %220 = arith.addf %216, %219 : vector<32x16xf32>
    %221 = vector.extract_strided_slice %6 {offsets = [1, 2, 0, 0], sizes = [1, 1, 5, 16], strides = [1, 1, 1, 1]} : vector<3x3x5x16xbf16> to vector<1x1x5x16xbf16>
    %222 = vector.shape_cast %221 : vector<1x1x5x16xbf16> to vector<5x16xbf16>
    %cst_127 = arith.constant dense<0.000000e+00> : vector<32x16xf32>
    %223 = tpu.matmul %43, %222, %cst_127 {dimension_numbers = #tpu.dot_dimension_numbers<[1], [0], [0], [1], [0, 0, 1, 1], [], []>} : vector<32x5xbf16>, vector<5x16xbf16>, vector<32x16xf32> -> vector<32x16xf32>
    %224 = arith.addf %220, %223 : vector<32x16xf32>
    %225 = vector.extract_strided_slice %6 {offsets = [2, 0, 0, 0], sizes = [1, 1, 5, 16], strides = [1, 1, 1, 1]} : vector<3x3x5x16xbf16> to vector<1x1x5x16xbf16>
    %226 = vector.shape_cast %225 : vector<1x1x5x16xbf16> to vector<5x16xbf16>
    %cst_128 = arith.constant dense<0.000000e+00> : vector<32x16xf32>
    %227 = tpu.matmul %49, %226, %cst_128 {dimension_numbers = #tpu.dot_dimension_numbers<[1], [0], [0], [1], [0, 0, 1, 1], [], []>} : vector<32x5xbf16>, vector<5x16xbf16>, vector<32x16xf32> -> vector<32x16xf32>
    %228 = arith.addf %224, %227 : vector<32x16xf32>
    %229 = vector.extract_strided_slice %6 {offsets = [2, 1, 0, 0], sizes = [1, 1, 5, 16], strides = [1, 1, 1, 1]} : vector<3x3x5x16xbf16> to vector<1x1x5x16xbf16>
    %230 = vector.shape_cast %229 : vector<1x1x5x16xbf16> to vector<5x16xbf16>
    %cst_129 = arith.constant dense<0.000000e+00> : vector<32x16xf32>
    %231 = tpu.matmul %52, %230, %cst_129 {dimension_numbers = #tpu.dot_dimension_numbers<[1], [0], [0], [1], [0, 0, 1, 1], [], []>} : vector<32x5xbf16>, vector<5x16xbf16>, vector<32x16xf32> -> vector<32x16xf32>
    %232 = arith.addf %228, %231 : vector<32x16xf32>
    %233 = vector.extract_strided_slice %6 {offsets = [2, 2, 0, 0], sizes = [1, 1, 5, 16], strides = [1, 1, 1, 1]} : vector<3x3x5x16xbf16> to vector<1x1x5x16xbf16>
    %234 = vector.shape_cast %233 : vector<1x1x5x16xbf16> to vector<5x16xbf16>
    %cst_130 = arith.constant dense<0.000000e+00> : vector<32x16xf32>
    %235 = tpu.matmul %55, %234, %cst_130 {dimension_numbers = #tpu.dot_dimension_numbers<[1], [0], [0], [1], [0, 0, 1, 1], [], []>} : vector<32x5xbf16>, vector<5x16xbf16>, vector<32x16xf32> -> vector<32x16xf32>
    %236 = arith.addf %232, %235 : vector<32x16xf32>
    %237 = vector.broadcast %7 : vector<1x16xf32> to vector<32x16xf32>
    %238 = arith.addf %236, %237 : vector<32x16xf32>
    %cst_131 = arith.constant dense<0.000000e+00> : vector<16xf32>
    %239 = vector.multi_reduction <add>, %238, %cst_131 [0] : vector<32x16xf32> to vector<16xf32>
    %240 = vector.shape_cast %239 : vector<16xf32> to vector<1x16xf32>
    %241 = arith.addf %193, %240 : vector<1x16xf32>
    %242 = arith.mulf %238, %238 : vector<32x16xf32>
    %cst_132 = arith.constant dense<0.000000e+00> : vector<16xf32>
    %243 = vector.multi_reduction <add>, %242, %cst_132 [0] : vector<32x16xf32> to vector<16xf32>
    %244 = vector.shape_cast %243 : vector<16xf32> to vector<1x16xf32>
    %245 = arith.addf %197, %244 : vector<1x16xf32>
    %246 = arith.maximumf %198, %238 : vector<32x16xf32>
    %247 = arith.minimumf %199, %238 : vector<32x16xf32>
    %248 = arith.truncf %246 : vector<32x16xf32> to vector<32x16xbf16>
    %c0_133 = arith.constant 0 : index
    %c0_134 = arith.constant 0 : index
    %c0_135 = arith.constant 0 : index
    %249 = vector.load %arg6[%c0_133, %c0_134, %c0_135] : memref<2x32x16xbf16, #tpu.memory_space<vmem>>, vector<1x32x16xbf16>
    %250 = vector.shape_cast %249 : vector<1x32x16xbf16> to vector<32x16xbf16>
    %251 = vector.shape_cast %248 : vector<32x16xbf16> to vector<1x32x16xbf16>
    tpu.vector_store %arg6[%c0_133, %c0_134, %c0_135], %251 {strides = array<i32>} : memref<2x32x16xbf16, #tpu.memory_space<vmem>>, vector<1x32x16xbf16>,
    %252 = arith.truncf %247 : vector<32x16xf32> to vector<32x16xbf16>
    %c1_136 = arith.constant 1 : index
    %c0_137 = arith.constant 0 : index
    %c0_138 = arith.constant 0 : index
    %253 = vector.load %arg6[%c1_136, %c0_137, %c0_138] : memref<2x32x16xbf16, #tpu.memory_space<vmem>>, vector<1x32x16xbf16>
    %254 = vector.shape_cast %253 : vector<1x32x16xbf16> to vector<32x16xbf16>
    %255 = vector.shape_cast %252 : vector<32x16xbf16> to vector<1x32x16xbf16>
    tpu.vector_store %arg6[%c1_136, %c0_137, %c0_138], %255 {strides = array<i32>} : memref<2x32x16xbf16, #tpu.memory_space<vmem>>, vector<1x32x16xbf16>,
    %256 = vector.shape_cast %241 : vector<1x16xf32> to vector<1x16xf32>
    %257 = vector.broadcast %256 : vector<1x16xf32> to vector<8x16xf32>
    %c0_139 = arith.constant 0 : index
    %c0_140 = arith.constant 0 : index
    %c0_141 = arith.constant 0 : index
    %258 = vector.load %arg7[%c0_139, %c0_140, %c0_141] : memref<1x8x16xf32, #tpu.memory_space<vmem>>, vector<1x8x16xf32>
    %259 = vector.shape_cast %258 : vector<1x8x16xf32> to vector<8x16xf32>
    %260 = vector.shape_cast %257 : vector<8x16xf32> to vector<1x8x16xf32>
    tpu.vector_store %arg7[%c0_139, %c0_140, %c0_141], %260 {strides = array<i32>} : memref<1x8x16xf32, #tpu.memory_space<vmem>>, vector<1x8x16xf32>,
    %261 = vector.shape_cast %245 : vector<1x16xf32> to vector<1x16xf32>
    %262 = vector.broadcast %261 : vector<1x16xf32> to vector<8x16xf32>
    %c0_142 = arith.constant 0 : index
    %c0_143 = arith.constant 0 : index
    %c0_144 = arith.constant 0 : index
    %263 = vector.load %arg8[%c0_142, %c0_143, %c0_144] : memref<1x8x16xf32, #tpu.memory_space<vmem>>, vector<1x8x16xf32>
    %264 = vector.shape_cast %263 : vector<1x8x16xf32> to vector<8x16xf32>
    %265 = vector.shape_cast %262 : vector<8x16xf32> to vector<1x8x16xf32>
    tpu.vector_store %arg8[%c0_142, %c0_143, %c0_144], %265 {strides = array<i32>} : memref<1x8x16xf32, #tpu.memory_space<vmem>>, vector<1x8x16xf32>,
    return
  }
  func.func @transform_0(%arg0: i32, %arg1: i32) -> (i32, i32, i32, i32, i32) {
    %c0_i32 = arith.constant 0 : i32
    %c0_i32_0 = arith.constant 0 : i32
    %c0_i32_1 = arith.constant 0 : i32
    %c0_i32_2 = arith.constant 0 : i32
    return %arg0, %c0_i32, %arg1, %c0_i32_0, %c0_i32_1 : i32, i32, i32, i32, i32
  }
  func.func @transform_1(%arg0: i32, %arg1: i32) -> (i32, i32, i32, i32, i32) {
    %c2_i32 = arith.constant 2 : i32
    %0 = arith.muli %arg1, %c2_i32 : i32
    %c2_i32_0 = arith.constant 2 : i32
    %1 = arith.addi %0, %c2_i32_0 : i32
    %c0_i32 = arith.constant 0 : i32
    %c0_i32_1 = arith.constant 0 : i32
    %c0_i32_2 = arith.constant 0 : i32
    %c0_i32_3 = arith.constant 0 : i32
    return %arg0, %c0_i32, %1, %c0_i32_1, %c0_i32_2 : i32, i32, i32, i32, i32
  }
  func.func @transform_2(%arg0: i32, %arg1: i32) -> (i32, i32, i32, i32) {
    %c0_i32 = arith.constant 0 : i32
    %c0_i32_0 = arith.constant 0 : i32
    %c0_i32_1 = arith.constant 0 : i32
    %c0_i32_2 = arith.constant 0 : i32
    %c0_i32_3 = arith.constant 0 : i32
    return %c0_i32, %c0_i32_0, %c0_i32_1, %c0_i32_2 : i32, i32, i32, i32
  }
  func.func @transform_3(%arg0: i32, %arg1: i32) -> (i32, i32) {
    %c0_i32 = arith.constant 0 : i32
    %c0_i32_0 = arith.constant 0 : i32
    %c0_i32_1 = arith.constant 0 : i32
    return %c0_i32, %c0_i32_0 : i32, i32
  }
  func.func @transform_4(%arg0: i32, %arg1: i32) -> (i32, i32, i32) {
    %c8_i32 = arith.constant 8 : i32
    %0 = arith.muli %arg0, %c8_i32 : i32
    %1 = arith.addi %0, %arg1 : i32
    %c0_i32 = arith.constant 0 : i32
    %c0_i32_0 = arith.constant 0 : i32
    %c0_i32_1 = arith.constant 0 : i32
    return %c0_i32, %1, %c0_i32_0 : i32, i32, i32
  }
  func.func @transform_5(%arg0: i32, %arg1: i32) -> (i32, i32, i32) {
    %c8_i32 = arith.constant 8 : i32
    %0 = arith.muli %arg0, %c8_i32 : i32
    %1 = arith.addi %0, %arg1 : i32
    %c0_i32 = arith.constant 0 : i32
    %c0_i32_0 = arith.constant 0 : i32
    %c0_i32_1 = arith.constant 0 : i32
    return %1, %c0_i32, %c0_i32_0 : i32, i32, i32
  }
  func.func @transform_6(%arg0: i32, %arg1: i32) -> (i32, i32, i32) {
    %c8_i32 = arith.constant 8 : i32
    %0 = arith.muli %arg0, %c8_i32 : i32
    %1 = arith.addi %0, %arg1 : i32
    %c0_i32 = arith.constant 0 : i32
    %c0_i32_0 = arith.constant 0 : i32
    %c0_i32_1 = arith.constant 0 : i32
    return %1, %c0_i32, %c0_i32_0 : i32, i32, i32
  }
}

module attributes {stable_mosaic.version = 11 : i64} {
  func.func @_bn_lrelu_kernel(%arg0: i32, %arg1: memref<2x128x16xbf16, #tpu.memory_space<vmem>>, %arg2: memref<1x16xf32, #tpu.memory_space<vmem>>, %arg3: memref<1x16xf32, #tpu.memory_space<vmem>>, %arg4: memref<128x16xbf16, #tpu.memory_space<vmem>>) attributes {dimension_semantics = [#tpu.dimension_semantics<parallel>], iteration_bounds = array<i64: 4>, scalar_prefetch = 0 : i64, scratch_operands = 0 : i64, tpu.core_type = #tpu.core_type<tc>, window_params = [{transform_indices = @transform_0, window_bounds = array<i64: 2, 128, 16>}, {pipeline_mode = #tpu.pipeline_mode<synchronous>, transform_indices = @transform_1, window_bounds = array<i64: 1, 16>}, {pipeline_mode = #tpu.pipeline_mode<synchronous>, transform_indices = @transform_2, window_bounds = array<i64: 1, 16>}, {transform_indices = @transform_3, window_bounds = array<i64: 128, 16>}]} {
    %c0 = arith.constant 0 : index
    %c0_0 = arith.constant 0 : index
    %0 = vector.load %arg2[%c0, %c0_0] : memref<1x16xf32, #tpu.memory_space<vmem>>, vector<1x16xf32>
    %c0_1 = arith.constant 0 : index
    %c0_2 = arith.constant 0 : index
    %1 = vector.load %arg3[%c0_1, %c0_2] : memref<1x16xf32, #tpu.memory_space<vmem>>, vector<1x16xf32>
    %cst = arith.constant 0.000000e+00 : f32
    %2 = vector.broadcast %cst : f32 to vector<1x16xf32>
    %3 = arith.cmpf oge, %0, %2 : vector<1x16xf32>
    %c0_3 = arith.constant 0 : index
    %c0_4 = arith.constant 0 : index
    %c0_5 = arith.constant 0 : index
    %4 = vector.load %arg1[%c0_3, %c0_4, %c0_5] : memref<2x128x16xbf16, #tpu.memory_space<vmem>>, vector<1x128x16xbf16>
    %5 = vector.shape_cast %4 : vector<1x128x16xbf16> to vector<128x16xbf16>
    %6 = arith.extf %5 : vector<128x16xbf16> to vector<128x16xf32>
    %c1 = arith.constant 1 : index
    %c0_6 = arith.constant 0 : index
    %c0_7 = arith.constant 0 : index
    %7 = vector.load %arg1[%c1, %c0_6, %c0_7] : memref<2x128x16xbf16, #tpu.memory_space<vmem>>, vector<1x128x16xbf16>
    %8 = vector.shape_cast %7 : vector<1x128x16xbf16> to vector<128x16xbf16>
    %9 = arith.extf %8 : vector<128x16xbf16> to vector<128x16xf32>
    %10 = vector.shape_cast %3 : vector<1x16xi1> to vector<1x16xi1>
    %11 = vector.broadcast %10 : vector<1x16xi1> to vector<128x16xi1>
    %12 = arith.select %11, %6, %9 : vector<128x16xi1>, vector<128x16xf32>
    %13 = vector.broadcast %0 : vector<1x16xf32> to vector<128x16xf32>
    %14 = arith.mulf %12, %13 : vector<128x16xf32>
    %15 = vector.broadcast %1 : vector<1x16xf32> to vector<128x16xf32>
    %16 = arith.addf %14, %15 : vector<128x16xf32>
    %cst_8 = arith.constant 0.000000e+00 : f32
    %17 = vector.broadcast %cst_8 : f32 to vector<128x16xf32>
    %18 = arith.cmpf ogt, %16, %17 : vector<128x16xf32>
    %cst_9 = arith.constant 2.000000e-01 : f32
    %19 = vector.broadcast %cst_9 : f32 to vector<128x16xf32>
    %20 = arith.mulf %19, %16 : vector<128x16xf32>
    %21 = arith.select %18, %16, %20 : vector<128x16xi1>, vector<128x16xf32>
    %22 = arith.truncf %21 : vector<128x16xf32> to vector<128x16xbf16>
    %c0_10 = arith.constant 0 : index
    %c0_11 = arith.constant 0 : index
    %23 = vector.load %arg4[%c0_10, %c0_11] : memref<128x16xbf16, #tpu.memory_space<vmem>>, vector<128x16xbf16>
    tpu.vector_store %arg4[%c0_10, %c0_11], %22 {strides = array<i32>} : memref<128x16xbf16, #tpu.memory_space<vmem>>, vector<128x16xbf16>,
    return
  }
  func.func @transform_0(%arg0: i32) -> (i32, i32, i32) {
    %c0_i32 = arith.constant 0 : i32
    %c0_i32_0 = arith.constant 0 : i32
    %c0_i32_1 = arith.constant 0 : i32
    return %c0_i32, %arg0, %c0_i32_0 : i32, i32, i32
  }
  func.func @transform_1(%arg0: i32) -> (i32, i32) {
    %c0_i32 = arith.constant 0 : i32
    %c0_i32_0 = arith.constant 0 : i32
    %c0_i32_1 = arith.constant 0 : i32
    return %c0_i32, %c0_i32_0 : i32, i32
  }
  func.func @transform_2(%arg0: i32) -> (i32, i32) {
    %c0_i32 = arith.constant 0 : i32
    %c0_i32_0 = arith.constant 0 : i32
    %c0_i32_1 = arith.constant 0 : i32
    return %c0_i32, %c0_i32_0 : i32, i32
  }
  func.func @transform_3(%arg0: i32) -> (i32, i32) {
    %c0_i32 = arith.constant 0 : i32
    %c0_i32_0 = arith.constant 0 : i32
    return %arg0, %c0_i32 : i32, i32
  }
}

module attributes {stable_mosaic.version = 11 : i64} {
  func.func @_conv_stats_kernel(%arg0: i32, %arg1: i32, %arg2: memref<1x4x4x9x16xbf16, #tpu.memory_space<vmem>>, %arg3: memref<1x4x1x9x16xbf16, #tpu.memory_space<vmem>>, %arg4: memref<3x3x16x32xbf16, #tpu.memory_space<vmem>>, %arg5: memref<1x32xf32, #tpu.memory_space<vmem>>, %arg6: memref<2x32x32xbf16, #tpu.memory_space<vmem>>, %arg7: memref<1x8x32xf32, #tpu.memory_space<vmem>>, %arg8: memref<1x8x32xf32, #tpu.memory_space<vmem>>, %arg9: memref<4x5x9x16xbf16, #tpu.memory_space<vmem>>) attributes {dimension_semantics = [#tpu.dimension_semantics<parallel>, #tpu.dimension_semantics<parallel>], iteration_bounds = array<i64: 2, 2>, scalar_prefetch = 0 : i64, scratch_operands = 1 : i64, tpu.core_type = #tpu.core_type<tc>, window_params = [{transform_indices = @transform_0, window_bounds = array<i64: 1, 4, 4, 9, 16>}, {transform_indices = @transform_1, window_bounds = array<i64: 1, 4, 1, 9, 16>}, {pipeline_mode = #tpu.pipeline_mode<synchronous>, transform_indices = @transform_2, window_bounds = array<i64: 3, 3, 16, 32>}, {pipeline_mode = #tpu.pipeline_mode<synchronous>, transform_indices = @transform_3, window_bounds = array<i64: 1, 32>}, {transform_indices = @transform_4, window_bounds = array<i64: 2, 32, 32>}, {transform_indices = @transform_5, window_bounds = array<i64: 1, 8, 32>}, {transform_indices = @transform_6, window_bounds = array<i64: 1, 8, 32>}]} {
    %c0 = arith.constant 0 : index
    %c0_0 = arith.constant 0 : index
    %c0_1 = arith.constant 0 : index
    %c0_2 = arith.constant 0 : index
    %c0_3 = arith.constant 0 : index
    %0 = vector.load %arg2[%c0, %c0_0, %c0_1, %c0_2, %c0_3] : memref<1x4x4x9x16xbf16, #tpu.memory_space<vmem>>, vector<1x4x4x9x16xbf16>
    %1 = vector.shape_cast %0 : vector<1x4x4x9x16xbf16> to vector<4x4x9x16xbf16>
    %c0_4 = arith.constant 0 : index
    %c0_5 = arith.constant 0 : index
    %c0_6 = arith.constant 0 : index
    %c0_7 = arith.constant 0 : index
    %2 = vector.load %arg9[%c0_4, %c0_5, %c0_6, %c0_7] : memref<4x5x9x16xbf16, #tpu.memory_space<vmem>>, vector<4x4x9x16xbf16>
    tpu.vector_store %arg9[%c0_4, %c0_5, %c0_6, %c0_7], %1 {strides = array<i32>} : memref<4x5x9x16xbf16, #tpu.memory_space<vmem>>, vector<4x4x9x16xbf16>,
    %c0_8 = arith.constant 0 : index
    %c0_9 = arith.constant 0 : index
    %c0_10 = arith.constant 0 : index
    %c0_11 = arith.constant 0 : index
    %c0_12 = arith.constant 0 : index
    %3 = vector.load %arg3[%c0_8, %c0_9, %c0_10, %c0_11, %c0_12] : memref<1x4x1x9x16xbf16, #tpu.memory_space<vmem>>, vector<1x4x1x9x16xbf16>
    %4 = vector.shape_cast %3 : vector<1x4x1x9x16xbf16> to vector<4x1x9x16xbf16>
    %c0_13 = arith.constant 0 : index
    %c4 = arith.constant 4 : index
    %c0_14 = arith.constant 0 : index
    %c0_15 = arith.constant 0 : index
    %5 = vector.load %arg9[%c0_13, %c4, %c0_14, %c0_15] : memref<4x5x9x16xbf16, #tpu.memory_space<vmem>>, vector<4x1x9x16xbf16>
    tpu.vector_store %arg9[%c0_13, %c4, %c0_14, %c0_15], %4 {strides = array<i32>} : memref<4x5x9x16xbf16, #tpu.memory_space<vmem>>, vector<4x1x9x16xbf16>,
    %c0_16 = arith.constant 0 : index
    %c0_17 = arith.constant 0 : index
    %c0_18 = arith.constant 0 : index
    %c0_19 = arith.constant 0 : index
    %6 = vector.load %arg4[%c0_16, %c0_17, %c0_18, %c0_19] : memref<3x3x16x32xbf16, #tpu.memory_space<vmem>>, vector<3x3x16x32xbf16>
    %c0_20 = arith.constant 0 : index
    %c0_21 = arith.constant 0 : index
    %7 = vector.load %arg5[%c0_20, %c0_21] : memref<1x32xf32, #tpu.memory_space<vmem>>, vector<1x32xf32>
    %c0_22 = arith.constant 0 : index
    %c0_23 = arith.constant 0 : index
    %c0_24 = arith.constant 0 : index
    %c0_25 = arith.constant 0 : index
    %8 = vector.load %arg9[%c0_22, %c0_23, %c0_24, %c0_25] : memref<4x5x9x16xbf16, #tpu.memory_space<vmem>>, vector<1x4x8x16xbf16>
    %9 = vector.shape_cast %8 : vector<1x4x8x16xbf16> to vector<4x8x16xbf16>
    %10 = vector.shape_cast %9 : vector<4x8x16xbf16> to vector<32x16xbf16>
    %c1 = arith.constant 1 : index
    %c0_26 = arith.constant 0 : index
    %c0_27 = arith.constant 0 : index
    %c0_28 = arith.constant 0 : index
    %11 = vector.load %arg9[%c1, %c0_26, %c0_27, %c0_28] : memref<4x5x9x16xbf16, #tpu.memory_space<vmem>>, vector<1x4x8x16xbf16>
    %12 = vector.shape_cast %11 : vector<1x4x8x16xbf16> to vector<4x8x16xbf16>
    %13 = vector.shape_cast %12 : vector<4x8x16xbf16> to vector<32x16xbf16>
    %c0_29 = arith.constant 0 : index
    %c0_30 = arith.constant 0 : index
    %c1_31 = arith.constant 1 : index
    %c0_32 = arith.constant 0 : index
    %14 = vector.load %arg9[%c0_29, %c0_30, %c1_31, %c0_32] : memref<4x5x9x16xbf16, #tpu.memory_space<vmem>>, vector<1x4x8x16xbf16>
    %15 = vector.shape_cast %14 : vector<1x4x8x16xbf16> to vector<4x8x16xbf16>
    %16 = vector.shape_cast %15 : vector<4x8x16xbf16> to vector<32x16xbf16>
    %c1_33 = arith.constant 1 : index
    %c0_34 = arith.constant 0 : index
    %c1_35 = arith.constant 1 : index
    %c0_36 = arith.constant 0 : index
    %17 = vector.load %arg9[%c1_33, %c0_34, %c1_35, %c0_36] : memref<4x5x9x16xbf16, #tpu.memory_space<vmem>>, vector<1x4x8x16xbf16>
    %18 = vector.shape_cast %17 : vector<1x4x8x16xbf16> to vector<4x8x16xbf16>
    %19 = vector.shape_cast %18 : vector<4x8x16xbf16> to vector<32x16xbf16>
    %c2 = arith.constant 2 : index
    %c0_37 = arith.constant 0 : index
    %c0_38 = arith.constant 0 : index
    %c0_39 = arith.constant 0 : index
    %20 = vector.load %arg9[%c2, %c0_37, %c0_38, %c0_39] : memref<4x5x9x16xbf16, #tpu.memory_space<vmem>>, vector<1x4x8x16xbf16>
    %21 = vector.shape_cast %20 : vector<1x4x8x16xbf16> to vector<4x8x16xbf16>
    %22 = vector.shape_cast %21 : vector<4x8x16xbf16> to vector<32x16xbf16>
    %c3 = arith.constant 3 : index
    %c0_40 = arith.constant 0 : index
    %c0_41 = arith.constant 0 : index
    %c0_42 = arith.constant 0 : index
    %23 = vector.load %arg9[%c3, %c0_40, %c0_41, %c0_42] : memref<4x5x9x16xbf16, #tpu.memory_space<vmem>>, vector<1x4x8x16xbf16>
    %24 = vector.shape_cast %23 : vector<1x4x8x16xbf16> to vector<4x8x16xbf16>
    %25 = vector.shape_cast %24 : vector<4x8x16xbf16> to vector<32x16xbf16>
    %c2_43 = arith.constant 2 : index
    %c0_44 = arith.constant 0 : index
    %c1_45 = arith.constant 1 : index
    %c0_46 = arith.constant 0 : index
    %26 = vector.load %arg9[%c2_43, %c0_44, %c1_45, %c0_46] : memref<4x5x9x16xbf16, #tpu.memory_space<vmem>>, vector<1x4x8x16xbf16>
    %27 = vector.shape_cast %26 : vector<1x4x8x16xbf16> to vector<4x8x16xbf16>
    %28 = vector.shape_cast %27 : vector<4x8x16xbf16> to vector<32x16xbf16>
    %c3_47 = arith.constant 3 : index
    %c0_48 = arith.constant 0 : index
    %c1_49 = arith.constant 1 : index
    %c0_50 = arith.constant 0 : index
    %29 = vector.load %arg9[%c3_47, %c0_48, %c1_49, %c0_50] : memref<4x5x9x16xbf16, #tpu.memory_space<vmem>>, vector<1x4x8x16xbf16>
    %30 = vector.shape_cast %29 : vector<1x4x8x16xbf16> to vector<4x8x16xbf16>
    %31 = vector.shape_cast %30 : vector<4x8x16xbf16> to vector<32x16xbf16>
    %c0_51 = arith.constant 0 : index
    %c1_52 = arith.constant 1 : index
    %c0_53 = arith.constant 0 : index
    %c0_54 = arith.constant 0 : index
    %32 = vector.load %arg9[%c0_51, %c1_52, %c0_53, %c0_54] : memref<4x5x9x16xbf16, #tpu.memory_space<vmem>>, vector<1x4x8x16xbf16>
    %33 = vector.shape_cast %32 : vector<1x4x8x16xbf16> to vector<4x8x16xbf16>
    %34 = vector.shape_cast %33 : vector<4x8x16xbf16> to vector<32x16xbf16>
    %c1_55 = arith.constant 1 : index
    %c1_56 = arith.constant 1 : index
    %c0_57 = arith.constant 0 : index
    %c0_58 = arith.constant 0 : index
    %35 = vector.load %arg9[%c1_55, %c1_56, %c0_57, %c0_58] : memref<4x5x9x16xbf16, #tpu.memory_space<vmem>>, vector<1x4x8x16xbf16>
    %36 = vector.shape_cast %35 : vector<1x4x8x16xbf16> to vector<4x8x16xbf16>
    %37 = vector.shape_cast %36 : vector<4x8x16xbf16> to vector<32x16xbf16>
    %c0_59 = arith.constant 0 : index
    %c1_60 = arith.constant 1 : index
    %c1_61 = arith.constant 1 : index
    %c0_62 = arith.constant 0 : index
    %38 = vector.load %arg9[%c0_59, %c1_60, %c1_61, %c0_62] : memref<4x5x9x16xbf16, #tpu.memory_space<vmem>>, vector<1x4x8x16xbf16>
    %39 = vector.shape_cast %38 : vector<1x4x8x16xbf16> to vector<4x8x16xbf16>
    %40 = vector.shape_cast %39 : vector<4x8x16xbf16> to vector<32x16xbf16>
    %c1_63 = arith.constant 1 : index
    %c1_64 = arith.constant 1 : index
    %c1_65 = arith.constant 1 : index
    %c0_66 = arith.constant 0 : index
    %41 = vector.load %arg9[%c1_63, %c1_64, %c1_65, %c0_66] : memref<4x5x9x16xbf16, #tpu.memory_space<vmem>>, vector<1x4x8x16xbf16>
    %42 = vector.shape_cast %41 : vector<1x4x8x16xbf16> to vector<4x8x16xbf16>
    %43 = vector.shape_cast %42 : vector<4x8x16xbf16> to vector<32x16xbf16>
    %c2_67 = arith.constant 2 : index
    %c1_68 = arith.constant 1 : index
    %c0_69 = arith.constant 0 : index
    %c0_70 = arith.constant 0 : index
    %44 = vector.load %arg9[%c2_67, %c1_68, %c0_69, %c0_70] : memref<4x5x9x16xbf16, #tpu.memory_space<vmem>>, vector<1x4x8x16xbf16>
    %45 = vector.shape_cast %44 : vector<1x4x8x16xbf16> to vector<4x8x16xbf16>
    %46 = vector.shape_cast %45 : vector<4x8x16xbf16> to vector<32x16xbf16>
    %c3_71 = arith.constant 3 : index
    %c1_72 = arith.constant 1 : index
    %c0_73 = arith.constant 0 : index
    %c0_74 = arith.constant 0 : index
    %47 = vector.load %arg9[%c3_71, %c1_72, %c0_73, %c0_74] : memref<4x5x9x16xbf16, #tpu.memory_space<vmem>>, vector<1x4x8x16xbf16>
    %48 = vector.shape_cast %47 : vector<1x4x8x16xbf16> to vector<4x8x16xbf16>
    %49 = vector.shape_cast %48 : vector<4x8x16xbf16> to vector<32x16xbf16>
    %c2_75 = arith.constant 2 : index
    %c1_76 = arith.constant 1 : index
    %c1_77 = arith.constant 1 : index
    %c0_78 = arith.constant 0 : index
    %50 = vector.load %arg9[%c2_75, %c1_76, %c1_77, %c0_78] : memref<4x5x9x16xbf16, #tpu.memory_space<vmem>>, vector<1x4x8x16xbf16>
    %51 = vector.shape_cast %50 : vector<1x4x8x16xbf16> to vector<4x8x16xbf16>
    %52 = vector.shape_cast %51 : vector<4x8x16xbf16> to vector<32x16xbf16>
    %c3_79 = arith.constant 3 : index
    %c1_80 = arith.constant 1 : index
    %c1_81 = arith.constant 1 : index
    %c0_82 = arith.constant 0 : index
    %53 = vector.load %arg9[%c3_79, %c1_80, %c1_81, %c0_82] : memref<4x5x9x16xbf16, #tpu.memory_space<vmem>>, vector<1x4x8x16xbf16>
    %54 = vector.shape_cast %53 : vector<1x4x8x16xbf16> to vector<4x8x16xbf16>
    %55 = vector.shape_cast %54 : vector<4x8x16xbf16> to vector<32x16xbf16>
    %cst = arith.constant 0.000000e+00 : f32
    %56 = vector.broadcast %cst : f32 to vector<1x32xf32>
    %cst_83 = arith.constant 0.000000e+00 : f32
    %57 = vector.broadcast %cst_83 : f32 to vector<1x32xf32>
    %cst_84 = arith.constant 0.000000e+00 : f32
    %58 = vector.broadcast %cst_84 : f32 to vector<32x32xf32>
    %59 = vector.extract_strided_slice %6 {offsets = [0, 0, 0, 0], sizes = [1, 1, 16, 32], strides = [1, 1, 1, 1]} : vector<3x3x16x32xbf16> to vector<1x1x16x32xbf16>
    %60 = vector.shape_cast %59 : vector<1x1x16x32xbf16> to vector<16x32xbf16>
    %cst_85 = arith.constant dense<0.000000e+00> : vector<32x32xf32>
    %61 = tpu.matmul %10, %60, %cst_85 {dimension_numbers = #tpu.dot_dimension_numbers<[1], [0], [0], [1], [0, 0, 1, 1], [], []>} : vector<32x16xbf16>, vector<16x32xbf16>, vector<32x32xf32> -> vector<32x32xf32>
    %62 = arith.addf %58, %61 : vector<32x32xf32>
    %63 = vector.extract_strided_slice %6 {offsets = [0, 1, 0, 0], sizes = [1, 1, 16, 32], strides = [1, 1, 1, 1]} : vector<3x3x16x32xbf16> to vector<1x1x16x32xbf16>
    %64 = vector.shape_cast %63 : vector<1x1x16x32xbf16> to vector<16x32xbf16>
    %cst_86 = arith.constant dense<0.000000e+00> : vector<32x32xf32>
    %65 = tpu.matmul %13, %64, %cst_86 {dimension_numbers = #tpu.dot_dimension_numbers<[1], [0], [0], [1], [0, 0, 1, 1], [], []>} : vector<32x16xbf16>, vector<16x32xbf16>, vector<32x32xf32> -> vector<32x32xf32>
    %66 = arith.addf %62, %65 : vector<32x32xf32>
    %67 = vector.extract_strided_slice %6 {offsets = [0, 2, 0, 0], sizes = [1, 1, 16, 32], strides = [1, 1, 1, 1]} : vector<3x3x16x32xbf16> to vector<1x1x16x32xbf16>
    %68 = vector.shape_cast %67 : vector<1x1x16x32xbf16> to vector<16x32xbf16>
    %cst_87 = arith.constant dense<0.000000e+00> : vector<32x32xf32>
    %69 = tpu.matmul %16, %68, %cst_87 {dimension_numbers = #tpu.dot_dimension_numbers<[1], [0], [0], [1], [0, 0, 1, 1], [], []>} : vector<32x16xbf16>, vector<16x32xbf16>, vector<32x32xf32> -> vector<32x32xf32>
    %70 = arith.addf %66, %69 : vector<32x32xf32>
    %71 = vector.extract_strided_slice %6 {offsets = [1, 0, 0, 0], sizes = [1, 1, 16, 32], strides = [1, 1, 1, 1]} : vector<3x3x16x32xbf16> to vector<1x1x16x32xbf16>
    %72 = vector.shape_cast %71 : vector<1x1x16x32xbf16> to vector<16x32xbf16>
    %cst_88 = arith.constant dense<0.000000e+00> : vector<32x32xf32>
    %73 = tpu.matmul %22, %72, %cst_88 {dimension_numbers = #tpu.dot_dimension_numbers<[1], [0], [0], [1], [0, 0, 1, 1], [], []>} : vector<32x16xbf16>, vector<16x32xbf16>, vector<32x32xf32> -> vector<32x32xf32>
    %74 = arith.addf %70, %73 : vector<32x32xf32>
    %75 = vector.extract_strided_slice %6 {offsets = [1, 1, 0, 0], sizes = [1, 1, 16, 32], strides = [1, 1, 1, 1]} : vector<3x3x16x32xbf16> to vector<1x1x16x32xbf16>
    %76 = vector.shape_cast %75 : vector<1x1x16x32xbf16> to vector<16x32xbf16>
    %cst_89 = arith.constant dense<0.000000e+00> : vector<32x32xf32>
    %77 = tpu.matmul %25, %76, %cst_89 {dimension_numbers = #tpu.dot_dimension_numbers<[1], [0], [0], [1], [0, 0, 1, 1], [], []>} : vector<32x16xbf16>, vector<16x32xbf16>, vector<32x32xf32> -> vector<32x32xf32>
    %78 = arith.addf %74, %77 : vector<32x32xf32>
    %79 = vector.extract_strided_slice %6 {offsets = [1, 2, 0, 0], sizes = [1, 1, 16, 32], strides = [1, 1, 1, 1]} : vector<3x3x16x32xbf16> to vector<1x1x16x32xbf16>
    %80 = vector.shape_cast %79 : vector<1x1x16x32xbf16> to vector<16x32xbf16>
    %cst_90 = arith.constant dense<0.000000e+00> : vector<32x32xf32>
    %81 = tpu.matmul %28, %80, %cst_90 {dimension_numbers = #tpu.dot_dimension_numbers<[1], [0], [0], [1], [0, 0, 1, 1], [], []>} : vector<32x16xbf16>, vector<16x32xbf16>, vector<32x32xf32> -> vector<32x32xf32>
    %82 = arith.addf %78, %81 : vector<32x32xf32>
    %83 = vector.extract_strided_slice %6 {offsets = [2, 0, 0, 0], sizes = [1, 1, 16, 32], strides = [1, 1, 1, 1]} : vector<3x3x16x32xbf16> to vector<1x1x16x32xbf16>
    %84 = vector.shape_cast %83 : vector<1x1x16x32xbf16> to vector<16x32xbf16>
    %cst_91 = arith.constant dense<0.000000e+00> : vector<32x32xf32>
    %85 = tpu.matmul %34, %84, %cst_91 {dimension_numbers = #tpu.dot_dimension_numbers<[1], [0], [0], [1], [0, 0, 1, 1], [], []>} : vector<32x16xbf16>, vector<16x32xbf16>, vector<32x32xf32> -> vector<32x32xf32>
    %86 = arith.addf %82, %85 : vector<32x32xf32>
    %87 = vector.extract_strided_slice %6 {offsets = [2, 1, 0, 0], sizes = [1, 1, 16, 32], strides = [1, 1, 1, 1]} : vector<3x3x16x32xbf16> to vector<1x1x16x32xbf16>
    %88 = vector.shape_cast %87 : vector<1x1x16x32xbf16> to vector<16x32xbf16>
    %cst_92 = arith.constant dense<0.000000e+00> : vector<32x32xf32>
    %89 = tpu.matmul %37, %88, %cst_92 {dimension_numbers = #tpu.dot_dimension_numbers<[1], [0], [0], [1], [0, 0, 1, 1], [], []>} : vector<32x16xbf16>, vector<16x32xbf16>, vector<32x32xf32> -> vector<32x32xf32>
    %90 = arith.addf %86, %89 : vector<32x32xf32>
    %91 = vector.extract_strided_slice %6 {offsets = [2, 2, 0, 0], sizes = [1, 1, 16, 32], strides = [1, 1, 1, 1]} : vector<3x3x16x32xbf16> to vector<1x1x16x32xbf16>
    %92 = vector.shape_cast %91 : vector<1x1x16x32xbf16> to vector<16x32xbf16>
    %cst_93 = arith.constant dense<0.000000e+00> : vector<32x32xf32>
    %93 = tpu.matmul %40, %92, %cst_93 {dimension_numbers = #tpu.dot_dimension_numbers<[1], [0], [0], [1], [0, 0, 1, 1], [], []>} : vector<32x16xbf16>, vector<16x32xbf16>, vector<32x32xf32> -> vector<32x32xf32>
    %94 = arith.addf %90, %93 : vector<32x32xf32>
    %95 = vector.broadcast %7 : vector<1x32xf32> to vector<32x32xf32>
    %96 = arith.addf %94, %95 : vector<32x32xf32>
    %cst_94 = arith.constant dense<0.000000e+00> : vector<32xf32>
    %97 = vector.multi_reduction <add>, %96, %cst_94 [0] : vector<32x32xf32> to vector<32xf32>
    %98 = vector.shape_cast %97 : vector<32xf32> to vector<1x32xf32>
    %99 = arith.addf %56, %98 : vector<1x32xf32>
    %100 = arith.mulf %96, %96 : vector<32x32xf32>
    %cst_95 = arith.constant dense<0.000000e+00> : vector<32xf32>
    %101 = vector.multi_reduction <add>, %100, %cst_95 [0] : vector<32x32xf32> to vector<32xf32>
    %102 = vector.shape_cast %101 : vector<32xf32> to vector<1x32xf32>
    %103 = arith.addf %57, %102 : vector<1x32xf32>
    %cst_96 = arith.constant 0.000000e+00 : f32
    %104 = vector.broadcast %cst_96 : f32 to vector<32x32xf32>
    %105 = vector.extract_strided_slice %6 {offsets = [0, 0, 0, 0], sizes = [1, 1, 16, 32], strides = [1, 1, 1, 1]} : vector<3x3x16x32xbf16> to vector<1x1x16x32xbf16>
    %106 = vector.shape_cast %105 : vector<1x1x16x32xbf16> to vector<16x32xbf16>
    %cst_97 = arith.constant dense<0.000000e+00> : vector<32x32xf32>
    %107 = tpu.matmul %13, %106, %cst_97 {dimension_numbers = #tpu.dot_dimension_numbers<[1], [0], [0], [1], [0, 0, 1, 1], [], []>} : vector<32x16xbf16>, vector<16x32xbf16>, vector<32x32xf32> -> vector<32x32xf32>
    %108 = arith.addf %104, %107 : vector<32x32xf32>
    %109 = vector.extract_strided_slice %6 {offsets = [0, 1, 0, 0], sizes = [1, 1, 16, 32], strides = [1, 1, 1, 1]} : vector<3x3x16x32xbf16> to vector<1x1x16x32xbf16>
    %110 = vector.shape_cast %109 : vector<1x1x16x32xbf16> to vector<16x32xbf16>
    %cst_98 = arith.constant dense<0.000000e+00> : vector<32x32xf32>
    %111 = tpu.matmul %16, %110, %cst_98 {dimension_numbers = #tpu.dot_dimension_numbers<[1], [0], [0], [1], [0, 0, 1, 1], [], []>} : vector<32x16xbf16>, vector<16x32xbf16>, vector<32x32xf32> -> vector<32x32xf32>
    %112 = arith.addf %108, %111 : vector<32x32xf32>
    %113 = vector.extract_strided_slice %6 {offsets = [0, 2, 0, 0], sizes = [1, 1, 16, 32], strides = [1, 1, 1, 1]} : vector<3x3x16x32xbf16> to vector<1x1x16x32xbf16>
    %114 = vector.shape_cast %113 : vector<1x1x16x32xbf16> to vector<16x32xbf16>
    %cst_99 = arith.constant dense<0.000000e+00> : vector<32x32xf32>
    %115 = tpu.matmul %19, %114, %cst_99 {dimension_numbers = #tpu.dot_dimension_numbers<[1], [0], [0], [1], [0, 0, 1, 1], [], []>} : vector<32x16xbf16>, vector<16x32xbf16>, vector<32x32xf32> -> vector<32x32xf32>
    %116 = arith.addf %112, %115 : vector<32x32xf32>
    %117 = vector.extract_strided_slice %6 {offsets = [1, 0, 0, 0], sizes = [1, 1, 16, 32], strides = [1, 1, 1, 1]} : vector<3x3x16x32xbf16> to vector<1x1x16x32xbf16>
    %118 = vector.shape_cast %117 : vector<1x1x16x32xbf16> to vector<16x32xbf16>
    %cst_100 = arith.constant dense<0.000000e+00> : vector<32x32xf32>
    %119 = tpu.matmul %25, %118, %cst_100 {dimension_numbers = #tpu.dot_dimension_numbers<[1], [0], [0], [1], [0, 0, 1, 1], [], []>} : vector<32x16xbf16>, vector<16x32xbf16>, vector<32x32xf32> -> vector<32x32xf32>
    %120 = arith.addf %116, %119 : vector<32x32xf32>
    %121 = vector.extract_strided_slice %6 {offsets = [1, 1, 0, 0], sizes = [1, 1, 16, 32], strides = [1, 1, 1, 1]} : vector<3x3x16x32xbf16> to vector<1x1x16x32xbf16>
    %122 = vector.shape_cast %121 : vector<1x1x16x32xbf16> to vector<16x32xbf16>
    %cst_101 = arith.constant dense<0.000000e+00> : vector<32x32xf32>
    %123 = tpu.matmul %28, %122, %cst_101 {dimension_numbers = #tpu.dot_dimension_numbers<[1], [0], [0], [1], [0, 0, 1, 1], [], []>} : vector<32x16xbf16>, vector<16x32xbf16>, vector<32x32xf32> -> vector<32x32xf32>
    %124 = arith.addf %120, %123 : vector<32x32xf32>
    %125 = vector.extract_strided_slice %6 {offsets = [1, 2, 0, 0], sizes = [1, 1, 16, 32], strides = [1, 1, 1, 1]} : vector<3x3x16x32xbf16> to vector<1x1x16x32xbf16>
    %126 = vector.shape_cast %125 : vector<1x1x16x32xbf16> to vector<16x32xbf16>
    %cst_102 = arith.constant dense<0.000000e+00> : vector<32x32xf32>
    %127 = tpu.matmul %31, %126, %cst_102 {dimension_numbers = #tpu.dot_dimension_numbers<[1], [0], [0], [1], [0, 0, 1, 1], [], []>} : vector<32x16xbf16>, vector<16x32xbf16>, vector<32x32xf32> -> vector<32x32xf32>
    %128 = arith.addf %124, %127 : vector<32x32xf32>
    %129 = vector.extract_strided_slice %6 {offsets = [2, 0, 0, 0], sizes = [1, 1, 16, 32], strides = [1, 1, 1, 1]} : vector<3x3x16x32xbf16> to vector<1x1x16x32xbf16>
    %130 = vector.shape_cast %129 : vector<1x1x16x32xbf16> to vector<16x32xbf16>
    %cst_103 = arith.constant dense<0.000000e+00> : vector<32x32xf32>
    %131 = tpu.matmul %37, %130, %cst_103 {dimension_numbers = #tpu.dot_dimension_numbers<[1], [0], [0], [1], [0, 0, 1, 1], [], []>} : vector<32x16xbf16>, vector<16x32xbf16>, vector<32x32xf32> -> vector<32x32xf32>
    %132 = arith.addf %128, %131 : vector<32x32xf32>
    %133 = vector.extract_strided_slice %6 {offsets = [2, 1, 0, 0], sizes = [1, 1, 16, 32], strides = [1, 1, 1, 1]} : vector<3x3x16x32xbf16> to vector<1x1x16x32xbf16>
    %134 = vector.shape_cast %133 : vector<1x1x16x32xbf16> to vector<16x32xbf16>
    %cst_104 = arith.constant dense<0.000000e+00> : vector<32x32xf32>
    %135 = tpu.matmul %40, %134, %cst_104 {dimension_numbers = #tpu.dot_dimension_numbers<[1], [0], [0], [1], [0, 0, 1, 1], [], []>} : vector<32x16xbf16>, vector<16x32xbf16>, vector<32x32xf32> -> vector<32x32xf32>
    %136 = arith.addf %132, %135 : vector<32x32xf32>
    %137 = vector.extract_strided_slice %6 {offsets = [2, 2, 0, 0], sizes = [1, 1, 16, 32], strides = [1, 1, 1, 1]} : vector<3x3x16x32xbf16> to vector<1x1x16x32xbf16>
    %138 = vector.shape_cast %137 : vector<1x1x16x32xbf16> to vector<16x32xbf16>
    %cst_105 = arith.constant dense<0.000000e+00> : vector<32x32xf32>
    %139 = tpu.matmul %43, %138, %cst_105 {dimension_numbers = #tpu.dot_dimension_numbers<[1], [0], [0], [1], [0, 0, 1, 1], [], []>} : vector<32x16xbf16>, vector<16x32xbf16>, vector<32x32xf32> -> vector<32x32xf32>
    %140 = arith.addf %136, %139 : vector<32x32xf32>
    %141 = vector.broadcast %7 : vector<1x32xf32> to vector<32x32xf32>
    %142 = arith.addf %140, %141 : vector<32x32xf32>
    %cst_106 = arith.constant dense<0.000000e+00> : vector<32xf32>
    %143 = vector.multi_reduction <add>, %142, %cst_106 [0] : vector<32x32xf32> to vector<32xf32>
    %144 = vector.shape_cast %143 : vector<32xf32> to vector<1x32xf32>
    %145 = arith.addf %99, %144 : vector<1x32xf32>
    %146 = arith.mulf %142, %142 : vector<32x32xf32>
    %cst_107 = arith.constant dense<0.000000e+00> : vector<32xf32>
    %147 = vector.multi_reduction <add>, %146, %cst_107 [0] : vector<32x32xf32> to vector<32xf32>
    %148 = vector.shape_cast %147 : vector<32xf32> to vector<1x32xf32>
    %149 = arith.addf %103, %148 : vector<1x32xf32>
    %150 = arith.maximumf %96, %142 : vector<32x32xf32>
    %151 = arith.minimumf %96, %142 : vector<32x32xf32>
    %cst_108 = arith.constant 0.000000e+00 : f32
    %152 = vector.broadcast %cst_108 : f32 to vector<32x32xf32>
    %153 = vector.extract_strided_slice %6 {offsets = [0, 0, 0, 0], sizes = [1, 1, 16, 32], strides = [1, 1, 1, 1]} : vector<3x3x16x32xbf16> to vector<1x1x16x32xbf16>
    %154 = vector.shape_cast %153 : vector<1x1x16x32xbf16> to vector<16x32xbf16>
    %cst_109 = arith.constant dense<0.000000e+00> : vector<32x32xf32>
    %155 = tpu.matmul %22, %154, %cst_109 {dimension_numbers = #tpu.dot_dimension_numbers<[1], [0], [0], [1], [0, 0, 1, 1], [], []>} : vector<32x16xbf16>, vector<16x32xbf16>, vector<32x32xf32> -> vector<32x32xf32>
    %156 = arith.addf %152, %155 : vector<32x32xf32>
    %157 = vector.extract_strided_slice %6 {offsets = [0, 1, 0, 0], sizes = [1, 1, 16, 32], strides = [1, 1, 1, 1]} : vector<3x3x16x32xbf16> to vector<1x1x16x32xbf16>
    %158 = vector.shape_cast %157 : vector<1x1x16x32xbf16> to vector<16x32xbf16>
    %cst_110 = arith.constant dense<0.000000e+00> : vector<32x32xf32>
    %159 = tpu.matmul %25, %158, %cst_110 {dimension_numbers = #tpu.dot_dimension_numbers<[1], [0], [0], [1], [0, 0, 1, 1], [], []>} : vector<32x16xbf16>, vector<16x32xbf16>, vector<32x32xf32> -> vector<32x32xf32>
    %160 = arith.addf %156, %159 : vector<32x32xf32>
    %161 = vector.extract_strided_slice %6 {offsets = [0, 2, 0, 0], sizes = [1, 1, 16, 32], strides = [1, 1, 1, 1]} : vector<3x3x16x32xbf16> to vector<1x1x16x32xbf16>
    %162 = vector.shape_cast %161 : vector<1x1x16x32xbf16> to vector<16x32xbf16>
    %cst_111 = arith.constant dense<0.000000e+00> : vector<32x32xf32>
    %163 = tpu.matmul %28, %162, %cst_111 {dimension_numbers = #tpu.dot_dimension_numbers<[1], [0], [0], [1], [0, 0, 1, 1], [], []>} : vector<32x16xbf16>, vector<16x32xbf16>, vector<32x32xf32> -> vector<32x32xf32>
    %164 = arith.addf %160, %163 : vector<32x32xf32>
    %165 = vector.extract_strided_slice %6 {offsets = [1, 0, 0, 0], sizes = [1, 1, 16, 32], strides = [1, 1, 1, 1]} : vector<3x3x16x32xbf16> to vector<1x1x16x32xbf16>
    %166 = vector.shape_cast %165 : vector<1x1x16x32xbf16> to vector<16x32xbf16>
    %cst_112 = arith.constant dense<0.000000e+00> : vector<32x32xf32>
    %167 = tpu.matmul %34, %166, %cst_112 {dimension_numbers = #tpu.dot_dimension_numbers<[1], [0], [0], [1], [0, 0, 1, 1], [], []>} : vector<32x16xbf16>, vector<16x32xbf16>, vector<32x32xf32> -> vector<32x32xf32>
    %168 = arith.addf %164, %167 : vector<32x32xf32>
    %169 = vector.extract_strided_slice %6 {offsets = [1, 1, 0, 0], sizes = [1, 1, 16, 32], strides = [1, 1, 1, 1]} : vector<3x3x16x32xbf16> to vector<1x1x16x32xbf16>
    %170 = vector.shape_cast %169 : vector<1x1x16x32xbf16> to vector<16x32xbf16>
    %cst_113 = arith.constant dense<0.000000e+00> : vector<32x32xf32>
    %171 = tpu.matmul %37, %170, %cst_113 {dimension_numbers = #tpu.dot_dimension_numbers<[1], [0], [0], [1], [0, 0, 1, 1], [], []>} : vector<32x16xbf16>, vector<16x32xbf16>, vector<32x32xf32> -> vector<32x32xf32>
    %172 = arith.addf %168, %171 : vector<32x32xf32>
    %173 = vector.extract_strided_slice %6 {offsets = [1, 2, 0, 0], sizes = [1, 1, 16, 32], strides = [1, 1, 1, 1]} : vector<3x3x16x32xbf16> to vector<1x1x16x32xbf16>
    %174 = vector.shape_cast %173 : vector<1x1x16x32xbf16> to vector<16x32xbf16>
    %cst_114 = arith.constant dense<0.000000e+00> : vector<32x32xf32>
    %175 = tpu.matmul %40, %174, %cst_114 {dimension_numbers = #tpu.dot_dimension_numbers<[1], [0], [0], [1], [0, 0, 1, 1], [], []>} : vector<32x16xbf16>, vector<16x32xbf16>, vector<32x32xf32> -> vector<32x32xf32>
    %176 = arith.addf %172, %175 : vector<32x32xf32>
    %177 = vector.extract_strided_slice %6 {offsets = [2, 0, 0, 0], sizes = [1, 1, 16, 32], strides = [1, 1, 1, 1]} : vector<3x3x16x32xbf16> to vector<1x1x16x32xbf16>
    %178 = vector.shape_cast %177 : vector<1x1x16x32xbf16> to vector<16x32xbf16>
    %cst_115 = arith.constant dense<0.000000e+00> : vector<32x32xf32>
    %179 = tpu.matmul %46, %178, %cst_115 {dimension_numbers = #tpu.dot_dimension_numbers<[1], [0], [0], [1], [0, 0, 1, 1], [], []>} : vector<32x16xbf16>, vector<16x32xbf16>, vector<32x32xf32> -> vector<32x32xf32>
    %180 = arith.addf %176, %179 : vector<32x32xf32>
    %181 = vector.extract_strided_slice %6 {offsets = [2, 1, 0, 0], sizes = [1, 1, 16, 32], strides = [1, 1, 1, 1]} : vector<3x3x16x32xbf16> to vector<1x1x16x32xbf16>
    %182 = vector.shape_cast %181 : vector<1x1x16x32xbf16> to vector<16x32xbf16>
    %cst_116 = arith.constant dense<0.000000e+00> : vector<32x32xf32>
    %183 = tpu.matmul %49, %182, %cst_116 {dimension_numbers = #tpu.dot_dimension_numbers<[1], [0], [0], [1], [0, 0, 1, 1], [], []>} : vector<32x16xbf16>, vector<16x32xbf16>, vector<32x32xf32> -> vector<32x32xf32>
    %184 = arith.addf %180, %183 : vector<32x32xf32>
    %185 = vector.extract_strided_slice %6 {offsets = [2, 2, 0, 0], sizes = [1, 1, 16, 32], strides = [1, 1, 1, 1]} : vector<3x3x16x32xbf16> to vector<1x1x16x32xbf16>
    %186 = vector.shape_cast %185 : vector<1x1x16x32xbf16> to vector<16x32xbf16>
    %cst_117 = arith.constant dense<0.000000e+00> : vector<32x32xf32>
    %187 = tpu.matmul %52, %186, %cst_117 {dimension_numbers = #tpu.dot_dimension_numbers<[1], [0], [0], [1], [0, 0, 1, 1], [], []>} : vector<32x16xbf16>, vector<16x32xbf16>, vector<32x32xf32> -> vector<32x32xf32>
    %188 = arith.addf %184, %187 : vector<32x32xf32>
    %189 = vector.broadcast %7 : vector<1x32xf32> to vector<32x32xf32>
    %190 = arith.addf %188, %189 : vector<32x32xf32>
    %cst_118 = arith.constant dense<0.000000e+00> : vector<32xf32>
    %191 = vector.multi_reduction <add>, %190, %cst_118 [0] : vector<32x32xf32> to vector<32xf32>
    %192 = vector.shape_cast %191 : vector<32xf32> to vector<1x32xf32>
    %193 = arith.addf %145, %192 : vector<1x32xf32>
    %194 = arith.mulf %190, %190 : vector<32x32xf32>
    %cst_119 = arith.constant dense<0.000000e+00> : vector<32xf32>
    %195 = vector.multi_reduction <add>, %194, %cst_119 [0] : vector<32x32xf32> to vector<32xf32>
    %196 = vector.shape_cast %195 : vector<32xf32> to vector<1x32xf32>
    %197 = arith.addf %149, %196 : vector<1x32xf32>
    %198 = arith.maximumf %150, %190 : vector<32x32xf32>
    %199 = arith.minimumf %151, %190 : vector<32x32xf32>
    %cst_120 = arith.constant 0.000000e+00 : f32
    %200 = vector.broadcast %cst_120 : f32 to vector<32x32xf32>
    %201 = vector.extract_strided_slice %6 {offsets = [0, 0, 0, 0], sizes = [1, 1, 16, 32], strides = [1, 1, 1, 1]} : vector<3x3x16x32xbf16> to vector<1x1x16x32xbf16>
    %202 = vector.shape_cast %201 : vector<1x1x16x32xbf16> to vector<16x32xbf16>
    %cst_121 = arith.constant dense<0.000000e+00> : vector<32x32xf32>
    %203 = tpu.matmul %25, %202, %cst_121 {dimension_numbers = #tpu.dot_dimension_numbers<[1], [0], [0], [1], [0, 0, 1, 1], [], []>} : vector<32x16xbf16>, vector<16x32xbf16>, vector<32x32xf32> -> vector<32x32xf32>
    %204 = arith.addf %200, %203 : vector<32x32xf32>
    %205 = vector.extract_strided_slice %6 {offsets = [0, 1, 0, 0], sizes = [1, 1, 16, 32], strides = [1, 1, 1, 1]} : vector<3x3x16x32xbf16> to vector<1x1x16x32xbf16>
    %206 = vector.shape_cast %205 : vector<1x1x16x32xbf16> to vector<16x32xbf16>
    %cst_122 = arith.constant dense<0.000000e+00> : vector<32x32xf32>
    %207 = tpu.matmul %28, %206, %cst_122 {dimension_numbers = #tpu.dot_dimension_numbers<[1], [0], [0], [1], [0, 0, 1, 1], [], []>} : vector<32x16xbf16>, vector<16x32xbf16>, vector<32x32xf32> -> vector<32x32xf32>
    %208 = arith.addf %204, %207 : vector<32x32xf32>
    %209 = vector.extract_strided_slice %6 {offsets = [0, 2, 0, 0], sizes = [1, 1, 16, 32], strides = [1, 1, 1, 1]} : vector<3x3x16x32xbf16> to vector<1x1x16x32xbf16>
    %210 = vector.shape_cast %209 : vector<1x1x16x32xbf16> to vector<16x32xbf16>
    %cst_123 = arith.constant dense<0.000000e+00> : vector<32x32xf32>
    %211 = tpu.matmul %31, %210, %cst_123 {dimension_numbers = #tpu.dot_dimension_numbers<[1], [0], [0], [1], [0, 0, 1, 1], [], []>} : vector<32x16xbf16>, vector<16x32xbf16>, vector<32x32xf32> -> vector<32x32xf32>
    %212 = arith.addf %208, %211 : vector<32x32xf32>
    %213 = vector.extract_strided_slice %6 {offsets = [1, 0, 0, 0], sizes = [1, 1, 16, 32], strides = [1, 1, 1, 1]} : vector<3x3x16x32xbf16> to vector<1x1x16x32xbf16>
    %214 = vector.shape_cast %213 : vector<1x1x16x32xbf16> to vector<16x32xbf16>
    %cst_124 = arith.constant dense<0.000000e+00> : vector<32x32xf32>
    %215 = tpu.matmul %37, %214, %cst_124 {dimension_numbers = #tpu.dot_dimension_numbers<[1], [0], [0], [1], [0, 0, 1, 1], [], []>} : vector<32x16xbf16>, vector<16x32xbf16>, vector<32x32xf32> -> vector<32x32xf32>
    %216 = arith.addf %212, %215 : vector<32x32xf32>
    %217 = vector.extract_strided_slice %6 {offsets = [1, 1, 0, 0], sizes = [1, 1, 16, 32], strides = [1, 1, 1, 1]} : vector<3x3x16x32xbf16> to vector<1x1x16x32xbf16>
    %218 = vector.shape_cast %217 : vector<1x1x16x32xbf16> to vector<16x32xbf16>
    %cst_125 = arith.constant dense<0.000000e+00> : vector<32x32xf32>
    %219 = tpu.matmul %40, %218, %cst_125 {dimension_numbers = #tpu.dot_dimension_numbers<[1], [0], [0], [1], [0, 0, 1, 1], [], []>} : vector<32x16xbf16>, vector<16x32xbf16>, vector<32x32xf32> -> vector<32x32xf32>
    %220 = arith.addf %216, %219 : vector<32x32xf32>
    %221 = vector.extract_strided_slice %6 {offsets = [1, 2, 0, 0], sizes = [1, 1, 16, 32], strides = [1, 1, 1, 1]} : vector<3x3x16x32xbf16> to vector<1x1x16x32xbf16>
    %222 = vector.shape_cast %221 : vector<1x1x16x32xbf16> to vector<16x32xbf16>
    %cst_126 = arith.constant dense<0.000000e+00> : vector<32x32xf32>
    %223 = tpu.matmul %43, %222, %cst_126 {dimension_numbers = #tpu.dot_dimension_numbers<[1], [0], [0], [1], [0, 0, 1, 1], [], []>} : vector<32x16xbf16>, vector<16x32xbf16>, vector<32x32xf32> -> vector<32x32xf32>
    %224 = arith.addf %220, %223 : vector<32x32xf32>
    %225 = vector.extract_strided_slice %6 {offsets = [2, 0, 0, 0], sizes = [1, 1, 16, 32], strides = [1, 1, 1, 1]} : vector<3x3x16x32xbf16> to vector<1x1x16x32xbf16>
    %226 = vector.shape_cast %225 : vector<1x1x16x32xbf16> to vector<16x32xbf16>
    %cst_127 = arith.constant dense<0.000000e+00> : vector<32x32xf32>
    %227 = tpu.matmul %49, %226, %cst_127 {dimension_numbers = #tpu.dot_dimension_numbers<[1], [0], [0], [1], [0, 0, 1, 1], [], []>} : vector<32x16xbf16>, vector<16x32xbf16>, vector<32x32xf32> -> vector<32x32xf32>
    %228 = arith.addf %224, %227 : vector<32x32xf32>
    %229 = vector.extract_strided_slice %6 {offsets = [2, 1, 0, 0], sizes = [1, 1, 16, 32], strides = [1, 1, 1, 1]} : vector<3x3x16x32xbf16> to vector<1x1x16x32xbf16>
    %230 = vector.shape_cast %229 : vector<1x1x16x32xbf16> to vector<16x32xbf16>
    %cst_128 = arith.constant dense<0.000000e+00> : vector<32x32xf32>
    %231 = tpu.matmul %52, %230, %cst_128 {dimension_numbers = #tpu.dot_dimension_numbers<[1], [0], [0], [1], [0, 0, 1, 1], [], []>} : vector<32x16xbf16>, vector<16x32xbf16>, vector<32x32xf32> -> vector<32x32xf32>
    %232 = arith.addf %228, %231 : vector<32x32xf32>
    %233 = vector.extract_strided_slice %6 {offsets = [2, 2, 0, 0], sizes = [1, 1, 16, 32], strides = [1, 1, 1, 1]} : vector<3x3x16x32xbf16> to vector<1x1x16x32xbf16>
    %234 = vector.shape_cast %233 : vector<1x1x16x32xbf16> to vector<16x32xbf16>
    %cst_129 = arith.constant dense<0.000000e+00> : vector<32x32xf32>
    %235 = tpu.matmul %55, %234, %cst_129 {dimension_numbers = #tpu.dot_dimension_numbers<[1], [0], [0], [1], [0, 0, 1, 1], [], []>} : vector<32x16xbf16>, vector<16x32xbf16>, vector<32x32xf32> -> vector<32x32xf32>
    %236 = arith.addf %232, %235 : vector<32x32xf32>
    %237 = vector.broadcast %7 : vector<1x32xf32> to vector<32x32xf32>
    %238 = arith.addf %236, %237 : vector<32x32xf32>
    %cst_130 = arith.constant dense<0.000000e+00> : vector<32xf32>
    %239 = vector.multi_reduction <add>, %238, %cst_130 [0] : vector<32x32xf32> to vector<32xf32>
    %240 = vector.shape_cast %239 : vector<32xf32> to vector<1x32xf32>
    %241 = arith.addf %193, %240 : vector<1x32xf32>
    %242 = arith.mulf %238, %238 : vector<32x32xf32>
    %cst_131 = arith.constant dense<0.000000e+00> : vector<32xf32>
    %243 = vector.multi_reduction <add>, %242, %cst_131 [0] : vector<32x32xf32> to vector<32xf32>
    %244 = vector.shape_cast %243 : vector<32xf32> to vector<1x32xf32>
    %245 = arith.addf %197, %244 : vector<1x32xf32>
    %246 = arith.maximumf %198, %238 : vector<32x32xf32>
    %247 = arith.minimumf %199, %238 : vector<32x32xf32>
    %248 = arith.truncf %246 : vector<32x32xf32> to vector<32x32xbf16>
    %c0_132 = arith.constant 0 : index
    %c0_133 = arith.constant 0 : index
    %c0_134 = arith.constant 0 : index
    %249 = vector.load %arg6[%c0_132, %c0_133, %c0_134] : memref<2x32x32xbf16, #tpu.memory_space<vmem>>, vector<1x32x32xbf16>
    %250 = vector.shape_cast %249 : vector<1x32x32xbf16> to vector<32x32xbf16>
    %251 = vector.shape_cast %248 : vector<32x32xbf16> to vector<1x32x32xbf16>
    tpu.vector_store %arg6[%c0_132, %c0_133, %c0_134], %251 {strides = array<i32>} : memref<2x32x32xbf16, #tpu.memory_space<vmem>>, vector<1x32x32xbf16>,
    %252 = arith.truncf %247 : vector<32x32xf32> to vector<32x32xbf16>
    %c1_135 = arith.constant 1 : index
    %c0_136 = arith.constant 0 : index
    %c0_137 = arith.constant 0 : index
    %253 = vector.load %arg6[%c1_135, %c0_136, %c0_137] : memref<2x32x32xbf16, #tpu.memory_space<vmem>>, vector<1x32x32xbf16>
    %254 = vector.shape_cast %253 : vector<1x32x32xbf16> to vector<32x32xbf16>
    %255 = vector.shape_cast %252 : vector<32x32xbf16> to vector<1x32x32xbf16>
    tpu.vector_store %arg6[%c1_135, %c0_136, %c0_137], %255 {strides = array<i32>} : memref<2x32x32xbf16, #tpu.memory_space<vmem>>, vector<1x32x32xbf16>,
    %256 = vector.shape_cast %241 : vector<1x32xf32> to vector<1x32xf32>
    %257 = vector.broadcast %256 : vector<1x32xf32> to vector<8x32xf32>
    %c0_138 = arith.constant 0 : index
    %c0_139 = arith.constant 0 : index
    %c0_140 = arith.constant 0 : index
    %258 = vector.load %arg7[%c0_138, %c0_139, %c0_140] : memref<1x8x32xf32, #tpu.memory_space<vmem>>, vector<1x8x32xf32>
    %259 = vector.shape_cast %258 : vector<1x8x32xf32> to vector<8x32xf32>
    %260 = vector.shape_cast %257 : vector<8x32xf32> to vector<1x8x32xf32>
    tpu.vector_store %arg7[%c0_138, %c0_139, %c0_140], %260 {strides = array<i32>} : memref<1x8x32xf32, #tpu.memory_space<vmem>>, vector<1x8x32xf32>,
    %261 = vector.shape_cast %245 : vector<1x32xf32> to vector<1x32xf32>
    %262 = vector.broadcast %261 : vector<1x32xf32> to vector<8x32xf32>
    %c0_141 = arith.constant 0 : index
    %c0_142 = arith.constant 0 : index
    %c0_143 = arith.constant 0 : index
    %263 = vector.load %arg8[%c0_141, %c0_142, %c0_143] : memref<1x8x32xf32, #tpu.memory_space<vmem>>, vector<1x8x32xf32>
    %264 = vector.shape_cast %263 : vector<1x8x32xf32> to vector<8x32xf32>
    %265 = vector.shape_cast %262 : vector<8x32xf32> to vector<1x8x32xf32>
    tpu.vector_store %arg8[%c0_141, %c0_142, %c0_143], %265 {strides = array<i32>} : memref<1x8x32xf32, #tpu.memory_space<vmem>>, vector<1x8x32xf32>,
    return
  }
  func.func @transform_0(%arg0: i32, %arg1: i32) -> (i32, i32, i32, i32, i32) {
    %c0_i32 = arith.constant 0 : i32
    %c0_i32_0 = arith.constant 0 : i32
    %c0_i32_1 = arith.constant 0 : i32
    %c0_i32_2 = arith.constant 0 : i32
    return %arg0, %c0_i32, %arg1, %c0_i32_0, %c0_i32_1 : i32, i32, i32, i32, i32
  }
  func.func @transform_1(%arg0: i32, %arg1: i32) -> (i32, i32, i32, i32, i32) {
    %c4_i32 = arith.constant 4 : i32
    %0 = arith.muli %arg1, %c4_i32 : i32
    %c4_i32_0 = arith.constant 4 : i32
    %1 = arith.addi %0, %c4_i32_0 : i32
    %c0_i32 = arith.constant 0 : i32
    %c0_i32_1 = arith.constant 0 : i32
    %c0_i32_2 = arith.constant 0 : i32
    %c0_i32_3 = arith.constant 0 : i32
    return %arg0, %c0_i32, %1, %c0_i32_1, %c0_i32_2 : i32, i32, i32, i32, i32
  }
  func.func @transform_2(%arg0: i32, %arg1: i32) -> (i32, i32, i32, i32) {
    %c0_i32 = arith.constant 0 : i32
    %c0_i32_0 = arith.constant 0 : i32
    %c0_i32_1 = arith.constant 0 : i32
    %c0_i32_2 = arith.constant 0 : i32
    %c0_i32_3 = arith.constant 0 : i32
    return %c0_i32, %c0_i32_0, %c0_i32_1, %c0_i32_2 : i32, i32, i32, i32
  }
  func.func @transform_3(%arg0: i32, %arg1: i32) -> (i32, i32) {
    %c0_i32 = arith.constant 0 : i32
    %c0_i32_0 = arith.constant 0 : i32
    %c0_i32_1 = arith.constant 0 : i32
    return %c0_i32, %c0_i32_0 : i32, i32
  }
  func.func @transform_4(%arg0: i32, %arg1: i32) -> (i32, i32, i32) {
    %c2_i32 = arith.constant 2 : i32
    %0 = arith.muli %arg0, %c2_i32 : i32
    %1 = arith.addi %0, %arg1 : i32
    %c0_i32 = arith.constant 0 : i32
    %c0_i32_0 = arith.constant 0 : i32
    %c0_i32_1 = arith.constant 0 : i32
    return %c0_i32, %1, %c0_i32_0 : i32, i32, i32
  }
  func.func @transform_5(%arg0: i32, %arg1: i32) -> (i32, i32, i32) {
    %c2_i32 = arith.constant 2 : i32
    %0 = arith.muli %arg0, %c2_i32 : i32
    %1 = arith.addi %0, %arg1 : i32
    %c0_i32 = arith.constant 0 : i32
    %c0_i32_0 = arith.constant 0 : i32
    %c0_i32_1 = arith.constant 0 : i32
    return %1, %c0_i32, %c0_i32_0 : i32, i32, i32
  }
  func.func @transform_6(%arg0: i32, %arg1: i32) -> (i32, i32, i32) {
    %c2_i32 = arith.constant 2 : i32
    %0 = arith.muli %arg0, %c2_i32 : i32
    %1 = arith.addi %0, %arg1 : i32
    %c0_i32 = arith.constant 0 : i32
    %c0_i32_0 = arith.constant 0 : i32
    %c0_i32_1 = arith.constant 0 : i32
    return %1, %c0_i32, %c0_i32_0 : i32, i32, i32
  }
}

module attributes {stable_mosaic.version = 11 : i64} {
  func.func @_bn_lrelu_outconv_kernel(%arg0: i32, %arg1: memref<2x128x32xbf16, #tpu.memory_space<vmem>>, %arg2: memref<1x32xf32, #tpu.memory_space<vmem>>, %arg3: memref<1x32xf32, #tpu.memory_space<vmem>>, %arg4: memref<32x128xbf16, #tpu.memory_space<vmem>>, %arg5: memref<1x128xf32, #tpu.memory_space<vmem>>, %arg6: memref<128x128xf32, #tpu.memory_space<vmem>>) attributes {dimension_semantics = [#tpu.dimension_semantics<parallel>], iteration_bounds = array<i64: 1>, scalar_prefetch = 0 : i64, scratch_operands = 0 : i64, tpu.core_type = #tpu.core_type<tc>, window_params = [{transform_indices = @transform_0, window_bounds = array<i64: 2, 128, 32>}, {pipeline_mode = #tpu.pipeline_mode<synchronous>, transform_indices = @transform_1, window_bounds = array<i64: 1, 32>}, {pipeline_mode = #tpu.pipeline_mode<synchronous>, transform_indices = @transform_2, window_bounds = array<i64: 1, 32>}, {pipeline_mode = #tpu.pipeline_mode<synchronous>, transform_indices = @transform_3, window_bounds = array<i64: 32, 128>}, {pipeline_mode = #tpu.pipeline_mode<synchronous>, transform_indices = @transform_4, window_bounds = array<i64: 1, 128>}, {transform_indices = @transform_5, window_bounds = array<i64: 128, 128>}]} {
    %c0 = arith.constant 0 : index
    %c0_0 = arith.constant 0 : index
    %0 = vector.load %arg2[%c0, %c0_0] : memref<1x32xf32, #tpu.memory_space<vmem>>, vector<1x32xf32>
    %c0_1 = arith.constant 0 : index
    %c0_2 = arith.constant 0 : index
    %1 = vector.load %arg3[%c0_1, %c0_2] : memref<1x32xf32, #tpu.memory_space<vmem>>, vector<1x32xf32>
    %cst = arith.constant 0.000000e+00 : f32
    %2 = vector.broadcast %cst : f32 to vector<1x32xf32>
    %3 = arith.cmpf oge, %0, %2 : vector<1x32xf32>
    %c0_3 = arith.constant 0 : index
    %c0_4 = arith.constant 0 : index
    %c0_5 = arith.constant 0 : index
    %4 = vector.load %arg1[%c0_3, %c0_4, %c0_5] : memref<2x128x32xbf16, #tpu.memory_space<vmem>>, vector<1x128x32xbf16>
    %5 = vector.shape_cast %4 : vector<1x128x32xbf16> to vector<128x32xbf16>
    %6 = arith.extf %5 : vector<128x32xbf16> to vector<128x32xf32>
    %c1 = arith.constant 1 : index
    %c0_6 = arith.constant 0 : index
    %c0_7 = arith.constant 0 : index
    %7 = vector.load %arg1[%c1, %c0_6, %c0_7] : memref<2x128x32xbf16, #tpu.memory_space<vmem>>, vector<1x128x32xbf16>
    %8 = vector.shape_cast %7 : vector<1x128x32xbf16> to vector<128x32xbf16>
    %9 = arith.extf %8 : vector<128x32xbf16> to vector<128x32xf32>
    %10 = vector.shape_cast %3 : vector<1x32xi1> to vector<1x32xi1>
    %11 = vector.broadcast %10 : vector<1x32xi1> to vector<128x32xi1>
    %12 = arith.select %11, %6, %9 : vector<128x32xi1>, vector<128x32xf32>
    %13 = vector.broadcast %0 : vector<1x32xf32> to vector<128x32xf32>
    %14 = arith.mulf %12, %13 : vector<128x32xf32>
    %15 = vector.broadcast %1 : vector<1x32xf32> to vector<128x32xf32>
    %16 = arith.addf %14, %15 : vector<128x32xf32>
    %cst_8 = arith.constant 0.000000e+00 : f32
    %17 = vector.broadcast %cst_8 : f32 to vector<128x32xf32>
    %18 = arith.cmpf ogt, %16, %17 : vector<128x32xf32>
    %cst_9 = arith.constant 2.000000e-01 : f32
    %19 = vector.broadcast %cst_9 : f32 to vector<128x32xf32>
    %20 = arith.mulf %19, %16 : vector<128x32xf32>
    %21 = arith.select %18, %16, %20 : vector<128x32xi1>, vector<128x32xf32>
    %22 = arith.truncf %21 : vector<128x32xf32> to vector<128x32xbf16>
    %c0_10 = arith.constant 0 : index
    %c0_11 = arith.constant 0 : index
    %23 = vector.load %arg4[%c0_10, %c0_11] : memref<32x128xbf16, #tpu.memory_space<vmem>>, vector<32x128xbf16>
    %cst_12 = arith.constant dense<0.000000e+00> : vector<128x128xf32>
    %24 = tpu.matmul %22, %23, %cst_12 {dimension_numbers = #tpu.dot_dimension_numbers<[1], [0], [0], [1], [0, 0, 1, 1], [], []>} : vector<128x32xbf16>, vector<32x128xbf16>, vector<128x128xf32> -> vector<128x128xf32>
    %c0_13 = arith.constant 0 : index
    %c0_14 = arith.constant 0 : index
    %25 = vector.load %arg5[%c0_13, %c0_14] : memref<1x128xf32, #tpu.memory_space<vmem>>, vector<1x128xf32>
    %26 = vector.broadcast %25 : vector<1x128xf32> to vector<128x128xf32>
    %27 = arith.addf %24, %26 : vector<128x128xf32>
    %c0_15 = arith.constant 0 : index
    %c0_16 = arith.constant 0 : index
    %28 = vector.load %arg6[%c0_15, %c0_16] : memref<128x128xf32, #tpu.memory_space<vmem>>, vector<128x128xf32>
    tpu.vector_store %arg6[%c0_15, %c0_16], %27 {strides = array<i32>} : memref<128x128xf32, #tpu.memory_space<vmem>>, vector<128x128xf32>,
    return
  }
  func.func @transform_0(%arg0: i32) -> (i32, i32, i32) {
    %c0_i32 = arith.constant 0 : i32
    %c0_i32_0 = arith.constant 0 : i32
    %c0_i32_1 = arith.constant 0 : i32
    return %c0_i32, %arg0, %c0_i32_0 : i32, i32, i32
  }
  func.func @transform_1(%arg0: i32) -> (i32, i32) {
    %c0_i32 = arith.constant 0 : i32
    %c0_i32_0 = arith.constant 0 : i32
    %c0_i32_1 = arith.constant 0 : i32
    return %c0_i32, %c0_i32_0 : i32, i32
  }
  func.func @transform_2(%arg0: i32) -> (i32, i32) {
    %c0_i32 = arith.constant 0 : i32
    %c0_i32_0 = arith.constant 0 : i32
    %c0_i32_1 = arith.constant 0 : i32
    return %c0_i32, %c0_i32_0 : i32, i32
  }
  func.func @transform_3(%arg0: i32) -> (i32, i32) {
    %c0_i32 = arith.constant 0 : i32
    %c0_i32_0 = arith.constant 0 : i32
    %c0_i32_1 = arith.constant 0 : i32
    return %c0_i32, %c0_i32_0 : i32, i32
  }
  func.func @transform_4(%arg0: i32) -> (i32, i32) {
    %c0_i32 = arith.constant 0 : i32
    %c0_i32_0 = arith.constant 0 : i32
    %c0_i32_1 = arith.constant 0 : i32
    return %c0_i32, %c0_i32_0 : i32, i32
  }
  func.func @transform_5(%arg0: i32) -> (i32, i32) {
    %c0_i32 = arith.constant 0 : i32
    %c0_i32_0 = arith.constant 0 : i32
    return %arg0, %c0_i32 : i32, i32
  }
}

</mosaic_0001>

<bundles_post_ra>
// kernel: _lambda_.5
= control target key start
LH: loop header
LB: loop body
LE: loop exit
PB: predicated region body
PF: predicated region fallthrough
CT: control target
= control target key end

     0   :  { %s790_s12 = smov 0   ;;  %s792_s13 = smov 0   ;;  %s997_s0 = inlined_call_operand.vmem [shape: bf16[2,512,16], index: 0, kind: input, shape index: {}]   ;;  %s998_s1 = inlined_call_operand.vmem [shape: f32[1,16], index: 1, kind: input, shape index: {}]   ;;  %s999_s2 = inlined_call_operand.vmem [shape: f32[1,16], index: 2, kind: input, shape index: {}]   ;;  %s1000_s3 = inlined_call_operand.vmem [shape: bf16[512,16], index: 3, kind: output, shape index: {}]  }
   0x1   :  { %s794_s14 = smov 0  }
   0x2 LB: > { %s609_s15 = sadd.s32 4294967295, %s767_s14   ;;  %s807_s16 = sadd.s32 1, %s767_s14   ;;  %s767_s14 = sphi %s794_s14, %s1005_s14   ;;  %s763_s13 = sphi %s792_s13, %s1004_s13   ;;  %s759_s12 = sphi %s790_s12, %s1003_s12  }
   0x3   : > { %s17_s17 = ssub.s32 %s767_s14, %s807_s16  ;;  %s20_s18 = sadd.s32 1, %s763_s13 }
   0x4   : > { %p18_p0 = scmp.eq.s32.totalorder %s17_s17, 0  ;;  %p27_p1 = scmp.ne.s32.totalorder %s763_s13, %s759_s12 }
   0x5   : > { %p28_p2 = scmp.eq.s32.totalorder %s767_s14, 0  ;;  %p612_p4 = scmp.ge.s32.totalorder %s767_s14, 4 }
   0x6   : > { %s816_s19 = scalar_select %p18_p0, %s763_s13, %s20_s18  }
   0x7   : > { %p29_p3 = por %p28_p2, %p27_p1  ;;  %127 = sbr.rel (%p612_p4) target bundleno = 32 (0x20), region = 24 }
   0xc   : > { %130 = sbr.rel (!%p29_p3) target bundleno = 32 (0x20), region = 28  ;;  %s132_s20 = sand.u32 (%p29_p3), 1, %s763_s13  }
   0xd   : > { %s638_s21 = sshll.u32 (%p29_p3), %s767_s14, 6  ;;  %s613_s22 = sshll.u32 (%p29_p3), %s132_s20, 7 }
   0xe   : > { %s824_s25 = scalar_lea.vmem (%p29_p3), %s997_s0, %s638_s21  ;;  %s134_s26 = scalar_lea.vmem (%p29_p3), [#allocation2], %s613_s22 }
   0xf   : > { %v154_v0 = vld [vmem:[%s824_s25] sm:$0xff] (%p29_p3)   ;;  %v158_v1 = vld [vmem:[%s824_s25 + $0x8] sm:$0xff] (%p29_p3)   ;;  %v162_v2 = vld [vmem:[%s824_s25 + $0x10] sm:$0xff] (%p29_p3)  }
  0x10   : > { %155 = vst [vmem:[%s134_s26] sm:$0xff] (%p29_p3), %v154_v0   ;;  %v166_v3 = vld [vmem:[%s824_s25 + $0x18] sm:$0xff] (%p29_p3)   ;;  %v170_v4 = vld [vmem:[%s824_s25 + $0x20] sm:$0xff] (%p29_p3)   ;;  %v174_v5 = vld [vmem:[%s824_s25 + $0x28] sm:$0xff] (%p29_p3)  }
  0x11   : > { %159 = vst [vmem:[%s134_s26 + $0x8] sm:$0xff] %v158_v1   ;;  %v178_v6 = vld [vmem:[%s824_s25 + $0x30] sm:$0xff]   ;;  %v182_v7 = vld [vmem:[%s824_s25 + $0x38] sm:$0xff]   ;;  %v186_v8 = vld [vmem:[%s824_s25 + $0x100] sm:$0xff]  }
  0x12   : > { %163 = vst [vmem:[%s134_s26 + $0x10] sm:$0xff] %v162_v2   ;;  %v190_v9 = vld [vmem:[%s824_s25 + $0x108] sm:$0xff]   ;;  %v194_v10 = vld [vmem:[%s824_s25 + $0x110] sm:$0xff]   ;;  %v198_v11 = vld [vmem:[%s824_s25 + $0x118] sm:$0xff]  }
  0x13   : > { %167 = vst [vmem:[%s134_s26 + $0x18] sm:$0xff] %v166_v3   ;;  %v202_v12 = vld [vmem:[%s824_s25 + $0x120] sm:$0xff]   ;;  %v206_v13 = vld [vmem:[%s824_s25 + $0x128] sm:$0xff]   ;;  %v210_v14 = vld [vmem:[%s824_s25 + $0x130] sm:$0xff]  }
  0x14   : > { %171 = vst [vmem:[%s134_s26 + $0x20] sm:$0xff] %v170_v4   ;;  %v214_v15 = vld [vmem:[%s824_s25 + $0x138] sm:$0xff]  }
  0x15   : > { %175 = vst [vmem:[%s134_s26 + $0x28] sm:$0xff] %v174_v5  }
  0x16   : > { %179 = vst [vmem:[%s134_s26 + $0x30] sm:$0xff] %v178_v6  }
  0x17   : > { %183 = vst [vmem:[%s134_s26 + $0x38] sm:$0xff] %v182_v7  }
  0x18   : > { %187 = vst [vmem:[%s134_s26 + $0x40] sm:$0xff] %v186_v8  }
  0x19   : > { %191 = vst [vmem:[%s134_s26 + $0x48] sm:$0xff] %v190_v9  }
  0x1a   : > { %195 = vst [vmem:[%s134_s26 + $0x50] sm:$0xff] %v194_v10  }
  0x1b   : > { %199 = vst [vmem:[%s134_s26 + $0x58] sm:$0xff] %v198_v11  }
  0x1c   : > { %203 = vst [vmem:[%s134_s26 + $0x60] sm:$0xff] %v202_v12  }
  0x1d   : > { %207 = vst [vmem:[%s134_s26 + $0x68] sm:$0xff] %v206_v13  }
  0x1e   : > { %211 = vst [vmem:[%s134_s26 + $0x70] sm:$0xff] %v210_v14  }
  0x1f   : > { %215 = vst [vmem:[%s134_s26 + $0x78] sm:$0xff] %v214_v15  }
  0x20 PF: > { %p616_p5 = scmp.ge.s32.totalorder %s767_s14, 1  ;;  %p304_p6 = scmp.lt.s32.totalorder %s767_s14, 5 }
  0x22   : > { %p305_p7 = pnand %p616_p5, %p304_p6 }
  0x23   : > { %s311_s27 = sand.u32 (!%p305_p7), 1, %s759_s12   ;;  %s618_s28 = sshll.u32 (!%p305_p7), %s609_s15, 4 }
  0x24   : > { %308 = sbr.rel (%p305_p7) target bundleno = 85 (0x55), region = 69  ;;  %s617_s4 = sshll.u32 (!%p305_p7), %s311_s27, 7 }
  0x25   : > { %p336_p8 = scmp.lt.s32.totalorder (!%p305_p7), %s618_s28, 63  ;;  %s855_s7 = scalar_lea.vmem (!%p305_p7), [#allocation2], %s617_s4 }
  0x29   : > { %v341_v16 = vld [vmem:[%s998_s1] sm:$0x1]  ;;  %v769_v17 = vmov 0   ;;  %v703_v23 = vld [vmem:[%s855_s7 + $0x8] sm:$0xff]   ;;  %v704_v29 = vld [vmem:[%s855_s7 + $0x10] sm:$0xff]   ;;  %vm530_vm2 = vcmask 125952  }
  0x2a   : > { %vm343_vm0 = vcmp.ge.f32.partialorder %v341_v16, 0.0  ;;  %v853_v19 = vld [vmem:[%s998_s1] ss:$0 sm:$0xff]  ;;  %v711_v28 = vld [vmem:[%s855_s7 + $0x48] sm:$0xff]   ;;  %v712_v30 = vld [vmem:[%s855_s7 + $0x50] sm:$0xff]   ;;  %v645_v33 = vunpack.c.l.bf16 %v703_v23  ;;  %v646_v35 = vunpack.c.h.bf16 %v703_v23  ;;  %s1007_s28 = smov (!%p336_p8, %s618_s28), 63  ;;  %v649_v39 = vunpack.c.l.bf16 %v704_v29 }
  0x2b   : > { %v409_v18 = vsel %vm343_vm0, 1, %v769_v17  ;;  %v640_v20 = vld [vmem:[%s855_s7] sm:$0xff]   ;;  %v677_v34 = vunpack.c.l.bf16 %v711_v28  ;;  %v678_v38 = vunpack.c.h.bf16 %v711_v28  ;;  %v681_v43 = vunpack.c.l.bf16 %v712_v30  ;;  %v705_v44 = vld [vmem:[%s855_s7 + $0x18] sm:$0xff]   ;;  %s619_s10 = sshll.u32 %s1007_s28, 2  ;;  %v715_v28 = vld [vmem:[%s855_s7 + $0x68] sm:$0xff]  }
  0x2c   : > { %v710_v21 = vld [vmem:[%s855_s7 + $0x40] sm:$0xff]   ;;  %v410_v22 = vperm.slane %v409_v18, 0  ;;  %v641_v24 = vunpack.c.l.bf16 %v640_v20  ;;  %v642_v26 = vunpack.c.h.bf16 %v640_v20  ;;  %v650_v47 = vunpack.c.h.bf16 %v704_v29  ;;  %v713_v57 = vld [vmem:[%s855_s7 + $0x58] sm:$0xff]   ;;  %s903_s14 = scalar_lea.vmem %s1000_s3, %s619_s10  ;;  %v707_v20 = vld [vmem:[%s855_s7 + $0x28] sm:$0xff]  }
  0x2d   : > { %v673_v25 = vunpack.c.l.bf16 %v710_v21  ;;  %v674_v27 = vunpack.c.h.bf16 %v710_v21  ;;  %v870_v32 = vld [vmem:[%s999_s2] ss:$0 sm:$0xff]  ;;  %v682_v48 = vunpack.c.h.bf16 %v712_v30  ;;  %v653_v56 = vunpack.c.l.bf16 %v705_v44 }
  0x2e   : > { %vm863_vm1 = vcmp.eq.s32.totalorder %v410_v22, 1  ;;  %v685_v2 = vunpack.c.l.bf16 %v713_v57  ;;  %v706_v6 = vld [vmem:[%s855_s7 + $0x20] sm:$0xff]   ;;  %v654_v12 = vunpack.c.h.bf16 %v705_v44  ;;  %v686_v13 = vunpack.c.h.bf16 %v713_v57 }
  0x2f   : > { %v412_v36 = vsel %vm863_vm1, %v641_v24, %v673_v25  ;;  %v413_v37 = vsel %vm863_vm1, %v642_v26, %v674_v27  ;;  %v414_v42 = vsel %vm863_vm1, %v645_v33, %v677_v34  ;;  %v415_v46 = vsel %vm863_vm1, %v646_v35, %v678_v38  ;;  %v714_v14 = vld [vmem:[%s855_s7 + $0x60] sm:$0xff]  }
  0x30   : > { %v431_v40 = vmul.f32 %v853_v19, %v412_v36  ;;  %v432_v41 = vmul.f32 %v853_v19, %v413_v37  ;;  %v433_v45 = vmul.f32 %v853_v19, %v414_v42  ;;  %v434_v51 = vmul.f32 %v853_v19, %v415_v46  ;;  %v708_v42 = vld [vmem:[%s855_s7 + $0x30] sm:$0xff]  }
  0x31   : > { %v416_v52 = vsel %vm863_vm1, %v649_v39, %v681_v43  ;;  %v417_v55 = vsel %vm863_vm1, %v650_v47, %v682_v48  ;;  %v418_v11 = vsel %vm863_vm1, %v653_v56, %v685_v2  ;;  %v657_v18 = vunpack.c.l.bf16 %v706_v6 }
  0x32   : > { %v450_v49 = vadd.f32 %v870_v32, %v431_v40  ;;  %v451_v50 = vadd.f32 %v870_v32, %v432_v41  ;;  %v452_v53 = vadd.f32 %v870_v32, %v433_v45  ;;  %v435_v54 = vmul.f32 %v853_v19, %v416_v52 }
  0x33   : > { %v453_v61 = vadd.f32 %v870_v32, %v434_v51  ;;  %v436_v1 = vmul.f32 %v853_v19, %v417_v55  ;;  %v437_v17 = vmul.f32 %v853_v19, %v418_v11  ;;  %v419_v25 = vsel %vm863_vm1, %v654_v12, %v686_v13 }
  0x34   : > { %vm466_vm3 = vcmp.gt.f32.partialorder %v450_v49, 0.0  ;;  %v482_v58 = vmul.f32 0.2, %v450_v49  ;;  %vm467_vm4 = vcmp.gt.f32.partialorder %v451_v50, 0.0  ;;  %v483_v59 = vmul.f32 0.2, %v451_v50 }
  0x35   : > { %vm468_vm5 = vcmp.gt.f32.partialorder %v452_v53, 0.0  ;;  %v484_v60 = vmul.f32 0.2, %v452_v53  ;;  %v454_v62 = vadd.f32 %v870_v32, %v435_v54  ;;  %vm469_vm6 = vcmp.gt.f32.partialorder %v453_v61, 0.0  ;;  %v716_v54 = vld [vmem:[%s855_s7 + $0x70] sm:$0xff]  }
  0x36   : > { %v498_v63 = vsel %vm466_vm3, %v450_v49, %v482_v58  ;;  %v499_v0 = vsel %vm467_vm4, %v451_v50, %v483_v59  ;;  %v485_v8 = vmul.f32 0.2, %v453_v61  ;;  %v455_v10 = vadd.f32 %v870_v32, %v436_v1 }
  0x37   : > { %v514_v3 = vpack.c.bf16 %v498_v63, %v498_v63  ;;  %v515_v4 = vpack.c.bf16 %v499_v0, %v499_v0  ;;  %v500_v5 = vsel %vm468_vm5, %v452_v53, %v484_v60  ;;  %vm470_vm7 = vcmp.gt.f32.partialorder %v454_v62, 0.0 }
  0x38   : > { %v516_v7 = vpack.c.bf16 %v500_v5, %v500_v5  ;;  %v486_v9 = vmul.f32 0.2, %v454_v62  ;;  %v501_v15 = vsel %vm469_vm6, %v453_v61, %v485_v8  ;;  %vm471_vm8 = vcmp.gt.f32.partialorder %v455_v10, 0.0  ;;  %v709_v5 = vld [vmem:[%s855_s7 + $0x38] sm:$0xff]  }
  0x39   : > { %531 = vst.msk [vmem:[%s903_s14] sm:$0xf] %vm530_vm2, %v514_v3  ;;  %v517_v21 = vpack.c.bf16 %v501_v15, %v501_v15  ;;  %v487_v23 = vmul.f32 0.2, %v455_v10  ;;  %v456_v24 = vadd.f32 %v870_v32, %v437_v17  ;;  %v689_v26 = vunpack.c.l.bf16 %v714_v14 }
  0x3a   : > { %532 = vst.msk [vmem:[%s903_s14 + $0x4] sm:$0xf] %vm530_vm2, %v515_v4  ;;  %v502_v16 = vsel %vm470_vm7, %v454_v62, %v486_v9  ;;  %v658_v27 = vunpack.c.h.bf16 %v706_v6  ;;  %v438_v30 = vmul.f32 %v853_v19, %v419_v25  ;;  %v690_v33 = vunpack.c.h.bf16 %v714_v14  ;;  %v717_v6 = vld [vmem:[%s855_s7 + $0x78] sm:$0xff]  }
  0x3b   : > { %533 = vst.msk [vmem:[%s903_s14 + $0x8] sm:$0xf] %vm530_vm2, %v516_v7  ;;  %v518_v22 = vpack.c.bf16 %v502_v16, %v502_v16  ;;  %v503_v29 = vsel %vm471_vm8, %v455_v10, %v487_v23  ;;  %v661_v34 = vunpack.c.l.bf16 %v707_v20  ;;  %vm472_vm9 = vcmp.gt.f32.partialorder %v456_v24, 0.0 }
  0x3c   : > { %534 = vst.msk [vmem:[%s903_s14 + $0xc] sm:$0xf] %vm530_vm2, %v517_v21  ;;  %v519_v35 = vpack.c.bf16 %v503_v29, %v503_v29  ;;  %v488_v36 = vmul.f32 0.2, %v456_v24  ;;  %v420_v37 = vsel %vm863_vm1, %v657_v18, %v689_v26  ;;  %v457_v38 = vadd.f32 %v870_v32, %v438_v30 }
  0x3d   : > { %535 = vst.msk [vmem:[%s903_s14 + $0x10] sm:$0xf] %vm530_vm2, %v518_v22  ;;  %v439_v39 = vmul.f32 %v853_v19, %v420_v37  ;;  %v421_v40 = vsel %vm863_vm1, %v658_v27, %v690_v33  ;;  %v693_v41 = vunpack.c.l.bf16 %v715_v28  ;;  %v662_v45 = vunpack.c.h.bf16 %v707_v20 }
  0x3e   : > { %536 = vst.msk [vmem:[%s903_s14 + $0x14] sm:$0xf] %vm530_vm2, %v519_v35  ;;  %v504_v43 = vsel %vm472_vm9, %v456_v24, %v488_v36  ;;  %v440_v44 = vmul.f32 %v853_v19, %v421_v40  ;;  %v694_v46 = vunpack.c.h.bf16 %v715_v28  ;;  %vm473_vm10 = vcmp.gt.f32.partialorder %v457_v38, 0.0 }
  0x3f   : > { %v520_v47 = vpack.c.bf16 %v504_v43, %v504_v43  ;;  %v489_v48 = vmul.f32 0.2, %v457_v38  ;;  %v458_v49 = vadd.f32 %v870_v32, %v439_v39  ;;  %v422_v51 = vsel %vm863_vm1, %v661_v34, %v693_v41 }
  0x40   : > { %v459_v50 = vadd.f32 %v870_v32, %v440_v44  ;;  %v423_v52 = vsel %vm863_vm1, %v662_v45, %v694_v46  ;;  %v665_v53 = vunpack.c.l.bf16 %v708_v42  ;;  %v441_v57 = vmul.f32 %v853_v19, %v422_v51 }
  0x41   : > { %537 = vst.msk [vmem:[%s903_s14 + $0x18] sm:$0xf] %vm530_vm2, %v520_v47  ;;  %v505_v55 = vsel %vm473_vm10, %v457_v38, %v489_v48  ;;  %vm474_vm11 = vcmp.gt.f32.partialorder %v458_v49, 0.0  ;;  %v490_v56 = vmul.f32 0.2, %v458_v49  ;;  %v442_v60 = vmul.f32 %v853_v19, %v423_v52 }
  0x42   : > { %v521_v58 = vpack.c.bf16 %v505_v55, %v505_v55  ;;  %vm475_vm12 = vcmp.gt.f32.partialorder %v459_v50, 0.0  ;;  %v491_v59 = vmul.f32 0.2, %v459_v50  ;;  %v460_v62 = vadd.f32 %v870_v32, %v441_v57 }
  0x43   : > { %v506_v61 = vsel %vm474_vm11, %v458_v49, %v490_v56  ;;  %v697_v63 = vunpack.c.l.bf16 %v716_v54  ;;  %v666_v0 = vunpack.c.h.bf16 %v708_v42  ;;  %v461_v3 = vadd.f32 %v870_v32, %v442_v60 }
  0x44   : > { %538 = vst.msk [vmem:[%s903_s14 + $0x1c] sm:$0xf] %vm530_vm2, %v521_v58  ;;  %v522_v1 = vpack.c.bf16 %v506_v61, %v506_v61  ;;  %v507_v2 = vsel %vm475_vm12, %v459_v50, %v491_v59  ;;  %v698_v4 = vunpack.c.h.bf16 %v716_v54  ;;  %vm476_vm13 = vcmp.gt.f32.partialorder %v460_v62, 0.0 }
  0x45   : > { %v523_v7 = vpack.c.bf16 %v507_v2, %v507_v2  ;;  %v492_v8 = vmul.f32 0.2, %v460_v62  ;;  %v424_v9 = vsel %vm863_vm1, %v665_v53, %v697_v63  ;;  %vm477_vm14 = vcmp.gt.f32.partialorder %v461_v3, 0.0 }
  0x46   : > { %539 = vst.msk [vmem:[%s903_s14 + $0x20] sm:$0xf] %vm530_vm2, %v522_v1  ;;  %v493_v10 = vmul.f32 0.2, %v461_v3  ;;  %v443_v11 = vmul.f32 %v853_v19, %v424_v9  ;;  %v425_v12 = vsel %vm863_vm1, %v666_v0, %v698_v4  ;;  %v669_v15 = vunpack.c.l.bf16 %v709_v5 }
  0x47   : > { %540 = vst.msk [vmem:[%s903_s14 + $0x24] sm:$0xf] %vm530_vm2, %v523_v7  ;;  %v508_v13 = vsel %vm476_vm13, %v460_v62, %v492_v8  ;;  %v444_v14 = vmul.f32 %v853_v19, %v425_v12  ;;  %v701_v16 = vunpack.c.l.bf16 %v717_v6  ;;  %v670_v21 = vunpack.c.h.bf16 %v709_v5 }
  0x48   : > { %v524_v17 = vpack.c.bf16 %v508_v13, %v508_v13  ;;  %v509_v18 = vsel %vm477_vm14, %v461_v3, %v493_v10  ;;  %v462_v20 = vadd.f32 %v870_v32, %v443_v11  ;;  %v702_v25 = vunpack.c.h.bf16 %v717_v6 }
  0x49   : > { %v525_v22 = vpack.c.bf16 %v509_v18, %v509_v18  ;;  %v463_v23 = vadd.f32 %v870_v32, %v444_v14  ;;  %v426_v24 = vsel %vm863_vm1, %v669_v15, %v701_v16 }
  0x4a   : > { %541 = vst.msk [vmem:[%s903_s14 + $0x28] sm:$0xf] %vm530_vm2, %v524_v17  ;;  %vm478_vm15 = vcmp.gt.f32.partialorder %v462_v20, 0.0  ;;  %v494_v26 = vmul.f32 0.2, %v462_v20  ;;  %v445_v27 = vmul.f32 %v853_v19, %v426_v24  ;;  %v427_v29 = vsel %vm863_vm1, %v670_v21, %v702_v25 }
  0x4b   : > { %542 = vst.msk [vmem:[%s903_s14 + $0x2c] sm:$0xf] %vm530_vm2, %v525_v22  ;;  %vm479_vm0 = vcmp.gt.f32.partialorder %v463_v23, 0.0  ;;  %v495_v28 = vmul.f32 0.2, %v463_v23  ;;  %v446_v34 = vmul.f32 %v853_v19, %v427_v29 }
  0x4c   : > { %v510_v30 = vsel %vm478_vm15, %v462_v20, %v494_v26  ;;  %v464_v33 = vadd.f32 %v870_v32, %v445_v27 }
  0x4d   : > { %v526_v35 = vpack.c.bf16 %v510_v30, %v510_v30  ;;  %v511_v36 = vsel %vm479_vm0, %v463_v23, %v495_v28  ;;  %v465_v39 = vadd.f32 %v870_v32, %v446_v34 }
  0x4e   : > { %v527_v37 = vpack.c.bf16 %v511_v36, %v511_v36  ;;  %vm480_vm3 = vcmp.gt.f32.partialorder %v464_v33, 0.0  ;;  %v496_v38 = vmul.f32 0.2, %v464_v33 }
  0x4f   : > { %543 = vst.msk [vmem:[%s903_s14 + $0x30] sm:$0xf] %vm530_vm2, %v526_v35  ;;  %vm481_vm1 = vcmp.gt.f32.partialorder %v465_v39, 0.0  ;;  %v497_v40 = vmul.f32 0.2, %v465_v39 }
  0x50   : > { %544 = vst.msk [vmem:[%s903_s14 + $0x34] sm:$0xf] %vm530_vm2, %v527_v37  ;;  %v512_v31 = vsel %vm480_vm3, %v464_v33, %v496_v38 }
  0x51   : > { %v528_v41 = vpack.c.bf16 %v512_v31, %v512_v31  ;;  %v513_v42 = vsel %vm481_vm1, %v465_v39, %v497_v40 }
  0x52   : > { %v529_v19 = vpack.c.bf16 %v513_v42, %v513_v42 }
  0x53   : > { %545 = vst.msk [vmem:[%s903_s14 + $0x38] sm:$0xf] %vm530_vm2, %v528_v41 }
  0x54   : > { %546 = vst.msk [vmem:[%s903_s14 + $0x3c] sm:$0xf] %vm530_vm2, %v529_v19 }
  0x55 PF: > { %p10_p9 = scmp.ge.s32.totalorder %s807_s16, 6   ;;  %s1003_s12 = smov %s763_s13 }
  0x56   : > { %s1004_s13 = smov %s816_s19  ;;  %s1005_s14 = smov %s807_s16 }
  0x57   :  { %12 = sbr.rel (!%p10_p9) target bundleno = 2 (0x2), region = 109 }

// kernel: _lambda_.4
= control target key start
LH: loop header
LB: loop body
LE: loop exit
PB: predicated region body
PF: predicated region fallthrough
CT: control target
= control target key end

     0   :  { %s4339_s0 = inlined_call_operand.vmem [shape: bf16[2,4,17,17,5], index: 0, kind: input, shape index: {}, may-alias: {0,1}]   ;;  %s4340_s1 = inlined_call_operand.vmem [shape: bf16[2,4,17,17,5], index: 1, kind: input, shape index: {}, may-alias: {0,1}]   ;;  %s4341_s2 = inlined_call_operand.vmem [shape: bf16[3,3,5,16], index: 2, kind: input, shape index: {}]   ;;  %s4342_s3 = inlined_call_operand.vmem [shape: f32[1,16], index: 3, kind: input, shape index: {}]   ;;  %s4343_s4 = inlined_call_operand.vmem [shape: bf16[2,512,16], index: 4, kind: output, shape index: {0}]   ;;  %s4344_s5 = inlined_call_operand.vmem [shape: f32[16,8,16], index: 5, kind: output, shape index: {1}]   ;;  %s4345_s6 = inlined_call_operand.vmem [shape: f32[16,8,16], index: 6, kind: output, shape index: {2}]  }
   0x1   :  { %4348 = sst [smem:[#allocation11_spill]] %s4339_s0 }
   0x2   :  { %4349 = sst [smem:[#allocation12_spill]] %s4343_s4 }
   0x3   :  { %4350 = sst [smem:[#allocation13_spill]] %s4344_s5 }
   0x4   :  { %4351 = sst [smem:[#allocation14_spill]] %s4345_s6 }
   0x5   :  { %s3370_s21 = smov 0   ;;  %s3372_s22 = smov 0  }
   0x6   :  { %s3374_s23 = smov 0   ;;  %s3376_s24 = smov 0  }
   0x7   :  { %s3378_s25 = smov 0   ;;  %s3380_s26 = smov 0  }
   0x8   :  { %s3382_s27 = smov 0   ;;  %s3384_s28 = smov 0  }
   0x9   :  { %s3386_s29 = smov 0   ;;  %s3388_s30 = smov 0  }
   0xa   :  { %s3390_s7 = smov 0  }
   0xb LB: > { %4352 = sst [smem:[#allocation6_spill]] %s3283_s27  ;;  %s26_s9 = sadd.s32 1, %s3291_s29  ;;  %s3299_s7 = sphi %s3390_s7, %s17_s7   ;;  %s3295_s30 = sphi %s3388_s30, %s4391_s30   ;;  %s3291_s29 = sphi %s3386_s29, %s4390_s29   ;;  %s3287_s28 = sphi %s3384_s28, %s4389_s28   ;;  %s3283_s27 = sphi %s3382_s27, %s4388_s27   ;;  %s3279_s26 = sphi %s3380_s26, %s4387_s26   ;;  %s3275_s25 = sphi %s3378_s25, %s4386_s25   ;;  %s3271_s24 = sphi %s3376_s24, %s4385_s24   ;;  %s3267_s23 = sphi %s3374_s23, %s4384_s23   ;;  %s3263_s22 = sphi %s3372_s22, %s4383_s22   ;;  %s3259_s21 = sphi %s3370_s21, %s4382_s21  }
   0xc   : > { %4353 = sst [smem:[#allocation7_spill]] %s3287_s28  ;;  %p27_p0 = scmp.ge.s32.totalorder %s26_s9, 8 }
   0xd   : > { %s29_s10 = sadd.s32 1, %s3295_s30  ;;  %s38_s11 = sadd.s32 1, %s3279_s26 }
   0xe   : > { %p45_p1 = scmp.ne.s32.totalorder %s3279_s26, %s3275_s25  ;;  %s4393_s9 = smov (%p27_p0, %s26_s9), 0 }
   0xf   : > { %4354 = sst [smem:[#allocation8_spill]] %s4393_s9  ;;  %s4395_s10 = smov (!%p27_p0, %s29_s10), %s3295_s30 }
  0x10   : > { %s34_s12 = ssub.s32 %s3291_s29, %s4393_s9  ;;  %p46_p2 = scmp.eq.s32.totalorder %s3299_s7, 0 }
  0x11   : > { %p31_p3 = scmp.ge.s32.totalorder %s4395_s10, 2  ;;  %s2807_s13 = sshll.u32 %s3291_s29, 1 }
  0x12   : > { %p3440_p4 = por %p46_p2, %p45_p1  ;;  %s62_s15 = sadd.s32 2, %s2807_s13 }
  0x13   : > { %s4397_s10 = smov (%p31_p3, %s4395_s10), 0  ;;  %s2808_s16 = sshll.u32 %s4393_s9, 1 }
  0x14   : > { %4356 = sst [smem:[#allocation9_spill]] %s4397_s10  ;;  %s70_s17 = sadd.s32 1, %s3271_s24 }
  0x15   : > { %s33_s18 = ssub.s32 %s3295_s30, %s4397_s10  ;;  %s64_s19 = sadd.s32 2, %s2808_s16 }
  0x16   : > { %s35_s20 = sor.u32 %s34_s12, %s33_s18  ;;  %s66_s8 = ssub.s32 %s62_s15, %s64_s19 }
  0x17   : > { %p36_p5 = scmp.eq.s32.totalorder %s35_s20, 0  ;;  %s67_s4 = sor.u32 %s66_s8, %s33_s18 }
  0x18   : > { %p68_p6 = scmp.eq.s32.totalorder %s67_s4, 0  ;;  %p77_p7 = scmp.ne.s32.totalorder %s3271_s24, %s3267_s23 }
  0x19   : > { %s3453_s13 = scalar_select %p36_p5, %s3279_s26, %s38_s11  }
  0x1a   : > { %s3456_s6 = scalar_select %p68_p6, %s3271_s24, %s70_s17  }
  0x1b   : > { %4357 = sst [smem:[#allocation10_spill]] %s3453_s13  ;;  %p3460_p8 = por %p77_p7, %p46_p2 }
  0x1c   : > { %s2809_s16 = sshll.u32 %s3295_s30, 3  ;;  %s2810_s28 = sshll.u32 %s4397_s10, 3 }
  0x1d   : > { %s136_s27 = sadd.s32 %s3291_s29, %s2809_s16  ;;  %s138_s12 = sadd.s32 %s2810_s28, %s4393_s9 }
  0x1e   : > { %s142_s15 = sadd.s32 1, %s3263_s22  ;;  %s139_s19 = ssub.s32 %s136_s27, %s138_s12 }
  0x1f   : > { %p152_p9 = scmp.ne.s32.totalorder %s3263_s22, %s3259_s21  ;;  %p140_p10 = scmp.eq.s32.totalorder %s139_s19, 0 }
  0x20   : > { %s4359_s8 = sadd.s32 4294967295, %s3299_s7   ;;  %p2816_p13 = scmp.ge.s32.totalorder %s3299_s7, 16 }
  0x21   : > { %p153_p11 = scmp.eq.s32.totalorder %s4359_s8, 15 }
  0x22   : > { %s3474_s4 = scalar_select %p140_p10, %s3263_s22, %s142_s15  }
  0x23   : > { %p3476_p12 = por %p153_p11, %p152_p9  ;;  %241 = sbr.rel (%p2816_p13) target bundleno = 130 (0x82), region = 24 }
  0x28   : > { %244 = sbr.rel (!%p3440_p4) target bundleno = 113 (0x71), region = 28  ;;  %s246_s27 = sand.u32 (%p3440_p4), 1, %s3279_s26  }
  0x29   : > { %s3014_s28 = smul.u32 (%p3440_p4), 96, %s246_s27  ;;  %s4361_s0 = sld [smem:[#allocation11_spill]] (%p3440_p4) }
  0x2a   : > { %s3015_s17 = smul.u32 (%p3440_p4), 6, %s3291_s29  ;;  %s3333_s10 = smov (%p3440_p4), 6  }
  0x2b   : > { %s3016_s18 = smul.u32 (%p3440_p4), 204, %s3295_s30  ;;  %s3491_s8 = scalar_lea.vmem (%p3440_p4), [#allocation3], %s3014_s28  }
  0x2c   : > { %3174 = sdivrem.u32 (%p3440_p4), %s3333_s10, 6 }
  0x2d   : > { %s258_s20 = sadd.s32 %s3016_s18, %s3015_s17 }
  0x2e   : > { %s2822_s16 = sshll.u32 %s258_s20, 2 }
  0x2f   : > { %s3489_s19 = scalar_lea.vmem %s4361_s0, %s2822_s16  }
  0x35   : > { %s3494_s14 = spop.drf %3174 }
  0x36   : > { %s3176_s9 = spop.drf %3174  ;;  %p2824_p0 = scmp.le.s32.totalorder %s3494_s14, 0 }
  0x37   : > { %s4362_s27 = smov (!%p2824_p0), %s3491_s8  ;;  %s4363_s17 = smov (!%p2824_p0), %s3489_s19 }
  0x38   : > { %2726 = sbr.rel (%p2824_p0) target bundleno = 86 (0x56), region = 264  ;;  %s3503_s18 = smov (!%p2824_p0), 0  }
  0x39   : > { %s3505_s20 = smov (!%p2824_p0), 0  }
  0x3d LB: >> { %v282_v0 = vld [vmem:[%s3307_s17] sm:$0xf]  ;;  %v284_v1 = vld [vmem:[%s3307_s17 + $0x4] sm:$0xf]  ;;  %v286_v2 = vld [vmem:[%s3307_s17 + $0x8] sm:$0xf]  ;;  %s3315_s20 = sphi %s3505_s20, %s276_s20   ;;  %s3311_s18 = sphi %s3503_s18, %s4366_s18   ;;  %s3307_s17 = sphi %s4363_s17, %s4365_s17   ;;  %s3303_s27 = sphi %s4362_s27, %s4364_s27  }
  0x3e   : >> { %283 = vst [vmem:[%s3303_s27] sm:$0xf] %v282_v0  ;;  %v288_v3 = vld [vmem:[%s3307_s17 + $0xc] sm:$0xf]  ;;  %v290_v4 = vld [vmem:[%s3307_s17 + $0x10] sm:$0xf]  ;;  %s330_s9 = sadd.s32 1, %s3311_s18 }
  0x3f   : >> { %285 = vst [vmem:[%s3303_s27 + $0x4] sm:$0xf] %v284_v1  ;;  %v292_v5 = vld [vmem:[%s3307_s17 + $0x14] sm:$0xf]  ;;  %v294_v6 = vld [vmem:[%s3307_s17 + $0xcc] sm:$0xf]  ;;  %p331_p1 = scmp.ge.s32.totalorder %s330_s9, %s3494_s14 }
  0x40   : >> { %287 = vst [vmem:[%s3303_s27 + $0x8] sm:$0xf] %v286_v2  ;;  %v296_v7 = vld [vmem:[%s3307_s17 + $0xd0] sm:$0xf]  ;;  %v298_v8 = vld [vmem:[%s3307_s17 + $0xd4] sm:$0xf] }
  0x41   : >> { %289 = vst [vmem:[%s3303_s27 + $0xc] sm:$0xf] %v288_v3  ;;  %v300_v9 = vld [vmem:[%s3307_s17 + $0xd8] sm:$0xf]  ;;  %v302_v10 = vld [vmem:[%s3307_s17 + $0xdc] sm:$0xf] }
  0x42   : >> { %291 = vst [vmem:[%s3303_s27 + $0x10] sm:$0xf] %v290_v4  ;;  %v304_v11 = vld [vmem:[%s3307_s17 + $0xe0] sm:$0xf]  ;;  %v306_v12 = vld [vmem:[%s3307_s17 + $0x198] sm:$0xf] }
  0x43   : >> { %293 = vst [vmem:[%s3303_s27 + $0x14] sm:$0xf] %v292_v5  ;;  %v308_v13 = vld [vmem:[%s3307_s17 + $0x19c] sm:$0xf]  ;;  %s4399_s9 = smov (%p331_p1, %s330_s9), 0  ;;  %s276_s20 = sadd.s32 1, %s3315_s20  }
  0x44   : >> { %295 = vst [vmem:[%s3303_s27 + $0x18] sm:$0xf] %v294_v6  ;;  %v310_v14 = vld [vmem:[%s3307_s17 + $0x1a0] sm:$0xf]  ;;  %v312_v15 = vld [vmem:[%s3307_s17 + $0x1a4] sm:$0xf]  ;;  %p275_p2 = scmp.ge.s32.totalorder %s276_s20, %s3494_s14  ;;  %s4366_s18 = smov %s4399_s9 }
  0x45   : >> { %297 = vst [vmem:[%s3303_s27 + $0x1c] sm:$0xf] %v296_v7  ;;  %s333_s28 = smul.u32 24, %s4399_s9  ;;  %v314_v16 = vld [vmem:[%s3307_s17 + $0x1a8] sm:$0xf] }
  0x46   : >> { %299 = vst [vmem:[%s3303_s27 + $0x20] sm:$0xf] %v298_v8  ;;  %v316_v17 = vld [vmem:[%s3307_s17 + $0x1ac] sm:$0xf]  ;;  %v318_v18 = vld [vmem:[%s3307_s17 + $0x264] sm:$0xf] }
  0x47   : >> { %301 = vst [vmem:[%s3303_s27 + $0x24] sm:$0xf] %v300_v9  ;;  %s335_s16 = scalar_lea.vmem %s3489_s19, %s333_s28   ;;  %s336_s12 = scalar_lea.vmem %s3491_s8, %s333_s28 [#allocation3]   ;;  %v320_v19 = vld [vmem:[%s3307_s17 + $0x268] sm:$0xf]  ;;  %v322_v20 = vld [vmem:[%s3307_s17 + $0x26c] sm:$0xf] }
  0x48   : >> { %303 = vst [vmem:[%s3303_s27 + $0x28] sm:$0xf] %v302_v10  ;;  %v324_v21 = vld [vmem:[%s3307_s17 + $0x270] sm:$0xf]  ;;  %v326_v22 = vld [vmem:[%s3307_s17 + $0x274] sm:$0xf] }
  0x49   : >> { %305 = vst [vmem:[%s3303_s27 + $0x2c] sm:$0xf] %v304_v11  ;;  %v328_v23 = vld [vmem:[%s3307_s17 + $0x278] sm:$0xf]  ;;  %s4365_s17 = smov %s335_s16 }
  0x4a   : >> { %307 = vst [vmem:[%s3303_s27 + $0x30] sm:$0xf] %v306_v12 }
  0x4b   : >> { %309 = vst [vmem:[%s3303_s27 + $0x34] sm:$0xf] %v308_v13 }
  0x4c   : >> { %311 = vst [vmem:[%s3303_s27 + $0x38] sm:$0xf] %v310_v14 }
  0x4d   : >> { %313 = vst [vmem:[%s3303_s27 + $0x3c] sm:$0xf] %v312_v15 }
  0x4e   : >> { %315 = vst [vmem:[%s3303_s27 + $0x40] sm:$0xf] %v314_v16 }
  0x4f   : >> { %317 = vst [vmem:[%s3303_s27 + $0x44] sm:$0xf] %v316_v17 }
  0x50   : >> { %319 = vst [vmem:[%s3303_s27 + $0x48] sm:$0xf] %v318_v18 }
  0x51   : >> { %321 = vst [vmem:[%s3303_s27 + $0x4c] sm:$0xf] %v320_v19  ;;  %278 = sbr.rel (!%p275_p2) target bundleno = 61 (0x3d), region = 270 }
  0x52   : >> { %323 = vst [vmem:[%s3303_s27 + $0x50] sm:$0xf] %v322_v20 }
  0x53   : >> { %325 = vst [vmem:[%s3303_s27 + $0x54] sm:$0xf] %v324_v21 }
  0x54   : >> { %327 = vst [vmem:[%s3303_s27 + $0x58] sm:$0xf] %v326_v22 }
  0x55   : >> { %329 = vst [vmem:[%s3303_s27 + $0x5c] sm:$0xf] %v328_v23  ;;  %s4364_s27 = smov %s336_s12 }
  0x56 PF: > { %3177 = sdivrem.u32 %s3333_s10, 6 }
  0x57   : > { %s2825_s15 = smul.u32 24, %s3494_s14 }
  0x59   : > { %s3588_s28 = scalar_lea.vmem %s3489_s19, %s2825_s15   ;;  %s3591_s0 = scalar_lea.vmem %s3491_s8, %s2825_s15 [#allocation3]  }
  0x5f   : > { %s3178_s13 = spop.drf %3177 }
  0x60   : > { %s3593_s12 = spop.drf %3177 }
  0x61   : > { %p2827_p3 = scmp.le.s32.totalorder %s3593_s12, 0 }
  0x62   : > { %s4367_s27 = smov (!%p2827_p3), %s3591_s0  ;;  %s4368_s17 = smov (!%p2827_p3), %s3588_s28 }
  0x63   : > { %2740 = sbr.rel (%p2827_p3) target bundleno = 113 (0x71), region = 275  ;;  %s3602_s18 = smov (!%p2827_p3), 0  }
  0x64   : > { %s3329_s10 = smov (!%p2827_p3), 0  }
  0x68 LB: >> { %v353_v24 = vld [vmem:[%s3323_s17] sm:$0xf]  ;;  %v355_v25 = vld [vmem:[%s3323_s17 + $0xcc] sm:$0xf]  ;;  %v357_v26 = vld [vmem:[%s3323_s17 + $0x198] sm:$0xf]  ;;  %s3331_s10 = sphi %s3329_s10, %s347_s10   ;;  %s3327_s18 = sphi %s3602_s18, %s4369_s18   ;;  %s3323_s17 = sphi %s4368_s17, %s366_s17   ;;  %s3319_s27 = sphi %s4367_s27, %s367_s27  }
  0x69   : >> { %354 = vst [vmem:[%s3319_s27] sm:$0xf] %v353_v24  ;;  %v359_v27 = vld [vmem:[%s3323_s17 + $0x264] sm:$0xf]  ;;  %s361_s13 = sadd.s32 1, %s3327_s18  ;;  %s347_s10 = sadd.s32 1, %s3331_s10  }
  0x6a   : >> { %356 = vst [vmem:[%s3319_s27 + $0x18] sm:$0xf] %v355_v25  ;;  %p362_p4 = scmp.ge.s32.totalorder %s361_s13, %s3593_s12  ;;  %p346_p5 = scmp.ge.s32.totalorder %s347_s10, %s3593_s12 }
  0x6b   : >> { %358 = vst [vmem:[%s3319_s27 + $0x30] sm:$0xf] %v357_v26 }
  0x6c   : >> { %360 = vst [vmem:[%s3319_s27 + $0x48] sm:$0xf] %v359_v27  ;;  %s4401_s13 = smov (%p362_p4, %s361_s13), 0  ;;  %349 = sbr.rel (!%p346_p5) target bundleno = 104 (0x68), region = 281 }
  0x6d   : >> { %s2828_s19 = sshll.u32 %s4401_s13, 2  ;;  %s4369_s18 = smov %s4401_s13 }
  0x6e   : >> { %s366_s17 = scalar_lea.vmem %s3588_s28, %s2828_s19   ;;  %s367_s27 = scalar_lea.vmem %s3591_s0, %s2828_s19 [#allocation3]  }
  0x71 PF: > { %513 = sbr.rel (!%p3460_p8) target bundleno = 130 (0x82), region = 90  ;;  %s515_s8 = sand.u32 (%p3460_p8), 1, %s3271_s24  }
  0x72   : > { %s2831_s14 = smul.u32 (%p3460_p8), 6, %s3291_s29 }
  0x73   : > { %s3017_s20 = smul.u32 (%p3460_p8), 48, %s515_s8 }
  0x74   : > { %s2674_s9 = smul.u32 (%p3460_p8), 204, %s3295_s30 }
  0x75   : > { %s517_s0 = scalar_lea.vmem (%p3460_p8), [#allocation4], %s3017_s20 }
  0x76   : > { %s2675_s16 = sadd.s32 %s2831_s14, %s2674_s9 }
  0x77   : > { %s2832_s15 = sshll.u32 %s2675_s16, 2 }
  0x78   : > { %s2677_s13 = scalar_lea.vmem %s4340_s1, %s2832_s15 }
  0x79   : > { %v2833_v28 = vld [vmem:[%s2677_s13 + $0x18] sm:$0xff]   ;;  %v2835_v29 = vld [vmem:[%s2677_s13 + $0x20] sm:$0xf]  ;;  %v2836_v30 = vld [vmem:[%s2677_s13 + $0xe4] sm:$0xff]  }
  0x7a   : > { %542 = vst [vmem:[%s517_s0] sm:$0xff] %v2833_v28   ;;  %v2838_v31 = vld [vmem:[%s2677_s13 + $0xec] sm:$0xf]  ;;  %v2839_v32 = vld [vmem:[%s2677_s13 + $0x1b0] sm:$0xff]   ;;  %v2841_v33 = vld [vmem:[%s2677_s13 + $0x1b8] sm:$0xf] }
  0x7b   : > { %546 = vst [vmem:[%s517_s0 + $0x8] sm:$0xf] %v2835_v29  ;;  %v2842_v34 = vld [vmem:[%s2677_s13 + $0x27c] sm:$0xff]   ;;  %v2844_v35 = vld [vmem:[%s2677_s13 + $0x284] sm:$0xf] }
  0x7c   : > { %548 = vst [vmem:[%s517_s0 + $0xc] sm:$0xff] %v2836_v30  }
  0x7d   : > { %552 = vst [vmem:[%s517_s0 + $0x14] sm:$0xf] %v2838_v31 }
  0x7e   : > { %554 = vst [vmem:[%s517_s0 + $0x18] sm:$0xff] %v2839_v32  }
  0x7f   : > { %558 = vst [vmem:[%s517_s0 + $0x20] sm:$0xf] %v2841_v33 }
  0x80   : > { %560 = vst [vmem:[%s517_s0 + $0x24] sm:$0xff] %v2842_v34  }
  0x81   : > { %564 = vst [vmem:[%s517_s0 + $0x2c] sm:$0xf] %v2844_v35 }
  0x82 PF: > { %p2845_p6 = scmp.ge.s32.totalorder %s3299_s7, 1  ;;  %p611_p7 = scmp.lt.s32.totalorder %s3299_s7, 17 }
  0x84   : > { %p612_p8 = pnand %p2845_p6, %p611_p7 }
  0x85   : > { %s618_s12 = sand.u32 (!%p612_p8), 1, %s3275_s25   ;;  %s650_s20 = sand.u32 (!%p612_p8), 1, %s3259_s21  }
  0x86   : > { %615 = sbr.rel (%p612_p8) target bundleno = 606 (0x25e), region = 131  ;;  %s2846_s9 = sshll.u32 (!%p612_p8), %s650_s20, 5 }
  0x87   : > { %s3018_s10 = smul.u32 (!%p612_p8), 96, %s618_s12  ;;  %s625_s12 = sand.u32 (!%p612_p8), 1, %s3267_s23  }
  0x88   : > { %s3750_s27 = smul.u32 (!%p612_p8), 48, %s625_s12  ;;  %s4245_s21 = scalar_lea.vmem (!%p612_p8), [#allocation5], %s2846_s9 }
  0x89   : > { %s3657_s15 = scalar_lea.vmem (!%p612_p8), [#allocation3], %s3018_s10  ;;  %s4374_s25 = sld [smem:[#allocation7_spill]] (!%p612_p8) }
  0x8a   : > { %s3785_s10 = scalar_lea.vmem (!%p612_p8), [#allocation4], %s3750_s27  ;;  %s4375_s16 = sld [smem:[#allocation6_spill]] (!%p612_p8) }
  0x8b   : > { %v799_v36 = vld [vmem:[%s4341_s2 + $0x4] sm:$0x7]  ;;  %vm1267_vm0 = vcmask 1041408   ;;  %vm1268_vm1 = vcmask 1042432   ;;  %v3334_v37 = vmov 65535   ;;  %vm721_vm2 = vcmask 35840  }
  0x8c   : > { %v1269_v38 = vsel %vm1267_vm0, 4294967295, %v3334_v37  ;;  %v798_v39 = vld [vmem:[%s4341_s2] sm:$0x7]  ;;  %v801_v41 = vld [vmem:[%s4341_s2 + $0xc] sm:$0x7]  ;;  %vm724_vm3 = vcmask 32768  }
  0x8d   : > { %v3634_v40 = vsel %vm1268_vm1, %v1269_v38, 0  ;;  %v800_v42 = vld [vmem:[%s4341_s2 + $0x8] sm:$0x7]  ;;  %v804_v47 = vld [vmem:[%s4341_s2 + $0x18] sm:$0x7]  ;;  %vm1260_vm5 = vcmask 39936  }
  0x8e   : > { %v3643_v43 = vand.u32 %v3634_v40, %v799_v36  ;;  %v3646_v44 = vand.u32 %v3634_v40, %v798_v39  ;;  %v3649_v45 = vand.u32 %v3634_v40, %v801_v41  ;;  %v3652_v46 = vand.u32 %v3634_v40, %v800_v42  ;;  %v703_v48 = vld [vmem:[%s3657_s15 + $0x18] sm:$0xf]  ;;  %v704_v49 = vld [vmem:[%s3657_s15 + $0x1c] sm:$0xf]  ;;  %v697_v50 = vld [vmem:[%s3657_s15] sm:$0xf] }
  0x8f   : > { %v3663_v51 = vand.u32 %v3634_v40, %v804_v47  ;;  %735 = vst.msk [vmem:[#allocation2 + $0x24] sm:$0xf] %vm721_vm2, %v703_v48  ;;  %v698_v52 = vld [vmem:[%s3657_s15 + $0x4] sm:$0xf]  ;;  %v727_v53 = vld [vmem:[#allocation2 + $0x8] sm:$0x1] }
  0x90   : > { %1281 = vmatpush.bf16.msra.mxu0 %v3643_v43  ;;  %1319 = vmatpush.bf16.msra.mxu1 %v3646_v44  ;;  %736 = vst.msk [vmem:[#allocation2 + $0x28] sm:$0xf] %vm721_vm2, %v704_v49  ;;  %v709_v54 = vld [vmem:[%s3657_s15 + $0x30] sm:$0xf]  ;;  %v699_v55 = vld [vmem:[%s3657_s15 + $0x8] sm:$0x1] }
  0x91   : > { %1395 = vmatpush.bf16.msra.mxu3 %v3649_v45  ;;  %1353 = vmatpush.bf16.msra.mxu2 %v3652_v46  ;;  %722 = vst.msk [vmem:[#allocation2] sm:$0xf] %vm721_vm2, %v697_v50  ;;  %v710_v56 = vld [vmem:[%s3657_s15 + $0x34] sm:$0xf]  ;;  %vm725_vm4 = vsmask.f32 256 }
  0x92   : > { %723 = vst.msk [vmem:[#allocation2 + $0x4] sm:$0xf] %vm721_vm2, %v698_v52  ;;  %vm3679_vm6 = vmand %vm724_vm3, %vm725_vm4  ;;  %v802_v58 = vld [vmem:[%s4341_s2 + $0x10] sm:$0x7]  ;;  %vm819_vm7 = vsmask.f32 3328 }
  0x93   : > { %745 = vst.msk [vmem:[#allocation2 + $0x48] sm:$0xf] %vm721_vm2, %v709_v54  ;;  %v728_v59 = vsel %vm3679_vm6, %v699_v55, %v727_v53  ;;  %v3690_v60 = vand.u32 %v3634_v40, %v802_v58  ;;  %v805_v61 = vld [vmem:[%s4341_s2 + $0x1c] sm:$0x7]  ;;  %v803_v62 = vld [vmem:[%s4341_s2 + $0x14] sm:$0x7] }
  0x94   : > { %746 = vst.msk [vmem:[#allocation2 + $0x4c] sm:$0xf] %vm721_vm2, %v710_v56  ;;  %v3700_v63 = vand.u32 %v3634_v40, %v805_v61  ;;  %v3703_v0 = vand.u32 %v3634_v40, %v803_v62  ;;  %v706_v1 = vld [vmem:[%s3657_s15 + $0x24] sm:$0xf]  ;;  %v707_v2 = vld [vmem:[%s3657_s15 + $0x28] sm:$0xf] }
  0x95   : > { %1517 = vmatpush.bf16.msrb.mxu2 %v3663_v51  ;;  %729 = vst [vmem:[#allocation2 + $0x8] sm:$0x1] %v728_v59  ;;  %vm820_vm8 = vsmask.f32 7440  ;;  %1437 = vmatpush.bf16.msrb.mxu0 %v3690_v60  ;;  %v700_v3 = vld [vmem:[%s3657_s15 + $0xc] sm:$0xf] }
  0x96   : > { %1559 = vmatpush.bf16.msrb.mxu3 %v3700_v63  ;;  %1475 = vmatpush.bf16.msrb.mxu1 %v3703_v0  ;;  %740 = vst.msk [vmem:[#allocation2 + $0x30] sm:$0xf] %vm721_vm2, %v706_v1  ;;  %v701_v4 = vld [vmem:[%s3657_s15 + $0x10] sm:$0xf]  ;;  %v712_v5 = vld [vmem:[%s3657_s15 + $0x3c] sm:$0xf]  ;;  %vm3737_vm9 = vmor %vm819_vm7, %vm820_vm8 }
  0x97   : > { %v3714_v6 = vld [vmem:[#allocation2 + $0x24] sm:$0xff]  ;;  %741 = vst.msk [vmem:[#allocation2 + $0x34] sm:$0xf] %vm721_vm2, %v707_v2  ;;  %v713_v7 = vld [vmem:[%s3657_s15 + $0x40] sm:$0xf]  ;;  %vm1620_vm10 = vcmask 130048  }
  0x98   : > { %v702_v8 = vld [vmem:[%s3657_s15 + $0x14] sm:$0x1]  ;;  %v808_v9 = vld [vmem:[#allocation2] sm:$0xf]  ;;  %730 = vst.msk [vmem:[#allocation2 + $0xc] sm:$0xf] %vm721_vm2, %v700_v3  ;;  %2859 = vmatmul.msk.bf16.vlgmr.msra.gmra.mxu0 %vm1260_vm5, %v3714_v6 }
  0x99   : > { %v732_v10 = vld [vmem:[#allocation2 + $0x14] sm:$0x1]  ;;  %v2997_v11 = vld [vmem:[#allocation2] sm:$0xff]  ;;  %v823_v13 = vshrl.u32 %v808_v9, 16  ;;  %v826_v14 = vshll.u32 %v808_v9, 16  ;;  %vm2478_vm11 = vcmask 125952  }
  0x9a   : > { %v809_v12 = vld [vmem:[#allocation2 + $0x4] sm:$0xf]  ;;  %731 = vst.msk [vmem:[#allocation2 + $0x10] sm:$0xf] %vm721_vm2, %v701_v4  ;;  %v733_v17 = vsel %vm3679_vm6, %v702_v8, %v732_v10  ;;  %v715_v18 = vld [vmem:[%s3657_s15 + $0x48] sm:$0xf]  ;;  %2869 = vmatmul.msk.bf16.vlgmr.msra.gmra.mxu1 %vm1260_vm5, %v2997_v11 }
  0x9b   : > { %v832_v15 = vshll.u32 %v809_v12, 16  ;;  %v836_v16 = vshrl.u32 %v809_v12, 16  ;;  %v3727_v19 = vld [vmem:[#allocation2 + $0x48] sm:$0xff]  ;;  %v825_v20 = vrot.slane %v823_v13, 4  ;;  %v828_v21 = vrot.slane %v826_v14, 5  ;;  %1660 = vmatpush.bf16.msra.mxu1 %v3643_v43  ;;  %s4376_s28 = sld [smem:[#allocation13_spill]] }
  0x9c   : > { %750 = vst.msk [vmem:[#allocation2 + $0x54] sm:$0xf] %vm721_vm2, %v712_v5  ;;  %v817_v22 = vld [vmem:[#allocation2 + $0x8] sm:$0x1]  ;;  %2881 = vmatmul.msk.bf16.vlgmr.msra.gmra.mxu3 %vm1260_vm5, %v3727_v19  ;;  %v716_v27 = vld [vmem:[%s3657_s15 + $0x4c] sm:$0xf] }
  0x9d   : > { %v834_v23 = vrot.slane %v832_v15, 5  ;;  %v838_v24 = vrot.slane %v836_v16, 4  ;;  %751 = vst.msk [vmem:[#allocation2 + $0x58] sm:$0xf] %vm721_vm2, %v713_v7  ;;  %v829_v25 = vor.u32 %v828_v21, %v825_v20  ;;  %v842_v26 = vshll.u32 %v817_v22, 16  ;;  %1710 = vmatpush.bf16.msra.mxu3 %v3652_v46  ;;  %s4377_s17 = sld [smem:[#allocation14_spill]] }
  0x9e   : > { %734 = vst [vmem:[#allocation2 + $0x14] sm:$0x1] %v733_v17  ;;  %v711_v30 = vld [vmem:[%s3657_s15 + $0x38] sm:$0x1]  ;;  %v747_v37 = vld [vmem:[#allocation2 + $0x50] sm:$0x1] }
  0x9f   : > { %v839_v29 = vor.u32 %v838_v24, %v834_v23  ;;  %755 = vst.msk [vmem:[#allocation2 + $0x6c] sm:$0xf] %vm721_vm2, %v715_v18  ;;  %v830_v31 = vrot.slane %v829_v25, 4  ;;  %v844_v32 = vrot.slane %v842_v26, 5  ;;  %v810_v33 = vld [vmem:[#allocation2 + $0xc] sm:$0xf]  ;;  %v748_v41 = vsel %vm3679_vm6, %v711_v30, %v747_v37 }
  0xa0   : > { %756 = vst.msk [vmem:[#allocation2 + $0x70] sm:$0xf] %vm721_vm2, %v716_v27  ;;  %v847_v35 = vshrl.u32 %v810_v33, 16  ;;  %v850_v36 = vshll.u32 %v810_v33, 16  ;;  %v921_v42 = vld [vmem:[#allocation2 + $0x48] sm:$0xf] }
  0xa1   : > { %v840_v34 = vrot.slane %v839_v29, 4  ;;  %v835_v38 = vsel %vm3737_vm9, %v830_v31, %v834_v23  ;;  %v811_v39 = vld [vmem:[#allocation2 + $0x10] sm:$0xf]  ;;  %749 = vst [vmem:[#allocation2 + $0x50] sm:$0x1] %v748_v41  ;;  %v933_v56 = vshrl.u32 %v921_v42, 16 }
  0xa2   : > { %v1331_v48 = vunpack.c.l.b16 %v835_v38  ;;  %v849_v49 = vrot.slane %v847_v35, 4  ;;  %v852_v50 = vrot.slane %v850_v36, 5  ;;  %v922_v52 = vld [vmem:[#allocation2 + $0x4c] sm:$0xf]  ;;  %v856_v54 = vshll.u32 %v811_v39, 16  ;;  %v3756_v3 = vld [vmem:[#allocation2 + $0x30] sm:$0xff] }
  0xa3   : > { %v845_v47 = vsel %vm3737_vm9, %v840_v34, %v844_v32  ;;  %v860_v55 = vshrl.u32 %v811_v39, 16  ;;  %v936_v61 = vshll.u32 %v921_v42, 16  ;;  %v942_v62 = vshll.u32 %v922_v52, 16  ;;  %v718_v8 = vld [vmem:[%s3657_s15 + $0x54] sm:$0xf]  ;;  %v2998_v9 = vld [vmem:[#allocation2 + $0xc] sm:$0xff] }
  0xa4   : > { %v1332_v53 = vunpack.c.l.b16 %v845_v47  ;;  %v853_v59 = vor.u32 %v852_v50, %v849_v49  ;;  %v946_v1 = vshrl.u32 %v922_v52, 16  ;;  %v858_v4 = vrot.slane %v856_v54, 5  ;;  %v806_v17 = vld [vmem:[%s4341_s2 + $0x20] sm:$0x7]  ;;  %v719_v18 = vld [vmem:[%s3657_s15 + $0x58] sm:$0xf] }
  0xa5   : > { %v818_v58 = vld [vmem:[#allocation2 + $0x14] sm:$0x1]  ;;  %v862_v5 = vrot.slane %v860_v55, 4  ;;  %v935_v11 = vrot.slane %v933_v56, 4  ;;  %v938_v12 = vrot.slane %v936_v61, 5  ;;  %v944_v13 = vrot.slane %v942_v62, 5 }
  0xa6   : > { %v3754_v2 = vpack.c.b16 %v1332_v53, %v1331_v48  ;;  %v866_v7 = vshll.u32 %v818_v58, 16  ;;  %v854_v10 = vrot.slane %v853_v59, 4  ;;  %v948_v16 = vrot.slane %v946_v1, 4  ;;  %760 = vst.msk [vmem:[#allocation2 + $0x78] sm:$0xf] %vm721_vm2, %v718_v8  ;;  %v3773_v24 = vld [vmem:[#allocation2 + $0x54] sm:$0xff] }
  0xa7   : > { %v863_v14 = vor.u32 %v862_v5, %v858_v4  ;;  %v939_v20 = vor.u32 %v938_v12, %v935_v11  ;;  %v3767_v21 = vand.u32 %v3634_v40, %v806_v17  ;;  %v714_v22 = vld [vmem:[%s3657_s15 + $0x44] sm:$0x1]  ;;  %v752_v23 = vld [vmem:[#allocation2 + $0x5c] sm:$0x1]  ;;  %761 = vst.msk [vmem:[#allocation2 + $0x7c] sm:$0xf] %vm721_vm2, %v719_v18 }
  0xa8   : > { %2871 = vmatmul.msk.bf16.vlgmr.msra.gmra.mxu2 %vm1260_vm5, %v3754_v2  ;;  %v868_v15 = vrot.slane %v866_v7, 5  ;;  %2860 = vmatmul.msk.bf16.gmra.mxu0 %vm1260_vm5, %v3756_v3  ;;  %v930_v26 = vld [vmem:[#allocation2 + $0x50] sm:$0x1]  ;;  %v949_v27 = vor.u32 %v948_v16, %v944_v13  ;;  %v753_v29 = vsel %vm3679_vm6, %v714_v22, %v752_v23  ;;  %v859_v30 = vsel %vm3737_vm9, %v854_v10, %v858_v4  ;;  %v923_v32 = vld [vmem:[#allocation2 + $0x54] sm:$0xf]  ;;  %s4378_s9 = sld [smem:[#allocation12_spill]] (%p3476_p12) }
  0xa9   : > { %1679 = vmatpush.bf16.msra.mxu2 %v3646_v44  ;;  %v864_v25 = vrot.slane %v863_v14, 4  ;;  %v952_v40 = vshll.u32 %v930_v26, 16  ;;  %1597 = vmatpush.bf16.msra.mxu0 %v3767_v21  ;;  %754 = vst [vmem:[#allocation2 + $0x5c] sm:$0x1] %v753_v29  ;;  %v940_v31 = vrot.slane %v939_v20, 4  ;;  %v1333_v39 = vunpack.c.l.b16 %v859_v30  ;;  %v3804_v8 = vld [vmem:[#allocation2 + $0x6c] sm:$0xff] }
  0xaa   : > { %2870 = vmatmul.msk.bf16.gmra.mxu1 %vm1260_vm5, %v2998_v9  ;;  %v924_v33 = vld [vmem:[#allocation2 + $0x58] sm:$0xf]  ;;  %v950_v35 = vrot.slane %v949_v27, 4  ;;  %v768_v37 = vld [vmem:[%s3785_s10 + $0xc] sm:$0xf]  ;;  %v957_v41 = vshrl.u32 %v923_v32, 16 }
  0xab   : > { %v869_v34 = vsel %vm3737_vm9, %v864_v25, %v868_v15  ;;  %v954_v36 = vrot.slane %v952_v40, 5  ;;  %v769_v38 = vld [vmem:[%s3785_s10 + $0x10] sm:$0xf]  ;;  %783 = vst.msk [vmem:[#allocation2 + $0x3c] sm:$0xf] %vm721_vm2, %v768_v37  ;;  %v960_v42 = vshll.u32 %v923_v32, 16  ;;  %v945_v49 = vsel %vm3737_vm9, %v940_v31, %v944_v13 }
  0xac   : > { %2882 = vmatmul.msk.bf16.gmra.mxu3 %vm1260_vm5, %v3773_v24  ;;  %784 = vst.msk [vmem:[#allocation2 + $0x40] sm:$0xf] %vm721_vm2, %v769_v38  ;;  %v765_v47 = vld [vmem:[%s3785_s10] sm:$0xf]  ;;  %v1334_v48 = vunpack.c.l.b16 %v869_v34  ;;  %v966_v50 = vshll.u32 %v924_v33, 16  ;;  %v970_v52 = vshrl.u32 %v924_v33, 16  ;;  %v1453_v55 = vunpack.c.l.b16 %v945_v49 }
  0xad   : > { %v766_v53 = vld [vmem:[%s3785_s10 + $0x4] sm:$0xf]  ;;  %778 = vst.msk [vmem:[#allocation2 + $0x18] sm:$0xf] %vm721_vm2, %v765_v47  ;;  %v955_v54 = vsel %vm3737_vm9, %v950_v35, %v954_v36  ;;  %v959_v56 = vrot.slane %v957_v41, 4  ;;  %v962_v58 = vrot.slane %v960_v42, 5 }
  0xae   : > { %779 = vst.msk [vmem:[#allocation2 + $0x1c] sm:$0xf] %vm721_vm2, %v766_v53  ;;  %v3801_v59 = vpack.c.b16 %v1334_v48, %v1333_v39  ;;  %v1454_v61 = vunpack.c.l.b16 %v955_v54  ;;  %v968_v62 = vrot.slane %v966_v50, 5  ;;  %v972_v1 = vrot.slane %v970_v52, 4  ;;  %v705_v4 = vld [vmem:[%s3657_s15 + $0x20] sm:$0x1] }
  0xaf   : > { %v737_v7 = vld [vmem:[#allocation2 + $0x2c] sm:$0x1]  ;;  %v963_v10 = vor.u32 %v962_v58, %v959_v56  ;;  %v1032_v15 = vld [vmem:[#allocation2 + $0x10] sm:$0xf]  ;;  %v767_v16 = vld [vmem:[%s3785_s10 + $0x8] sm:$0x1] }
  0xb0   : > { %v931_v5 = vld [vmem:[#allocation2 + $0x5c] sm:$0x1]  ;;  %v738_v9 = vsel %vm3679_vm6, %v705_v4, %v737_v7  ;;  %v3810_v11 = vpack.c.b16 %v1454_v61, %v1453_v55  ;;  %v973_v12 = vor.u32 %v972_v1, %v968_v62  ;;  %v1031_v14 = vld [vmem:[#allocation2 + $0xc] sm:$0xf]  ;;  %v3815_v17 = vld [vmem:[#allocation2 + $0x30] sm:$0xff]  ;;  %v1052_v29 = vshll.u32 %v1032_v15, 16 }
  0xb1   : > { %739 = vst [vmem:[#allocation2 + $0x2c] sm:$0x1] %v738_v9  ;;  %v976_v13 = vshll.u32 %v931_v5, 16  ;;  %v780_v18 = vld [vmem:[#allocation2 + $0x20] sm:$0x1]  ;;  %v964_v20 = vrot.slane %v963_v10, 4 }
  0xb2   : > { %v1043_v22 = vshrl.u32 %v1031_v14, 16  ;;  %v1046_v23 = vshll.u32 %v1031_v14, 16  ;;  %v781_v25 = vsel %vm3679_vm6, %v767_v16, %v780_v18  ;;  %v974_v26 = vrot.slane %v973_v12, 4  ;;  %v813_v30 = vld [vmem:[#allocation2 + $0x24] sm:$0xf]  ;;  %v3833_v53 = vld [vmem:[#allocation2 + $0xc] sm:$0xff] }
  0xb3   : > { %v978_v27 = vrot.slane %v976_v13, 5  ;;  %v1056_v40 = vshrl.u32 %v1032_v15, 16  ;;  %782 = vst [vmem:[#allocation2 + $0x20] sm:$0x1] %v781_v25  ;;  %v814_v31 = vld [vmem:[#allocation2 + $0x28] sm:$0xf]  ;;  %v969_v32 = vsel %vm3737_vm9, %v964_v20, %v968_v62 }
  0xb4   : > { %v1040_v33 = vld [vmem:[#allocation2 + $0x14] sm:$0x1]  ;;  %v1045_v34 = vrot.slane %v1043_v22, 4  ;;  %v1048_v35 = vrot.slane %v1046_v23, 5  ;;  %v708_v36 = vld [vmem:[%s3657_s15 + $0x2c] sm:$0x1]  ;;  %v1455_v54 = vunpack.c.l.b16 %v969_v32 }
  0xb5   : > { %v979_v37 = vsel %vm3737_vm9, %v974_v26, %v978_v27  ;;  %v1054_v38 = vrot.slane %v1052_v29, 5  ;;  %v1058_v39 = vrot.slane %v1056_v40, 4  ;;  %v873_v41 = vshrl.u32 %v813_v30, 16  ;;  %v742_v42 = vld [vmem:[#allocation2 + $0x38] sm:$0x1]  ;;  %v3844_v16 = vld [vmem:[#allocation2 + $0x3c] sm:$0xff] }
  0xb6   : > { %v876_v47 = vshll.u32 %v813_v30, 16  ;;  %v882_v48 = vshll.u32 %v814_v31, 16  ;;  %v886_v49 = vshrl.u32 %v814_v31, 16  ;;  %v743_v50 = vsel %vm3679_vm6, %v708_v36, %v742_v42  ;;  %v3835_v5 = vld [vmem:[#allocation2 + $0x78] sm:$0xff] }
  0xb7   : > { %744 = vst [vmem:[#allocation2 + $0x38] sm:$0x1] %v743_v50  ;;  %v1062_v52 = vshll.u32 %v1040_v33, 16  ;;  %v1456_v55 = vunpack.c.l.b16 %v979_v37  ;;  %v1049_v56 = vor.u32 %v1048_v35, %v1045_v34  ;;  %v1059_v58 = vor.u32 %v1058_v39, %v1054_v38  ;;  %v1033_v20 = vld [vmem:[#allocation2 + $0x18] sm:$0xf] }
  0xb8   : > { %2872 = vmatmul.msk.bf16.gmra.mxu2 %vm1260_vm5, %v3801_v59  ;;  %2891 = vmatmul.msk.bf16.vlgmr.msrb.gmra.mxu0 %vm1260_vm5, %v3804_v8  ;;  %v875_v61 = vrot.slane %v873_v41, 4  ;;  %v878_v62 = vrot.slane %v876_v47, 5  ;;  %v884_v1 = vrot.slane %v882_v48, 5  ;;  %v888_v4 = vrot.slane %v886_v49, 4  ;;  %v870_v7 = vld [vmem:[#allocation2 + $0x2c] sm:$0x1] }
  0xb9   : > { %1733 = vmatpush.bf16.msrb.mxu0 %v3649_v45  ;;  %v3839_v9 = vpack.c.b16 %v1456_v55, %v1455_v54  ;;  %v1050_v10 = vrot.slane %v1049_v56, 4  ;;  %v1060_v12 = vrot.slane %v1059_v58, 4  ;;  %v1064_v13 = vrot.slane %v1062_v52, 5  ;;  %v1034_v22 = vld [vmem:[#allocation2 + $0x1c] sm:$0xf] }
  0xba   : > { %2893 = vmatmul.msk.bf16.vlgmr.msrb.gmra.mxu1 %vm1260_vm5, %v3810_v11  ;;  %v879_v14 = vor.u32 %v878_v62, %v875_v61  ;;  %v889_v15 = vor.u32 %v888_v4, %v884_v1  ;;  %v892_v18 = vshll.u32 %v870_v7, 16  ;;  %v1067_v29 = vshrl.u32 %v1033_v20, 16  ;;  %v815_v33 = vld [vmem:[#allocation2 + $0x30] sm:$0xf]  ;;  %v816_v34 = vld [vmem:[#allocation2 + $0x34] sm:$0xf] }
  0xbb   : > { %1756 = vmatpush.bf16.msrb.mxu1 %v3690_v60  ;;  %v1055_v23 = vsel %vm3737_vm9, %v1050_v10, %v1054_v38  ;;  %v1065_v25 = vsel %vm3737_vm9, %v1060_v12, %v1064_v13  ;;  %v1070_v30 = vshll.u32 %v1033_v20, 16  ;;  %v1076_v31 = vshll.u32 %v1034_v22, 16  ;;  %v1041_v48 = vld [vmem:[#allocation2 + $0x20] sm:$0x1]  ;;  %v3858_v55 = vld [vmem:[#allocation2 + $0x18] sm:$0xff] }
  0xbc   : > { %2913 = vmatmul.msk.bf16.vlgmr.msrb.gmra.mxu3 %vm1260_vm5, %v3815_v17  ;;  %v880_v26 = vrot.slane %v879_v14, 4  ;;  %v890_v27 = vrot.slane %v889_v15, 4  ;;  %v894_v40 = vrot.slane %v892_v18, 5  ;;  %v1080_v32 = vshrl.u32 %v1034_v22, 16  ;;  %v717_v62 = vld [vmem:[%s3657_s15 + $0x50] sm:$0x1] }
  0xbd   : > { %1814 = vmatpush.bf16.msrb.mxu3 %v3663_v51  ;;  %v1575_v35 = vunpack.c.l.b16 %v1055_v23  ;;  %v1576_v36 = vunpack.c.l.b16 %v1065_v25  ;;  %v1069_v38 = vrot.slane %v1067_v29, 4  ;;  %v1072_v41 = vrot.slane %v1070_v30, 5 }
  0xbe   : > { %v885_v37 = vsel %vm3737_vm9, %v880_v26, %v884_v1  ;;  %v895_v39 = vsel %vm3737_vm9, %v890_v27, %v894_v40  ;;  %v1078_v42 = vrot.slane %v1076_v31, 5  ;;  %v1082_v47 = vrot.slane %v1080_v32, 4  ;;  %v757_v1 = vld [vmem:[#allocation2 + $0x74] sm:$0x1]  ;;  %v871_v20 = vld [vmem:[#allocation2 + $0x38] sm:$0x1] }
  0xbf   : > { %v897_v49 = vshrl.u32 %v815_v33, 16  ;;  %v900_v50 = vshll.u32 %v815_v33, 16  ;;  %v906_v52 = vshll.u32 %v816_v34, 16  ;;  %v910_v54 = vshrl.u32 %v816_v34, 16 }
  0xc0   : > { %v3860_v56 = vpack.c.b16 %v1576_v36, %v1575_v35  ;;  %v1691_v58 = vunpack.c.l.b16 %v885_v37  ;;  %v1692_v61 = vunpack.c.l.b16 %v895_v39  ;;  %v1073_v4 = vor.u32 %v1072_v41, %v1069_v38  ;;  %v720_v38 = vld [vmem:[%s3657_s15 + $0x5c] sm:$0x1]  ;;  %v762_v39 = vld [vmem:[#allocation2 + $0x80] sm:$0x1]  ;;  %s2847_s15 = sshll.u32 %s4374_s25, 3 }
  0xc1   : > { %v1083_v7 = vor.u32 %v1082_v47, %v1078_v42  ;;  %v1086_v10 = vshll.u32 %v1041_v48, 16  ;;  %v758_v12 = vsel %vm3679_vm6, %v717_v62, %v757_v1  ;;  %v899_v13 = vrot.slane %v897_v49, 4  ;;  %v926_v49 = vld [vmem:[#allocation2 + $0x6c] sm:$0xf]  ;;  %s4274_s18 = sadd.s32 %s4375_s16, %s2847_s15 }
  0xc2   : > { %v902_v14 = vrot.slane %v900_v50, 5  ;;  %v908_v15 = vrot.slane %v906_v52, 5  ;;  %v912_v18 = vrot.slane %v910_v54, 4  ;;  %759 = vst [vmem:[#allocation2 + $0x74] sm:$0x1] %v758_v12  ;;  %v1695_v22 = vpack.c.b16 %v1692_v61, %v1691_v58  ;;  %p682_p9 = scmp.lt.s32.totalorder %s4274_s18, 15 }
  0xc3   : > { %v1074_v23 = vrot.slane %v1073_v4, 4  ;;  %v1084_v25 = vrot.slane %v1083_v7, 4  ;;  %v1088_v26 = vrot.slane %v1086_v10, 5  ;;  %v916_v40 = vshll.u32 %v871_v20, 16  ;;  %v927_v50 = vld [vmem:[#allocation2 + $0x70] sm:$0xf] }
  0xc4   : > { %v903_v27 = vor.u32 %v902_v14, %v899_v13  ;;  %v913_v29 = vor.u32 %v912_v18, %v908_v15  ;;  %v763_v48 = vsel %vm3679_vm6, %v720_v38, %v762_v39  ;;  %v983_v54 = vshrl.u32 %v926_v49, 16  ;;  %s683_s19 = scalar_select %p682_p9, %s4274_s18, 15 }
  0xc5   : > { %v1079_v30 = vsel %vm3737_vm9, %v1074_v23, %v1078_v42  ;;  %v1089_v31 = vsel %vm3737_vm9, %v1084_v25, %v1088_v26  ;;  %v918_v34 = vrot.slane %v916_v40, 5  ;;  %764 = vst [vmem:[#allocation2 + $0x80] sm:$0x1] %v763_v48  ;;  %v986_v58 = vshll.u32 %v926_v49, 16  ;;  %v929_v23 = vld [vmem:[#allocation2 + $0x7c] sm:$0xf] }
  0xc6   : > { %v904_v32 = vrot.slane %v903_v27, 4  ;;  %v914_v33 = vrot.slane %v913_v29, 4  ;;  %v1577_v35 = vunpack.c.l.b16 %v1079_v30  ;;  %v1578_v36 = vunpack.c.l.b16 %v1089_v31  ;;  %v770_v27 = vld [vmem:[%s3785_s10 + $0x14] sm:$0x1]  ;;  %s2848_s13 = sshll.u32 %s683_s19, 3  ;;  %s3013_s8 = sshll.u32 (%p3476_p12), %s4274_s18, 4 }
  0xc7   : > { %v992_v61 = vshll.u32 %v927_v50, 16  ;;  %v996_v62 = vshrl.u32 %v927_v50, 16  ;;  %v985_v1 = vrot.slane %v983_v54, 4  ;;  %v988_v4 = vrot.slane %v986_v58, 5  ;;  %v785_v29 = vld [vmem:[#allocation2 + $0x44] sm:$0x1]  ;;  %s685_s12 = scalar_lea.vmem %s4376_s28, %s2848_s13  ;;  %s2517_s25 = scalar_lea.vmem (%p3476_p12), %s4378_s9, %s3013_s8 }
  0xc8   : > { %2903 = vmatmul.msk.bf16.vlgmr.msrb.gmra.mxu2 %vm1260_vm5, %v3833_v53  ;;  %2892 = vmatmul.msk.bf16.gmra.mxu0 %vm1260_vm5, %v3835_v5  ;;  %v919_v37 = vsel %vm3737_vm9, %v914_v33, %v918_v34  ;;  %v3884_v41 = vpack.c.b16 %v1578_v36, %v1577_v35  ;;  %v1016_v40 = vshll.u32 %v929_v23, 16  ;;  %v1020_v30 = vshrl.u32 %v929_v23, 16  ;;  %v1037_v33 = vld [vmem:[#allocation2 + $0x34] sm:$0xf] }
  0xc9   : > { %1791 = vmatpush.bf16.msrb.mxu2 %v3703_v0  ;;  %v1694_v47 = vunpack.c.l.b16 %v919_v37  ;;  %v998_v7 = vrot.slane %v996_v62, 4  ;;  %v980_v10 = vld [vmem:[#allocation2 + $0x74] sm:$0x1]  ;;  %v989_v12 = vor.u32 %v988_v4, %v985_v1  ;;  %v786_v31 = vsel %vm3679_vm6, %v770_v27, %v785_v29 }
  0xca   : > { %2894 = vmatmul.msk.bf16.gmra.mxu1 %vm1260_vm5, %v3839_v9  ;;  %v1002_v14 = vshll.u32 %v980_v10, 16  ;;  %787 = vst [vmem:[#allocation2 + $0x44] sm:$0x1] %v786_v31  ;;  %v1102_v37 = vshll.u32 %v1037_v33, 16  ;;  %v1106_v38 = vshrl.u32 %v1037_v33, 16  ;;  %v1022_v48 = vrot.slane %v1020_v30, 4 }
  0xcc   : > { %2914 = vmatmul.msk.bf16.gmra.mxu3 %vm1260_vm5, %v3844_v16  ;;  %v1004_v20 = vrot.slane %v1002_v14, 5  ;;  %v981_v49 = vld [vmem:[#allocation2 + $0x80] sm:$0x1]  ;;  %v1104_v58 = vrot.slane %v1102_v37, 5 }
  0xcd   : > { %v1026_v4 = vshll.u32 %v981_v49, 16  ;;  %v1200_v57 = vld [vmem:[#allocation2 + $0x80] sm:$0x1] }
  0xd8   : > { %2904 = vmatmul.msk.bf16.gmra.mxu2 %vm1260_vm5, %v3858_v55  ;;  %2915 = vmatmul.msk.bf16.vlgmr.msra.gmra.mxu0 %vm1260_vm5, %v3860_v56 }
  0xd9   : > { %1837 = vmatpush.bf16.msra.mxu0 %v3700_v63 }
  0xda   : > { %2917 = vmatmul.msk.bf16.vlgmr.msra.gmra.mxu1 %vm1260_vm5, %v3754_v2  ;;  %v909_v2 = vsel %vm3737_vm9, %v904_v32, %v908_v15  ;;  %v990_v15 = vrot.slane %v989_v12, 4  ;;  %v1036_v32 = vld [vmem:[#allocation2 + $0x30] sm:$0xf] }
  0xdb   : > { %1872 = vmatpush.bf16.msra.mxu1 %v3767_v21  ;;  %v1693_v42 = vunpack.c.l.b16 %v909_v2  ;;  %v1093_v36 = vshrl.u32 %v1036_v32, 16  ;;  %v1096_v2 = vshll.u32 %v1036_v32, 16 }
  0xdc   : > { %2921 = vmatmul.msk.bf16.vlgmr.msra.gmra.mxu3 %vm1260_vm5, %v1695_v22  ;;  %v928_v22 = vld [vmem:[#allocation2 + $0x78] sm:$0xf] }
  0xdd   : > { %1958 = vmatpush.bf16.msra.mxu3 %v3646_v44  ;;  %v1696_v52 = vpack.c.b16 %v1694_v47, %v1693_v42  ;;  %v1007_v26 = vshrl.u32 %v928_v22, 16  ;;  %v1018_v47 = vrot.slane %v1016_v40, 5  ;;  %v1098_v54 = vrot.slane %v1096_v2, 5 }
  0xdf   : > { %v1009_v39 = vrot.slane %v1007_v26, 4  ;;  %v1023_v1 = vor.u32 %v1022_v48, %v1018_v47  ;;  %v1039_v26 = vld [vmem:[#allocation2 + $0x40] sm:$0xf] }
  0xe0   : > { %v1126_v32 = vshll.u32 %v1039_v26, 16  ;;  %v1130_v33 = vshrl.u32 %v1039_v26, 16 }
  0xe1   : > { %v1024_v14 = vrot.slane %v1023_v1, 4 }
  0xe8   : > { %2919 = vmatmul.msk.bf16.vlgmr.msra.gmra.mxu2 %vm1260_vm5, %v3714_v6  ;;  %2916 = vmatmul.msk.bf16.gmra.mxu0 %vm1260_vm5, %v3884_v41  ;;  %v994_v6 = vrot.slane %v992_v61, 5  ;;  %v1108_v61 = vrot.slane %v1106_v38, 4  ;;  %v1128_v38 = vrot.slane %v1126_v32, 5 }
  0xe9   : > { %1939 = vmatpush.bf16.msra.mxu2 %v3643_v43 }
  0xea   : > { %2918 = vmatmul.msk.bf16.gmra.mxu1 %vm1260_vm5, %v3801_v59  ;;  %v999_v13 = vor.u32 %v998_v7, %v994_v6  ;;  %v995_v59 = vsel %vm3737_vm9, %v990_v15, %v994_v6  ;;  %v1090_v6 = vld [vmem:[#allocation2 + $0x38] sm:$0x1]  ;;  %v1109_v10 = vor.u32 %v1108_v61, %v1104_v58  ;;  %v1028_v15 = vrot.slane %v1026_v4, 5 }
  0xeb   : > { %v1772_v34 = vunpack.c.l.b16 %v995_v59  ;;  %v1112_v12 = vshll.u32 %v1090_v6, 16 }
  0xec   : > { %2922 = vmatmul.msk.bf16.gmra.mxu3 %vm1260_vm5, %v1696_v52  ;;  %v1000_v18 = vrot.slane %v999_v13, 4  ;;  %v1095_v52 = vrot.slane %v1093_v36, 4  ;;  %v1029_v59 = vsel %vm3737_vm9, %v1024_v14, %v1028_v15 }
  0xed   : > { %v1775_v29 = vunpack.c.l.b16 %v1029_v59 }
  0xee   : > { %v1005_v25 = vsel %vm3737_vm9, %v1000_v18, %v1004_v20  ;;  %v1099_v7 = vor.u32 %v1098_v54, %v1095_v52  ;;  %v1110_v20 = vrot.slane %v1109_v10, 4 }
  0xef   : > { %v1773_v35 = vunpack.c.l.b16 %v1005_v25  ;;  %v1038_v25 = vld [vmem:[#allocation2 + $0x3c] sm:$0xf] }
  0xf0   : > { %v1100_v18 = vrot.slane %v1099_v7, 4  ;;  %v1117_v30 = vshrl.u32 %v1038_v25, 16  ;;  %v1120_v31 = vshll.u32 %v1038_v25, 16 }
  0xf1   : > { %v3914_v50 = vpack.c.b16 %v1773_v35, %v1772_v34 }
  0xf2   : > { %v1119_v2 = vrot.slane %v1117_v30, 4  ;;  %v1122_v37 = vrot.slane %v1120_v31, 5 }
  0xf4   : > { %v1123_v52 = vor.u32 %v1122_v37, %v1119_v2 }
  0xf8   : > { %2920 = vmatmul.msk.bf16.gmra.mxu2 %vm1260_vm5, %v3756_v3  ;;  %2923 = vmatmul.msk.bf16.vlgmr.msrb.gmra.mxu0 %vm1260_vm5, %v3804_v8  ;;  %v1010_v3 = vshll.u32 %v928_v22, 16  ;;  %v1114_v22 = vrot.slane %v1112_v12, 5 }
  0xf9   : > { %1977 = vmatpush.bf16.msrb.mxu0 %v3652_v46 }
  0xfa   : > { %2925 = vmatmul.msk.bf16.vlgmr.msrb.gmra.mxu1 %vm1260_vm5, %v3810_v11  ;;  %v1012_v42 = vrot.slane %v1010_v3, 5  ;;  %v1105_v3 = vsel %vm3737_vm9, %v1100_v18, %v1104_v58  ;;  %v1115_v40 = vsel %vm3737_vm9, %v1110_v20, %v1114_v22 }
  0xfb   : > { %2000 = vmatpush.bf16.msrb.mxu1 %v3649_v45  ;;  %v1853_v35 = vunpack.c.l.b16 %v1105_v3  ;;  %v1854_v36 = vunpack.c.l.b16 %v1115_v40 }
  0xfc   : > { %2929 = vmatmul.msk.bf16.vlgmr.msrb.gmra.mxu3 %vm1260_vm5, %v3815_v17  ;;  %v1013_v62 = vor.u32 %v1012_v42, %v1009_v39  ;;  %v1132_v39 = vrot.slane %v1130_v33, 4  ;;  %v1091_v42 = vld [vmem:[#allocation2 + $0x44] sm:$0x1] }
  0xfd   : > { %2046 = vmatpush.bf16.msrb.mxu3 %v3703_v0  ;;  %v3937_v48 = vpack.c.b16 %v1854_v36, %v1853_v35  ;;  %v1136_v58 = vshll.u32 %v1091_v42, 16 }
  0xfe   : > { %v1014_v13 = vrot.slane %v1013_v62, 4  ;;  %v1133_v54 = vor.u32 %v1132_v39, %v1128_v38  ;;  %v1124_v62 = vrot.slane %v1123_v52, 4 }
  0xff   : > { %v1138_v4 = vrot.slane %v1136_v58, 5  ;;  %v772_v58 = vld [vmem:[%s3785_s10 + $0x1c] sm:$0xf] }
 0x100   : > { %v1019_v23 = vsel %vm3737_vm9, %v1014_v13, %v1018_v47  ;;  %v1134_v1 = vrot.slane %v1133_v54, 4  ;;  %v1129_v12 = vsel %vm3737_vm9, %v1124_v62, %v1128_v38  ;;  %v771_v54 = vld [vmem:[%s3785_s10 + $0x18] sm:$0xf]  ;;  %789 = vst.msk [vmem:[#allocation2 + $0x64] sm:$0xf] %vm721_vm2, %v772_v58 }
 0x101   : > { %v1774_v27 = vunpack.c.l.b16 %v1019_v23  ;;  %v1855_v15 = vunpack.c.l.b16 %v1129_v12  ;;  %788 = vst.msk [vmem:[#allocation2 + $0x60] sm:$0xf] %vm721_vm2, %v771_v54  ;;  %v775_v62 = vld [vmem:[%s3785_s10 + $0x28] sm:$0xf]  ;;  %v1141_v12 = vld [vmem:[#allocation2 + $0x54] sm:$0xf] }
 0x102   : > { %v1139_v13 = vsel %vm3737_vm9, %v1134_v1, %v1138_v4  ;;  %v773_v1 = vld [vmem:[%s3785_s10 + $0x20] sm:$0x1]  ;;  %v790_v4 = vld [vmem:[#allocation2 + $0x68] sm:$0x1]  ;;  %794 = vst.msk [vmem:[#allocation2 + $0x88] sm:$0xf] %vm721_vm2, %v775_v62 }
 0x103   : > { %v3933_v34 = vpack.c.b16 %v1775_v29, %v1774_v27  ;;  %v1856_v18 = vunpack.c.l.b16 %v1139_v13 }
 0x105   : > { %v3954_v22 = vpack.c.b16 %v1856_v18, %v1855_v15  ;;  %v1142_v15 = vld [vmem:[#allocation2 + $0x58] sm:$0xf] }
 0x107   : > { %v1144_v62 = vld [vmem:[#allocation2 + $0x64] sm:$0xf] }
 0x108   : > { %2927 = vmatmul.msk.bf16.vlgmr.msrb.gmra.mxu2 %vm1260_vm5, %v3914_v50  ;;  %2924 = vmatmul.msk.bf16.gmra.mxu0 %vm1260_vm5, %v3835_v5 }
 0x109   : > { %2023 = vmatpush.bf16.msrb.mxu2 %v3690_v60 }
 0x10a   : > { %2926 = vmatmul.msk.bf16.gmra.mxu1 %vm1260_vm5, %v3839_v9 }
 0x10c   : > { %2930 = vmatmul.msk.bf16.gmra.mxu3 %vm1260_vm5, %v3844_v16 }
 0x115   : > { %v1283_v47 = vpop.f32.mrf.mxu0 }
 0x117   : > { %v1321_v49 = vpop.f32.mrf.mxu1 }
 0x118   : > { %2928 = vmatmul.msk.bf16.gmra.mxu2 %vm1260_vm5, %v3933_v34  ;;  %v1322_v61 = vadd.f32 %v1321_v49, %v1283_v47  ;;  %2931 = vmatmul.msk.bf16.vlgmr.msra.gmra.mxu0 %vm1260_vm5, %v3860_v56 }
 0x119   : > { %2085 = vmatpush.bf16.msra.mxu0 %v3663_v51 }
 0x11a   : > { %2933 = vmatmul.msk.bf16.vlgmr.msra.gmra.mxu1 %vm1260_vm5, %v3937_v48 }
 0x11b   : > { %2124 = vmatpush.bf16.msra.mxu1 %v3700_v63 }
 0x11c   : > { %2937 = vmatmul.msk.bf16.vlgmr.msra.gmra.mxu3 %vm1260_vm5, %v3727_v19 }
 0x11d   : > { %v1285_v6 = vpop.f32.mrf.mxu0  ;;  %2226 = vmatpush.bf16.msra.mxu3 %v3643_v43 }
 0x11f   : > { %v1323_v7 = vpop.f32.mrf.mxu1  ;;  %v1397_v10 = vpop.f32.mrf.mxu3 }
 0x120   : > { %v1324_v14 = vadd.f32 %v1323_v7, %v1285_v6 }
 0x125   : > { %v1288_v20 = vpop.f32.mrf.mxu0 }
 0x127   : > { %v1326_v19 = vpop.f32.mrf.mxu1  ;;  %v1399_v23 = vpop.f32.mrf.mxu3 }
 0x128   : > { %2935 = vmatmul.msk.bf16.vlgmr.msra.gmra.mxu2 %vm1260_vm5, %v3804_v8  ;;  %v1327_v43 = vadd.f32 %v1326_v19, %v1288_v20  ;;  %2932 = vmatmul.msk.bf16.gmra.mxu0 %vm1260_vm5, %v3884_v41  ;;  %v1153_v19 = vshrl.u32 %v1141_v12, 16 }
 0x129   : > { %2159 = vmatpush.bf16.msra.mxu2 %v3767_v21 }
 0x12a   : > { %2934 = vmatmul.msk.bf16.gmra.mxu1 %vm1260_vm5, %v3954_v22 }
 0x12b   : > { %v1355_v59 = vpop.f32.mrf.mxu2 }
 0x12c   : > { %v1365_v25 = vadd.f32 %v1355_v59, %v1322_v61  ;;  %2938 = vmatmul.msk.bf16.gmra.mxu3 %vm1260_vm5, %v3773_v24  ;;  %v1162_v59 = vshll.u32 %v1142_v15, 16 }
 0x12d   : > { %v1290_v27 = vpop.f32.mrf.mxu0 }
 0x12e   : > { %v1407_v26 = vadd.f32 %v1397_v10, %v1365_v25  ;;  %v1166_v25 = vshrl.u32 %v1142_v15, 16 }
 0x12f   : > { %v1328_v29 = vpop.f32.mrf.mxu1  ;;  %v1402_v3 = vpop.f32.mrf.mxu3 }
 0x130   : > { %v1329_v40 = vadd.f32 %v1328_v29, %v1290_v27  ;;  %v1155_v29 = vrot.slane %v1153_v19, 4 }
 0x133   : > { %v1357_v30 = vpop.f32.mrf.mxu2 }
 0x134   : > { %v1366_v31 = vadd.f32 %v1357_v30, %v1324_v14  ;;  %v1168_v30 = vrot.slane %v1166_v25, 4 }
 0x135   : > { %v1439_v33 = vpop.f32.mrf.mxu0 }
 0x136   : > { %v1408_v32 = vadd.f32 %v1399_v23, %v1366_v31  ;;  %v1449_v35 = vadd.f32 %v1439_v33, %v1407_v26  ;;  %v1150_v33 = vld [vmem:[#allocation2 + $0x5c] sm:$0x1] }
 0x137   : > { %v1477_v36 = vpop.f32.mrf.mxu1  ;;  %v1404_v2 = vpop.f32.mrf.mxu3 }
 0x138   : > { %2936 = vmatmul.msk.bf16.gmra.mxu2 %vm1260_vm5, %v3835_v5  ;;  %v1487_v37 = vadd.f32 %v1477_v36, %v1449_v35  ;;  %2939 = vmatmul.msk.bf16.vlgmr.msrb.gmra.mxu0 %vm1260_vm5, %v3810_v11 }
 0x139   : > { %2245 = vmatpush.bf16.msrb.mxu0 %v3646_v44 }
 0x13a   : > { %2941 = vmatmul.msk.bf16.vlgmr.msrb.gmra.mxu1 %vm1260_vm5, %v3833_v53 }
 0x13b   : > { %v1360_v24 = vpop.f32.mrf.mxu2  ;;  %2264 = vmatpush.bf16.msrb.mxu1 %v3652_v46  ;;  %v774_v46 = vld [vmem:[%s3785_s10 + $0x24] sm:$0xf] }
 0x13c   : > { %v1367_v38 = vadd.f32 %v1360_v24, %v1327_v43  ;;  %2945 = vmatmul.msk.bf16.vlgmr.msrb.gmra.mxu3 %vm1260_vm5, %v3860_v56  ;;  %793 = vst.msk [vmem:[#allocation2 + $0x84] sm:$0xf] %vm721_vm2, %v774_v46  ;;  %v1156_v43 = vshll.u32 %v1141_v12, 16  ;;  %v1172_v24 = vshll.u32 %v1150_v33, 16  ;;  %v1143_v46 = vld [vmem:[#allocation2 + $0x60] sm:$0xf] }
 0x13d   : > { %v1441_v42 = vpop.f32.mrf.mxu0  ;;  %2310 = vmatpush.bf16.msrb.mxu3 %v3690_v60  ;;  %v791_v60 = vsel %vm3679_vm6, %v773_v1, %v790_v4  ;;  %v1186_v12 = vshll.u32 %v1144_v62, 16 }
 0x13e   : > { %v1409_v39 = vadd.f32 %v1402_v3, %v1367_v38  ;;  %v1450_v47 = vadd.f32 %v1441_v42, %v1408_v32  ;;  %792 = vst [vmem:[#allocation2 + $0x68] sm:$0x1] %v791_v60  ;;  %v1158_v3 = vrot.slane %v1156_v43, 5  ;;  %v3009_v38 = vld [vmem:[#allocation2 + $0x54] sm:$0xff]  ;;  %v1174_v58 = vrot.slane %v1172_v24, 5  ;;  %v3010_v24 = vld [vmem:[#allocation2 + $0x60] sm:$0xff] }
 0x13f   : > { %v1479_v49 = vpop.f32.mrf.mxu1  ;;  %v1561_v52 = vpop.f32.mrf.mxu3 }
 0x140   : > { %v1488_v44 = vadd.f32 %v1479_v49, %v1450_v47  ;;  %v3996_v49 = vld [vmem:[#allocation2 + $0x78] sm:$0xff] }
 0x143   : > { %v1362_v61 = vpop.f32.mrf.mxu2 }
 0x144   : > { %v1368_v53 = vadd.f32 %v1362_v61, %v1329_v40  ;;  %v1164_v40 = vrot.slane %v1162_v59, 5 }
 0x145   : > { %v1444_v7 = vpop.f32.mrf.mxu0 }
 0x146   : > { %v1410_v6 = vadd.f32 %v1404_v2, %v1368_v53  ;;  %v1451_v10 = vadd.f32 %v1444_v7, %v1409_v39  ;;  %v1177_v7 = vshrl.u32 %v1143_v46, 16 }
 0x147   : > { %v1482_v13 = vpop.f32.mrf.mxu1  ;;  %v1563_v14 = vpop.f32.mrf.mxu3 }
 0x148   : > { %2943 = vmatmul.msk.bf16.vlgmr.msrb.gmra.mxu2 %vm1260_vm5, %v3815_v17  ;;  %v1489_v18 = vadd.f32 %v1482_v13, %v1451_v10  ;;  %2940 = vmatmul.msk.bf16.gmra.mxu0 %vm1260_vm5, %v3839_v9  ;;  %v1180_v10 = vshll.u32 %v1143_v46, 16  ;;  %v1190_v13 = vshrl.u32 %v1144_v62, 16  ;;  %v1179_v59 = vrot.slane %v1177_v7, 4 }
 0x149   : > { %2287 = vmatpush.bf16.msrb.mxu2 %v3649_v45 }
 0x14a   : > { %2942 = vmatmul.msk.bf16.gmra.mxu1 %vm1260_vm5, %v3858_v55  ;;  %v1159_v55 = vor.u32 %v1158_v3, %v1155_v29  ;;  %v1182_v25 = vrot.slane %v1180_v10, 5 }
 0x14b   : > { %v1519_v20 = vpop.f32.mrf.mxu2 }
 0x14c   : > { %v1529_v23 = vadd.f32 %v1519_v20, %v1487_v37  ;;  %2946 = vmatmul.msk.bf16.gmra.mxu3 %vm1260_vm5, %v3884_v41  ;;  %v1169_v37 = vor.u32 %v1168_v30, %v1164_v40  ;;  %v1183_v33 = vor.u32 %v1182_v25, %v1179_v59 }
 0x14d   : > { %v1446_v27 = vpop.f32.mrf.mxu0 }
 0x14e   : > { %v1571_v26 = vadd.f32 %v1561_v52, %v1529_v23  ;;  %v1452_v45 = vadd.f32 %v1446_v27, %v1410_v6  ;;  %v1160_v52 = vrot.slane %v1159_v55, 4  ;;  %v1170_v54 = vrot.slane %v1169_v37, 4 }
 0x14f   : > { %v1484_v31 = vpop.f32.mrf.mxu1  ;;  %v1566_v32 = vpop.f32.mrf.mxu3 }
 0x150   : > { %v1490_v35 = vadd.f32 %v1484_v31, %v1452_v45  ;;  %v1165_v6 = vsel %vm3737_vm9, %v1160_v52, %v1164_v40  ;;  %v1175_v60 = vsel %vm3737_vm9, %v1170_v54, %v1174_v58  ;;  %v4037_v52 = vld [vmem:[#allocation2 + $0x84] sm:$0xff]  ;;  %v1184_v58 = vrot.slane %v1183_v33, 4 }
 0x151   : > { %v2141_v20 = vunpack.c.l.b16 %v1175_v60 }
 0x153   : > { %v1521_v36 = vpop.f32.mrf.mxu2 }
 0x154   : > { %v1530_v2 = vadd.f32 %v1521_v36, %v1488_v44  ;;  %v4003_v44 = vld [vmem:[%s4342_s3] ss:$0 sm:$0xff] }
 0x155   : > { %v1599_v42 = vpop.f32.mrf.mxu0 }
 0x156   : > { %v1572_v39 = vadd.f32 %v1563_v14, %v1530_v2  ;;  %v1609_v47 = vadd.f32 %v1599_v42, %v1571_v26  ;;  %v1188_v26 = vrot.slane %v1186_v12, 5 }
 0x157   : > { %v3998_v61 = vpop.f32.mrf.mxu1  ;;  %v1568_v53 = vpop.f32.mrf.mxu3 }
 0x158   : > { %2944 = vmatmul.msk.bf16.gmra.mxu2 %vm1260_vm5, %v3844_v16  ;;  %2955 = vmatmul.msk.bf16.vlgmr.msra.gmra.mxu0 %vm1260_vm5, %v3009_v38  ;;  %v4015_v14 = vadd.f32 %v4003_v44, %v1609_v47 }
 0x159   : > { %2333 = vmatpush.bf16.msra.mxu0 %v3703_v0 }
 0x15a   : > { %2965 = vmatmul.msk.bf16.vlgmr.msra.gmra.mxu1 %vm1260_vm5, %v3996_v49  ;;  %v1635_v27 = vmul.f32 %v4015_v14, %v4015_v14 }
 0x15b   : > { %v1524_v1 = vpop.f32.mrf.mxu2  ;;  %2356 = vmatpush.bf16.msra.mxu1 %v3663_v51  ;;  %v1192_v51 = vrot.slane %v1190_v13, 4 }
 0x15c   : > { %v1531_v4 = vadd.f32 %v1524_v1, %v1489_v18  ;;  %2969 = vmatmul.msk.bf16.vlgmr.msra.gmra.mxu3 %vm1260_vm5, %v3810_v11  ;;  %v2140_v18 = vunpack.c.l.b16 %v1165_v6  ;;  %v1151_v11 = vld [vmem:[#allocation2 + $0x68] sm:$0x1]  ;;  %v1639_v55 = vsel %vm1620_vm10, %v1635_v27, 0.0 }
 0x15d   : > { %v1601_v15 = vpop.f32.mrf.mxu0  ;;  %2414 = vmatpush.bf16.msra.mxu3 %v3767_v21  ;;  %v1621_v21 = vsel %vm1620_vm10, %v4015_v14, 0.0  ;;  %v1193_v36 = vor.u32 %v1192_v51, %v1188_v26  ;;  %v1196_v2 = vshll.u32 %v1151_v11, 16 }
 0x15e   : > { %v1573_v0 = vadd.f32 %v1566_v32, %v1531_v4  ;;  %v1610_v19 = vadd.f32 %v1601_v15, %v1572_v39  ;;  %v4025_v3 = vpack.c.b16 %v2141_v20, %v2140_v18 }
 0x15f   : > { %v1664_v23 = vpop.f32.mrf.mxu1  ;;  %v1712_v43 = vpop.f32.mrf.mxu3  ;;  %v1194_v46 = vrot.slane %v1193_v36, 4  ;;  %v1198_v62 = vrot.slane %v1196_v2, 5 }
 0x160   : > { %v4023_v29 = vadd.f32 %v4003_v44, %v1610_v19 }
 0x161   : > { %v1199_v10 = vsel %vm3737_vm9, %v1194_v46, %v1198_v62 }
 0x162   : > { %v1622_v40 = vsel %vm1620_vm10, %v4023_v29, 0.0  ;;  %v1636_v30 = vmul.f32 %v4023_v29, %v4023_v29  ;;  %v2143_v20 = vunpack.c.l.b16 %v1199_v10 }
 0x163   : > { %v1526_v45 = vpop.f32.mrf.mxu2  ;;  %v1623_v32 = vadd.f32 %v1622_v40, %v1621_v21 }
 0x164   : > { %v1532_v31 = vadd.f32 %v1526_v45, %v1490_v35  ;;  %v1640_v37 = vsel %vm1620_vm10, %v1636_v30, 0.0 }
 0x165   : > { %v1641_v39 = vadd.f32 %v1640_v37, %v1639_v55  ;;  %v1604_v42 = vpop.f32.mrf.mxu0 }
 0x166   : > { %v1574_v38 = vadd.f32 %v1568_v53, %v1532_v31  ;;  %v1611_v47 = vadd.f32 %v1604_v42, %v1573_v0  ;;  %v776_v42 = vld [vmem:[%s3785_s10 + $0x2c] sm:$0x1]  ;;  %s693_s10 = scalar_lea.vmem %s4377_s17, %s2848_s13 }
 0x167   : > { %v1667_v54 = vpop.f32.mrf.mxu1  ;;  %v1714_v35 = vpop.f32.mrf.mxu3 }
 0x168   : > { %2967 = vmatmul.msk.bf16.vlgmr.msra.gmra.mxu2 %vm1260_vm5, %v4025_v3  ;;  %v4041_v1 = vadd.f32 %v4003_v44, %v1611_v47  ;;  %2956 = vmatmul.msk.bf16.gmra.mxu0 %vm1260_vm5, %v3010_v24  ;;  %v1146_v24 = vld [vmem:[#allocation2 + $0x78] sm:$0xf]  ;;  %v795_v47 = vld [vmem:[#allocation2 + $0x8c] sm:$0x1] }
 0x169   : > { %2379 = vmatpush.bf16.msra.mxu2 %v3700_v63  ;;  %v1189_v63 = vsel %vm3737_vm9, %v1184_v58, %v1188_v26  ;;  %v1206_v62 = vshll.u32 %v1146_v24, 16 }
 0x16a   : > { %v1624_v4 = vsel %vm1620_vm10, %v4041_v1, 0.0  ;;  %v1637_v6 = vmul.f32 %v4041_v1, %v4041_v1  ;;  %2966 = vmatmul.msk.bf16.gmra.mxu1 %vm1260_vm5, %v4037_v52 }
 0x16b   : > { %v1681_v53 = vpop.f32.mrf.mxu2  ;;  %v1625_v7 = vadd.f32 %v1624_v4, %v1623_v32 }
 0x16c   : > { %v1682_v60 = vadd.f32 %v1681_v53, %v3998_v61  ;;  %v1642_v12 = vsel %vm1620_vm10, %v1637_v6, 0.0  ;;  %2970 = vmatmul.msk.bf16.gmra.mxu3 %vm1260_vm5, %v3839_v9  ;;  %v2142_v61 = vunpack.c.l.b16 %v1189_v63 }
 0x16d   : > { %v1643_v0 = vadd.f32 %v1642_v12, %v1641_v39  ;;  %v1606_v15 = vpop.f32.mrf.mxu0  ;;  %v1147_v39 = vld [vmem:[#allocation2 + $0x7c] sm:$0xf] }
 0x16e   : > { %v1722_v13 = vadd.f32 %v1712_v43, %v1682_v60  ;;  %v1612_v18 = vadd.f32 %v1606_v15, %v1574_v38  ;;  %v4065_v9 = vpack.c.b16 %v2143_v20, %v2142_v61  ;;  %v1212_v53 = vshll.u32 %v1147_v39, 16 }
 0x16f   : > { %v1669_v19 = vpop.f32.mrf.mxu1  ;;  %v1717_v59 = vpop.f32.mrf.mxu3  ;;  %v1216_v4 = vshrl.u32 %v1147_v39, 16 }
 0x170   : > { %v4059_v25 = vadd.f32 %v4003_v44, %v1612_v18  ;;  %v1214_v10 = vrot.slane %v1212_v53, 5 }
 0x171   : > { %v1218_v12 = vrot.slane %v1216_v4, 4 }
 0x172   : > { %v1626_v51 = vsel %vm1620_vm10, %v4059_v25, 0.0  ;;  %v1638_v27 = vmul.f32 %v4059_v25, %v4059_v25 }
 0x173   : > { %v1683_v26 = vpop.f32.mrf.mxu2  ;;  %v4067_v43 = vadd.f32 %v1626_v51, %v1625_v7  ;;  %v1208_v7 = vrot.slane %v1206_v62, 5 }
 0x174   : > { %v1684_v11 = vadd.f32 %v1683_v26, %v1664_v23  ;;  %v1644_v45 = vsel %vm1620_vm10, %v1638_v27, 0.0  ;;  %v1148_v27 = vld [vmem:[#allocation2 + $0x84] sm:$0xf] }
 0x175   : > { %v4070_v40 = vadd.f32 %v1644_v45, %v1643_v0  ;;  %v1735_v30 = vpop.f32.mrf.mxu0 }
 0x176   : > { %v1723_v21 = vadd.f32 %v1714_v35, %v1684_v11  ;;  %v1745_v31 = vadd.f32 %v1735_v30, %v1722_v13  ;;  %v1149_v30 = vld [vmem:[#allocation2 + $0x88] sm:$0xf] }
 0x177   : > { %v1758_v32 = vpop.f32.mrf.mxu1  ;;  %v1719_v33 = vpop.f32.mrf.mxu3 }
 0x178   : > { %2968 = vmatmul.msk.bf16.gmra.mxu2 %vm1260_vm5, %v4065_v9  ;;  %v1768_v36 = vadd.f32 %v1758_v32, %v1745_v31  ;;  %2971 = vmatmul.msk.bf16.vlgmr.msrb.gmra.mxu0 %vm1260_vm5, %v3804_v8  ;;  %v796_v8 = vsel %vm3679_vm6, %v776_v42, %v795_v47 }
 0x179   : > { %797 = vst [vmem:[#allocation2 + $0x8c] sm:$0x1] %v796_v8 }
 0x17a   : > { %2973 = vmatmul.msk.bf16.vlgmr.msrb.gmra.mxu1 %vm1260_vm5, %v3914_v50 }
 0x17b   : > { %v1686_v23 = vpop.f32.mrf.mxu2 }
 0x17c   : > { %v1687_v2 = vadd.f32 %v1686_v23, %v1667_v54  ;;  %2977 = vmatmul.msk.bf16.vlgmr.msrb.gmra.mxu3 %vm1260_vm5, %v3860_v56  ;;  %v1203_v54 = vshrl.u32 %v1146_v24, 16  ;;  %v1230_v23 = vshll.u32 %v1148_v27, 16 }
 0x17d   : > { %v1737_v37 = vpop.f32.mrf.mxu0 }
 0x17e   : > { %v1724_v55 = vadd.f32 %v1717_v59, %v1687_v2  ;;  %v1746_v38 = vadd.f32 %v1737_v37, %v1723_v21  ;;  %v1205_v60 = vrot.slane %v1203_v54, 4  ;;  %v1222_v59 = vshll.u32 %v1200_v57, 16 }
 0x17f   : > { %v1760_v35 = vpop.f32.mrf.mxu1  ;;  %v1816_v58 = vpop.f32.mrf.mxu3  ;;  %v1232_v42 = vrot.slane %v1230_v23, 5 }
 0x180   : > { %v1769_v46 = vadd.f32 %v1760_v35, %v1746_v38  ;;  %v1209_v61 = vor.u32 %v1208_v7, %v1205_v60  ;;  %v1224_v21 = vrot.slane %v1222_v59, 5  ;;  %v1201_v62 = vld [vmem:[#allocation2 + $0x8c] sm:$0x1] }
 0x181   : > { %v1246_v7 = vshll.u32 %v1201_v62, 16 }
 0x182   : > { %v1210_v51 = vrot.slane %v1209_v61, 4 }
 0x183   : > { %v1688_v50 = vpop.f32.mrf.mxu2 }
 0x184   : > { %v1689_v56 = vadd.f32 %v1688_v50, %v1669_v19  ;;  %v1219_v19 = vor.u32 %v1218_v12, %v1214_v10 }
 0x185   : > { %v1740_v63 = vpop.f32.mrf.mxu0 }
 0x186   : > { %v1725_v6 = vadd.f32 %v1719_v33, %v1689_v56  ;;  %v1747_v13 = vadd.f32 %v1740_v63, %v1724_v55  ;;  %v1220_v45 = vrot.slane %v1219_v19, 4  ;;  %v1227_v33 = vshrl.u32 %v1148_v27, 16 }
 0x187   : > { %v1763_v0 = vpop.f32.mrf.mxu1  ;;  %v1818_v15 = vpop.f32.mrf.mxu3  ;;  %v1240_v55 = vshrl.u32 %v1149_v30, 16 }
 0x188   : > { %2975 = vmatmul.msk.bf16.vlgmr.msrb.gmra.mxu2 %vm1260_vm5, %v3815_v17  ;;  %v1770_v18 = vadd.f32 %v1763_v0, %v1747_v13  ;;  %2972 = vmatmul.msk.bf16.gmra.mxu0 %vm1260_vm5, %v3835_v5  ;;  %v1229_v39 = vrot.slane %v1227_v33, 4  ;;  %v1248_v0 = vrot.slane %v1246_v7, 5 }
 0x189   : > { %v1242_v8 = vrot.slane %v1240_v55, 4 }
 0x18a   : > { %2974 = vmatmul.msk.bf16.gmra.mxu1 %vm1260_vm5, %v3933_v34  ;;  %v1236_v34 = vshll.u32 %v1149_v30, 16  ;;  %v1233_v56 = vor.u32 %v1232_v42, %v1229_v39 }
 0x18b   : > { %v1793_v20 = vpop.f32.mrf.mxu2 }
 0x18c   : > { %v1803_v26 = vadd.f32 %v1793_v20, %v1768_v36  ;;  %2978 = vmatmul.msk.bf16.gmra.mxu3 %vm1260_vm5, %v3884_v41  ;;  %v1215_v36 = vsel %vm3737_vm9, %v1210_v51, %v1214_v10  ;;  %v1225_v41 = vsel %vm3737_vm9, %v1220_v45, %v1224_v21 }
 0x18d   : > { %v1742_v11 = vpop.f32.mrf.mxu0  ;;  %v2395_v38 = vunpack.c.l.b16 %v1215_v36  ;;  %v2396_v35 = vunpack.c.l.b16 %v1225_v41 }
 0x18e   : > { %v1826_v17 = vadd.f32 %v1816_v58, %v1803_v26  ;;  %v1748_v31 = vadd.f32 %v1742_v11, %v1725_v6  ;;  %v1238_v58 = vrot.slane %v1236_v34, 5 }
 0x18f   : > { %v1765_v5 = vpop.f32.mrf.mxu1  ;;  %v1821_v32 = vpop.f32.mrf.mxu3 }
 0x190   : > { %v1771_v2 = vadd.f32 %v1765_v5, %v1748_v31  ;;  %v1243_v60 = vor.u32 %v1242_v8, %v1238_v58 }
 0x193   : > { %v1795_v37 = vpop.f32.mrf.mxu2 }
 0x194   : > { %v1804_v24 = vadd.f32 %v1795_v37, %v1769_v46  ;;  %v2399_v46 = vpack.c.b16 %v2396_v35, %v2395_v38 }
 0x195   : > { %v1839_v54 = vpop.f32.mrf.mxu0 }
 0x196   : > { %v1827_v47 = vadd.f32 %v1818_v15, %v1804_v24  ;;  %v1849_v50 = vadd.f32 %v1839_v54, %v1826_v17  ;;  %v1628_v54 = vrot.slane %v4067_v43, 4 }
 0x197   : > { %v1874_v53 = vpop.f32.mrf.mxu1  ;;  %v1823_v4 = vpop.f32.mrf.mxu3 }
 0x198   : > { %2976 = vmatmul.msk.bf16.gmra.mxu2 %vm1260_vm5, %v3844_v16  ;;  %v1884_v6 = vadd.f32 %v1874_v53, %v1849_v50  ;;  %2979 = vmatmul.msk.bf16.vlgmr.msra.gmra.mxu0 %vm1260_vm5, %v3937_v48  ;;  %v1234_v16 = vrot.slane %v1233_v56, 4  ;;  %v1244_v48 = vrot.slane %v1243_v60, 4  ;;  %v1629_v7 = vadd.f32 %v1628_v54, %v4067_v43 }
 0x19a   : > { %v4100_v12 = vadd.f32 %v4003_v44, %v1884_v6  ;;  %2981 = vmatmul.msk.bf16.vlgmr.msra.gmra.mxu1 %vm1260_vm5, %v3996_v49  ;;  %v1239_v49 = vsel %vm3737_vm9, %v1234_v16, %v1238_v58  ;;  %v1249_v26 = vsel %vm3737_vm9, %v1244_v48, %v1248_v0  ;;  %v1630_v43 = vrot.slane %v1629_v7, 2 }
 0x19b   : > { %v1798_v63 = vpop.f32.mrf.mxu2  ;;  %v2397_v21 = vunpack.c.l.b16 %v1239_v49  ;;  %v2398_v30 = vunpack.c.l.b16 %v1249_v26 }
 0x19c   : > { %v1805_v10 = vadd.f32 %v1798_v63, %v1770_v18  ;;  %v1924_v13 = vmax.f32 %v4015_v14, %v4100_v12  ;;  %v1928_v57 = vmin.f32 %v4015_v14, %v4100_v12  ;;  %2985 = vmatmul.msk.bf16.vlgmr.msra.gmra.mxu3 %vm1260_vm5, %v2399_v46  ;;  %v1906_v51 = vmul.f32 %v4100_v12, %v4100_v12 }
 0x19d   : > { %v1841_v15 = vpop.f32.mrf.mxu0  ;;  %v1892_v45 = vsel %vm1620_vm10, %v4100_v12, 0.0  ;;  %v2400_v39 = vpack.c.b16 %v2398_v30, %v2397_v21  ;;  %v1631_v21 = vadd.f32 %v1630_v43, %v1629_v7 }
 0x19e   : > { %v1828_v61 = vadd.f32 %v1821_v32, %v1805_v10  ;;  %v1850_v18 = vadd.f32 %v1841_v15, %v1827_v47  ;;  %v1910_v36 = vsel %vm1620_vm10, %v1906_v51, 0.0 }
 0x19f   : > { %v1876_v20 = vpop.f32.mrf.mxu1  ;;  %v1960_v19 = vpop.f32.mrf.mxu3 }
 0x1a0   : > { %v1885_v59 = vadd.f32 %v1876_v20, %v1850_v18 }
 0x1a2   : > { %v4116_v11 = vadd.f32 %v4003_v44, %v1885_v59 }
 0x1a3   : > { %v1800_v17 = vpop.f32.mrf.mxu2 }
 0x1a4   : > { %v1806_v27 = vadd.f32 %v1800_v17, %v1771_v2  ;;  %v1893_v31 = vsel %vm1620_vm10, %v4116_v11, 0.0  ;;  %v1907_v28 = vmul.f32 %v4116_v11, %v4116_v11  ;;  %v1925_v5 = vmax.f32 %v4023_v29, %v4116_v11 }
 0x1a5   : > { %v1929_v32 = vmin.f32 %v4023_v29, %v4116_v11  ;;  %v1894_v33 = vadd.f32 %v1893_v31, %v1892_v45  ;;  %v1844_v23 = vpop.f32.mrf.mxu0 }
 0x1a6   : > { %v1829_v2 = vadd.f32 %v1823_v4, %v1806_v27  ;;  %v1911_v34 = vsel %vm1620_vm10, %v1907_v28, 0.0  ;;  %v1851_v55 = vadd.f32 %v1844_v23, %v1828_v61  ;;  %v1646_v4 = vrot.slane %v4070_v40, 4 }
 0x1a7   : > { %v1912_v37 = vadd.f32 %v1911_v34, %v1910_v36  ;;  %v1879_v41 = vpop.f32.mrf.mxu1  ;;  %v1962_v24 = vpop.f32.mrf.mxu3  ;;  %v1632_v34 = vrot.slane %v1631_v21, 1 }
 0x1a8   : > { %2983 = vmatmul.msk.bf16.vlgmr.msra.gmra.mxu2 %vm1260_vm5, %v4025_v3  ;;  %v1886_v38 = vadd.f32 %v1879_v41, %v1851_v55  ;;  %2980 = vmatmul.msk.bf16.gmra.mxu0 %vm1260_vm5, %v3954_v22  ;;  %v1647_v48 = vadd.f32 %v1646_v4, %v4070_v40 }
 0x1aa   : > { %v4135_v35 = vadd.f32 %v4003_v44, %v1886_v38  ;;  %2982 = vmatmul.msk.bf16.gmra.mxu1 %vm1260_vm5, %v4037_v52  ;;  %v1648_v49 = vrot.slane %v1647_v48, 2 }
 0x1ab   : > { %v1941_v42 = vpop.f32.mrf.mxu2 }
 0x1ac   : > { %v1961_v47 = vadd.f32 %v1960_v19, %v1941_v42  ;;  %v1895_v3 = vsel %vm1620_vm10, %v4135_v35, 0.0  ;;  %v1908_v58 = vmul.f32 %v4135_v35, %v4135_v35  ;;  %v1926_v8 = vmax.f32 %v4041_v1, %v4135_v35  ;;  %2986 = vmatmul.msk.bf16.gmra.mxu3 %vm1260_vm5, %v2400_v39 }
 0x1ad   : > { %v1930_v22 = vmin.f32 %v4041_v1, %v4135_v35  ;;  %v1896_v62 = vadd.f32 %v1895_v3, %v1894_v33  ;;  %v1846_v50 = vpop.f32.mrf.mxu0  ;;  %v1649_v23 = vadd.f32 %v1648_v49, %v1647_v48 }
 0x1ae   : > { %v1913_v52 = vsel %vm1620_vm10, %v1908_v58, 0.0  ;;  %v1852_v53 = vadd.f32 %v1846_v50, %v1829_v2  ;;  %v1633_v58 = vadd.f32 %v1632_v34, %v1631_v21 }
 0x1af   : > { %v1914_v56 = vadd.f32 %v1913_v52, %v1912_v37  ;;  %v1881_v6 = vpop.f32.mrf.mxu1  ;;  %v1965_v46 = vpop.f32.mrf.mxu3 }
 0x1b0   : > { %v1887_v60 = vadd.f32 %v1881_v6, %v1852_v53 }
 0x1b2   : > { %v4153_v16 = vadd.f32 %v4003_v44, %v1887_v60 }
 0x1b3   : > { %v1943_v63 = vpop.f32.mrf.mxu2 }
 0x1b4   : > { %v1963_v10 = vadd.f32 %v1962_v24, %v1943_v63  ;;  %v1897_v0 = vsel %vm1620_vm10, %v4153_v16, 0.0  ;;  %v1909_v15 = vmul.f32 %v4153_v16, %v4153_v16  ;;  %v1927_v61 = vmax.f32 %v4059_v25, %v4153_v16 }
 0x1b5   : > { %v1931_v18 = vmin.f32 %v4059_v25, %v4153_v16  ;;  %v1898_v20 = vadd.f32 %v1897_v0, %v1896_v62  ;;  %v1979_v19 = vpop.f32.mrf.mxu0  ;;  %v1650_v24 = vrot.slane %v1649_v23, 1 }
 0x1b6   : > { %v1915_v59 = vsel %vm1620_vm10, %v1909_v15, 0.0  ;;  %v1989_v40 = vadd.f32 %v1979_v19, %v1961_v47 }
 0x1b7   : > { %v1899_v26 = vrot.slane %v1898_v20, 4  ;;  %v1916_v17 = vadd.f32 %v1915_v59, %v1914_v56  ;;  %v2002_v51 = vpop.f32.mrf.mxu1  ;;  %v1967_v27 = vpop.f32.mrf.mxu3  ;;  %v1651_v53 = vadd.f32 %v1650_v24, %v1649_v23 }
 0x1b8   : > { %2984 = vmatmul.msk.bf16.gmra.mxu2 %vm1260_vm5, %v4065_v9  ;;  %v2012_v45 = vadd.f32 %v2002_v51, %v1989_v40 }
 0x1b9   : > { %v1900_v30 = vadd.f32 %v1899_v26, %v1898_v20  ;;  %v1917_v31 = vrot.slane %v1916_v17, 4 }
 0x1bb   : > { %v1946_v28 = vpop.f32.mrf.mxu2  ;;  %v1901_v2 = vrot.slane %v1900_v30, 2  ;;  %v1918_v36 = vadd.f32 %v1917_v31, %v1916_v17 }
 0x1bc   : > { %v1966_v33 = vadd.f32 %v1965_v46, %v1946_v28 }
 0x1bd   : > { %v1902_v55 = vadd.f32 %v1901_v2, %v1900_v30  ;;  %v1919_v37 = vrot.slane %v1918_v36, 2  ;;  %v1981_v41 = vpop.f32.mrf.mxu0 }
 0x1be   : > { %v1990_v9 = vadd.f32 %v1981_v41, %v1963_v10 }
 0x1bf   : > { %v1903_v38 = vrot.slane %v1902_v55, 1  ;;  %v1920_v39 = vadd.f32 %v1919_v37, %v1918_v36  ;;  %v2004_v42 = vpop.f32.mrf.mxu1  ;;  %v2048_v47 = vpop.f32.mrf.mxu3 }
 0x1c0   : > { %v2013_v3 = vadd.f32 %v2004_v42, %v1990_v9 }
 0x1c1   : > { %v1904_v54 = vadd.f32 %v1903_v38, %v1902_v55  ;;  %v1921_v62 = vrot.slane %v1920_v39, 1 }
 0x1c3   : > { %v1948_v50 = vpop.f32.mrf.mxu2  ;;  %v4167_v4 = vadd.f32 %v1904_v54, %v1633_v58  ;;  %v1922_v56 = vadd.f32 %v1921_v62, %v1920_v39 }
 0x1c4   : > { %v1968_v52 = vadd.f32 %v1967_v27, %v1948_v50 }
 0x1c5   : > { %v4169_v6 = vadd.f32 %v1922_v56, %v1651_v53  ;;  %v1984_v46 = vpop.f32.mrf.mxu0 }
 0x1c6   : > { %v1991_v60 = vadd.f32 %v1984_v46, %v1966_v33 }
 0x1c7   : > { %v2007_v7 = vpop.f32.mrf.mxu1  ;;  %v2050_v63 = vpop.f32.mrf.mxu3 }
 0x1c8   : > { %v2014_v10 = vadd.f32 %v2007_v7, %v1991_v60 }
 0x1cb   : > { %v2025_v48 = vpop.f32.mrf.mxu2 }
 0x1cc   : > { %v2035_v0 = vadd.f32 %v2025_v48, %v2012_v45 }
 0x1cd   : > { %v1986_v43 = vpop.f32.mrf.mxu0 }
 0x1ce   : > { %v2058_v15 = vadd.f32 %v2048_v47, %v2035_v0  ;;  %v1992_v20 = vadd.f32 %v1986_v43, %v1968_v52 }
 0x1cf   : > { %v2009_v19 = vpop.f32.mrf.mxu1  ;;  %v2053_v59 = vpop.f32.mrf.mxu3 }
 0x1d0   : > { %v2015_v40 = vadd.f32 %v2009_v19, %v1992_v20 }
 0x1d3   : > { %v2027_v49 = vpop.f32.mrf.mxu2 }
 0x1d4   : > { %v2036_v26 = vadd.f32 %v2027_v49, %v2013_v3 }
 0x1d5   : > { %v2087_v51 = vpop.f32.mrf.mxu0 }
 0x1d6   : > { %v2059_v17 = vadd.f32 %v2050_v63, %v2036_v26  ;;  %v2097_v27 = vadd.f32 %v2087_v51, %v2058_v15 }
 0x1d7   : > { %v2126_v21 = vpop.f32.mrf.mxu1  ;;  %v2055_v30 = vpop.f32.mrf.mxu3 }
 0x1d8   : > { %v2136_v31 = vadd.f32 %v2126_v21, %v2097_v27 }
 0x1db   : > { %v2030_v28 = vpop.f32.mrf.mxu2 }
 0x1dc   : > { %v2037_v33 = vadd.f32 %v2030_v28, %v2014_v10 }
 0x1dd   : > { %v2089_v2 = vpop.f32.mrf.mxu0 }
 0x1de   : > { %v2060_v23 = vadd.f32 %v2053_v59, %v2037_v33  ;;  %v2098_v36 = vadd.f32 %v2089_v2, %v2059_v17 }
 0x1df   : > { %v2128_v45 = vpop.f32.mrf.mxu1  ;;  %v4171_v34 = vpop.f32.mrf.mxu3 }
 0x1e0   : > { %v2137_v55 = vadd.f32 %v2128_v45, %v2098_v36 }
 0x1e3   : > { %v2032_v37 = vpop.f32.mrf.mxu2 }
 0x1e4   : > { %v2038_v41 = vadd.f32 %v2032_v37, %v2015_v40 }
 0x1e5   : > { %v2092_v24 = vpop.f32.mrf.mxu0 }
 0x1e6   : > { %v2061_v9 = vadd.f32 %v2055_v30, %v2038_v41  ;;  %v2099_v38 = vadd.f32 %v2092_v24, %v2060_v23 }
 0x1e7   : > { %v2131_v39 = vpop.f32.mrf.mxu1  ;;  %v4173_v42 = vpop.f32.mrf.mxu3 }
 0x1e8   : > { %v2138_v47 = vadd.f32 %v2131_v39, %v2099_v38 }
 0x1eb   : > { %v2161_v3 = vpop.f32.mrf.mxu2 }
 0x1ec   : > { %v2171_v58 = vadd.f32 %v2161_v3, %v2136_v31 }
 0x1ed   : > { %v2094_v62 = vpop.f32.mrf.mxu0 }
 0x1ee   : > { %v2175_v54 = vadd.f32 %v4003_v44, %v2171_v58  ;;  %v2100_v53 = vadd.f32 %v2094_v62, %v2061_v9 }
 0x1ef   : > { %v2133_v56 = vpop.f32.mrf.mxu1  ;;  %v4186_v46 = vpop.f32.mrf.mxu3 }
 0x1f0   : > { %v4179_v50 = vmax.f32 %v1924_v13, %v2175_v54  ;;  %v4184_v52 = vmin.f32 %v1928_v57, %v2175_v54  ;;  %v2139_v7 = vadd.f32 %v2133_v56, %v2100_v53  ;;  %v2193_v10 = vmul.f32 %v2175_v54, %v2175_v54 }
 0x1f1   : > { %v2179_v0 = vsel %vm1620_vm10, %v2175_v54, 0.0 }
 0x1f2   : > { %v2197_v59 = vsel %vm1620_vm10, %v2193_v10, 0.0 }
 0x1f3   : > { %v2163_v60 = vpop.f32.mrf.mxu2 }
 0x1f4   : > { %v2172_v63 = vadd.f32 %v2163_v60, %v2137_v55 }
 0x1f5   : > { %v2247_v15 = vpop.f32.mrf.mxu0 }
 0x1f6   : > { %v2176_v48 = vadd.f32 %v4003_v44, %v2172_v63 }
 0x1f7   : > { %v2266_v20 = vpop.f32.mrf.mxu1  ;;  %v4201_v19 = vpop.f32.mrf.mxu3 }
 0x1f8   : > { %v2180_v13 = vsel %vm1620_vm10, %v2176_v48, 0.0  ;;  %v2194_v43 = vmul.f32 %v2176_v48, %v2176_v48  ;;  %v4194_v14 = vmax.f32 %v1925_v5, %v2176_v48  ;;  %v4199_v12 = vmin.f32 %v1929_v32, %v2176_v48 }
 0x1f9   : > { %v2181_v57 = vadd.f32 %v2180_v13, %v2179_v0  ;;  %v2248_v13 = vadd.f32 %v2247_v15, %v4171_v34 }
 0x1fa   : > { %v2198_v40 = vsel %vm1620_vm10, %v2194_v43, 0.0 }
 0x1fb   : > { %v2199_v49 = vadd.f32 %v2198_v40, %v2197_v59  ;;  %v2166_v26 = vpop.f32.mrf.mxu2  ;;  %v2276_v40 = vadd.f32 %v2266_v20, %v2248_v13 }
 0x1fc   : > { %v2173_v17 = vadd.f32 %v2166_v26, %v2138_v47 }
 0x1fd   : > { %v2249_v5 = vpop.f32.mrf.mxu0 }
 0x1fe   : > { %v2177_v51 = vadd.f32 %v4003_v44, %v2173_v17  ;;  %v2250_v17 = vadd.f32 %v2249_v5, %v4173_v42 }
 0x1ff   : > { %v2312_v30 = vpop.f32.mrf.mxu3  ;;  %v2268_v23 = vpop.f32.mrf.mxu1 }
 0x200   : > { %v2182_v27 = vsel %vm1620_vm10, %v2177_v51, 0.0  ;;  %v2195_v21 = vmul.f32 %v2177_v51, %v2177_v51  ;;  %v4210_v29 = vmax.f32 %v1926_v8, %v2177_v51  ;;  %v4215_v11 = vmin.f32 %v1930_v22, %v2177_v51 }
 0x201   : > { %v2183_v32 = vadd.f32 %v2182_v27, %v2181_v57 }
 0x202   : > { %v2200_v31 = vsel %vm1620_vm10, %v2195_v21, 0.0 }
 0x203   : > { %v2201_v28 = vadd.f32 %v2200_v31, %v2199_v49  ;;  %v2168_v33 = vpop.f32.mrf.mxu2 }
 0x204   : > { %v2174_v2 = vadd.f32 %v2168_v33, %v2139_v7 }
 0x205   : > { %v2252_v35 = vpop.f32.mrf.mxu0 }
 0x206   : > { %v2178_v36 = vadd.f32 %v4003_v44, %v2174_v2 }
 0x207   : > { %v2314_v37 = vpop.f32.mrf.mxu3  ;;  %v2271_v3 = vpop.f32.mrf.mxu1 }
 0x208   : > { %v2184_v45 = vsel %vm1620_vm10, %v2178_v36, 0.0  ;;  %v2196_v55 = vmul.f32 %v2178_v36, %v2178_v36  ;;  %v4223_v8 = vmax.f32 %v1927_v61, %v2178_v36  ;;  %v4228_v1 = vmin.f32 %v1931_v18, %v2178_v36 }
 0x209   : > { %v2185_v22 = vadd.f32 %v2184_v45, %v2183_v32 }
 0x20a   : > { %v2202_v41 = vsel %vm1620_vm10, %v2196_v55, 0.0 }
 0x20b   : > { %v2186_v9 = vrot.slane %v2185_v22, 4  ;;  %v2203_v24 = vadd.f32 %v2202_v41, %v2201_v28  ;;  %v2289_v38 = vpop.f32.mrf.mxu2 }
 0x20c   : > { %v2299_v49 = vadd.f32 %v2289_v38, %v2276_v40 }
 0x20d   : > { %v2187_v39 = vadd.f32 %v2186_v9, %v2185_v22  ;;  %v2204_v47 = vrot.slane %v2203_v24, 4  ;;  %v2254_v53 = vpop.f32.mrf.mxu0 }
 0x20e   : > { %v2322_v27 = vadd.f32 %v2312_v30, %v2299_v49 }
 0x20f   : > { %v2188_v58 = vrot.slane %v2187_v39, 2  ;;  %v2205_v54 = vadd.f32 %v2204_v47, %v2203_v24  ;;  %v2317_v18 = vpop.f32.mrf.mxu3  ;;  %v2273_v48 = vpop.f32.mrf.mxu1 }
 0x211   : > { %v2189_v61 = vadd.f32 %v2188_v58, %v2187_v39  ;;  %v2206_v62 = vrot.slane %v2205_v54, 2 }
 0x213   : > { %v2190_v56 = vrot.slane %v2189_v61, 1  ;;  %v2207_v25 = vadd.f32 %v2206_v62, %v2205_v54  ;;  %v2291_v16 = vpop.f32.mrf.mxu2 }
 0x215   : > { %v2191_v60 = vadd.f32 %v2190_v56, %v2189_v61  ;;  %v2208_v7 = vrot.slane %v2207_v25, 1  ;;  %v2335_v57 = vpop.f32.mrf.mxu0 }
 0x216   : > { %v2345_v21 = vadd.f32 %v2335_v57, %v2322_v27 }
 0x217   : > { %v4232_v63 = vadd.f32 %v2191_v60, %v4167_v4  ;;  %v2209_v10 = vadd.f32 %v2208_v7, %v2207_v25  ;;  %v2319_v59 = vpop.f32.mrf.mxu3  ;;  %v2358_v26 = vpop.f32.mrf.mxu1  ;;  %v2277_v4 = vadd.f32 %v2268_v23, %v2250_v17  ;;  %v2255_v23 = vadd.f32 %v2254_v53, %v4201_v19 }
 0x218   : > { %v2368_v33 = vadd.f32 %v2358_v26, %v2345_v21 }
 0x219   : > { %v4235_v0 = vadd.f32 %v2209_v10, %v4169_v6  ;;  %v2300_v28 = vadd.f32 %v2291_v16, %v2277_v4  ;;  %v2253_v6 = vadd.f32 %v2252_v35, %v4186_v46 }
 0x21b   : > { %v2294_v43 = vpop.f32.mrf.mxu2  ;;  %v2323_v2 = vadd.f32 %v2314_v37, %v2300_v28  ;;  %v2278_v20 = vadd.f32 %v2271_v3, %v2253_v6  ;;  %v2279_v3 = vadd.f32 %v2273_v48, %v2255_v23 }
 0x21d   : > { %v2337_v32 = vpop.f32.mrf.mxu0  ;;  %v2301_v22 = vadd.f32 %v2294_v43, %v2278_v20 }
 0x21e   : > { %v2346_v45 = vadd.f32 %v2337_v32, %v2323_v2 }
 0x21f   : > { %v2416_v31 = vpop.f32.mrf.mxu3  ;;  %v2360_v34 = vpop.f32.mrf.mxu1  ;;  %v2324_v9 = vadd.f32 %v2317_v18, %v2301_v22 }
 0x220   : > { %v2369_v41 = vadd.f32 %v2360_v34, %v2346_v45 }
 0x223   : > { %v2296_v51 = vpop.f32.mrf.mxu2 }
 0x225   : > { %v2340_v42 = vpop.f32.mrf.mxu0 }
 0x226   : > { %v2347_v58 = vadd.f32 %v2340_v42, %v2324_v9 }
 0x227   : > { %v2418_v30 = vpop.f32.mrf.mxu3  ;;  %v2363_v47 = vpop.f32.mrf.mxu1 }
 0x228   : > { %v2370_v54 = vadd.f32 %v2363_v47, %v2347_v58 }
 0x22b   : > { %v2381_v15 = vpop.f32.mrf.mxu2 }
 0x22c   : > { %v2391_v36 = vadd.f32 %v2381_v15, %v2368_v33 }
 0x22d   : > { %v2342_v61 = vpop.f32.mrf.mxu0 }
 0x22e   : > { %v2426_v55 = vadd.f32 %v2416_v31, %v2391_v36 }
 0x22f   : > { %v2421_v56 = vpop.f32.mrf.mxu3  ;;  %v2365_v13 = vpop.f32.mrf.mxu1 }
 0x230   : > { %v2430_v5 = vadd.f32 %v4003_v44, %v2426_v55 }
 0x232   : > { %v2466_v46 = vmax.f32 %v4179_v50, %v2430_v5  ;;  %v2470_v35 = vmin.f32 %v4184_v52, %v2430_v5  ;;  %v2302_v50 = vadd.f32 %v2296_v51, %v2279_v3  ;;  %v2448_v40 = vmul.f32 %v2430_v5, %v2430_v5 }
 0x233   : > { %v2383_v37 = vpop.f32.mrf.mxu2  ;;  %v2434_v32 = vsel %vm1620_vm10, %v2430_v5, 0.0 }
 0x234   : > { %v2474_v24 = vpack.c.bf16 %v2466_v46, %v2466_v46  ;;  %v2483_v38 = vpack.c.bf16 %v2470_v35, %v2470_v35  ;;  %v2392_v39 = vadd.f32 %v2383_v37, %v2369_v41  ;;  %v2325_v16 = vadd.f32 %v2319_v59, %v2302_v50 }
 0x235   : > { %v2452_v6 = vsel %vm1620_vm10, %v2448_v40, 0.0 }
 0x236   : > { %2479 = vst.msk [vmem:[%s4245_s21] sm:$0xf] %vm2478_vm11, %v2474_v24  ;;  %v2427_v19 = vadd.f32 %v2418_v30, %v2392_v39  ;;  %v2348_v10 = vadd.f32 %v2342_v61, %v2325_v16 }
 0x237   : > { %2987 = vst.msk [vmem:[%s4245_s21 + $0x10] sm:$0xf] %vm2478_vm11, %v2483_v38  ;;  %v2423_v21 = vpop.f32.mrf.mxu3 }
 0x238   : > { %v2431_v52 = vadd.f32 %v4003_v44, %v2427_v19 }
 0x23a   : > { %v2467_v62 = vmax.f32 %v4194_v14, %v2431_v52  ;;  %v2471_v53 = vmin.f32 %v4199_v12, %v2431_v52  ;;  %v2449_v57 = vmul.f32 %v2431_v52, %v2431_v52  ;;  %v2371_v14 = vadd.f32 %v2365_v13, %v2348_v10 }
 0x23b   : > { %v2386_v25 = vpop.f32.mrf.mxu2  ;;  %v2435_v49 = vsel %vm1620_vm10, %v2431_v52, 0.0 }
 0x23c   : > { %v2475_v18 = vpack.c.bf16 %v2467_v62, %v2467_v62  ;;  %v2484_v60 = vpack.c.bf16 %v2471_v53, %v2471_v53  ;;  %v2393_v7 = vadd.f32 %v2386_v25, %v2370_v54  ;;  %v2453_v31 = vsel %vm1620_vm10, %v2449_v57, 0.0 }
 0x23d   : > { %v2436_v28 = vadd.f32 %v2435_v49, %v2434_v32  ;;  %v2454_v15 = vadd.f32 %v2453_v31, %v2452_v6 }
 0x23e   : > { %2480 = vst.msk [vmem:[%s4245_s21 + $0x4] sm:$0xf] %vm2478_vm11, %v2475_v18  ;;  %v2428_v48 = vadd.f32 %v2421_v56, %v2393_v7 }
 0x23f   : > { %2988 = vst.msk [vmem:[%s4245_s21 + $0x14] sm:$0xf] %vm2478_vm11, %v2484_v60 }
 0x240   : > { %v2432_v43 = vadd.f32 %v4003_v44, %v2428_v48 }
 0x242   : > { %v2468_v12 = vmax.f32 %v4210_v29, %v2432_v43  ;;  %v2472_v59 = vmin.f32 %v4215_v11, %v2432_v43  ;;  %v2450_v17 = vmul.f32 %v2432_v43, %v2432_v43  ;;  %v2437_v29 = vsel %vm1620_vm10, %v2432_v43, 0.0 }
 0x243   : > { %v2388_v26 = vpop.f32.mrf.mxu2  ;;  %v2438_v2 = vadd.f32 %v2437_v29, %v2436_v28 }
 0x244   : > { %v2476_v51 = vpack.c.bf16 %v2468_v12, %v2468_v12  ;;  %v2485_v27 = vpack.c.bf16 %v2472_v59, %v2472_v59  ;;  %v2394_v4 = vadd.f32 %v2388_v26, %v2371_v14  ;;  %v2455_v33 = vsel %vm1620_vm10, %v2450_v17, 0.0 }
 0x245   : > { %v2456_v22 = vadd.f32 %v2455_v33, %v2454_v15 }
 0x246   : > { %2481 = vst.msk [vmem:[%s4245_s21 + $0x8] sm:$0xf] %vm2478_vm11, %v2476_v51  ;;  %v2429_v11 = vadd.f32 %v2423_v21, %v2394_v4 }
 0x247   : > { %2989 = vst.msk [vmem:[%s4245_s21 + $0x18] sm:$0xf] %vm2478_vm11, %v2485_v27 }
 0x248   : > { %v2433_v34 = vadd.f32 %v4003_v44, %v2429_v11 }
 0x24a   : > { %v2439_v36 = vsel %vm1620_vm10, %v2433_v34, 0.0  ;;  %v2451_v20 = vmul.f32 %v2433_v34, %v2433_v34  ;;  %v2469_v45 = vmax.f32 %v4223_v8, %v2433_v34  ;;  %v2473_v55 = vmin.f32 %v4228_v1, %v2433_v34 }
 0x24b   : > { %v2440_v42 = vadd.f32 %v2439_v36, %v2438_v2 }
 0x24c   : > { %v2457_v5 = vsel %vm1620_vm10, %v2451_v20, 0.0  ;;  %v2477_v44 = vpack.c.bf16 %v2469_v45, %v2469_v45  ;;  %v2486_v30 = vpack.c.bf16 %v2473_v55, %v2473_v55 }
 0x24d   : > { %v2441_v23 = vrot.slane %v2440_v42, 4  ;;  %v2458_v41 = vadd.f32 %v2457_v5, %v2456_v22 }
 0x24e   : > { %2482 = vst.msk [vmem:[%s4245_s21 + $0xc] sm:$0xf] %vm2478_vm11, %v2477_v44 }
 0x24f   : > { %v2442_v46 = vadd.f32 %v2441_v23, %v2440_v42  ;;  %v2459_v35 = vrot.slane %v2458_v41, 4  ;;  %2990 = vst.msk [vmem:[%s4245_s21 + $0x1c] sm:$0xf] %vm2478_vm11, %v2486_v30 }
 0x251   : > { %v2443_v37 = vrot.slane %v2442_v46, 2  ;;  %v2460_v8 = vadd.f32 %v2459_v35, %v2458_v41 }
 0x253   : > { %v2444_v9 = vadd.f32 %v2443_v37, %v2442_v46  ;;  %v2461_v1 = vrot.slane %v2460_v8, 2 }
 0x255   : > { %v2445_v24 = vrot.slane %v2444_v9, 1  ;;  %v2462_v38 = vadd.f32 %v2461_v1, %v2460_v8  ;;  %v2538_v50 = vld [vmem:[%s4245_s21 + $0x8] sm:$0xff] (%p3476_p12)  }
 0x256   : > { %v2546_v52 = vld [vmem:[%s4245_s21 + $0x18] sm:$0xff] (%p3476_p12)   ;;  %2539 = vst [vmem:[%s2517_s25 + $0x8] sm:$0xff] (%p3476_p12), %v2538_v50  }
 0x257   : > { %v2446_v39 = vadd.f32 %v2445_v24, %v2444_v9  ;;  %v2463_v47 = vrot.slane %v2462_v38, 1  ;;  %2547 = vst [vmem:[%s2517_s25 + $0x108] sm:$0xff] (%p3476_p12), %v2546_v52  }
 0x259   : > { %v2447_v3 = vadd.f32 %v2446_v39, %v4232_v63  ;;  %v2464_v58 = vadd.f32 %v2463_v47, %v2462_v38  ;;  %2512 = sbr.rel (!%p3476_p12) target bundleno = 606 (0x25e), region = 143  ;;  %v2534_v63 = vld [vmem:[%s4245_s21] sm:$0xff] (%p3476_p12)  }
 0x25a   : > { %2535 = vst [vmem:[%s2517_s25] sm:$0xff] (%p3476_p12), %v2534_v63  }
 0x25b   : > { %v2465_v19 = vadd.f32 %v2464_v58, %v4235_v0  ;;  %2492 = vst.msk [vmem:[%s685_s12] sm:$0xff] %vm1620_vm10, %v2447_v3  ;;  %v2542_v0 = vld [vmem:[%s4245_s21 + $0x10] sm:$0xff] (%p3476_p12)  }
 0x25c   : > { %2543 = vst [vmem:[%s2517_s25 + $0x100] sm:$0xff] (%p3476_p12), %v2542_v0  }
 0x25d   : > { %2493 = vst.msk [vmem:[%s693_s10] sm:$0xff] %vm1620_vm10, %v2465_v19 }
 0x25e PF: > { %s17_s7 = sadd.s32 1, %s3299_s7   ;;  %s4379_s11 = sld [smem:[#allocation10_spill]] }
 0x25f   : > { %p14_p10 = scmp.ge.s32.totalorder %s17_s7, 18   ;;  %s4380_s16 = sld [smem:[#allocation8_spill]] }
 0x260   : > { %s4381_s15 = sld [smem:[#allocation9_spill]]  ;;  %s4382_s21 = smov %s3263_s22 }
 0x261   : > { %s4383_s22 = smov %s3474_s4  ;;  %s4384_s23 = smov %s3271_s24 }
 0x262   : > { %s4385_s24 = smov %s3456_s6  ;;  %s4386_s25 = smov %s3279_s26 }
 0x263   : > { %s4388_s27 = smov %s3291_s29  ;;  %s4389_s28 = smov %s3295_s30 }
 0x264   : > { %s4387_s26 = smov %s4379_s11  ;;  %16 = sbr.rel (!%p14_p10) target bundleno = 11 (0xb), region = 292 }
 0x265   : > { %s4390_s29 = smov %s4380_s16 }
 0x266   : > { %s4391_s30 = smov %s4381_s15 }

// kernel: _lambda_.7
= control target key start
LH: loop header
LB: loop body
LE: loop exit
PB: predicated region body
PF: predicated region fallthrough
CT: control target
= control target key end

     0   :  { %v439_v11 = vmov 0   ;;  %vm222_vm2 = vcmask 261120   ;;  %s668_s3 = inlined_call_operand.vmem [shape: bf16[32,128], index: 3, kind: input, shape index: {}]   ;;  %s669_s0 = inlined_call_operand.vmem [shape: bf16[2,128,32], index: 0, kind: input, shape index: {}]   ;;  %s670_s1 = inlined_call_operand.vmem [shape: f32[1,32], index: 1, kind: input, shape index: {}]   ;;  %s671_s2 = inlined_call_operand.vmem [shape: f32[1,32], index: 2, kind: input, shape index: {}]   ;;  %s672_s4 = inlined_call_operand.vmem [shape: f32[1,128], index: 4, kind: input, shape index: {}]   ;;  %s673_s5 = inlined_call_operand.vmem [shape: f32[128,128], index: 5, kind: output, shape index: {}]  }
   0x1   :  { %v349_v0 = vld [vmem:[%s668_s3 + $0x8] sm:$0xff]  ;;  %v21_v1 = vld [vmem:[%s670_s1] sm:$0x1]  ;;  %v415_v9 = vld [vmem:[%s669_s0 + $0x10] sm:$0xff]  }
   0x2   :  { %vm23_vm0 = vcmp.ge.f32.partialorder %v21_v1, 0.0  ;;  %v351_v2 = vld [vmem:[%s669_s0] sm:$0xff]   ;;  %253 = vmatpush.bf16.msra.mxu0 %v349_v0  ;;  %429 = vmatpush.bf16.msra.mxu1 %v349_v0  ;;  %v360_v13 = vunpack.c.l.bf16 %v415_v9  ;;  %v361_v14 = vunpack.c.h.bf16 %v415_v9  ;;  %v423_v15 = vld [vmem:[%s669_s0 + $0x50] sm:$0xff]   ;;  %v511_v24 = vld [vmem:[%s669_s0 + $0x8] sm:$0xff]  }
   0x3   :  { %v421_v3 = vld [vmem:[%s669_s0 + $0x40] sm:$0xff]   ;;  %v352_v5 = vunpack.c.l.bf16 %v351_v2  ;;  %v353_v6 = vunpack.c.h.bf16 %v351_v2  ;;  %430 = vmatpush.bf16.msra.mxu2 %v349_v0  ;;  %431 = vmatpush.bf16.msra.mxu3 %v349_v0  ;;  %v89_v12 = vsel %vm23_vm0, 1, %v439_v11  ;;  %v392_v19 = vunpack.c.l.bf16 %v423_v15  ;;  %v419_v22 = vld [vmem:[%s669_s0 + $0x30] sm:$0xff]   ;;  %v422_v2 = vld [vmem:[%s669_s0 + $0x48] sm:$0xff]  }
   0x4   :  { %v348_v4 = vld [vmem:[%s668_s3] sm:$0xff]  ;;  %v384_v7 = vunpack.c.l.bf16 %v421_v3  ;;  %v385_v10 = vunpack.c.h.bf16 %v421_v3  ;;  %v90_v18 = vperm.slane %v89_v12, 0  ;;  %v393_v20 = vunpack.c.h.bf16 %v423_v15  ;;  %v427_v23 = vld [vmem:[%s669_s0 + $0x70] sm:$0xff]   ;;  %v416_v3 = vld [vmem:[%s669_s0 + $0x18] sm:$0xff]  }
   0x5   :  { %v488_v8 = vld [vmem:[%s670_s1] ss:$0 sm:$0xff]  ;;  %v376_v28 = vunpack.c.l.bf16 %v419_v22  ;;  %v377_v31 = vunpack.c.h.bf16 %v419_v22  ;;  %v408_v32 = vunpack.c.l.bf16 %v427_v23  ;;  %v409_v33 = vunpack.c.h.bf16 %v427_v23 }
   0x6   :  { %v417_v16 = vld [vmem:[%s669_s0 + $0x20] sm:$0xff]   ;;  %254 = vmatpush.bf16.msra.mxu0 %v348_v4  ;;  %432 = vmatpush.bf16.msra.mxu1 %v348_v4  ;;  %vm513_vm1 = vcmp.eq.s32.totalorder %v90_v18, 1  ;;  %v356_v37 = vunpack.c.l.bf16 %v511_v24  ;;  %v388_v12 = vunpack.c.l.bf16 %v422_v2  ;;  %v418_v18 = vld [vmem:[%s669_s0 + $0x28] sm:$0xff]  }
   0x7   :  { %v425_v17 = vld [vmem:[%s669_s0 + $0x60] sm:$0xff]   ;;  %v368_v21 = vunpack.c.l.bf16 %v417_v16  ;;  %v369_v25 = vunpack.c.h.bf16 %v417_v16  ;;  %433 = vmatpush.bf16.msra.mxu2 %v348_v4  ;;  %434 = vmatpush.bf16.msra.mxu3 %v348_v4  ;;  %v92_v34 = vsel %vm513_vm1, %v352_v5, %v384_v7  ;;  %v93_v35 = vsel %vm513_vm1, %v353_v6, %v385_v10 }
   0x8   :  { %v400_v26 = vunpack.c.l.bf16 %v425_v17  ;;  %v401_v27 = vunpack.c.h.bf16 %v425_v17  ;;  %v520_v30 = vld [vmem:[%s671_s2] ss:$0 sm:$0xff]  ;;  %v96_v36 = vsel %vm513_vm1, %v360_v13, %v392_v19  ;;  %v111_v38 = vmul.f32 %v488_v8, %v92_v34  ;;  %v424_v17 = vld [vmem:[%s669_s0 + $0x58] sm:$0xff]  }
   0x9   :  { %v112_v39 = vmul.f32 %v488_v8, %v93_v35  ;;  %v97_v40 = vsel %vm513_vm1, %v361_v14, %v393_v20  ;;  %v115_v41 = vmul.f32 %v488_v8, %v96_v36  ;;  %v104_v45 = vsel %vm513_vm1, %v376_v28, %v408_v32  ;;  %v438_v29 = vld [vmem:[%s672_s4] ss:$0 sm:$0xff] }
   0xa   :  { %v116_v42 = vmul.f32 %v488_v8, %v97_v40  ;;  %v100_v43 = vsel %vm513_vm1, %v368_v21, %v400_v26  ;;  %v101_v44 = vsel %vm513_vm1, %v369_v25, %v401_v27  ;;  %v130_v46 = vadd.f32 %v520_v30, %v111_v38  ;;  %v426_v27 = vld [vmem:[%s669_s0 + $0x68] sm:$0xff]  }
   0xb   :  { %v131_v47 = vadd.f32 %v520_v30, %v112_v39  ;;  %v134_v48 = vadd.f32 %v520_v30, %v115_v41  ;;  %v119_v49 = vmul.f32 %v488_v8, %v100_v43  ;;  %v120_v51 = vmul.f32 %v488_v8, %v101_v44 }
   0xc   :  { %v135_v50 = vadd.f32 %v520_v30, %v116_v42  ;;  %v105_v52 = vsel %vm513_vm1, %v377_v31, %v409_v33  ;;  %v123_v53 = vmul.f32 %v488_v8, %v104_v45  ;;  %vm146_vm3 = vcmp.gt.f32.partialorder %v130_v46, 0.0  ;;  %v420_v42 = vld [vmem:[%s669_s0 + $0x38] sm:$0xff]  }
   0xd   :  { %vm147_vm4 = vcmp.gt.f32.partialorder %v131_v47, 0.0  ;;  %v162_v54 = vmul.f32 0.2, %v130_v46  ;;  %v163_v55 = vmul.f32 0.2, %v131_v47  ;;  %vm150_vm5 = vcmp.gt.f32.partialorder %v134_v48, 0.0 }
   0xe   :  { %vm151_vm6 = vcmp.gt.f32.partialorder %v135_v50, 0.0  ;;  %v166_v56 = vmul.f32 0.2, %v134_v48  ;;  %v167_v57 = vmul.f32 0.2, %v135_v50  ;;  %v138_v60 = vadd.f32 %v520_v30, %v119_v49  ;;  %v428_v49 = vld [vmem:[%s669_s0 + $0x78] sm:$0xff]  }
   0xf   :  { %v178_v58 = vsel %vm146_vm3, %v130_v46, %v162_v54  ;;  %v179_v59 = vsel %vm147_vm4, %v131_v47, %v163_v55  ;;  %v139_v61 = vadd.f32 %v520_v30, %v120_v51  ;;  %v124_v1 = vmul.f32 %v488_v8, %v105_v52 }
  0x10   :  { %v194_v62 = vpack.c.bf16 %v179_v59, %v178_v58  ;;  %v182_v63 = vsel %vm150_vm5, %v134_v48, %v166_v56  ;;  %v183_v0 = vsel %vm151_vm6, %v135_v50, %v167_v57  ;;  %vm154_vm7 = vcmp.gt.f32.partialorder %v138_v60, 0.0 }
  0x11   :  { %v196_v4 = vpack.c.bf16 %v183_v0, %v182_v63  ;;  %vm155_vm8 = vcmp.gt.f32.partialorder %v139_v61, 0.0  ;;  %v170_v5 = vmul.f32 0.2, %v138_v60  ;;  %v171_v6 = vmul.f32 0.2, %v139_v61 }
  0x12   :  { %340 = vmatmul.msk.bf16.vlgmr.msra.gmra.mxu0 %vm222_vm2, %v194_v62  ;;  %v142_v7 = vadd.f32 %v520_v30, %v123_v53  ;;  %v143_v9 = vadd.f32 %v520_v30, %v124_v1  ;;  %v357_v10 = vunpack.c.h.bf16 %v511_v24  ;;  %v389_v13 = vunpack.c.h.bf16 %v422_v2 }
  0x13   :  { %342 = vmatmul.msk.bf16.vlgmr.msra.gmra.mxu1 %vm222_vm2, %v196_v4  ;;  %v186_v11 = vsel %vm154_vm7, %v138_v60, %v170_v5  ;;  %v364_v14 = vunpack.c.l.bf16 %v416_v3  ;;  %v187_v15 = vsel %vm155_vm8, %v139_v61, %v171_v6  ;;  %v94_v21 = vsel %vm513_vm1, %v356_v37, %v388_v12 }
  0x14   :  { %vm158_vm9 = vcmp.gt.f32.partialorder %v142_v7, 0.0  ;;  %vm159_vm10 = vcmp.gt.f32.partialorder %v143_v9, 0.0  ;;  %v174_v16 = vmul.f32 0.2, %v142_v7  ;;  %v198_v19 = vpack.c.bf16 %v187_v15, %v186_v11 }
  0x15   :  { %v175_v20 = vmul.f32 0.2, %v143_v9  ;;  %v95_v22 = vsel %vm513_vm1, %v357_v10, %v389_v13  ;;  %v113_v24 = vmul.f32 %v488_v8, %v94_v21  ;;  %v365_v26 = vunpack.c.h.bf16 %v416_v3 }
  0x16   :  { %v190_v23 = vsel %vm158_vm9, %v142_v7, %v174_v16  ;;  %v114_v25 = vmul.f32 %v488_v8, %v95_v22  ;;  %344 = vmatmul.msk.bf16.vlgmr.msra.gmra.mxu2 %vm222_vm2, %v198_v19  ;;  %v396_v31 = vunpack.c.l.bf16 %v424_v17  ;;  %v397_v32 = vunpack.c.h.bf16 %v424_v17 }
  0x17   :  { %v191_v28 = vsel %vm159_vm10, %v143_v9, %v175_v20  ;;  %v372_v33 = vunpack.c.l.bf16 %v418_v18  ;;  %v132_v35 = vadd.f32 %v520_v30, %v113_v24  ;;  %v373_v37 = vunpack.c.h.bf16 %v418_v18 }
  0x18   :  { %v200_v34 = vpack.c.bf16 %v191_v28, %v190_v23  ;;  %v133_v36 = vadd.f32 %v520_v30, %v114_v25  ;;  %v98_v38 = vsel %vm513_vm1, %v364_v14, %v396_v31  ;;  %v99_v39 = vsel %vm513_vm1, %v365_v26, %v397_v32 }
  0x19   :  { %v404_v40 = vunpack.c.l.bf16 %v426_v27  ;;  %v405_v41 = vunpack.c.h.bf16 %v426_v27  ;;  %vm148_vm11 = vcmp.gt.f32.partialorder %v132_v35, 0.0  ;;  %v164_v43 = vmul.f32 0.2, %v132_v35 }
  0x1a   :  { %346 = vmatmul.msk.bf16.vlgmr.msra.gmra.mxu3 %vm222_vm2, %v200_v34  ;;  %vm149_vm12 = vcmp.gt.f32.partialorder %v133_v36, 0.0  ;;  %v165_v44 = vmul.f32 0.2, %v133_v36  ;;  %v117_v45 = vmul.f32 %v488_v8, %v98_v38  ;;  %v118_v46 = vmul.f32 %v488_v8, %v99_v39 }
  0x1b   :  { %v102_v47 = vsel %vm513_vm1, %v372_v33, %v404_v40  ;;  %v103_v48 = vsel %vm513_vm1, %v373_v37, %v405_v41  ;;  %v180_v50 = vsel %vm148_vm11, %v132_v35, %v164_v43  ;;  %v380_v57 = vunpack.c.l.bf16 %v420_v42 }
  0x1c   :  { %v181_v51 = vsel %vm149_vm12, %v133_v36, %v165_v44  ;;  %v121_v52 = vmul.f32 %v488_v8, %v102_v47  ;;  %v122_v53 = vmul.f32 %v488_v8, %v103_v48  ;;  %v136_v55 = vadd.f32 %v520_v30, %v117_v45 }
  0x1d   :  { %v195_v54 = vpack.c.bf16 %v181_v51, %v180_v50  ;;  %v137_v56 = vadd.f32 %v520_v30, %v118_v46  ;;  %v381_v60 = vunpack.c.h.bf16 %v420_v42  ;;  %v412_v61 = vunpack.c.l.bf16 %v428_v49 }
  0x1e   :  { %v140_v58 = vadd.f32 %v520_v30, %v121_v52  ;;  %v141_v59 = vadd.f32 %v520_v30, %v122_v53  ;;  %vm152_vm13 = vcmp.gt.f32.partialorder %v136_v55, 0.0  ;;  %v168_v62 = vmul.f32 0.2, %v136_v55 }
  0x1f   :  { %vm153_vm14 = vcmp.gt.f32.partialorder %v137_v56, 0.0  ;;  %v169_v63 = vmul.f32 0.2, %v137_v56  ;;  %v413_v4 = vunpack.c.h.bf16 %v428_v49  ;;  %v106_v5 = vsel %vm513_vm1, %v380_v57, %v412_v61 }
  0x20   :  { %vm156_vm15 = vcmp.gt.f32.partialorder %v140_v58, 0.0  ;;  %vm157_vm0 = vcmp.gt.f32.partialorder %v141_v59, 0.0  ;;  %v172_v0 = vmul.f32 0.2, %v140_v58  ;;  %v173_v1 = vmul.f32 0.2, %v141_v59 }
  0x21   :  { %v184_v2 = vsel %vm152_vm13, %v136_v55, %v168_v62  ;;  %v185_v3 = vsel %vm153_vm14, %v137_v56, %v169_v63  ;;  %v125_v10 = vmul.f32 %v488_v8, %v106_v5  ;;  %v107_v12 = vsel %vm513_vm1, %v381_v60, %v413_v4 }
  0x22   :  { %341 = vmatmul.msk.bf16.gmra.mxu0 %vm222_vm2, %v195_v54  ;;  %v197_v6 = vpack.c.bf16 %v185_v3, %v184_v2  ;;  %v188_v7 = vsel %vm156_vm15, %v140_v58, %v172_v0  ;;  %v189_v9 = vsel %vm157_vm0, %v141_v59, %v173_v1  ;;  %v126_v13 = vmul.f32 %v488_v8, %v107_v12 }
  0x23   :  { %v199_v11 = vpack.c.bf16 %v189_v9, %v188_v7  ;;  %v144_v14 = vadd.f32 %v520_v30, %v125_v10 }
  0x24   :  { %343 = vmatmul.msk.bf16.gmra.mxu1 %vm222_vm2, %v197_v6  ;;  %v145_v15 = vadd.f32 %v520_v30, %v126_v13 }
  0x25   :  { %vm160_vm3 = vcmp.gt.f32.partialorder %v144_v14, 0.0  ;;  %v176_v16 = vmul.f32 0.2, %v144_v14 }
  0x26   :  { %345 = vmatmul.msk.bf16.gmra.mxu2 %vm222_vm2, %v199_v11  ;;  %vm161_vm4 = vcmp.gt.f32.partialorder %v145_v15, 0.0  ;;  %v177_v17 = vmul.f32 0.2, %v145_v15 }
  0x27   :  { %v192_v18 = vsel %vm160_vm3, %v144_v14, %v176_v16 }
  0x28   :  { %v193_v19 = vsel %vm161_vm4, %v145_v15, %v177_v17 }
  0x29   :  { %v201_v20 = vpack.c.bf16 %v193_v19, %v192_v18 }
  0x2b   :  { %347 = vmatmul.msk.bf16.gmra.mxu3 %vm222_vm2, %v201_v20 }
  0x8f   :  { %v256_v8 = vpop.f32.mrf.mxu0 }
  0x90   :  { %v257_v21 = vadd.f32 %v438_v29, %v256_v8  ;;  %v266_v22 = vpop.f32.mrf.mxu1 }
  0x91   :  { %v267_v23 = vadd.f32 %v438_v29, %v266_v22 }
  0x92   :  { %296 = vst [vmem:[%s673_s5] sm:$0xff] %v257_v21 }
  0x93   :  { %300 = vst [vmem:[%s673_s5 + $0x20] sm:$0xff] %v267_v23 }
  0x97   :  { %v258_v30 = vpop.f32.mrf.mxu0 }
  0x98   :  { %v259_v24 = vadd.f32 %v438_v29, %v258_v30  ;;  %v268_v25 = vpop.f32.mrf.mxu1 }
  0x99   :  { %v269_v26 = vadd.f32 %v438_v29, %v268_v25  ;;  %v276_v27 = vpop.f32.mrf.mxu2 }
  0x9a   :  { %297 = vst [vmem:[%s673_s5 + $0x8] sm:$0xff] %v259_v24  ;;  %v277_v28 = vadd.f32 %v438_v29, %v276_v27 }
  0x9b   :  { %301 = vst [vmem:[%s673_s5 + $0x28] sm:$0xff] %v269_v26 }
  0x9c   :  { %304 = vst [vmem:[%s673_s5 + $0x40] sm:$0xff] %v277_v28 }
  0x9d   :  { %v286_v31 = vpop.f32.mrf.mxu3 }
  0x9e   :  { %v287_v32 = vadd.f32 %v438_v29, %v286_v31 }
  0x9f   :  { %v261_v33 = vpop.f32.mrf.mxu0 }
  0xa0   :  { %308 = vst [vmem:[%s673_s5 + $0x60] sm:$0xff] %v287_v32  ;;  %v262_v34 = vadd.f32 %v438_v29, %v261_v33 }
  0xa1   :  { %v271_v35 = vpop.f32.mrf.mxu1  ;;  %v278_v36 = vpop.f32.mrf.mxu2 }
  0xa2   :  { %298 = vst [vmem:[%s673_s5 + $0x10] sm:$0xff] %v262_v34  ;;  %v272_v37 = vadd.f32 %v438_v29, %v271_v35  ;;  %v279_v38 = vadd.f32 %v438_v29, %v278_v36 }
  0xa4   :  { %302 = vst [vmem:[%s673_s5 + $0x30] sm:$0xff] %v272_v37 }
  0xa5   :  { %305 = vst [vmem:[%s673_s5 + $0x48] sm:$0xff] %v279_v38  ;;  %v288_v39 = vpop.f32.mrf.mxu3 }
  0xa6   :  { %v289_v40 = vadd.f32 %v438_v29, %v288_v39 }
  0xa7   :  { %v263_v41 = vpop.f32.mrf.mxu0 }
  0xa8   :  { %309 = vst [vmem:[%s673_s5 + $0x68] sm:$0xff] %v289_v40  ;;  %v264_v42 = vadd.f32 %v438_v29, %v263_v41 }
  0xa9   :  { %v273_v43 = vpop.f32.mrf.mxu1  ;;  %v281_v44 = vpop.f32.mrf.mxu2 }
  0xaa   :  { %299 = vst [vmem:[%s673_s5 + $0x18] sm:$0xff] %v264_v42  ;;  %v274_v45 = vadd.f32 %v438_v29, %v273_v43  ;;  %v282_v46 = vadd.f32 %v438_v29, %v281_v44 }
  0xac   :  { %303 = vst [vmem:[%s673_s5 + $0x38] sm:$0xff] %v274_v45 }
  0xad   :  { %306 = vst [vmem:[%s673_s5 + $0x50] sm:$0xff] %v282_v46 }
  0xae   :  { %v291_v47 = vpop.f32.mrf.mxu3 }
  0xaf   :  { %v292_v48 = vadd.f32 %v438_v29, %v291_v47 }
  0xb1   :  { %v283_v49 = vpop.f32.mrf.mxu2  ;;  %310 = vst [vmem:[%s673_s5 + $0x70] sm:$0xff] %v292_v48 }
  0xb2   :  { %v284_v50 = vadd.f32 %v438_v29, %v283_v49 }
  0xb4   :  { %307 = vst [vmem:[%s673_s5 + $0x58] sm:$0xff] %v284_v50 }
  0xb6   :  { %v293_v51 = vpop.f32.mrf.mxu3 }
  0xb7   :  { %v294_v52 = vadd.f32 %v438_v29, %v293_v51 }
  0xb9   :  { %311 = vst [vmem:[%s673_s5 + $0x78] sm:$0xff] %v294_v52 }

// kernel: _lambda_.6
= control target key start
LH: loop header
LB: loop body
LE: loop exit
PB: predicated region body
PF: predicated region fallthrough
CT: control target
= control target key end

     0   :  { %s4528_s0 = inlined_call_operand.vmem [shape: bf16[2,4,9,9,16], index: 0, kind: input, shape index: {}, may-alias: {0,1}]   ;;  %s4529_s1 = inlined_call_operand.vmem [shape: bf16[2,4,9,9,16], index: 1, kind: input, shape index: {}, may-alias: {0,1}]   ;;  %s4530_s2 = inlined_call_operand.vmem [shape: bf16[3,3,16,32], index: 2, kind: input, shape index: {}]   ;;  %s4531_s3 = inlined_call_operand.vmem [shape: f32[1,32], index: 3, kind: input, shape index: {}]   ;;  %s4532_s4 = inlined_call_operand.vmem [shape: bf16[2,128,32], index: 4, kind: output, shape index: {0}]   ;;  %s4533_s5 = inlined_call_operand.vmem [shape: f32[4,8,32], index: 5, kind: output, shape index: {1}]   ;;  %s4534_s6 = inlined_call_operand.vmem [shape: f32[4,8,32], index: 6, kind: output, shape index: {2}]  }
   0x1   :  { %4538 = sst [smem:[#allocation12_spill]] %s4528_s0 }
   0x2   :  { %4539 = sst [smem:[#allocation13_spill]] %s4532_s4 }
   0x3   :  { %4540 = sst [smem:[#allocation14_spill]] %s4533_s5 }
   0x4   :  { %4541 = sst [smem:[#allocation15_spill]] %s4534_s6 }
   0x5   :  { %s3555_s21 = smov 0   ;;  %s3557_s22 = smov 0  }
   0x6   :  { %s3559_s23 = smov 0   ;;  %s3561_s24 = smov 0  }
   0x7   :  { %s3563_s25 = smov 0   ;;  %s3565_s26 = smov 0  }
   0x8   :  { %s3567_s27 = smov 0   ;;  %s3569_s28 = smov 0  }
   0x9   :  { %s3571_s29 = smov 0   ;;  %s3573_s30 = smov 0  }
   0xa   :  { %s3575_s7 = smov 0  }
   0xb LB: > { %4542 = sst [smem:[#allocation6_spill]] %s3482_s26  ;;  %s26_s9 = sadd.s32 1, %s3494_s29  ;;  %s3502_s7 = sphi %s3575_s7, %s17_s7   ;;  %s3498_s30 = sphi %s3573_s30, %s4578_s30   ;;  %s3494_s29 = sphi %s3571_s29, %s4577_s29   ;;  %s3490_s28 = sphi %s3569_s28, %s4576_s28   ;;  %s3486_s27 = sphi %s3567_s27, %s4575_s27   ;;  %s3482_s26 = sphi %s3565_s26, %s4568_s26   ;;  %s3478_s25 = sphi %s3563_s25, %s4567_s25   ;;  %s3474_s24 = sphi %s3561_s24, %s4574_s24   ;;  %s3470_s23 = sphi %s3559_s23, %s4573_s23   ;;  %s3466_s22 = sphi %s3557_s22, %s4572_s22   ;;  %s3462_s21 = sphi %s3555_s21, %s4571_s21  }
   0xc   : > { %4543 = sst [smem:[#allocation7_spill]] %s3486_s27  ;;  %p27_p0 = scmp.ge.s32.totalorder %s26_s9, 2 }
   0xd   : > { %4544 = sst [smem:[#allocation8_spill]] %s3490_s28  ;;  %s29_s10 = sadd.s32 1, %s3498_s30 }
   0xe   : > { %s38_s11 = sadd.s32 1, %s3482_s26  ;;  %p45_p1 = scmp.ne.s32.totalorder %s3482_s26, %s3478_s25 }
   0xf   : > { %s4580_s9 = smov (%p27_p0, %s26_s9), 0  ;;  %s4582_s10 = smov (!%p27_p0, %s29_s10), %s3498_s30 }
  0x10   : > { %4545 = sst [smem:[#allocation9_spill]] %s4580_s9  ;;  %s34_s12 = ssub.s32 %s3494_s29, %s4580_s9 }
  0x11   : > { %p46_p2 = scmp.eq.s32.totalorder %s3502_s7, 0  ;;  %p31_p3 = scmp.ge.s32.totalorder %s4582_s10, 2 }
  0x12   : > { %s2956_s13 = sshll.u32 %s3494_s29, 2  ;;  %s2957_s16 = sshll.u32 %s4580_s9, 2 }
  0x13   : > { %p3625_p4 = por %p46_p2, %p45_p1  ;;  %s62_s15 = sadd.s32 4, %s2956_s13 }
  0x14   : > { %s4584_s10 = smov (%p31_p3, %s4582_s10), 0  ;;  %s70_s17 = sadd.s32 1, %s3474_s24 }
  0x15   : > { %4547 = sst [smem:[#allocation10_spill]] %s4584_s10  ;;  %s33_s18 = ssub.s32 %s3498_s30, %s4584_s10 }
  0x16   : > { %s64_s19 = sadd.s32 4, %s2957_s16  ;;  %s35_s20 = sor.u32 %s34_s12, %s33_s18 }
  0x17   : > { %s66_s8 = ssub.s32 %s62_s15, %s64_s19  ;;  %p36_p5 = scmp.eq.s32.totalorder %s35_s20, 0 }
  0x18   : > { %s67_s4 = sor.u32 %s66_s8, %s33_s18  ;;  %p77_p7 = scmp.ne.s32.totalorder %s3474_s24, %s3470_s23 }
  0x19   : > { %p68_p6 = scmp.eq.s32.totalorder %s67_s4, 0  ;;  %s2958_s16 = sshll.u32 %s3498_s30, 1 }
  0x1a   : > { %s3638_s13 = scalar_select %p36_p5, %s3482_s26, %s38_s11  }
  0x1b   : > { %s3641_s6 = scalar_select %p68_p6, %s3474_s24, %s70_s17  }
  0x1c   : > { %4548 = sst [smem:[#allocation11_spill]] %s3638_s13  ;;  %p3645_p8 = por %p77_p7, %p46_p2 }
  0x1d   : > { %s136_s27 = sadd.s32 %s3494_s29, %s2958_s16  ;;  %s2959_s28 = sshll.u32 %s4584_s10, 1 }
  0x1e   : > { %s138_s12 = sadd.s32 %s2959_s28, %s4580_s9  ;;  %s142_s15 = sadd.s32 1, %s3466_s22 }
  0x1f   : > { %s139_s19 = ssub.s32 %s136_s27, %s138_s12  ;;  %p152_p9 = scmp.ne.s32.totalorder %s3466_s22, %s3462_s21 }
  0x20   : > { %p140_p10 = scmp.eq.s32.totalorder %s139_s19, 0  ;;  %s4550_s8 = sadd.s32 4294967295, %s3502_s7  }
  0x21   : > { %p153_p11 = scmp.eq.s32.totalorder %s4550_s8, 3  ;;  %p2965_p13 = scmp.ge.s32.totalorder %s3502_s7, 4 }
  0x22   : > { %s3659_s4 = scalar_select %p140_p10, %s3466_s22, %s142_s15  }
  0x23   : > { %p3661_p12 = por %p153_p11, %p152_p9  ;;  %241 = sbr.rel (%p2965_p13) target bundleno = 95 (0x5f), region = 24 }
  0x28   : > { %244 = sbr.rel (!%p3625_p4) target bundleno = 83 (0x53), region = 28  ;;  %s246_s27 = sand.u32 (%p3625_p4), 1, %s3482_s26  }
  0x29   : > { %s3669_s28 = sshll.u32 (%p3625_p4), %s246_s27, 7  ;;  %s3187_s17 = sshll.u32 (%p3625_p4), %s3494_s29, 3 }
  0x2a   : > { %s3217_s18 = smul.u32 (%p3625_p4), 72, %s3498_s30  ;;  %s4552_s0 = sld [smem:[#allocation12_spill]] (%p3625_p4) }
  0x2b   : > { %s248_s8 = scalar_lea.vmem (%p3625_p4), [#allocation3], %s3669_s28   ;;  %s3686_s27 = smov (%p3625_p4), 0  }
  0x2c   : > { %s258_s20 = sadd.s32 (%p3625_p4), %s3217_s18, %s3187_s17  ;;  %s4553_s14 = smov (%p3625_p4), %s248_s8 }
  0x2d   : > { %s2972_s16 = sshll.u32 %s258_s20, 2  ;;  %s3688_s9 = smov 0  }
  0x30   : > { %s3676_s19 = scalar_lea.vmem %s4552_s0, %s2972_s16  }
  0x31   : > { %s4554_s10 = smov %s3676_s19 }
  0x32 LB: >> { %v281_v0 = vld [vmem:[%s3510_s10] sm:$0xf]  ;;  %v283_v1 = vld [vmem:[%s3510_s10 + $0x4] sm:$0xf]  ;;  %v285_v2 = vld [vmem:[%s3510_s10 + $0x8] sm:$0xf]  ;;  %s3518_s9 = sphi %s3688_s9, %s275_s9   ;;  %s3514_s27 = sphi %s3686_s27, %s4557_s27   ;;  %s3510_s10 = sphi %s4554_s10, %s4556_s10   ;;  %s3506_s14 = sphi %s4553_s14, %s4555_s14  }
  0x33   : >> { %282 = vst [vmem:[%s3506_s14] sm:$0xf] %v281_v0  ;;  %v287_v3 = vld [vmem:[%s3510_s10 + $0xc] sm:$0xf]  ;;  %v289_v4 = vld [vmem:[%s3510_s10 + $0x10] sm:$0xf]  ;;  %s345_s17 = sadd.s32 1, %s3514_s27 }
  0x34   : >> { %284 = vst [vmem:[%s3506_s14 + $0x4] sm:$0xf] %v283_v1  ;;  %v291_v5 = vld [vmem:[%s3510_s10 + $0x14] sm:$0xf]  ;;  %v293_v6 = vld [vmem:[%s3510_s10 + $0x18] sm:$0xf] }
  0x35   : >> { %286 = vst [vmem:[%s3506_s14 + $0x8] sm:$0xf] %v285_v2  ;;  %v295_v7 = vld [vmem:[%s3510_s10 + $0x1c] sm:$0xf]  ;;  %v297_v8 = vld [vmem:[%s3510_s10 + $0x48] sm:$0xf] }
  0x36   : >> { %288 = vst [vmem:[%s3506_s14 + $0xc] sm:$0xf] %v287_v3  ;;  %v299_v9 = vld [vmem:[%s3510_s10 + $0x4c] sm:$0xf]  ;;  %v301_v10 = vld [vmem:[%s3510_s10 + $0x50] sm:$0xf] }
  0x37   : >> { %290 = vst [vmem:[%s3506_s14 + $0x10] sm:$0xf] %v289_v4  ;;  %v303_v11 = vld [vmem:[%s3510_s10 + $0x54] sm:$0xf]  ;;  %v305_v12 = vld [vmem:[%s3510_s10 + $0x58] sm:$0xf] }
  0x38   : >> { %292 = vst [vmem:[%s3506_s14 + $0x14] sm:$0xf] %v291_v5  ;;  %v307_v13 = vld [vmem:[%s3510_s10 + $0x5c] sm:$0xf]  ;;  %p346_p0 = scmp.ge.s32.totalorder %s345_s17, 1  ;;  %s275_s9 = sadd.s32 1, %s3518_s9  }
  0x39   : >> { %294 = vst [vmem:[%s3506_s14 + $0x18] sm:$0xf] %v293_v6  ;;  %v309_v14 = vld [vmem:[%s3510_s10 + $0x60] sm:$0xf]  ;;  %v311_v15 = vld [vmem:[%s3510_s10 + $0x64] sm:$0xf] }
  0x3a   : >> { %296 = vst [vmem:[%s3506_s14 + $0x1c] sm:$0xf] %v295_v7  ;;  %v313_v16 = vld [vmem:[%s3510_s10 + $0x90] sm:$0xf]  ;;  %v315_v17 = vld [vmem:[%s3510_s10 + $0x94] sm:$0xf] }
  0x3b   : >> { %298 = vst [vmem:[%s3506_s14 + $0x20] sm:$0xf] %v297_v8  ;;  %s4586_s17 = smov (%p346_p0, %s345_s17), 0  ;;  %v317_v18 = vld [vmem:[%s3510_s10 + $0x98] sm:$0xf]  ;;  %p274_p1 = scmp.ge.s32.totalorder %s275_s9, 1 }
  0x3c   : >> { %300 = vst [vmem:[%s3506_s14 + $0x24] sm:$0xf] %v299_v9  ;;  %v319_v19 = vld [vmem:[%s3510_s10 + $0x9c] sm:$0xf]  ;;  %s2976_s18 = sshll.u32 %s4586_s17, 5  ;;  %s4557_s27 = smov %s4586_s17 }
  0x3d   : >> { %302 = vst [vmem:[%s3506_s14 + $0x28] sm:$0xf] %v301_v10  ;;  %v321_v20 = vld [vmem:[%s3510_s10 + $0xa0] sm:$0xf]  ;;  %s3746_s20 = scalar_lea.vmem %s3676_s19, %s2976_s18   ;;  %s351_s16 = scalar_lea.vmem %s248_s8, %s2976_s18 [#allocation3]   ;;  %v323_v21 = vld [vmem:[%s3510_s10 + $0xa4] sm:$0xf] }
  0x3e   : >> { %304 = vst [vmem:[%s3506_s14 + $0x2c] sm:$0xf] %v303_v11  ;;  %v325_v22 = vld [vmem:[%s3510_s10 + $0xa8] sm:$0xf]  ;;  %v327_v23 = vld [vmem:[%s3510_s10 + $0xac] sm:$0xf] }
  0x3f   : >> { %306 = vst [vmem:[%s3506_s14 + $0x30] sm:$0xf] %v305_v12  ;;  %v329_v24 = vld [vmem:[%s3510_s10 + $0xd8] sm:$0xf]  ;;  %v331_v25 = vld [vmem:[%s3510_s10 + $0xdc] sm:$0xf] }
  0x40   : >> { %308 = vst [vmem:[%s3506_s14 + $0x34] sm:$0xf] %v307_v13  ;;  %v333_v26 = vld [vmem:[%s3510_s10 + $0xe0] sm:$0xf]  ;;  %v335_v27 = vld [vmem:[%s3510_s10 + $0xe4] sm:$0xf] }
  0x41   : >> { %310 = vst [vmem:[%s3506_s14 + $0x38] sm:$0xf] %v309_v14  ;;  %v337_v28 = vld [vmem:[%s3510_s10 + $0xe8] sm:$0xf]  ;;  %v339_v29 = vld [vmem:[%s3510_s10 + $0xec] sm:$0xf] }
  0x42   : >> { %312 = vst [vmem:[%s3506_s14 + $0x3c] sm:$0xf] %v311_v15  ;;  %v341_v30 = vld [vmem:[%s3510_s10 + $0xf0] sm:$0xf]  ;;  %v343_v31 = vld [vmem:[%s3510_s10 + $0xf4] sm:$0xf]  ;;  %s4556_s10 = smov %s3746_s20 }
  0x43   : >> { %314 = vst [vmem:[%s3506_s14 + $0x40] sm:$0xf] %v313_v16 }
  0x44   : >> { %316 = vst [vmem:[%s3506_s14 + $0x44] sm:$0xf] %v315_v17 }
  0x45   : >> { %318 = vst [vmem:[%s3506_s14 + $0x48] sm:$0xf] %v317_v18 }
  0x46   : >> { %320 = vst [vmem:[%s3506_s14 + $0x4c] sm:$0xf] %v319_v19 }
  0x47   : >> { %322 = vst [vmem:[%s3506_s14 + $0x50] sm:$0xf] %v321_v20 }
  0x48   : >> { %324 = vst [vmem:[%s3506_s14 + $0x54] sm:$0xf] %v323_v21 }
  0x49   : >> { %326 = vst [vmem:[%s3506_s14 + $0x58] sm:$0xf] %v325_v22 }
  0x4a   : >> { %328 = vst [vmem:[%s3506_s14 + $0x5c] sm:$0xf] %v327_v23 }
  0x4b   : >> { %330 = vst [vmem:[%s3506_s14 + $0x60] sm:$0xf] %v329_v24 }
  0x4c   : >> { %332 = vst [vmem:[%s3506_s14 + $0x64] sm:$0xf] %v331_v25 }
  0x4d   : >> { %334 = vst [vmem:[%s3506_s14 + $0x68] sm:$0xf] %v333_v26 }
  0x4e   : >> { %336 = vst [vmem:[%s3506_s14 + $0x6c] sm:$0xf] %v335_v27  ;;  %277 = sbr.rel (!%p274_p1) target bundleno = 50 (0x32), region = 270 }
  0x4f   : >> { %338 = vst [vmem:[%s3506_s14 + $0x70] sm:$0xf] %v337_v28 }
  0x50   : >> { %340 = vst [vmem:[%s3506_s14 + $0x74] sm:$0xf] %v339_v29 }
  0x51   : >> { %342 = vst [vmem:[%s3506_s14 + $0x78] sm:$0xf] %v341_v30 }
  0x52   : >> { %344 = vst [vmem:[%s3506_s14 + $0x7c] sm:$0xf] %v343_v31  ;;  %s4555_s14 = smov %s351_s16 }
  0x53 PF: > { %542 = sbr.rel (!%p3645_p8) target bundleno = 95 (0x5f), region = 90  ;;  %s544_s12 = sand.u32 (%p3645_p8), 1, %s3474_s24  }
  0x54   : > { %s3190_s15 = sshll.u32 (%p3645_p8), %s3494_s29, 3  ;;  %s2984_s18 = sshll.u32 (%p3645_p8), %s544_s12, 5 }
  0x55   : > { %s2823_s0 = smul.u32 (%p3645_p8), 72, %s3498_s30  ;;  %s546_s9 = scalar_lea.vmem (%p3645_p8), [#allocation4], %s2984_s18 }
  0x57   : > { %s2824_s13 = sadd.s32 (%p3645_p8), %s3190_s15, %s2823_s0 }
  0x58   : > { %s2987_s16 = sshll.u32 %s2824_s13, 2 }
  0x59   : > { %s2826_s17 = scalar_lea.vmem %s4529_s1, %s2987_s16 }
  0x5a   : > { %v2988_v32 = vld [vmem:[%s2826_s17 + $0x20] sm:$0xff]   ;;  %v2990_v33 = vld [vmem:[%s2826_s17 + $0x68] sm:$0xff]   ;;  %v2992_v34 = vld [vmem:[%s2826_s17 + $0xb0] sm:$0xff]  }
  0x5b   : > { %571 = vst [vmem:[%s546_s9] sm:$0xff] %v2988_v32   ;;  %v2994_v35 = vld [vmem:[%s2826_s17 + $0xf8] sm:$0xff]  }
  0x5c   : > { %575 = vst [vmem:[%s546_s9 + $0x8] sm:$0xff] %v2990_v33  }
  0x5d   : > { %579 = vst [vmem:[%s546_s9 + $0x10] sm:$0xff] %v2992_v34  }
  0x5e   : > { %583 = vst [vmem:[%s546_s9 + $0x18] sm:$0xff] %v2994_v35  }
  0x5f PF: > { %p2996_p2 = scmp.ge.s32.totalorder %s3502_s7, 1  ;;  %p624_p3 = scmp.lt.s32.totalorder %s3502_s7, 5 }
  0x61   : > { %p625_p4 = pnand %p2996_p2, %p624_p3 }
  0x62   : > { %s631_s13 = sand.u32 (!%p625_p4), 1, %s3478_s25   ;;  %s638_s10 = sand.u32 (!%p625_p4), 1, %s3470_s23  }
  0x63   : > { %628 = sbr.rel (%p625_p4) target bundleno = 570 (0x23a), region = 131  ;;  %s2997_s8 = sshll.u32 (!%p625_p4), %s631_s13, 7 }
  0x64   : > { %s3824_s25 = scalar_lea.vmem (!%p625_p4), [#allocation3], %s2997_s8  ;;  %s3945_s23 = sshll.u32 (!%p625_p4), %s638_s10, 5 }
  0x65   : > { %s3964_s13 = scalar_lea.vmem (!%p625_p4), [#allocation4], %s3945_s23  ;;  %s4562_s19 = sld [smem:[#allocation8_spill]] (!%p625_p4) }
  0x66   : > { %s4563_s8 = sld [smem:[#allocation7_spill]] (!%p625_p4) }
  0x67   : > { %s4564_s16 = sld [smem:[#allocation14_spill]] (!%p625_p4) }
  0x68   : > { %v3799_v36 = vld [vmem:[%s4530_s2 + $0x8] sm:$0xff]  ;;  %v3804_v37 = vld [vmem:[%s4530_s2] sm:$0xff]  ;;  %vm742_vm0 = vcmask 125952   ;;  %v3810_v38 = vld [vmem:[%s4530_s2 + $0x18] sm:$0xff]  ;;  %vm744_vm1 = vcmask 122880   ;;  %vm1392_vm4 = vcmask 130048  }
  0x69   : > { %v3815_v39 = vld [vmem:[%s4530_s2 + $0x10] sm:$0xff]  ;;  %vm745_vm2 = vsmask.f32 256  ;;  %1406 = vmatpush.bf16.msra.mxu0 %v3799_v36  ;;  %1447 = vmatpush.bf16.msra.mxu1 %v3804_v37  ;;  %v747_v41 = vld [vmem:[#allocation2 + $0x4] sm:$0x1]  ;;  %v3855_v54 = vld [vmem:[%s4530_s2 + $0x38] sm:$0xff] }
  0x6a   : > { %v3820_v40 = vld [vmem:[%s4530_s2 + $0x30] sm:$0xff]  ;;  %v718_v42 = vld [vmem:[%s3824_s25 + $0x20] sm:$0xf]  ;;  %v720_v43 = vld [vmem:[%s3824_s25 + $0x28] sm:$0xf]  ;;  %1529 = vmatpush.bf16.msra.mxu3 %v3810_v38  ;;  %1484 = vmatpush.bf16.msra.mxu2 %v3815_v39  ;;  %vm1769_vm8 = vcmask 261120  }
  0x6b   : > { %v710_v44 = vld [vmem:[%s3824_s25] sm:$0xf]  ;;  %762 = vst.msk [vmem:[#allocation2 + $0x28] sm:$0xf] %vm742_vm0, %v718_v42  ;;  %v712_v45 = vld [vmem:[%s3824_s25 + $0x8] sm:$0xf]  ;;  %vm3833_vm3 = vmand %vm744_vm1, %vm745_vm2 }
  0x6c   : > { %v751_v47 = vld [vmem:[#allocation2 + $0xc] sm:$0x1]  ;;  %766 = vst.msk [vmem:[#allocation2 + $0x30] sm:$0xf] %vm742_vm0, %v720_v43  ;;  %v726_v48 = vld [vmem:[%s3824_s25 + $0x40] sm:$0xf] }
  0x6d   : > { %v711_v49 = vld [vmem:[%s3824_s25 + $0x4] sm:$0x1]  ;;  %743 = vst.msk [vmem:[#allocation2] sm:$0xf] %vm742_vm0, %v710_v44  ;;  %v728_v50 = vld [vmem:[%s3824_s25 + $0x48] sm:$0xf] }
  0x6e   : > { %1660 = vmatpush.bf16.msrb.mxu2 %v3820_v40  ;;  %v713_v51 = vld [vmem:[%s3824_s25 + $0xc] sm:$0x1]  ;;  %750 = vst.msk [vmem:[#allocation2 + $0x8] sm:$0xf] %vm742_vm0, %v712_v45  ;;  %v748_v52 = vsel %vm3833_vm3, %v711_v49, %v747_v41  ;;  %v3850_v53 = vld [vmem:[%s4530_s2 + $0x20] sm:$0xff]  ;;  %1705 = vmatpush.bf16.msrb.mxu3 %v3855_v54  ;;  %vm2627_vm9 = vcmask 257024  }
  0x6f   : > { %778 = vst.msk [vmem:[#allocation2 + $0x50] sm:$0xf] %vm742_vm0, %v726_v48  ;;  %v752_v55 = vsel %vm3833_vm3, %v713_v51, %v751_v47  ;;  %vm867_vm5 = vsmask.f32 3328  ;;  %v3863_v56 = vld [vmem:[%s4530_s2 + $0x28] sm:$0xff]  ;;  %1574 = vmatpush.bf16.msrb.mxu0 %v3850_v53  ;;  %s3000_s14 = sshll.u32 %s4562_s19, 1 }
  0x70   : > { %782 = vst.msk [vmem:[#allocation2 + $0x58] sm:$0xf] %vm742_vm0, %v728_v50  ;;  %vm868_vm6 = vsmask.f32 7440  ;;  %v722_v57 = vld [vmem:[%s3824_s25 + $0x30] sm:$0xf]  ;;  %1615 = vmatpush.bf16.msrb.mxu1 %v3863_v56  ;;  %s4463_s27 = sadd.s32 %s4563_s8, %s3000_s14 }
  0x71   : > { %749 = vst [vmem:[#allocation2 + $0x4] sm:$0x1] %v748_v52  ;;  %v724_v58 = vld [vmem:[%s3824_s25 + $0x38] sm:$0xf]  ;;  %v714_v59 = vld [vmem:[%s3824_s25 + $0x10] sm:$0xf]  ;;  %vm3894_vm7 = vmor %vm867_vm5, %vm868_vm6 }
  0x72   : > { %v3006_v60 = vld [vmem:[#allocation2 + $0x28] sm:$0xf]  ;;  %753 = vst [vmem:[#allocation2 + $0xc] sm:$0x1] %v752_v55  ;;  %v716_v61 = vld [vmem:[%s3824_s25 + $0x18] sm:$0xf] }
  0x73   : > { %v3202_v62 = vld [vmem:[#allocation2 + $0x2c] sm:$0xf0]  ;;  %770 = vst.msk [vmem:[#allocation2 + $0x38] sm:$0xf] %vm742_vm0, %v722_v57  ;;  %v732_v3 = vld [vmem:[%s3824_s25 + $0x58] sm:$0xf] }
  0x74   : > { %v730_v63 = vld [vmem:[%s3824_s25 + $0x50] sm:$0xf]  ;;  %v3875_v0 = vor.u32 %v3202_v62, %v3006_v60  ;;  %v3020_v1 = vld [vmem:[#allocation2] sm:$0xf]  ;;  %774 = vst.msk [vmem:[#allocation2 + $0x40] sm:$0xf] %vm742_vm0, %v724_v58 }
  0x75   : > { %v854_v2 = vld [vmem:[#allocation2] sm:$0xf]  ;;  %v3200_v4 = vld [vmem:[#allocation2 + $0x4] sm:$0xf0]  ;;  %754 = vst.msk [vmem:[#allocation2 + $0x10] sm:$0xf] %vm742_vm0, %v714_v59 }
  0x76   : > { %v855_v5 = vld [vmem:[#allocation2 + $0x8] sm:$0xf]  ;;  %v871_v6 = vshrl.u32 %v854_v2, 16  ;;  %v874_v7 = vshll.u32 %v854_v2, 16  ;;  %3016 = vmatmul.msk.bf16.vlgmr.msra.gmra.mxu0 %vm1392_vm4, %v3875_v0  ;;  %v3021_v8 = vor.u32 %v3200_v4, %v3020_v1  ;;  %v3040_v9 = vld [vmem:[#allocation2 + $0x50] sm:$0xf] }
  0x77   : > { %v885_v10 = vshrl.u32 %v855_v5, 16  ;;  %v888_v11 = vshll.u32 %v855_v5, 16  ;;  %v3204_v12 = vld [vmem:[#allocation2 + $0x54] sm:$0xf0]  ;;  %758 = vst.msk [vmem:[#allocation2 + $0x18] sm:$0xf] %vm742_vm0, %v716_v61 }
  0x78   : > { %v873_v13 = vrot.slane %v871_v6, 4  ;;  %v876_v14 = vrot.slane %v874_v7, 5  ;;  %v715_v15 = vld [vmem:[%s3824_s25 + $0x14] sm:$0x1]  ;;  %3030 = vmatmul.msk.bf16.vlgmr.msra.gmra.mxu1 %vm1392_vm4, %v3021_v8  ;;  %v3885_v16 = vor.u32 %v3204_v12, %v3040_v9  ;;  %v863_v17 = vld [vmem:[#allocation2 + $0x4] sm:$0x1] }
  0x79   : > { %v887_v18 = vrot.slane %v885_v10, 4  ;;  %v890_v19 = vrot.slane %v888_v11, 5  ;;  %786 = vst.msk [vmem:[#allocation2 + $0x60] sm:$0xf] %vm742_vm0, %v730_v63  ;;  %v864_v20 = vld [vmem:[#allocation2 + $0xc] sm:$0x1]  ;;  %1809 = vmatpush.bf16.msra.mxu1 %v3799_v36 }
  0x7a   : > { %v877_v21 = vor.u32 %v876_v14, %v873_v13  ;;  %v880_v22 = vshll.u32 %v863_v17, 16  ;;  %790 = vst.msk [vmem:[#allocation2 + $0x68] sm:$0xf] %vm742_vm0, %v732_v3  ;;  %3050 = vmatmul.msk.bf16.vlgmr.msra.gmra.mxu3 %vm1392_vm4, %v3885_v16  ;;  %v894_v25 = vshll.u32 %v864_v20, 16  ;;  %v717_v26 = vld [vmem:[%s3824_s25 + $0x1c] sm:$0x1] }
  0x7b   : > { %v891_v24 = vor.u32 %v890_v19, %v887_v18  ;;  %v755_v29 = vld [vmem:[#allocation2 + $0x14] sm:$0x1]  ;;  %1859 = vmatpush.bf16.msra.mxu3 %v3815_v39  ;;  %v759_v33 = vld [vmem:[#allocation2 + $0x1c] sm:$0x1]  ;;  %v3010_v35 = vld [vmem:[#allocation2 + $0x38] sm:$0xf] }
  0x7c   : > { %v878_v27 = vrot.slane %v877_v21, 4  ;;  %v882_v28 = vrot.slane %v880_v22, 5  ;;  %v896_v31 = vrot.slane %v894_v25, 5  ;;  %v756_v32 = vsel %vm3833_vm3, %v715_v15, %v755_v29  ;;  %v3203_v41 = vld [vmem:[#allocation2 + $0x3c] sm:$0xf0]  ;;  %p695_p5 = scmp.lt.s32.totalorder %s4463_s27, 3 }
  0x7d   : > { %v892_v30 = vrot.slane %v891_v24, 4  ;;  %757 = vst [vmem:[#allocation2 + $0x14] sm:$0x1] %v756_v32  ;;  %v760_v42 = vsel %vm3833_vm3, %v717_v26, %v759_v33  ;;  %v856_v43 = vld [vmem:[#allocation2 + $0x10] sm:$0xf]  ;;  %v3915_v3 = vor.u32 %v3203_v41, %v3010_v35  ;;  %v3932_v32 = vld [vmem:[%s4530_s2 + $0x40] sm:$0xff] }
  0x7e   : > { %v883_v34 = vsel %vm3894_vm7, %v878_v27, %v882_v28  ;;  %v734_v44 = vld [vmem:[%s3824_s25 + $0x60] sm:$0xf]  ;;  %v3024_v48 = vld [vmem:[#allocation2 + $0x10] sm:$0xf]  ;;  %761 = vst [vmem:[#allocation2 + $0x1c] sm:$0x1] %v760_v42  ;;  %1746 = vmatpush.bf16.msra.mxu0 %v3932_v32 }
  0x7f   : > { %v897_v45 = vsel %vm3894_vm7, %v892_v30, %v896_v31  ;;  %v1459_v47 = vunpack.c.l.b16 %v883_v34  ;;  %v857_v49 = vld [vmem:[#allocation2 + $0x18] sm:$0xf]  ;;  %v899_v52 = vshrl.u32 %v856_v43, 16  ;;  %v902_v55 = vshll.u32 %v856_v43, 16  ;;  %v736_v57 = vld [vmem:[%s3824_s25 + $0x68] sm:$0xf] }
  0x80   : > { %v1460_v50 = vunpack.c.l.b16 %v897_v45  ;;  %v3201_v51 = vld [vmem:[#allocation2 + $0x14] sm:$0xf0]  ;;  %v3044_v58 = vld [vmem:[#allocation2 + $0x60] sm:$0xf]  ;;  %v913_v60 = vshrl.u32 %v857_v49, 16  ;;  %v916_v61 = vshll.u32 %v857_v49, 16 }
  0x81   : > { %v3205_v59 = vld [vmem:[#allocation2 + $0x64] sm:$0xf0]  ;;  %794 = vst.msk [vmem:[#allocation2 + $0x78] sm:$0xf] %vm742_vm0, %v734_v44  ;;  %v901_v63 = vrot.slane %v899_v52, 4  ;;  %v904_v1 = vrot.slane %v902_v55, 5  ;;  %v3025_v8 = vor.u32 %v3201_v51, %v3024_v48 }
  0x82   : > { %v3911_v62 = vpack.c.b16 %v1460_v50, %v1459_v47  ;;  %798 = vst.msk [vmem:[#allocation2 + $0x80] sm:$0xf] %vm742_vm0, %v736_v57  ;;  %v727_v2 = vld [vmem:[%s3824_s25 + $0x44] sm:$0x1]  ;;  %v915_v4 = vrot.slane %v913_v60, 4  ;;  %v918_v5 = vrot.slane %v916_v61, 5  ;;  %v3925_v20 = vor.u32 %v3205_v59, %v3044_v58 }
  0x83   : > { %v729_v6 = vld [vmem:[%s3824_s25 + $0x4c] sm:$0x1]  ;;  %v779_v7 = vld [vmem:[#allocation2 + $0x54] sm:$0x1]  ;;  %v905_v9 = vor.u32 %v904_v1, %v901_v63  ;;  %v783_v11 = vld [vmem:[#allocation2 + $0x5c] sm:$0x1] }
  0x84   : > { %3036 = vmatmul.msk.bf16.vlgmr.msra.gmra.mxu2 %vm1392_vm4, %v3911_v62  ;;  %v780_v10 = vsel %vm3833_vm3, %v727_v2, %v779_v7  ;;  %v987_v12 = vld [vmem:[#allocation2 + $0x50] sm:$0xf]  ;;  %v988_v13 = vld [vmem:[#allocation2 + $0x58] sm:$0xf]  ;;  %v865_v14 = vld [vmem:[#allocation2 + $0x14] sm:$0x1]  ;;  %v919_v15 = vor.u32 %v918_v5, %v915_v4  ;;  %v784_v17 = vsel %vm3833_vm3, %v729_v6, %v783_v11 }
  0x85   : > { %781 = vst [vmem:[#allocation2 + $0x54] sm:$0x1] %v780_v10  ;;  %v1001_v18 = vshrl.u32 %v987_v12, 16  ;;  %v1004_v19 = vshll.u32 %v987_v12, 16  ;;  %1828 = vmatpush.bf16.msra.mxu2 %v3804_v37  ;;  %v866_v21 = vld [vmem:[#allocation2 + $0x1c] sm:$0x1] }
  0x86   : > { %v906_v22 = vrot.slane %v905_v9, 4  ;;  %v908_v24 = vshll.u32 %v865_v14, 16  ;;  %785 = vst [vmem:[#allocation2 + $0x5c] sm:$0x1] %v784_v17  ;;  %3017 = vmatmul.msk.bf16.gmra.mxu0 %vm1392_vm4, %v3915_v3  ;;  %v920_v25 = vrot.slane %v919_v15, 4  ;;  %v922_v26 = vshll.u32 %v866_v21, 16 }
  0x87   : > { %v1003_v27 = vrot.slane %v1001_v18, 4  ;;  %v1006_v28 = vrot.slane %v1004_v19, 5  ;;  %v1015_v30 = vshrl.u32 %v988_v13, 16  ;;  %v1018_v31 = vshll.u32 %v988_v13, 16  ;;  %v738_v44 = vld [vmem:[%s3824_s25 + $0x70] sm:$0xf] }
  0x88   : > { %v910_v29 = vrot.slane %v908_v24, 5  ;;  %3031 = vmatmul.msk.bf16.gmra.mxu1 %vm1392_vm4, %v3025_v8  ;;  %v924_v33 = vrot.slane %v922_v26, 5  ;;  %v740_v45 = vld [vmem:[%s3824_s25 + $0x78] sm:$0xf]  ;;  %802 = vst.msk [vmem:[#allocation2 + $0x88] sm:$0xf] %vm742_vm0, %v738_v44 }
  0x89   : > { %v1007_v34 = vor.u32 %v1006_v28, %v1003_v27  ;;  %v1017_v41 = vrot.slane %v1015_v30, 4  ;;  %v1020_v42 = vrot.slane %v1018_v31, 5  ;;  %v731_v51 = vld [vmem:[%s3824_s25 + $0x54] sm:$0x1]  ;;  %v3054_v52 = vld [vmem:[#allocation2 + $0x78] sm:$0xf] }
  0x8a   : > { %v911_v35 = vsel %vm3894_vm7, %v906_v22, %v910_v29  ;;  %3051 = vmatmul.msk.bf16.gmra.mxu3 %vm1392_vm4, %v3925_v20  ;;  %v925_v43 = vsel %vm3894_vm7, %v920_v25, %v924_v33  ;;  %v3206_v55 = vld [vmem:[#allocation2 + $0x7c] sm:$0xf0]  ;;  %806 = vst.msk [vmem:[#allocation2 + $0x90] sm:$0xf] %vm742_vm0, %v740_v45  ;;  %v733_v63 = vld [vmem:[%s3824_s25 + $0x5c] sm:$0x1] }
  0x8b   : > { %v1461_v47 = vunpack.c.l.b16 %v911_v35  ;;  %v1462_v48 = vunpack.c.l.b16 %v925_v43  ;;  %v1021_v50 = vor.u32 %v1020_v42, %v1017_v41  ;;  %v1008_v58 = vrot.slane %v1007_v34, 4  ;;  %v787_v1 = vld [vmem:[#allocation2 + $0x64] sm:$0x1]  ;;  %v791_v5 = vld [vmem:[#allocation2 + $0x6c] sm:$0x1]  ;;  %s696_s12 = scalar_select %p695_p5, %s4463_s27, 3 }
  0x8c   : > { %v996_v49 = vld [vmem:[#allocation2 + $0x54] sm:$0x1]  ;;  %v788_v4 = vsel %vm3833_vm3, %v731_v51, %v787_v1  ;;  %v989_v6 = vld [vmem:[#allocation2 + $0x60] sm:$0xf]  ;;  %v792_v9 = vsel %vm3833_vm3, %v733_v63, %v791_v5  ;;  %v990_v10 = vld [vmem:[#allocation2 + $0x68] sm:$0xf]  ;;  %v3959_v17 = vor.u32 %v3206_v55, %v3054_v52 }
  0x8d   : > { %v997_v57 = vld [vmem:[#allocation2 + $0x5c] sm:$0x1]  ;;  %v1010_v59 = vshll.u32 %v996_v49, 16  ;;  %v1022_v60 = vrot.slane %v1021_v50, 4  ;;  %v3953_v7 = vpack.c.b16 %v1462_v48, %v1461_v47  ;;  %789 = vst [vmem:[#allocation2 + $0x64] sm:$0x1] %v788_v4 }
  0x8e   : > { %v1024_v61 = vshll.u32 %v997_v57, 16  ;;  %v1029_v11 = vshrl.u32 %v989_v6, 16  ;;  %793 = vst [vmem:[#allocation2 + $0x6c] sm:$0x1] %v792_v9  ;;  %v1032_v13 = vshll.u32 %v989_v6, 16  ;;  %v1043_v14 = vshrl.u32 %v990_v10, 16 }
  0x8f   : > { %v1012_v2 = vrot.slane %v1010_v59, 5  ;;  %v1046_v15 = vshll.u32 %v990_v10, 16  ;;  %v812_v22 = vld [vmem:[%s3964_s13 + $0x8] sm:$0xf]  ;;  %v3088_v25 = vld [vmem:[#allocation2 + $0x30] sm:$0xf] }
  0x90   : > { %v1026_v8 = vrot.slane %v1024_v61, 5  ;;  %v1031_v21 = vrot.slane %v1029_v11, 4  ;;  %v1034_v26 = vrot.slane %v1032_v13, 5  ;;  %v1045_v27 = vrot.slane %v1043_v14, 4  ;;  %v3210_v29 = vld [vmem:[#allocation2 + $0x34] sm:$0xf0] }
  0x91   : > { %v1013_v12 = vsel %vm3894_vm7, %v1008_v58, %v1012_v2  ;;  %v1048_v28 = vrot.slane %v1046_v15, 5  ;;  %823 = vst.msk [vmem:[#allocation2 + $0x48] sm:$0xf] %vm742_vm0, %v812_v22  ;;  %v810_v30 = vld [vmem:[%s3964_s13] sm:$0xf]  ;;  %v3976_v42 = vor.u32 %v3210_v29, %v3088_v25  ;;  %s3001_s15 = sshll.u32 %s696_s12, 3 }
  0x92   : > { %v1027_v18 = vsel %vm3894_vm7, %v1022_v60, %v1026_v8  ;;  %v1590_v19 = vunpack.c.l.b16 %v1013_v12  ;;  %819 = vst.msk [vmem:[#allocation2 + $0x20] sm:$0xf] %vm742_vm0, %v810_v30  ;;  %v1117_v33 = vld [vmem:[#allocation2 + $0x8] sm:$0xf]  ;;  %v1035_v34 = vor.u32 %v1034_v26, %v1031_v21  ;;  %v1118_v41 = vld [vmem:[#allocation2 + $0x10] sm:$0xf]  ;;  %s698_s20 = scalar_lea.vmem %s4564_s16, %s3001_s15 }
  0x93   : > { %v1591_v24 = vunpack.c.l.b16 %v1027_v18  ;;  %v1049_v35 = vor.u32 %v1048_v28, %v1045_v27  ;;  %v1131_v47 = vshrl.u32 %v1117_v33, 16  ;;  %v1134_v48 = vshll.u32 %v1117_v33, 16  ;;  %v719_v52 = vld [vmem:[%s3824_s25 + $0x24] sm:$0x1]  ;;  %v1126_v59 = vld [vmem:[#allocation2 + $0xc] sm:$0x1] }
  0x94   : > { %3037 = vmatmul.msk.bf16.gmra.mxu2 %vm1392_vm4, %v3953_v7  ;;  %v998_v43 = vld [vmem:[#allocation2 + $0x64] sm:$0x1]  ;;  %v1145_v50 = vshrl.u32 %v1118_v41, 16  ;;  %v1148_v51 = vshll.u32 %v1118_v41, 16  ;;  %v1036_v55 = vrot.slane %v1035_v34, 4  ;;  %s4565_s0 = sld [smem:[#allocation15_spill]] }
  0x95   : > { %v3971_v31 = vpack.c.b16 %v1591_v24, %v1590_v19  ;;  %v999_v44 = vld [vmem:[#allocation2 + $0x6c] sm:$0x1]  ;;  %v1038_v45 = vshll.u32 %v998_v43, 16  ;;  %v1050_v58 = vrot.slane %v1049_v35, 4  ;;  %v3074_v60 = vld [vmem:[#allocation2 + $0x8] sm:$0xf] }
  0x96   : > { %3064 = vmatmul.msk.bf16.vlgmr.msrb.gmra.mxu0 %vm1392_vm4, %v3959_v17  ;;  %v1052_v49 = vshll.u32 %v999_v44, 16  ;;  %v3208_v61 = vld [vmem:[#allocation2 + $0xc] sm:$0xf0]  ;;  %v1127_v1 = vld [vmem:[#allocation2 + $0x14] sm:$0x1]  ;;  %v1133_v5 = vrot.slane %v1131_v47, 4 }
  0x97   : > { %1882 = vmatpush.bf16.msrb.mxu0 %v3810_v38  ;;  %v1040_v57 = vrot.slane %v1038_v45, 5  ;;  %v721_v2 = vld [vmem:[%s3824_s25 + $0x2c] sm:$0x1]  ;;  %v1136_v6 = vrot.slane %v1134_v48, 5  ;;  %v767_v9 = vld [vmem:[#allocation2 + $0x34] sm:$0x1]  ;;  %v3996_v27 = vor.u32 %v3208_v61, %v3074_v60 }
  0x98   : > { %3070 = vmatmul.msk.bf16.vlgmr.msrb.gmra.mxu1 %vm1392_vm4, %v3971_v31  ;;  %v1054_v63 = vrot.slane %v1052_v49, 5  ;;  %v763_v4 = vld [vmem:[#allocation2 + $0x2c] sm:$0x1]  ;;  %v859_v10 = vld [vmem:[#allocation2 + $0x28] sm:$0xf]  ;;  %v1147_v11 = vrot.slane %v1145_v50, 4  ;;  %v768_v21 = vsel %vm3833_vm3, %v721_v2, %v767_v9 }
  0x99   : > { %1905 = vmatpush.bf16.msrb.mxu1 %v3850_v53  ;;  %v764_v8 = vsel %vm3833_vm3, %v719_v52, %v763_v4  ;;  %v1150_v12 = vrot.slane %v1148_v51, 5  ;;  %v860_v13 = vld [vmem:[#allocation2 + $0x30] sm:$0xf]  ;;  %v3058_v14 = vld [vmem:[#allocation2 + $0x88] sm:$0xf]  ;;  %v1041_v15 = vsel %vm3894_vm7, %v1036_v55, %v1040_v57  ;;  %v1140_v19 = vshll.u32 %v1126_v59, 16 }
  0x9a   : > { %3098 = vmatmul.msk.bf16.vlgmr.msrb.gmra.mxu3 %vm1392_vm4, %v3976_v42  ;;  %765 = vst [vmem:[#allocation2 + $0x2c] sm:$0x1] %v764_v8  ;;  %v1055_v18 = vsel %vm3894_vm7, %v1050_v58, %v1054_v63  ;;  %v811_v22 = vld [vmem:[%s3964_s13 + $0x4] sm:$0x1]  ;;  %v931_v24 = vshrl.u32 %v859_v10, 16  ;;  %v934_v25 = vshll.u32 %v859_v10, 16  ;;  %v1592_v34 = vunpack.c.l.b16 %v1041_v15  ;;  %s706_s5 = scalar_lea.vmem %s4565_s0, %s3001_s15 }
  0x9b   : > { %1963 = vmatpush.bf16.msrb.mxu3 %v3820_v40  ;;  %769 = vst [vmem:[#allocation2 + $0x34] sm:$0x1] %v768_v21  ;;  %v820_v26 = vld [vmem:[#allocation2 + $0x24] sm:$0x1]  ;;  %v3207_v28 = vld [vmem:[#allocation2 + $0x8c] sm:$0xf0]  ;;  %v1593_v35 = vunpack.c.l.b16 %v1055_v18  ;;  %v1137_v41 = vor.u32 %v1136_v6, %v1133_v5  ;;  %v1151_v43 = vor.u32 %v1150_v12, %v1147_v11 }
  0x9c   : > { %v1154_v29 = vshll.u32 %v1127_v1, 16  ;;  %v945_v30 = vshrl.u32 %v860_v13, 16  ;;  %v948_v33 = vshll.u32 %v860_v13, 16  ;;  %v3092_v44 = vld [vmem:[#allocation2 + $0x40] sm:$0xf]  ;;  %v1142_v47 = vrot.slane %v1140_v19, 5 }
  0x9d   : > { %v3211_v45 = vld [vmem:[#allocation2 + $0x44] sm:$0xf0]  ;;  %v821_v48 = vsel %vm3833_vm3, %v811_v22, %v820_v26  ;;  %v4000_v49 = vor.u32 %v3207_v28, %v3058_v14  ;;  %v933_v50 = vrot.slane %v931_v24, 4  ;;  %v936_v51 = vrot.slane %v934_v25, 5  ;;  %v723_v52 = vld [vmem:[%s3824_s25 + $0x34] sm:$0x1] }
  0x9e   : > { %822 = vst [vmem:[#allocation2 + $0x24] sm:$0x1] %v821_v48  ;;  %v947_v57 = vrot.slane %v945_v30, 4  ;;  %v950_v58 = vrot.slane %v948_v33, 5  ;;  %v725_v59 = vld [vmem:[%s3824_s25 + $0x3c] sm:$0x1]  ;;  %v4006_v60 = vpack.c.b16 %v1593_v35, %v1592_v34  ;;  %v4013_v9 = vor.u32 %v3211_v45, %v3092_v44 }
  0x9f   : > { %v1138_v61 = vrot.slane %v1137_v41, 4  ;;  %v1152_v63 = vrot.slane %v1151_v43, 4  ;;  %v1156_v1 = vrot.slane %v1154_v29, 5  ;;  %v771_v2 = vld [vmem:[#allocation2 + $0x3c] sm:$0x1]  ;;  %v937_v10 = vor.u32 %v936_v51, %v933_v50  ;;  %s3216_s26 = sshll.u32 (%p3661_p12), %s4463_s27, 4 }
  0xa0   : > { %v1119_v5 = vld [vmem:[#allocation2 + $0x18] sm:$0xf]  ;;  %v772_v6 = vsel %vm3833_vm3, %v723_v52, %v771_v2  ;;  %v775_v8 = vld [vmem:[#allocation2 + $0x44] sm:$0x1]  ;;  %v1120_v12 = vld [vmem:[#allocation2 + $0x20] sm:$0xf]  ;;  %v951_v14 = vor.u32 %v950_v58, %v947_v57 }
  0xa1   : > { %v926_v55 = vld [vmem:[#allocation2 + $0x2c] sm:$0x1]  ;;  %773 = vst [vmem:[#allocation2 + $0x3c] sm:$0x1] %v772_v6  ;;  %v776_v13 = vsel %vm3833_vm3, %v725_v59, %v775_v8  ;;  %v1143_v18 = vsel %vm3894_vm7, %v1138_v61, %v1142_v47  ;;  %v1157_v19 = vsel %vm3894_vm7, %v1152_v63, %v1156_v1  ;;  %v1159_v21 = vshrl.u32 %v1119_v5, 16 }
  0xa2   : > { %v927_v4 = vld [vmem:[#allocation2 + $0x34] sm:$0x1]  ;;  %v940_v11 = vshll.u32 %v926_v55, 16  ;;  %777 = vst [vmem:[#allocation2 + $0x44] sm:$0x1] %v776_v13  ;;  %v1162_v22 = vshll.u32 %v1119_v5, 16  ;;  %v1721_v41 = vunpack.c.l.b16 %v1143_v18  ;;  %v1722_v43 = vunpack.c.l.b16 %v1157_v19 }
  0xa3   : > { %v954_v15 = vshll.u32 %v927_v4, 16  ;;  %v1173_v24 = vshrl.u32 %v1120_v12, 16  ;;  %v1176_v25 = vshll.u32 %v1120_v12, 16  ;;  %v3078_v26 = vld [vmem:[#allocation2 + $0x18] sm:$0xf]  ;;  %v938_v28 = vrot.slane %v937_v10, 4 }
  0xa4   : > { %3084 = vmatmul.msk.bf16.vlgmr.msrb.gmra.mxu2 %vm1392_vm4, %v3996_v27  ;;  %v942_v29 = vrot.slane %v940_v11, 5  ;;  %v3209_v30 = vld [vmem:[#allocation2 + $0x1c] sm:$0xf0]  ;;  %v952_v33 = vrot.slane %v951_v14, 4  ;;  %v861_v35 = vld [vmem:[#allocation2 + $0x38] sm:$0xf]  ;;  %v4033_v6 = vpack.c.b16 %v1722_v43, %v1721_v41 }
  0xa5   : > { %1940 = vmatpush.bf16.msrb.mxu2 %v3863_v56  ;;  %v956_v34 = vrot.slane %v954_v15, 5  ;;  %v862_v44 = vld [vmem:[#allocation2 + $0x40] sm:$0xf]  ;;  %v1128_v45 = vld [vmem:[#allocation2 + $0x1c] sm:$0x1]  ;;  %v1161_v47 = vrot.slane %v1159_v21, 4  ;;  %v4025_v52 = vor.u32 %v3209_v30, %v3078_v26 }
  0xa6   : > { %3065 = vmatmul.msk.bf16.gmra.mxu0 %vm1392_vm4, %v4000_v49  ;;  %v1164_v48 = vrot.slane %v1162_v22, 5  ;;  %v1175_v50 = vrot.slane %v1173_v24, 4  ;;  %v1178_v51 = vrot.slane %v1176_v25, 5  ;;  %v943_v55 = vsel %vm3894_vm7, %v938_v28, %v942_v29  ;;  %v1129_v59 = vld [vmem:[#allocation2 + $0x24] sm:$0x1] }
  0xa7   : > { %v959_v57 = vshrl.u32 %v861_v35, 16  ;;  %v957_v58 = vsel %vm3894_vm7, %v952_v33, %v956_v34  ;;  %v962_v61 = vshll.u32 %v861_v35, 16  ;;  %v973_v63 = vshrl.u32 %v862_v44, 16  ;;  %v735_v4 = vld [vmem:[%s3824_s25 + $0x64] sm:$0x1] }
  0xa8   : > { %3071 = vmatmul.msk.bf16.gmra.mxu1 %vm1392_vm4, %v4006_v60  ;;  %v976_v1 = vshll.u32 %v862_v44, 16  ;;  %v1168_v2 = vshll.u32 %v1128_v45, 16  ;;  %v737_v5 = vld [vmem:[%s3824_s25 + $0x6c] sm:$0x1]  ;;  %v1840_v8 = vunpack.c.l.b16 %v943_v55  ;;  %v1165_v10 = vor.u32 %v1164_v48, %v1161_v47  ;;  %v795_v12 = vld [vmem:[#allocation2 + $0x7c] sm:$0x1] }
  0xa9   : > { %v1179_v11 = vor.u32 %v1178_v51, %v1175_v50  ;;  %v799_v13 = vld [vmem:[#allocation2 + $0x84] sm:$0x1]  ;;  %v1841_v14 = vunpack.c.l.b16 %v957_v58  ;;  %v1182_v15 = vshll.u32 %v1129_v59, 16  ;;  %v796_v18 = vsel %vm3833_vm3, %v735_v4, %v795_v12  ;;  %v928_v26 = vld [vmem:[#allocation2 + $0x3c] sm:$0x1] }
  0xaa   : > { %3099 = vmatmul.msk.bf16.gmra.mxu3 %vm1392_vm4, %v4013_v9  ;;  %v800_v19 = vsel %vm3833_vm3, %v737_v5, %v799_v13  ;;  %v961_v21 = vrot.slane %v959_v57, 4  ;;  %v964_v22 = vrot.slane %v962_v61, 5  ;;  %v975_v24 = vrot.slane %v973_v63, 4  ;;  %797 = vst [vmem:[#allocation2 + $0x7c] sm:$0x1] %v796_v18 }
  0xab   : > { %v978_v25 = vrot.slane %v976_v1, 5  ;;  %v929_v28 = vld [vmem:[#allocation2 + $0x44] sm:$0x1]  ;;  %801 = vst [vmem:[#allocation2 + $0x84] sm:$0x1] %v800_v19  ;;  %v1170_v29 = vrot.slane %v1168_v2, 5  ;;  %v1844_v30 = vpack.c.b16 %v1841_v14, %v1840_v8 }
  0xac   : > { %v1166_v33 = vrot.slane %v1165_v10, 4  ;;  %v1180_v34 = vrot.slane %v1179_v11, 4  ;;  %v1184_v35 = vrot.slane %v1182_v15, 5  ;;  %v965_v41 = vor.u32 %v964_v22, %v961_v21  ;;  %v739_v63 = vld [vmem:[%s3824_s25 + $0x74] sm:$0x1] }
  0xad   : > { %v968_v43 = vshll.u32 %v928_v26, 16  ;;  %v979_v44 = vor.u32 %v978_v25, %v975_v24  ;;  %v982_v45 = vshll.u32 %v929_v28, 16  ;;  %v741_v1 = vld [vmem:[%s3824_s25 + $0x7c] sm:$0x1]  ;;  %v803_v2 = vld [vmem:[#allocation2 + $0x8c] sm:$0x1] }
  0xae   : > { %v1171_v47 = vsel %vm3894_vm7, %v1166_v33, %v1170_v29  ;;  %v1185_v48 = vsel %vm3894_vm7, %v1180_v34, %v1184_v35  ;;  %v966_v50 = vrot.slane %v965_v41, 4  ;;  %v804_v4 = vsel %vm3833_vm3, %v739_v63, %v803_v2  ;;  %v807_v5 = vld [vmem:[#allocation2 + $0x94] sm:$0x1]  ;;  %v992_v12 = vld [vmem:[#allocation2 + $0x78] sm:$0xf] }
  0xaf   : > { %v970_v51 = vrot.slane %v968_v43, 5  ;;  %v980_v55 = vrot.slane %v979_v44, 4  ;;  %v984_v57 = vrot.slane %v982_v45, 5  ;;  %v1723_v58 = vunpack.c.l.b16 %v1171_v47  ;;  %805 = vst [vmem:[#allocation2 + $0x8c] sm:$0x1] %v804_v4 }
  0xb0   : > { %v1724_v59 = vunpack.c.l.b16 %v1185_v48  ;;  %v993_v13 = vld [vmem:[#allocation2 + $0x80] sm:$0xf]  ;;  %v1061_v15 = vshrl.u32 %v992_v12, 16  ;;  %v1064_v18 = vshll.u32 %v992_v12, 16  ;;  %v994_v43 = vld [vmem:[#allocation2 + $0x88] sm:$0xf] }
  0xb1   : > { %v985_v61 = vsel %vm3894_vm7, %v980_v55, %v984_v57  ;;  %v1075_v19 = vshrl.u32 %v993_v13, 16  ;;  %v1078_v21 = vshll.u32 %v993_v13, 16  ;;  %v1056_v26 = vld [vmem:[#allocation2 + $0x7c] sm:$0x1]  ;;  %v995_v44 = vld [vmem:[#allocation2 + $0x90] sm:$0xf] }
  0xb2   : > { %v4061_v8 = vpack.c.b16 %v1724_v59, %v1723_v58  ;;  %v1843_v11 = vunpack.c.l.b16 %v985_v61  ;;  %v1063_v22 = vrot.slane %v1061_v15, 4  ;;  %v1057_v28 = vld [vmem:[#allocation2 + $0x84] sm:$0x1]  ;;  %v1070_v29 = vshll.u32 %v1056_v26, 16  ;;  %v824_v57 = vld [vmem:[#allocation2 + $0x4c] sm:$0x1] }
  0xb3   : > { %v1077_v24 = vrot.slane %v1075_v19, 4  ;;  %v1080_v25 = vrot.slane %v1078_v21, 5  ;;  %v1084_v33 = vshll.u32 %v1057_v28, 16  ;;  %v1089_v45 = vshrl.u32 %v994_v43, 16  ;;  %v1122_v59 = vld [vmem:[#allocation2 + $0x30] sm:$0xf] }
  0xb4   : > { %3085 = vmatmul.msk.bf16.gmra.mxu2 %vm1392_vm4, %v4025_v52  ;;  %v1072_v35 = vrot.slane %v1070_v29, 5  ;;  %v1092_v47 = vshll.u32 %v994_v43, 16  ;;  %v1106_v55 = vshll.u32 %v995_v44, 16  ;;  %v1187_v26 = vld [vmem:[#allocation2 + $0x3c] sm:$0x1] }
  0xb6   : > { %3104 = vmatmul.msk.bf16.vlgmr.msra.gmra.mxu0 %vm1392_vm4, %v4033_v6  ;;  %v1094_v2 = vrot.slane %v1092_v47, 5 }
  0xb7   : > { %1986 = vmatpush.bf16.msra.mxu0 %v3855_v54 }
  0xb8   : > { %3106 = vmatmul.msk.bf16.vlgmr.msra.gmra.mxu1 %vm1392_vm4, %v3911_v62  ;;  %v971_v62 = vsel %vm3894_vm7, %v966_v50, %v970_v51  ;;  %v1103_v51 = vshrl.u32 %v995_v44, 16 }
  0xb9   : > { %2021 = vmatpush.bf16.msra.mxu1 %v3932_v32  ;;  %v1842_v10 = vunpack.c.l.b16 %v971_v62  ;;  %v1123_v62 = vld [vmem:[#allocation2 + $0x38] sm:$0xf] }
  0xba   : > { %3110 = vmatmul.msk.bf16.vlgmr.msra.gmra.mxu3 %vm1392_vm4, %v1844_v30  ;;  %v1081_v30 = vor.u32 %v1080_v25, %v1077_v24  ;;  %v1105_v4 = vrot.slane %v1103_v51, 4  ;;  %v1205_v12 = vshrl.u32 %v1123_v62, 16  ;;  %v1208_v13 = vshll.u32 %v1123_v62, 16  ;;  %v1186_v25 = vld [vmem:[#allocation2 + $0x34] sm:$0x1] }
  0xbb   : > { %2107 = vmatpush.bf16.msra.mxu3 %v3804_v37  ;;  %v808_v37 = vsel %vm3833_vm3, %v741_v1, %v807_v5  ;;  %v1845_v14 = vpack.c.b16 %v1843_v11, %v1842_v10  ;;  %v1058_v1 = vld [vmem:[#allocation2 + $0x8c] sm:$0x1]  ;;  %v1108_v5 = vrot.slane %v1106_v55, 5  ;;  %v1191_v11 = vshrl.u32 %v1122_v59, 16 }
  0xbc   : > { %809 = vst [vmem:[#allocation2 + $0x94] sm:$0x1] %v808_v37  ;;  %v1082_v41 = vrot.slane %v1081_v30, 4  ;;  %v1194_v37 = vshll.u32 %v1122_v59, 16  ;;  %v1098_v15 = vshll.u32 %v1058_v1, 16  ;;  %v1210_v24 = vrot.slane %v1208_v13, 5 }
  0xbd   : > { %v1193_v21 = vrot.slane %v1191_v11, 4 }
  0xbe   : > { %v1100_v28 = vrot.slane %v1098_v15, 5 }
  0xc3   : > { %v1059_v10 = vld [vmem:[#allocation2 + $0x94] sm:$0x1] }
  0xc4   : > { %3108 = vmatmul.msk.bf16.vlgmr.msra.gmra.mxu2 %vm1392_vm4, %v3875_v0  ;;  %v1066_v0 = vrot.slane %v1064_v18, 5  ;;  %v1109_v18 = vor.u32 %v1108_v5, %v1105_v4  ;;  %v1112_v19 = vshll.u32 %v1059_v10, 16  ;;  %v1188_v10 = vld [vmem:[#allocation2 + $0x44] sm:$0x1] }
  0xc5   : > { %2088 = vmatpush.bf16.msra.mxu2 %v3799_v36  ;;  %v1228_v15 = vshll.u32 %v1188_v10, 16  ;;  %v3374_v10 = vld [vmem:[%s4530_s2 + $0x20] sm:$0xff] }
  0xc6   : > { %3105 = vmatmul.msk.bf16.gmra.mxu0 %vm1392_vm4, %v4061_v8  ;;  %v1067_v36 = vor.u32 %v1066_v0, %v1063_v22  ;;  %v1196_v22 = vrot.slane %v1194_v37, 5  ;;  %v1207_v0 = vrot.slane %v1205_v12, 4  ;;  %v1114_v29 = vrot.slane %v1112_v19, 5 }
  0xc8   : > { %3107 = vmatmul.msk.bf16.gmra.mxu1 %vm1392_vm4, %v3953_v7  ;;  %v1068_v34 = vrot.slane %v1067_v36, 4  ;;  %v1086_v7 = vrot.slane %v1084_v33, 5  ;;  %v1110_v36 = vrot.slane %v1109_v18, 4  ;;  %v1197_v30 = vor.u32 %v1196_v22, %v1193_v21 }
  0xc9   : > { %v1200_v33 = vshll.u32 %v1186_v25, 16 }
  0xca   : > { %3111 = vmatmul.msk.bf16.gmra.mxu3 %vm1392_vm4, %v1845_v14  ;;  %v1073_v48 = vsel %vm3894_vm7, %v1068_v34, %v1072_v35  ;;  %v1087_v50 = vsel %vm3894_vm7, %v1082_v41, %v1086_v7  ;;  %v1211_v34 = vor.u32 %v1210_v24, %v1207_v0  ;;  %v1214_v35 = vshll.u32 %v1187_v26, 16 }
  0xcb   : > { %v1921_v61 = vunpack.c.l.b16 %v1073_v48  ;;  %v1922_v63 = vunpack.c.l.b16 %v1087_v50  ;;  %v1115_v7 = vsel %vm3894_vm7, %v1110_v36, %v1114_v29  ;;  %v1198_v43 = vrot.slane %v1197_v30, 4  ;;  %v1125_v48 = vld [vmem:[#allocation2 + $0x48] sm:$0xf] }
  0xcc   : > { %v1202_v44 = vrot.slane %v1200_v33, 5  ;;  %v1216_v47 = vrot.slane %v1214_v35, 5  ;;  %v1924_v51 = vunpack.c.l.b16 %v1115_v7  ;;  %v1233_v59 = vshrl.u32 %v1125_v48, 16 }
  0xcd   : > { %v4091_v14 = vpack.c.b16 %v1922_v63, %v1921_v61  ;;  %v1236_v62 = vshll.u32 %v1125_v48, 16  ;;  %v1230_v0 = vrot.slane %v1228_v15, 5 }
  0xce   : > { %v1203_v55 = vsel %vm3894_vm7, %v1198_v43, %v1202_v44  ;;  %v1235_v4 = vrot.slane %v1233_v59, 4 }
  0xcf   : > { %v2002_v63 = vunpack.c.l.b16 %v1203_v55  ;;  %v1238_v5 = vrot.slane %v1236_v62, 5 }
  0xd1   : > { %v1239_v18 = vor.u32 %v1238_v5, %v1235_v4  ;;  %v3373_v4 = vld [vmem:[%s4530_s2 + $0x10] sm:$0xff] }
  0xd3   : > { %v1240_v24 = vrot.slane %v1239_v18, 4 }
  0xd4   : > { %3109 = vmatmul.msk.bf16.gmra.mxu2 %vm1392_vm4, %v3915_v3  ;;  %v813_v3 = vld [vmem:[%s3964_s13 + $0xc] sm:$0x1] }
  0xd5   : > { %v825_v58 = vsel %vm3833_vm3, %v813_v3, %v824_v57 }
  0xd6   : > { %3112 = vmatmul.msk.bf16.vlgmr.msrb.gmra.mxu0 %vm1392_vm4, %v3959_v17  ;;  %826 = vst [vmem:[#allocation2 + $0x4c] sm:$0x1] %v825_v58 }
  0xd7   : > { %2126 = vmatpush.bf16.msrb.mxu0 %v3815_v39  ;;  %v1091_v39 = vrot.slane %v1089_v45, 4  ;;  %v1212_v45 = vrot.slane %v1211_v34, 4 }
  0xd8   : > { %3114 = vmatmul.msk.bf16.vlgmr.msrb.gmra.mxu1 %vm1392_vm4, %v3971_v31 }
  0xd9   : > { %2149 = vmatpush.bf16.msrb.mxu1 %v3810_v38  ;;  %v1095_v38 = vor.u32 %v1094_v2, %v1091_v39  ;;  %v1217_v3 = vsel %vm3894_vm7, %v1212_v45, %v1216_v47 }
  0xda   : > { %3118 = vmatmul.msk.bf16.vlgmr.msrb.gmra.mxu3 %vm1392_vm4, %v3976_v42  ;;  %v2003_v1 = vunpack.c.l.b16 %v1217_v3 }
  0xdb   : > { %2195 = vmatpush.bf16.msrb.mxu3 %v3863_v56  ;;  %v1096_v56 = vrot.slane %v1095_v38, 4 }
  0xdc   : > { %v4114_v12 = vpack.c.b16 %v2003_v1, %v2002_v63 }
  0xdd   : > { %v1101_v41 = vsel %vm3894_vm7, %v1096_v56, %v1100_v28  ;;  %v1189_v11 = vld [vmem:[#allocation2 + $0x4c] sm:$0x1] }
  0xde   : > { %v1923_v50 = vunpack.c.l.b16 %v1101_v41  ;;  %v1242_v19 = vshll.u32 %v1189_v11, 16  ;;  %v3371_v56 = vld [vmem:[%s4530_s2 + $0x8] sm:$0xff] }
  0xe0   : > { %v4110_v61 = vpack.c.b16 %v1924_v51, %v1923_v50  ;;  %v1244_v25 = vrot.slane %v1242_v19, 5  ;;  %v816_v19 = vld [vmem:[%s3964_s13 + $0x18] sm:$0xf] }
  0xe1   : > { %831 = vst.msk [vmem:[#allocation2 + $0x98] sm:$0xf] %vm742_vm0, %v816_v19 }
  0xe2   : > { %v1245_v29 = vsel %vm3894_vm7, %v1240_v24, %v1244_v25 }
  0xe4   : > { %3116 = vmatmul.msk.bf16.vlgmr.msrb.gmra.mxu2 %vm1392_vm4, %v4091_v14 }
  0xe5   : > { %2172 = vmatpush.bf16.msrb.mxu2 %v3850_v53  ;;  %v1124_v53 = vld [vmem:[#allocation2 + $0x40] sm:$0xf] }
  0xe6   : > { %3113 = vmatmul.msk.bf16.gmra.mxu0 %vm1392_vm4, %v4000_v49  ;;  %v1219_v57 = vshrl.u32 %v1124_v53, 16  ;;  %v1222_v58 = vshll.u32 %v1124_v53, 16 }
  0xe8   : > { %3115 = vmatmul.msk.bf16.gmra.mxu1 %vm1392_vm4, %v4006_v60  ;;  %v1221_v39 = vrot.slane %v1219_v57, 4  ;;  %v1224_v2 = vrot.slane %v1222_v58, 5 }
  0xea   : > { %3119 = vmatmul.msk.bf16.gmra.mxu3 %vm1392_vm4, %v4013_v9  ;;  %v1225_v38 = vor.u32 %v1224_v2, %v1221_v39  ;;  %v3372_v39 = vld [vmem:[%s4530_s2] sm:$0xff] }
  0xec   : > { %v1226_v22 = vrot.slane %v1225_v38, 4 }
  0xee   : > { %v1231_v36 = vsel %vm3894_vm7, %v1226_v22, %v1230_v0  ;;  %v828_v22 = vld [vmem:[#allocation2 + $0x74] sm:$0x1] }
  0xef   : > { %v2004_v33 = vunpack.c.l.b16 %v1231_v36 }
  0xf3   : > { %v1408_v37 = vpop.f32.mrf.mxu0 }
  0xf4   : > { %3117 = vmatmul.msk.bf16.gmra.mxu2 %vm1392_vm4, %v4110_v61 }
  0xf5   : > { %v1449_v13 = vpop.f32.mrf.mxu1 }
  0xf6   : > { %v1450_v21 = vadd.f32 %v1449_v13, %v1408_v37  ;;  %3120 = vmatmul.msk.bf16.vlgmr.msra.gmra.mxu0 %vm1392_vm4, %v4033_v6  ;;  %v814_v13 = vld [vmem:[%s3964_s13 + $0x10] sm:$0xf] }
  0xf7   : > { %2234 = vmatpush.bf16.msra.mxu0 %v3820_v40  ;;  %827 = vst.msk [vmem:[#allocation2 + $0x70] sm:$0xf] %vm742_vm0, %v814_v13 }
  0xf8   : > { %3122 = vmatmul.msk.bf16.vlgmr.msra.gmra.mxu1 %vm1392_vm4, %v4114_v12 }
  0xf9   : > { %2273 = vmatpush.bf16.msra.mxu1 %v3855_v54  ;;  %v2005_v54 = vunpack.c.l.b16 %v1245_v29 }
  0xfa   : > { %3126 = vmatmul.msk.bf16.vlgmr.msra.gmra.mxu3 %vm1392_vm4, %v3885_v16 }
  0xfb   : > { %v1410_v26 = vpop.f32.mrf.mxu0  ;;  %2375 = vmatpush.bf16.msra.mxu3 %v3371_v56  ;;  %v4133_v34 = vpack.c.b16 %v2005_v54, %v2004_v33 }
  0xfd   : > { %v1451_v28 = vpop.f32.mrf.mxu1  ;;  %v1531_v40 = vpop.f32.mrf.mxu3 }
  0xfe   : > { %v1452_v30 = vadd.f32 %v1451_v28, %v1410_v26  ;;  %v1247_v26 = vld [vmem:[#allocation2 + $0x58] sm:$0xf]  ;;  %v1248_v28 = vld [vmem:[#allocation2 + $0x60] sm:$0xf] }
  0xff   : > { %v1261_v54 = vshrl.u32 %v1247_v26, 16 }
 0x103   : > { %v1413_v16 = vpop.f32.mrf.mxu0 }
 0x104   : > { %3124 = vmatmul.msk.bf16.vlgmr.msra.gmra.mxu2 %vm1392_vm4, %v3959_v17 }
 0x105   : > { %2308 = vmatpush.bf16.msra.mxu2 %v3932_v32  ;;  %v1454_v35 = vpop.f32.mrf.mxu1  ;;  %v1533_v41 = vpop.f32.mrf.mxu3 }
 0x106   : > { %v1455_v43 = vadd.f32 %v1454_v35, %v1413_v16  ;;  %3121 = vmatmul.msk.bf16.gmra.mxu0 %vm1392_vm4, %v4061_v8  ;;  %v1264_v16 = vshll.u32 %v1247_v26, 16 }
 0x107   : > { %v1486_v7 = vpop.f32.mrf.mxu2 }
 0x108   : > { %v1496_v44 = vadd.f32 %v1486_v7, %v1450_v21  ;;  %3123 = vmatmul.msk.bf16.gmra.mxu1 %vm1392_vm4, %v4133_v34  ;;  %v815_v21 = vld [vmem:[%s3964_s13 + $0x14] sm:$0x1]  ;;  %v1278_v7 = vshll.u32 %v1248_v28, 16 }
 0x109   : > { %v829_v24 = vsel %vm3833_vm3, %v815_v21, %v828_v22 }
 0x10a   : > { %v1541_v45 = vadd.f32 %v1531_v40, %v1496_v44  ;;  %3127 = vmatmul.msk.bf16.gmra.mxu3 %vm1392_vm4, %v3925_v20  ;;  %830 = vst [vmem:[#allocation2 + $0x74] sm:$0x1] %v829_v24  ;;  %v3375_v40 = vld [vmem:[%s4530_s2 + $0x18] sm:$0xff]  ;;  %v1263_v44 = vrot.slane %v1261_v54, 4  ;;  %v1250_v24 = vld [vmem:[#allocation2 + $0x70] sm:$0xf] }
 0x10b   : > { %v1415_v47 = vpop.f32.mrf.mxu0  ;;  %v1303_v54 = vshrl.u32 %v1250_v24, 16 }
 0x10d   : > { %v1456_v53 = vpop.f32.mrf.mxu1  ;;  %v1536_v48 = vpop.f32.mrf.mxu3 }
 0x10e   : > { %v1457_v51 = vadd.f32 %v1456_v53, %v1415_v47  ;;  %v1256_v53 = vld [vmem:[#allocation2 + $0x5c] sm:$0x1] }
 0x10f   : > { %v1488_v50 = vpop.f32.mrf.mxu2 }
 0x110   : > { %v1497_v55 = vadd.f32 %v1488_v50, %v1452_v30  ;;  %v1280_v50 = vrot.slane %v1278_v7, 5 }
 0x112   : > { %v1542_v3 = vadd.f32 %v1533_v41, %v1497_v55  ;;  %v1275_v41 = vshrl.u32 %v1248_v28, 16  ;;  %v1257_v55 = vld [vmem:[#allocation2 + $0x64] sm:$0x1] }
 0x113   : > { %v1576_v57 = vpop.f32.mrf.mxu0 }
 0x114   : > { %3125 = vmatmul.msk.bf16.gmra.mxu2 %vm1392_vm4, %v4000_v49  ;;  %v1586_v58 = vadd.f32 %v1576_v57, %v1541_v45  ;;  %v1266_v45 = vrot.slane %v1264_v16, 5  ;;  %v1306_v16 = vshll.u32 %v1250_v24, 16 }
 0x115   : > { %v1617_v59 = vpop.f32.mrf.mxu1  ;;  %v1538_v62 = vpop.f32.mrf.mxu3 }
 0x116   : > { %v1627_v1 = vadd.f32 %v1617_v59, %v1586_v58  ;;  %3128 = vmatmul.msk.bf16.vlgmr.msrb.gmra.mxu0 %vm1392_vm4, %v3971_v31 }
 0x117   : > { %v1491_v63 = vpop.f32.mrf.mxu2  ;;  %2394 = vmatpush.bf16.msrb.mxu0 %v3372_v39 }
 0x118   : > { %v1498_v20 = vadd.f32 %v1491_v63, %v1455_v43  ;;  %3130 = vmatmul.msk.bf16.vlgmr.msrb.gmra.mxu1 %vm1392_vm4, %v3996_v27  ;;  %v1270_v63 = vshll.u32 %v1256_v53, 16 }
 0x119   : > { %2413 = vmatpush.bf16.msrb.mxu1 %v3373_v4  ;;  %v3148_v4 = vld [vmem:[#allocation2 + $0x80] sm:$0xf] }
 0x11a   : > { %v1543_v2 = vadd.f32 %v1536_v48, %v1498_v20  ;;  %3134 = vmatmul.msk.bf16.vlgmr.msrb.gmra.mxu3 %vm1392_vm4, %v4033_v6  ;;  %v1277_v48 = vrot.slane %v1275_v41, 4  ;;  %v3212_v20 = vld [vmem:[#allocation2 + $0x5c] sm:$0xf0] }
 0x11b   : > { %v1578_v5 = vpop.f32.mrf.mxu0  ;;  %2459 = vmatpush.bf16.msrb.mxu3 %v3374_v10 }
 0x11c   : > { %v1587_v11 = vadd.f32 %v1578_v5, %v1542_v3  ;;  %v1281_v39 = vor.u32 %v1280_v50, %v1277_v48  ;;  %v3214_v5 = vld [vmem:[#allocation2 + $0x84] sm:$0xf0]  ;;  %v1258_v48 = vld [vmem:[#allocation2 + $0x6c] sm:$0x1]  ;;  %v1259_v50 = vld [vmem:[#allocation2 + $0x74] sm:$0x1] }
 0x11d   : > { %v1619_v37 = vpop.f32.mrf.mxu1  ;;  %v1707_v27 = vpop.f32.mrf.mxu3  ;;  %v4179_v21 = vor.u32 %v3214_v5, %v3148_v4 }
 0x11e   : > { %v1628_v15 = vadd.f32 %v1619_v37, %v1587_v11 }
 0x11f   : > { %v1493_v38 = vpop.f32.mrf.mxu2 }
 0x120   : > { %v1499_v18 = vadd.f32 %v1493_v38, %v1457_v51  ;;  %v1282_v38 = vrot.slane %v1281_v39, 4  ;;  %v1298_v39 = vshll.u32 %v1258_v48, 16 }
 0x122   : > { %v1544_v0 = vadd.f32 %v1538_v62, %v1499_v18  ;;  %v1267_v62 = vor.u32 %v1266_v45, %v1263_v44 }
 0x123   : > { %v1581_v25 = vpop.f32.mrf.mxu0 }
 0x124   : > { %3132 = vmatmul.msk.bf16.vlgmr.msrb.gmra.mxu2 %vm1392_vm4, %v3976_v42  ;;  %v1588_v56 = vadd.f32 %v1581_v25, %v1543_v2  ;;  %v1284_v2 = vshll.u32 %v1257_v55, 16  ;;  %v1268_v37 = vrot.slane %v1267_v62, 4  ;;  %v4186_v25 = vld [vmem:[%s4531_s3] ss:$0 sm:$0xff]  ;;  %v1308_v55 = vrot.slane %v1306_v16, 5 }
 0x125   : > { %2436 = vmatpush.bf16.msrb.mxu2 %v3375_v40  ;;  %v1622_v36 = vpop.f32.mrf.mxu1  ;;  %v1709_v29 = vpop.f32.mrf.mxu3 }
 0x126   : > { %v1629_v33 = vadd.f32 %v1622_v36, %v1588_v56  ;;  %3129 = vmatmul.msk.bf16.gmra.mxu0 %vm1392_vm4, %v4006_v60  ;;  %v1286_v18 = vrot.slane %v1284_v2, 5  ;;  %v1312_v2 = vshll.u32 %v1259_v50, 16 }
 0x127   : > { %v1662_v30 = vpop.f32.mrf.mxu2 }
 0x128   : > { %v1672_v35 = vadd.f32 %v1662_v30, %v1627_v1  ;;  %3131 = vmatmul.msk.bf16.gmra.mxu1 %vm1392_vm4, %v4025_v52  ;;  %v3138_v52 = vld [vmem:[#allocation2 + $0x58] sm:$0xf]  ;;  %v1287_v40 = vsel %vm3894_vm7, %v1282_v38, %v1286_v18  ;;  %v3376_v30 = vld [vmem:[%s4530_s2 + $0x28] sm:$0xff] }
 0x129   : > { %v3139_v11 = vor.u32 %v3212_v20, %v3138_v52  ;;  %v3142_v52 = vld [vmem:[#allocation2 + $0x68] sm:$0xf] }
 0x12a   : > { %v1717_v43 = vadd.f32 %v1707_v27, %v1672_v35  ;;  %3135 = vmatmul.msk.bf16.gmra.mxu3 %vm1392_vm4, %v4061_v8  ;;  %v1272_v27 = vrot.slane %v1270_v63, 5 }
 0x12b   : > { %v1583_v47 = vpop.f32.mrf.mxu0 }
 0x12c   : > { %v1589_v51 = vadd.f32 %v1583_v47, %v1544_v0  ;;  %v1273_v56 = vsel %vm3894_vm7, %v1268_v37, %v1272_v27  ;;  %v3215_v37 = vld [vmem:[#allocation2 + $0x94] sm:$0xf0] }
 0x12d   : > { %v1624_v3 = vpop.f32.mrf.mxu1  ;;  %v1712_v57 = vpop.f32.mrf.mxu3  ;;  %v2289_v7 = vunpack.c.l.b16 %v1273_v56 }
 0x12e   : > { %v1630_v59 = vadd.f32 %v1624_v3, %v1589_v51  ;;  %v1305_v51 = vrot.slane %v1303_v54, 4 }
 0x12f   : > { %v1664_v58 = vpop.f32.mrf.mxu2 }
 0x130   : > { %v1673_v1 = vadd.f32 %v1664_v58, %v1628_v15  ;;  %v1249_v15 = vld [vmem:[#allocation2 + $0x68] sm:$0xf]  ;;  %v1309_v27 = vor.u32 %v1308_v55, %v1305_v51 }
 0x131   : > { %v1289_v36 = vshrl.u32 %v1249_v15, 16 }
 0x132   : > { %v1718_v10 = vadd.f32 %v1709_v29, %v1673_v1  ;;  %v1292_v29 = vshll.u32 %v1249_v15, 16 }
 0x133   : > { %v1748_v13 = vpop.f32.mrf.mxu0  ;;  %v1291_v45 = vrot.slane %v1289_v36, 4  ;;  %v1310_v36 = vrot.slane %v1309_v27, 4 }
 0x134   : > { %3133 = vmatmul.msk.bf16.gmra.mxu2 %vm1392_vm4, %v4013_v9  ;;  %v1758_v19 = vadd.f32 %v1748_v13, %v1717_v43  ;;  %v2290_v43 = vunpack.c.l.b16 %v1287_v40  ;;  %v1294_v47 = vrot.slane %v1292_v29, 5  ;;  %v1300_v40 = vrot.slane %v1298_v39, 5 }
 0x135   : > { %v4181_v22 = vpop.f32.mrf.mxu1  ;;  %v1714_v0 = vpop.f32.mrf.mxu3  ;;  %v1314_v29 = vrot.slane %v1312_v2, 5 }
 0x136   : > { %3144 = vmatmul.msk.bf16.vlgmr.msra.gmra.mxu0 %vm1392_vm4, %v3139_v11  ;;  %v4202_v41 = vadd.f32 %v4186_v25, %v1758_v19  ;;  %v4212_v63 = vpack.c.b16 %v2290_v43, %v2289_v7  ;;  %v1295_v20 = vor.u32 %v1294_v47, %v1291_v45  ;;  %v3152_v11 = vld [vmem:[#allocation2 + $0x90] sm:$0xf] }
 0x137   : > { %v1667_v26 = vpop.f32.mrf.mxu2  ;;  %2482 = vmatpush.bf16.msra.mxu0 %v3376_v30  ;;  %v1315_v45 = vsel %vm3894_vm7, %v1310_v36, %v1314_v29  ;;  %v1253_v36 = vld [vmem:[#allocation2 + $0x88] sm:$0xf] }
 0x138   : > { %v1674_v28 = vadd.f32 %v1667_v26, %v1629_v33  ;;  %3154 = vmatmul.msk.bf16.vlgmr.msra.gmra.mxu1 %vm1392_vm4, %v4179_v21  ;;  %v3377_v33 = vld [vmem:[%s4530_s2 + $0x30] sm:$0xff]  ;;  %v1784_v58 = vmul.f32 %v4202_v41, %v4202_v41  ;;  %v1770_v4 = vsel %vm1769_vm8, %v4202_v41, 0.0  ;;  %v4224_v26 = vor.u32 %v3215_v37, %v3152_v11 }
 0x139   : > { %2505 = vmatpush.bf16.msra.mxu1 %v3377_v33  ;;  %v1296_v56 = vrot.slane %v1295_v20, 4  ;;  %v2292_v55 = vunpack.c.l.b16 %v1315_v45 }
 0x13a   : > { %v1719_v35 = vadd.f32 %v1712_v57, %v1674_v28  ;;  %3158 = vmatmul.msk.bf16.vlgmr.msra.gmra.mxu3 %vm1392_vm4, %v3971_v31 }
 0x13b   : > { %v1750_v44 = vpop.f32.mrf.mxu0  ;;  %2563 = vmatpush.bf16.msra.mxu3 %v3932_v32  ;;  %v3213_v32 = vld [vmem:[#allocation2 + $0x6c] sm:$0xf0] }
 0x13c   : > { %v1759_v53 = vadd.f32 %v1750_v44, %v1718_v10  ;;  %v3143_v19 = vor.u32 %v3213_v32, %v3142_v52  ;;  %v1301_v44 = vsel %vm3894_vm7, %v1296_v56, %v1300_v40  ;;  %v1252_v56 = vld [vmem:[#allocation2 + $0x80] sm:$0xf] }
 0x13d   : > { %v1813_v3 = vpop.f32.mrf.mxu1  ;;  %v1861_v57 = vpop.f32.mrf.mxu3  ;;  %v2291_v51 = vunpack.c.l.b16 %v1301_v44 }
 0x13e   : > { %v4210_v31 = vadd.f32 %v4186_v25, %v1759_v53 }
 0x13f   : > { %v1669_v62 = vpop.f32.mrf.mxu2  ;;  %v4250_v39 = vpack.c.b16 %v2292_v55, %v2291_v51 }
 0x140   : > { %v1675_v1 = vadd.f32 %v1669_v62, %v1630_v59  ;;  %v1771_v5 = vsel %vm1769_vm8, %v4210_v31, 0.0  ;;  %v1785_v10 = vmul.f32 %v4210_v31, %v4210_v31  ;;  %v1788_v59 = vsel %vm1769_vm8, %v1784_v58, 0.0 }
 0x141   : > { %v1772_v13 = vadd.f32 %v1771_v5, %v1770_v4 }
 0x142   : > { %v1720_v38 = vadd.f32 %v1714_v0, %v1675_v1  ;;  %v1789_v18 = vsel %vm1769_vm8, %v1785_v10, 0.0  ;;  %v3378_v0 = vld [vmem:[%s4530_s2 + $0x38] sm:$0xff] }
 0x143   : > { %v1790_v15 = vadd.f32 %v1789_v18, %v1788_v59  ;;  %v1753_v24 = vpop.f32.mrf.mxu0 }
 0x144   : > { %3156 = vmatmul.msk.bf16.vlgmr.msra.gmra.mxu2 %vm1392_vm4, %v4212_v63  ;;  %v1760_v28 = vadd.f32 %v1753_v24, %v1719_v35 }
 0x145   : > { %2528 = vmatpush.bf16.msra.mxu2 %v3378_v0  ;;  %v1816_v30 = vpop.f32.mrf.mxu1  ;;  %v1863_v54 = vpop.f32.mrf.mxu3 }
 0x146   : > { %v4230_v16 = vadd.f32 %v4186_v25, %v1760_v28  ;;  %3145 = vmatmul.msk.bf16.gmra.mxu0 %vm1392_vm4, %v3143_v19  ;;  %v817_v19 = vld [vmem:[%s3964_s13 + $0x1c] sm:$0x1]  ;;  %s663_s13 = sand.u32 1, %s3462_s21  }
 0x147   : > { %v1830_v33 = vpop.f32.mrf.mxu2  ;;  %s2999_s28 = sshll.u32 %s663_s13, 5  ;;  %s4566_s13 = sld [smem:[#allocation13_spill]] (%p3661_p12) }
 0x148   : > { %v1831_v7 = vadd.f32 %v1830_v33, %v4181_v22  ;;  %v1773_v35 = vsel %vm1769_vm8, %v4230_v16, 0.0  ;;  %v1786_v43 = vmul.f32 %v4230_v16, %v4230_v16  ;;  %3155 = vmatmul.msk.bf16.gmra.mxu1 %vm1392_vm4, %v4224_v26  ;;  %s4434_s21 = scalar_lea.vmem [#allocation5], %s2999_s28 }
 0x149   : > { %v1774_v47 = vadd.f32 %v1773_v35, %v1772_v13  ;;  %v1338_v35 = vshll.u32 %v1253_v36, 16 }
 0x14a   : > { %v1871_v53 = vadd.f32 %v1861_v57, %v1831_v7  ;;  %v1791_v48 = vsel %vm1769_vm8, %v1786_v43, 0.0  ;;  %3159 = vmatmul.msk.bf16.gmra.mxu3 %vm1392_vm4, %v4006_v60  ;;  %v1335_v7 = vshrl.u32 %v1253_v36, 16 }
 0x14b   : > { %v1792_v22 = vadd.f32 %v1791_v48, %v1790_v15  ;;  %v1755_v50 = vpop.f32.mrf.mxu0  ;;  %v832_v15 = vld [vmem:[#allocation2 + $0x9c] sm:$0x1]  ;;  %v1316_v48 = vld [vmem:[#allocation2 + $0x84] sm:$0x1] }
 0x14c   : > { %v1761_v58 = vadd.f32 %v1755_v50, %v1720_v38  ;;  %v833_v28 = vsel %vm3833_vm3, %v817_v19, %v832_v15  ;;  %v1337_v45 = vrot.slane %v1335_v7, 4 }
 0x14d   : > { %v1818_v62 = vpop.f32.mrf.mxu1  ;;  %v1866_v1 = vpop.f32.mrf.mxu3  ;;  %834 = vst [vmem:[#allocation2 + $0x9c] sm:$0x1] %v833_v28  ;;  %s2666_s28 = scalar_lea.vmem (%p3661_p12), %s4566_s13, %s3216_s26 }
 0x14e   : > { %v4248_v52 = vadd.f32 %v4186_v25, %v1761_v58 }
 0x14f   : > { %v1832_v32 = vpop.f32.mrf.mxu2 }
 0x150   : > { %v1833_v20 = vadd.f32 %v1832_v32, %v1813_v3  ;;  %v1775_v57 = vsel %vm1769_vm8, %v4248_v52, 0.0  ;;  %v1787_v60 = vmul.f32 %v4248_v52, %v4248_v52  ;;  %v1330_v32 = vshll.u32 %v1316_v48, 16 }
 0x151   : > { %v4256_v2 = vadd.f32 %v1775_v57, %v1774_v47  ;;  %v1340_v47 = vrot.slane %v1338_v35, 5 }
 0x152   : > { %v1872_v4 = vadd.f32 %v1863_v54, %v1833_v20  ;;  %v1793_v5 = vsel %vm1769_vm8, %v1787_v60, 0.0  ;;  %v1321_v54 = vshrl.u32 %v1252_v56, 16  ;;  %v1254_v60 = vld [vmem:[#allocation2 + $0x90] sm:$0xf] }
 0x153   : > { %v4259_v10 = vadd.f32 %v1793_v5, %v1792_v22  ;;  %v1884_v3 = vpop.f32.mrf.mxu0  ;;  %v1317_v22 = vld [vmem:[#allocation2 + $0x8c] sm:$0x1]  ;;  %v1341_v20 = vor.u32 %v1340_v47, %v1337_v45 }
 0x154   : > { %3157 = vmatmul.msk.bf16.gmra.mxu2 %vm1392_vm4, %v4250_v39  ;;  %v1894_v11 = vadd.f32 %v1884_v3, %v1871_v53  ;;  %v1323_v43 = vrot.slane %v1321_v54, 4  ;;  %v1344_v57 = vshll.u32 %v1317_v22, 16  ;;  %v1332_v3 = vrot.slane %v1330_v32, 5  ;;  %v1318_v54 = vld [vmem:[#allocation2 + $0x94] sm:$0x1] }
 0x155   : > { %v1907_v37 = vpop.f32.mrf.mxu1  ;;  %v1868_v27 = vpop.f32.mrf.mxu3  ;;  %v1319_v35 = vld [vmem:[#allocation2 + $0x9c] sm:$0x1] }
 0x156   : > { %v1917_v38 = vadd.f32 %v1907_v37, %v1894_v11  ;;  %3160 = vmatmul.msk.bf16.vlgmr.msrb.gmra.mxu0 %vm1392_vm4, %v3959_v17  ;;  %v1342_v11 = vrot.slane %v1341_v20, 4  ;;  %v1346_v37 = vrot.slane %v1344_v57, 5  ;;  %v1372_v22 = vshll.u32 %v1319_v35, 16 }
 0x157   : > { %v1835_v13 = vpop.f32.mrf.mxu2 }
 0x158   : > { %v1836_v59 = vadd.f32 %v1835_v13, %v1816_v30  ;;  %3162 = vmatmul.msk.bf16.vlgmr.msrb.gmra.mxu1 %vm1392_vm4, %v4091_v14  ;;  %v1324_v14 = vshll.u32 %v1252_v56, 16  ;;  %v1347_v28 = vsel %vm3894_vm7, %v1342_v11, %v1346_v37  ;;  %v1374_v20 = vrot.slane %v1372_v22, 5 }
 0x15a   : > { %v1873_v18 = vadd.f32 %v1866_v1, %v1836_v59  ;;  %3166 = vmatmul.msk.bf16.vlgmr.msrb.gmra.mxu3 %vm1392_vm4, %v4033_v6  ;;  %v1326_v44 = vrot.slane %v1324_v14, 5  ;;  %v1349_v59 = vshrl.u32 %v1254_v60, 16 }
 0x15b   : > { %v1886_v24 = vpop.f32.mrf.mxu0 }
 0x15c   : > { %v1895_v40 = vadd.f32 %v1886_v24, %v1872_v4  ;;  %v1351_v36 = vrot.slane %v1349_v59, 4 }
 0x15d   : > { %v1909_v29 = vpop.f32.mrf.mxu1  ;;  %v1965_v17 = vpop.f32.mrf.mxu3 }
 0x15e   : > { %v1918_v30 = vadd.f32 %v1909_v29, %v1895_v40 }
 0x15f   : > { %v1837_v0 = vpop.f32.mrf.mxu2 }
 0x160   : > { %v1838_v33 = vadd.f32 %v1837_v0, %v1818_v62  ;;  %v1327_v62 = vor.u32 %v1326_v44, %v1323_v43  ;;  %v2545_v0 = vunpack.c.l.b16 %v1347_v28 }
 0x162   : > { %v1874_v6 = vadd.f32 %v1868_v27, %v1838_v33  ;;  %v1328_v5 = vrot.slane %v1327_v62, 4  ;;  %v1255_v27 = vld [vmem:[#allocation2 + $0x98] sm:$0xf] }
 0x163   : > { %v1889_v46 = vpop.f32.mrf.mxu0  ;;  %v1363_v24 = vshrl.u32 %v1255_v27, 16 }
 0x164   : > { %3164 = vmatmul.msk.bf16.vlgmr.msrb.gmra.mxu2 %vm1392_vm4, %v3976_v42  ;;  %v1896_v53 = vadd.f32 %v1889_v46, %v1873_v18  ;;  %v1352_v18 = vshll.u32 %v1254_v60, 16  ;;  %v1358_v46 = vshll.u32 %v1318_v54, 16 }
 0x165   : > { %v1912_v50 = vpop.f32.mrf.mxu1  ;;  %v1967_v51 = vpop.f32.mrf.mxu3  ;;  %v1365_v14 = vrot.slane %v1363_v24, 4 }
 0x166   : > { %v1919_v58 = vadd.f32 %v1912_v50, %v1896_v53  ;;  %3161 = vmatmul.msk.bf16.gmra.mxu0 %vm1392_vm4, %v4000_v49  ;;  %v1354_v29 = vrot.slane %v1352_v18, 5  ;;  %v1360_v62 = vrot.slane %v1358_v46, 5  ;;  %v1795_v46 = vrot.slane %v4259_v10, 4 }
 0x167   : > { %v1942_v55 = vpop.f32.mrf.mxu2 }
 0x168   : > { %v1952_v1 = vadd.f32 %v1942_v55, %v1917_v38  ;;  %3163 = vmatmul.msk.bf16.gmra.mxu1 %vm1392_vm4, %v4110_v61  ;;  %v1366_v61 = vshll.u32 %v1255_v27, 16  ;;  %v1355_v44 = vor.u32 %v1354_v29, %v1351_v36 }
 0x16a   : > { %v1975_v42 = vadd.f32 %v1965_v17, %v1952_v1  ;;  %3167 = vmatmul.msk.bf16.gmra.mxu3 %vm1392_vm4, %v4061_v8  ;;  %v1333_v8 = vsel %vm3894_vm7, %v1328_v5, %v1332_v3  ;;  %v1368_v33 = vrot.slane %v1366_v61, 5  ;;  %v1356_v55 = vrot.slane %v1355_v44, 4 }
 0x16b   : > { %v1891_v4 = vpop.f32.mrf.mxu0  ;;  %v2544_v17 = vunpack.c.l.b16 %v1333_v8 }
 0x16c   : > { %v1897_v49 = vadd.f32 %v1891_v4, %v1874_v6  ;;  %v1369_v48 = vor.u32 %v1368_v33, %v1365_v14 }
 0x16d   : > { %v1914_v13 = vpop.f32.mrf.mxu1  ;;  %v1970_v38 = vpop.f32.mrf.mxu3  ;;  %v2548_v53 = vpack.c.b16 %v2545_v0, %v2544_v17 }
 0x16e   : > { %v1920_v15 = vadd.f32 %v1914_v13, %v1897_v49 }
 0x16f   : > { %v1944_v19 = vpop.f32.mrf.mxu2 }
 0x170   : > { %v1953_v56 = vadd.f32 %v1944_v19, %v1918_v30 }
 0x172   : > { %v1976_v40 = vadd.f32 %v1967_v51, %v1953_v56 }
 0x173   : > { %v1988_v7 = vpop.f32.mrf.mxu0 }
 0x174   : > { %3165 = vmatmul.msk.bf16.gmra.mxu2 %vm1392_vm4, %v4013_v9  ;;  %v1998_v30 = vadd.f32 %v1988_v7, %v1975_v42 }
 0x175   : > { %v2023_v6 = vpop.f32.mrf.mxu1  ;;  %v1972_v43 = vpop.f32.mrf.mxu3 }
 0x176   : > { %v2033_v47 = vadd.f32 %v2023_v6, %v1998_v30  ;;  %3168 = vmatmul.msk.bf16.vlgmr.msra.gmra.mxu0 %vm1392_vm4, %v4114_v12  ;;  %v1370_v12 = vrot.slane %v1369_v48, 4  ;;  %v1777_v30 = vrot.slane %v4256_v2, 4 }
 0x177   : > { %v1947_v45 = vpop.f32.mrf.mxu2 }
 0x178   : > { %v1954_v50 = vadd.f32 %v1947_v45, %v1919_v58  ;;  %v4289_v51 = vadd.f32 %v4186_v25, %v2033_v47  ;;  %3170 = vmatmul.msk.bf16.vlgmr.msra.gmra.mxu1 %vm1392_vm4, %v4179_v21  ;;  %v1361_v21 = vsel %vm3894_vm7, %v1356_v55, %v1360_v62  ;;  %v1375_v3 = vsel %vm3894_vm7, %v1370_v12, %v1374_v20 }
 0x179   : > { %v2547_v59 = vunpack.c.l.b16 %v1375_v3  ;;  %v1796_v62 = vadd.f32 %v1795_v46, %v4259_v10 }
 0x17a   : > { %v1977_v9 = vadd.f32 %v1970_v38, %v1954_v50  ;;  %v2073_v1 = vmax.f32 %v4202_v41, %v4289_v51  ;;  %v2077_v32 = vmin.f32 %v4202_v41, %v4289_v51  ;;  %3174 = vmatmul.msk.bf16.vlgmr.msra.gmra.mxu3 %vm1392_vm4, %v2548_v53  ;;  %v2055_v37 = vmul.f32 %v4289_v51, %v4289_v51 }
 0x17b   : > { %v1990_v58 = vpop.f32.mrf.mxu0  ;;  %v2041_v49 = vsel %vm1769_vm8, %v4289_v51, 0.0  ;;  %v2546_v38 = vunpack.c.l.b16 %v1361_v21  ;;  %v1778_v50 = vadd.f32 %v1777_v30, %v4256_v2 }
 0x17c   : > { %v1999_v57 = vadd.f32 %v1990_v58, %v1976_v40  ;;  %v2059_v56 = vsel %vm1769_vm8, %v2055_v37, 0.0 }
 0x17d   : > { %v2025_v42 = vpop.f32.mrf.mxu1  ;;  %v2109_v60 = vpop.f32.mrf.mxu3  ;;  %v2549_v54 = vpack.c.b16 %v2547_v59, %v2546_v38 }
 0x17e   : > { %v2034_v5 = vadd.f32 %v2025_v42, %v1999_v57  ;;  %v1779_v42 = vrot.slane %v1778_v50, 2 }
 0x17f   : > { %v1949_v4 = vpop.f32.mrf.mxu2 }
 0x180   : > { %v1955_v11 = vadd.f32 %v1949_v4, %v1920_v15  ;;  %v4305_v27 = vadd.f32 %v4186_v25, %v2034_v5  ;;  %v1797_v5 = vrot.slane %v1796_v62, 2  ;;  %v1780_v38 = vadd.f32 %v1779_v42, %v1778_v50 }
 0x182   : > { %v1978_v13 = vadd.f32 %v1972_v43, %v1955_v11  ;;  %v2042_v18 = vsel %vm1769_vm8, %v4305_v27, 0.0  ;;  %v2056_v23 = vmul.f32 %v4305_v27, %v4305_v27  ;;  %v2074_v19 = vmax.f32 %v4210_v31, %v4305_v27 }
 0x183   : > { %v2078_v15 = vmin.f32 %v4210_v31, %v4305_v27  ;;  %v2043_v24 = vadd.f32 %v2042_v18, %v2041_v49  ;;  %v1993_v61 = vpop.f32.mrf.mxu0 }
 0x184   : > { %3172 = vmatmul.msk.bf16.vlgmr.msra.gmra.mxu2 %vm1392_vm4, %v4212_v63  ;;  %v2060_v8 = vsel %vm1769_vm8, %v2056_v23, 0.0  ;;  %v2000_v28 = vadd.f32 %v1993_v61, %v1977_v9 }
 0x185   : > { %v2061_v40 = vadd.f32 %v2060_v8, %v2059_v56  ;;  %v2028_v36 = vpop.f32.mrf.mxu1  ;;  %v2111_v29 = vpop.f32.mrf.mxu3  ;;  %v1781_v8 = vrot.slane %v1780_v38, 1 }
 0x186   : > { %v2035_v0 = vadd.f32 %v2028_v36, %v2000_v28  ;;  %3169 = vmatmul.msk.bf16.gmra.mxu0 %vm1392_vm4, %v4133_v34 }
 0x187   : > { %v2090_v17 = vpop.f32.mrf.mxu2  ;;  %v1782_v30 = vadd.f32 %v1781_v8, %v1780_v38 }
 0x188   : > { %v2110_v14 = vadd.f32 %v2109_v60, %v2090_v17  ;;  %v4324_v33 = vadd.f32 %v4186_v25, %v2035_v0  ;;  %3171 = vmatmul.msk.bf16.gmra.mxu1 %vm1392_vm4, %v4224_v26 }
 0x18a   : > { %v2044_v63 = vsel %vm1769_vm8, %v4324_v33, 0.0  ;;  %v2057_v7 = vmul.f32 %v4324_v33, %v4324_v33  ;;  %v2075_v35 = vmax.f32 %v4230_v16, %v4324_v33  ;;  %v2079_v34 = vmin.f32 %v4230_v16, %v4324_v33  ;;  %3175 = vmatmul.msk.bf16.gmra.mxu3 %vm1392_vm4, %v2549_v54 }
 0x18b   : > { %v2045_v6 = vadd.f32 %v2044_v63, %v2043_v24  ;;  %v1995_v43 = vpop.f32.mrf.mxu0  ;;  %v1798_v24 = vadd.f32 %v1797_v5, %v1796_v62 }
 0x18c   : > { %v2062_v26 = vsel %vm1769_vm8, %v2057_v7, 0.0  ;;  %v2001_v44 = vadd.f32 %v1995_v43, %v1978_v13 }
 0x18d   : > { %v2063_v45 = vadd.f32 %v2062_v26, %v2061_v40  ;;  %v2030_v47 = vpop.f32.mrf.mxu1  ;;  %v2114_v53 = vpop.f32.mrf.mxu3 }
 0x18e   : > { %v2036_v22 = vadd.f32 %v2030_v47, %v2001_v44 }
 0x18f   : > { %v2092_v48 = vpop.f32.mrf.mxu2 }
 0x190   : > { %v2112_v9 = vadd.f32 %v2111_v29, %v2092_v48  ;;  %v4342_v55 = vadd.f32 %v4186_v25, %v2036_v22  ;;  %v1799_v29 = vrot.slane %v1798_v24, 1 }
 0x192   : > { %v2046_v12 = vsel %vm1769_vm8, %v4342_v55, 0.0  ;;  %v2058_v20 = vmul.f32 %v4342_v55, %v4342_v55  ;;  %v2076_v58 = vmax.f32 %v4248_v52, %v4342_v55  ;;  %v2080_v57 = vmin.f32 %v4248_v52, %v4342_v55 }
 0x193   : > { %v2047_v2 = vadd.f32 %v2046_v12, %v2045_v6  ;;  %v2128_v60 = vpop.f32.mrf.mxu0  ;;  %v1800_v44 = vadd.f32 %v1799_v29, %v1798_v24 }
 0x194   : > { %3173 = vmatmul.msk.bf16.gmra.mxu2 %vm1392_vm4, %v4250_v39  ;;  %v2064_v10 = vsel %vm1769_vm8, %v2058_v20, 0.0  ;;  %v2138_v4 = vadd.f32 %v2128_v60, %v2110_v14 }
 0x195   : > { %v2048_v21 = vrot.slane %v2047_v2, 4  ;;  %v2065_v3 = vadd.f32 %v2064_v10, %v2063_v45  ;;  %v2151_v11 = vpop.f32.mrf.mxu1  ;;  %v2116_v37 = vpop.f32.mrf.mxu3 }
 0x196   : > { %v2161_v13 = vadd.f32 %v2151_v11, %v2138_v4 }
 0x197   : > { %v2095_v49 = vpop.f32.mrf.mxu2  ;;  %v2049_v59 = vadd.f32 %v2048_v21, %v2047_v2  ;;  %v2066_v18 = vrot.slane %v2065_v3, 4 }
 0x198   : > { %v2115_v23 = vadd.f32 %v2114_v53, %v2095_v49 }
 0x199   : > { %v2050_v61 = vrot.slane %v2049_v59, 2  ;;  %v2067_v56 = vadd.f32 %v2066_v18, %v2065_v3 }
 0x19b   : > { %v2051_v39 = vadd.f32 %v2050_v61, %v2049_v59  ;;  %v2068_v28 = vrot.slane %v2067_v56, 2  ;;  %v2130_v40 = vpop.f32.mrf.mxu0 }
 0x19c   : > { %v2139_v36 = vadd.f32 %v2130_v40, %v2112_v9 }
 0x19d   : > { %v2052_v17 = vrot.slane %v2051_v39, 1  ;;  %v2069_v0 = vadd.f32 %v2068_v28, %v2067_v56  ;;  %v2153_v54 = vpop.f32.mrf.mxu1  ;;  %v2197_v14 = vpop.f32.mrf.mxu3 }
 0x19e   : > { %v2162_v7 = vadd.f32 %v2153_v54, %v2139_v36 }
 0x19f   : > { %v2097_v63 = vpop.f32.mrf.mxu2  ;;  %v2053_v6 = vadd.f32 %v2052_v17, %v2051_v39  ;;  %v2070_v43 = vrot.slane %v2069_v0, 1 }
 0x1a0   : > { %v2117_v26 = vadd.f32 %v2116_v37, %v2097_v63 }
 0x1a1   : > { %v4356_v46 = vadd.f32 %v2053_v6, %v1782_v30  ;;  %v2071_v45 = vadd.f32 %v2070_v43, %v2069_v0 }
 0x1a3   : > { %v4358_v47 = vadd.f32 %v2071_v45, %v1800_v44  ;;  %v2133_v53 = vpop.f32.mrf.mxu0 }
 0x1a4   : > { %v2140_v48 = vadd.f32 %v2133_v53, %v2115_v23 }
 0x1a5   : > { %v2156_v22 = vpop.f32.mrf.mxu1  ;;  %v2199_v50 = vpop.f32.mrf.mxu3 }
 0x1a6   : > { %v2163_v62 = vadd.f32 %v2156_v22, %v2140_v48 }
 0x1a7   : > { %v2174_v9 = vpop.f32.mrf.mxu2 }
 0x1a8   : > { %v2184_v12 = vadd.f32 %v2174_v9, %v2161_v13 }
 0x1aa   : > { %v2207_v20 = vadd.f32 %v2197_v14, %v2184_v12 }
 0x1ab   : > { %v2135_v42 = vpop.f32.mrf.mxu0 }
 0x1ac   : > { %v2141_v2 = vadd.f32 %v2135_v42, %v2117_v26 }
 0x1ad   : > { %v2158_v60 = vpop.f32.mrf.mxu1  ;;  %v2202_v10 = vpop.f32.mrf.mxu3 }
 0x1ae   : > { %v2164_v5 = vadd.f32 %v2158_v60, %v2141_v2 }
 0x1af   : > { %v2176_v4 = vpop.f32.mrf.mxu2 }
 0x1b0   : > { %v2185_v21 = vadd.f32 %v2176_v4, %v2162_v7 }
 0x1b2   : > { %v2208_v3 = vadd.f32 %v2199_v50, %v2185_v21 }
 0x1b3   : > { %v2236_v11 = vpop.f32.mrf.mxu0 }
 0x1b4   : > { %v2246_v37 = vadd.f32 %v2236_v11, %v2207_v20 }
 0x1b5   : > { %v2275_v49 = vpop.f32.mrf.mxu1  ;;  %v2204_v38 = vpop.f32.mrf.mxu3 }
 0x1b6   : > { %v2285_v18 = vadd.f32 %v2275_v49, %v2246_v37 }
 0x1b7   : > { %v2179_v59 = vpop.f32.mrf.mxu2 }
 0x1b8   : > { %v2186_v23 = vadd.f32 %v2179_v59, %v2163_v62 }
 0x1ba   : > { %v2209_v24 = vadd.f32 %v2202_v10, %v2186_v23 }
 0x1bb   : > { %v2238_v61 = vpop.f32.mrf.mxu0 }
 0x1bc   : > { %v2247_v56 = vadd.f32 %v2238_v61, %v2208_v3 }
 0x1bd   : > { %v2277_v13 = vpop.f32.mrf.mxu1  ;;  %v4360_v8 = vpop.f32.mrf.mxu3 }
 0x1be   : > { %v2286_v28 = vadd.f32 %v2277_v13, %v2247_v56 }
 0x1bf   : > { %v2181_v39 = vpop.f32.mrf.mxu2 }
 0x1c0   : > { %v2187_v40 = vadd.f32 %v2181_v39, %v2164_v5 }
 0x1c2   : > { %v2210_v36 = vadd.f32 %v2204_v38, %v2187_v40 }
 0x1c3   : > { %v2241_v29 = vpop.f32.mrf.mxu0 }
 0x1c4   : > { %v2248_v17 = vadd.f32 %v2241_v29, %v2209_v24 }
 0x1c5   : > { %v2280_v0 = vpop.f32.mrf.mxu1  ;;  %v4362_v54 = vpop.f32.mrf.mxu3 }
 0x1c6   : > { %v2287_v63 = vadd.f32 %v2280_v0, %v2248_v17 }
 0x1c7   : > { %v2310_v14 = vpop.f32.mrf.mxu2 }
 0x1c8   : > { %v2320_v7 = vadd.f32 %v2310_v14, %v2285_v18 }
 0x1ca   : > { %v2324_v30 = vadd.f32 %v4186_v25, %v2320_v7 }
 0x1cb   : > { %v2243_v26 = vpop.f32.mrf.mxu0 }
 0x1cc   : > { %v4368_v6 = vmax.f32 %v2073_v1, %v2324_v30  ;;  %v4373_v43 = vmin.f32 %v2077_v32, %v2324_v30  ;;  %v2249_v44 = vadd.f32 %v2243_v26, %v2210_v36  ;;  %v2342_v9 = vmul.f32 %v2324_v30, %v2324_v30 }
 0x1cd   : > { %v2282_v45 = vpop.f32.mrf.mxu1  ;;  %v4375_v53 = vpop.f32.mrf.mxu3  ;;  %v2328_v12 = vsel %vm1769_vm8, %v2324_v30, 0.0 }
 0x1ce   : > { %v2288_v22 = vadd.f32 %v2282_v45, %v2249_v44  ;;  %v2346_v2 = vsel %vm1769_vm8, %v2342_v9, 0.0 }
 0x1cf   : > { %v2312_v48 = vpop.f32.mrf.mxu2 }
 0x1d0   : > { %v2321_v50 = vadd.f32 %v2312_v48, %v2286_v28 }
 0x1d2   : > { %v2325_v62 = vadd.f32 %v4186_v25, %v2321_v50 }
 0x1d3   : > { %v2396_v32 = vpop.f32.mrf.mxu0 }
 0x1d4   : > { %v2329_v1 = vsel %vm1769_vm8, %v2325_v62, 0.0  ;;  %v2343_v20 = vmul.f32 %v2325_v62, %v2325_v62  ;;  %v4383_v41 = vmax.f32 %v2074_v19, %v2325_v62  ;;  %v4388_v51 = vmin.f32 %v2078_v15, %v2325_v62 }
 0x1d5   : > { %v2330_v42 = vadd.f32 %v2329_v1, %v2328_v12  ;;  %v2415_v10 = vpop.f32.mrf.mxu1  ;;  %v4392_v4 = vpop.f32.mrf.mxu3  ;;  %v2397_v1 = vadd.f32 %v2396_v32, %v4360_v8 }
 0x1d6   : > { %v2347_v60 = vsel %vm1769_vm8, %v2343_v20, 0.0 }
 0x1d7   : > { %v2348_v5 = vadd.f32 %v2347_v60, %v2346_v2  ;;  %v2315_v21 = vpop.f32.mrf.mxu2  ;;  %v2425_v60 = vadd.f32 %v2415_v10, %v2397_v1 }
 0x1d8   : > { %v2322_v3 = vadd.f32 %v2315_v21, %v2287_v63 }
 0x1da   : > { %v2326_v19 = vadd.f32 %v4186_v25, %v2322_v3 }
 0x1db   : > { %v2398_v15 = vpop.f32.mrf.mxu0 }
 0x1dc   : > { %v2331_v11 = vsel %vm1769_vm8, %v2326_v19, 0.0  ;;  %v2344_v37 = vmul.f32 %v2326_v19, %v2326_v19  ;;  %v4399_v31 = vmax.f32 %v2075_v35, %v2326_v19  ;;  %v4404_v27 = vmin.f32 %v2079_v34, %v2326_v19 }
 0x1dd   : > { %v2332_v49 = vadd.f32 %v2331_v11, %v2330_v42  ;;  %v2461_v59 = vpop.f32.mrf.mxu3  ;;  %v2417_v24 = vpop.f32.mrf.mxu1  ;;  %v2399_v3 = vadd.f32 %v2398_v15, %v4362_v54 }
 0x1de   : > { %v2349_v38 = vsel %vm1769_vm8, %v2344_v37, 0.0 }
 0x1df   : > { %v2350_v18 = vadd.f32 %v2349_v38, %v2348_v5  ;;  %v2317_v23 = vpop.f32.mrf.mxu2 }
 0x1e0   : > { %v2323_v61 = vadd.f32 %v2317_v23, %v2288_v22 }
 0x1e2   : > { %v2327_v56 = vadd.f32 %v4186_v25, %v2323_v61 }
 0x1e3   : > { %v2401_v34 = vpop.f32.mrf.mxu0 }
 0x1e4   : > { %v2333_v13 = vsel %vm1769_vm8, %v2327_v56, 0.0  ;;  %v2345_v35 = vmul.f32 %v2327_v56, %v2327_v56  ;;  %v4412_v16 = vmax.f32 %v2076_v58, %v2327_v56  ;;  %v4417_v33 = vmin.f32 %v2080_v57, %v2327_v56 }
 0x1e5   : > { %v2334_v39 = vadd.f32 %v2333_v13, %v2332_v49  ;;  %v2463_v40 = vpop.f32.mrf.mxu3  ;;  %v2420_v63 = vpop.f32.mrf.mxu1 }
 0x1e6   : > { %v2351_v28 = vsel %vm1769_vm8, %v2345_v35, 0.0 }
 0x1e7   : > { %v2335_v36 = vrot.slane %v2334_v39, 4  ;;  %v2352_v29 = vadd.f32 %v2351_v28, %v2350_v18  ;;  %v2438_v17 = vpop.f32.mrf.mxu2 }
 0x1e8   : > { %v2448_v5 = vadd.f32 %v2438_v17, %v2425_v60 }
 0x1e9   : > { %v2336_v0 = vadd.f32 %v2335_v36, %v2334_v39  ;;  %v2353_v14 = vrot.slane %v2352_v29, 4 }
 0x1ea   : > { %v2471_v11 = vadd.f32 %v2461_v59, %v2448_v5 }
 0x1eb   : > { %v2337_v7 = vrot.slane %v2336_v0, 2  ;;  %v2354_v30 = vadd.f32 %v2353_v14, %v2352_v29  ;;  %v2403_v44 = vpop.f32.mrf.mxu0 }
 0x1ed   : > { %v2338_v58 = vadd.f32 %v2337_v7, %v2336_v0  ;;  %v2355_v26 = vrot.slane %v2354_v30, 2  ;;  %v2466_v57 = vpop.f32.mrf.mxu3  ;;  %v2422_v62 = vpop.f32.mrf.mxu1 }
 0x1ef   : > { %v2339_v45 = vrot.slane %v2338_v58, 1  ;;  %v2356_v52 = vadd.f32 %v2355_v26, %v2354_v30  ;;  %v2440_v55 = vpop.f32.mrf.mxu2 }
 0x1f1   : > { %v2340_v48 = vadd.f32 %v2339_v45, %v2338_v58  ;;  %v2357_v22 = vrot.slane %v2356_v52, 1 }
 0x1f3   : > { %v4421_v50 = vadd.f32 %v2340_v48, %v4356_v46  ;;  %v2358_v9 = vadd.f32 %v2357_v22, %v2356_v52  ;;  %v2484_v42 = vpop.f32.mrf.mxu0  ;;  %v2426_v46 = vadd.f32 %v2417_v24, %v2399_v3  ;;  %v2404_v24 = vadd.f32 %v2403_v44, %v4392_v4 }
 0x1f4   : > { %v2494_v37 = vadd.f32 %v2484_v42, %v2471_v11 }
 0x1f5   : > { %v4424_v12 = vadd.f32 %v2358_v9, %v4358_v47  ;;  %v2468_v2 = vpop.f32.mrf.mxu3  ;;  %v2507_v21 = vpop.f32.mrf.mxu1  ;;  %v2449_v18 = vadd.f32 %v2440_v55, %v2426_v46  ;;  %v2402_v47 = vadd.f32 %v2401_v34, %v4375_v53 }
 0x1f6   : > { %v2517_v23 = vadd.f32 %v2507_v21, %v2494_v37 }
 0x1f7   : > { %v2443_v20 = vpop.f32.mrf.mxu2  ;;  %v2472_v61 = vadd.f32 %v2463_v40, %v2449_v18  ;;  %v2427_v10 = vadd.f32 %v2420_v63, %v2402_v47  ;;  %v2428_v63 = vadd.f32 %v2422_v62, %v2404_v24 }
 0x1f9   : > { %v2450_v39 = vadd.f32 %v2443_v20, %v2427_v10 }
 0x1fb   : > { %v2486_v49 = vpop.f32.mrf.mxu0  ;;  %v2473_v36 = vadd.f32 %v2466_v57, %v2450_v39 }
 0x1fc   : > { %v2495_v13 = vadd.f32 %v2486_v49, %v2472_v61 }
 0x1fd   : > { %v2565_v38 = vpop.f32.mrf.mxu3  ;;  %v2509_v8 = vpop.f32.mrf.mxu1 }
 0x1fe   : > { %v2518_v28 = vadd.f32 %v2509_v8, %v2495_v13 }
 0x1ff   : > { %v2445_v19 = vpop.f32.mrf.mxu2 }
 0x203   : > { %v2489_v54 = vpop.f32.mrf.mxu0 }
 0x204   : > { %v2496_v7 = vadd.f32 %v2489_v54, %v2473_v36 }
 0x205   : > { %v2567_v59 = vpop.f32.mrf.mxu3  ;;  %v2512_v14 = vpop.f32.mrf.mxu1 }
 0x206   : > { %v2519_v30 = vadd.f32 %v2512_v14, %v2496_v7 }
 0x207   : > { %v2530_v32 = vpop.f32.mrf.mxu2 }
 0x208   : > { %v2540_v56 = vadd.f32 %v2530_v32, %v2517_v23 }
 0x20a   : > { %v2575_v35 = vadd.f32 %v2565_v38, %v2540_v56 }
 0x20b   : > { %v2491_v58 = vpop.f32.mrf.mxu0 }
 0x20c   : > { %v2579_v15 = vadd.f32 %v4186_v25, %v2575_v35 }
 0x20d   : > { %v2570_v45 = vpop.f32.mrf.mxu3  ;;  %v2514_v1 = vpop.f32.mrf.mxu1 }
 0x20e   : > { %v2615_v53 = vmax.f32 %v4368_v6, %v2579_v15  ;;  %v2619_v34 = vmin.f32 %v4373_v43, %v2579_v15  ;;  %v2451_v6 = vadd.f32 %v2445_v19, %v2428_v63  ;;  %v2597_v60 = vmul.f32 %v2579_v15, %v2579_v15 }
 0x20f   : > { %v2532_v40 = vpop.f32.mrf.mxu2  ;;  %v2583_v49 = vsel %vm1769_vm8, %v2579_v15, 0.0 }
 0x210   : > { %v2623_v29 = vpack.c.bf16 %v2615_v53, %v2615_v53  ;;  %v2632_v17 = vpack.c.bf16 %v2619_v34, %v2619_v34  ;;  %v2541_v0 = vadd.f32 %v2532_v40, %v2518_v28  ;;  %v2474_v55 = vadd.f32 %v2468_v2, %v2451_v6 }
 0x211   : > { %v2601_v47 = vsel %vm1769_vm8, %v2597_v60, 0.0 }
 0x212   : > { %2628 = vst.msk [vmem:[%s4434_s21] sm:$0xf] %vm2627_vm9, %v2623_v29  ;;  %v2576_v4 = vadd.f32 %v2567_v59, %v2541_v0  ;;  %v2497_v9 = vadd.f32 %v2491_v58, %v2474_v55 }
 0x213   : > { %3176 = vst.msk [vmem:[%s4434_s21 + $0x10] sm:$0xf] %vm2627_vm9, %v2632_v17 }
 0x214   : > { %v2580_v43 = vadd.f32 %v4186_v25, %v2576_v4 }
 0x215   : > { %v2572_v37 = vpop.f32.mrf.mxu3 }
 0x216   : > { %v2616_v26 = vmax.f32 %v4383_v41, %v2580_v43  ;;  %v2620_v44 = vmin.f32 %v4388_v51, %v2580_v43  ;;  %v2598_v42 = vmul.f32 %v2580_v43, %v2580_v43  ;;  %v2520_v41 = vadd.f32 %v2514_v1, %v2497_v9 }
 0x217   : > { %v2535_v52 = vpop.f32.mrf.mxu2  ;;  %v2584_v5 = vsel %vm1769_vm8, %v2580_v43, 0.0 }
 0x218   : > { %v2624_v57 = vpack.c.bf16 %v2616_v26, %v2616_v26  ;;  %v2633_v48 = vpack.c.bf16 %v2620_v44, %v2620_v44  ;;  %v2542_v22 = vadd.f32 %v2535_v52, %v2519_v30  ;;  %v2602_v38 = vsel %vm1769_vm8, %v2598_v42, 0.0 }
 0x219   : > { %v2585_v18 = vadd.f32 %v2584_v5, %v2583_v49  ;;  %v2603_v32 = vadd.f32 %v2602_v38, %v2601_v47 }
 0x21a   : > { %2629 = vst.msk [vmem:[%s4434_s21 + $0x4] sm:$0xf] %vm2627_vm9, %v2624_v57  ;;  %v2577_v62 = vadd.f32 %v2570_v45, %v2542_v22 }
 0x21b   : > { %3177 = vst.msk [vmem:[%s4434_s21 + $0x14] sm:$0xf] %vm2627_vm9, %v2633_v48 }
 0x21c   : > { %v2581_v20 = vadd.f32 %v4186_v25, %v2577_v62 }
 0x21e   : > { %v2617_v51 = vmax.f32 %v4399_v31, %v2581_v20  ;;  %v2621_v2 = vmin.f32 %v4404_v27, %v2581_v20  ;;  %v2599_v3 = vmul.f32 %v2581_v20, %v2581_v20  ;;  %v2586_v31 = vsel %vm1769_vm8, %v2581_v20, 0.0 }
 0x21f   : > { %v2537_v21 = vpop.f32.mrf.mxu2  ;;  %v2587_v61 = vadd.f32 %v2586_v31, %v2585_v18 }
 0x220   : > { %v2625_v19 = vpack.c.bf16 %v2617_v51, %v2617_v51  ;;  %v2634_v11 = vpack.c.bf16 %v2621_v2, %v2621_v2  ;;  %v2543_v46 = vadd.f32 %v2537_v21, %v2520_v41  ;;  %v2604_v23 = vsel %vm1769_vm8, %v2599_v3, 0.0 }
 0x221   : > { %v2605_v39 = vadd.f32 %v2604_v23, %v2603_v32 }
 0x222   : > { %2630 = vst.msk [vmem:[%s4434_s21 + $0x8] sm:$0xf] %vm2627_vm9, %v2625_v19  ;;  %v2578_v27 = vadd.f32 %v2572_v37, %v2543_v46 }
 0x223   : > { %3178 = vst.msk [vmem:[%s4434_s21 + $0x18] sm:$0xf] %vm2627_vm9, %v2634_v11 }
 0x224   : > { %v2582_v8 = vadd.f32 %v4186_v25, %v2578_v27 }
 0x226   : > { %v2588_v56 = vsel %vm1769_vm8, %v2582_v8, 0.0  ;;  %v2600_v10 = vmul.f32 %v2582_v8, %v2582_v8  ;;  %v2618_v13 = vmax.f32 %v4412_v16, %v2582_v8  ;;  %v2622_v35 = vmin.f32 %v4417_v33, %v2582_v8 }
 0x227   : > { %v2589_v54 = vadd.f32 %v2588_v56, %v2587_v61 }
 0x228   : > { %v2606_v15 = vsel %vm1769_vm8, %v2600_v10, 0.0  ;;  %v2626_v25 = vpack.c.bf16 %v2618_v13, %v2618_v13  ;;  %v2635_v59 = vpack.c.bf16 %v2622_v35, %v2622_v35 }
 0x229   : > { %v2590_v24 = vrot.slane %v2589_v54, 4  ;;  %v2607_v28 = vadd.f32 %v2606_v15, %v2605_v39 }
 0x22a   : > { %2631 = vst.msk [vmem:[%s4434_s21 + $0xc] sm:$0xf] %vm2627_vm9, %v2626_v25 }
 0x22b   : > { %v2591_v53 = vadd.f32 %v2590_v24, %v2589_v54  ;;  %v2608_v34 = vrot.slane %v2607_v28, 4  ;;  %3179 = vst.msk [vmem:[%s4434_s21 + $0x1c] sm:$0xf] %vm2627_vm9, %v2635_v59 }
 0x22d   : > { %v2592_v40 = vrot.slane %v2591_v53, 2  ;;  %v2609_v16 = vadd.f32 %v2608_v34, %v2607_v28 }
 0x22f   : > { %v2593_v36 = vadd.f32 %v2592_v40, %v2591_v53  ;;  %v2610_v33 = vrot.slane %v2609_v16, 2 }
 0x231   : > { %v2594_v29 = vrot.slane %v2593_v36, 1  ;;  %v2611_v17 = vadd.f32 %v2610_v33, %v2609_v16  ;;  %v2687_v6 = vld [vmem:[%s4434_s21 + $0x8] sm:$0xff] (%p3661_p12)  }
 0x232   : > { %v2695_v43 = vld [vmem:[%s4434_s21 + $0x18] sm:$0xff] (%p3661_p12)   ;;  %2688 = vst [vmem:[%s2666_s28 + $0x8] sm:$0xff] (%p3661_p12), %v2687_v6  }
 0x233   : > { %v2595_v0 = vadd.f32 %v2594_v29, %v2593_v36  ;;  %v2612_v14 = vrot.slane %v2611_v17, 1  ;;  %2696 = vst [vmem:[%s2666_s28 + $0x48] sm:$0xff] (%p3661_p12), %v2695_v43  }
 0x235   : > { %v2596_v63 = vadd.f32 %v2595_v0, %v4421_v50  ;;  %v2613_v7 = vadd.f32 %v2612_v14, %v2611_v17  ;;  %2661 = sbr.rel (!%p3661_p12) target bundleno = 570 (0x23a), region = 143  ;;  %v2683_v50 = vld [vmem:[%s4434_s21] sm:$0xff] (%p3661_p12)  }
 0x236   : > { %2684 = vst [vmem:[%s2666_s28] sm:$0xff] (%p3661_p12), %v2683_v50  }
 0x237   : > { %v2614_v4 = vadd.f32 %v2613_v7, %v4424_v12  ;;  %2641 = vst.msk [vmem:[%s698_s20] sm:$0xff] %vm1769_vm8, %v2596_v63  ;;  %v2691_v12 = vld [vmem:[%s4434_s21 + $0x10] sm:$0xff] (%p3661_p12)  }
 0x238   : > { %2692 = vst [vmem:[%s2666_s28 + $0x40] sm:$0xff] (%p3661_p12), %v2691_v12  }
 0x239   : > { %2642 = vst.msk [vmem:[%s706_s5] sm:$0xff] %vm1769_vm8, %v2614_v4 }
 0x23a PF: > { %s17_s7 = sadd.s32 1, %s3502_s7   ;;  %s4567_s25 = sld [smem:[#allocation6_spill]] }
 0x23b   : > { %p14_p6 = scmp.ge.s32.totalorder %s17_s7, 6   ;;  %s4568_s26 = sld [smem:[#allocation11_spill]] }
 0x23c   : > { %s4569_s11 = sld [smem:[#allocation9_spill]]  ;;  %s4571_s21 = smov %s3466_s22 }
 0x23d   : > { %s4570_s19 = sld [smem:[#allocation10_spill]]  ;;  %s4572_s22 = smov %s3659_s4 }
 0x23e   : > { %s4573_s23 = smov %s3474_s24  ;;  %s4574_s24 = smov %s3641_s6 }
 0x23f   : > { %s4575_s27 = smov %s3494_s29  ;;  %s4576_s28 = smov %s3498_s30 }
 0x240   :  { %16 = sbr.rel (!%p14_p6) target bundleno = 11 (0xb), region = 292 }
 0x242   : > { %s4577_s29 = smov %s4569_s11 }
 0x243   : > { %s4578_s30 = smov %s4570_s19 }

</bundles_post_ra>
